<compile_context>
chip_gen: v5e
topology: v5e:2x2
jax: 0.10.0
libtpu: 0.0.40
codegen_flags: <defaults>
</compile_context>

<pallas_src>
import functools
import numpy as np
import jax
import jax.numpy as jnp
from jax.experimental import pallas as pl
from jax.experimental.pallas import tpu as pltpu


def _round_up(x, m):
    return (x + m - 1) // m * m


# ----------------------------- Pallas kernel -------------------------------- #

def _conv_kernel(xs_ref, wr_ref, wi_ref, br_ref, bi_ref, or_ref, oi_ref,
                 xbig_ref, *, kernel_size, shifts, strides, blocks, dim_order,
                 kxp):
    """Shift-into-scratch + K-stacked complex matmul.

    xs_ref  : (KXp, N)     compute dtype.  Rows [0:C]=Re(U), [C:2C]=Im(U), rest 0.
                           Columns = row-major flatten of (lattice..., extra...).
    wr_ref  : (Mp, KO*KXp) compute dtype, per-offset [W_re | -W_im] blocks.
    wi_ref  : (Mp, KO*KXp) compute dtype, per-offset [W_im |  W_re] blocks.
    br/bi   : (Mp, 1)      f32 bias planes (added after the dot).
    or/oi   : (Mp, N)      f32 real/imag outputs.
    xbig_ref: (KO*KXp, N)  VMEM im2col scratch.
    """
    nd = len(kernel_size)
    n = xs_ref.shape[1]

    def rolled(x, d, k):
        """Circular shift of kernel offset k along lattice dim d on the
        flattened lane axis.  A per-dim shift is a *blocked* roll
        (block = lattice[d] * stride[d]) built from two global pltpu.rolls and
        one select; the outermost dim (block == N) is a single global roll."""
        blk = blocks[d]
        s = (-shifts[d][k] * strides[d]) % blk
        if s == 0:
            return x
        if blk == n:
            return pltpu.roll(x, s, axis=1)
        hi = pltpu.roll(x, s, axis=1)
        lo = pltpu.roll(x, (s - blk) % n, axis=1)
        # Mask recomputed right before use (no long-lived iota/mask vregs).
        lane = jax.lax.broadcasted_iota(jnp.int32, x.shape, 1)
        return jnp.where(lane % blk >= s, hi, lo)

    x0 = xs_ref[...]

    # Hierarchical offset enumeration with shared shift prefixes.  dim_order
    # places the cheap global-roll dim at the deepest level; ko follows the
    # same row-major order the host used to pack the weight columns.
    def build(lvl, x, ko):
        if lvl == nd:
            xbig_ref[pl.ds(ko * kxp, kxp), :] = x
            return
        d = dim_order[lvl]
        for k in range(kernel_size[d]):
            build(lvl + 1, rolled(x, d, k), ko * kernel_size[d] + k)

    build(0, x0, 0)

    # The whole complex convolution: two K-stacked MXU matmuls, f32 accumulate.
    xb = xbig_ref[...]
    or_ref[...] = jnp.dot(wr_ref[...], xb,
                          preferred_element_type=jnp.float32) + br_ref[...]
    oi_ref[...] = jnp.dot(wi_ref[...], xb,
                          preferred_element_type=jnp.float32) + bi_ref[...]


def _conv_forward(xs, wr, wi, br, bi, *, kernel_size, shifts, strides, blocks,
                  dim_order, kxp):
    """All operands already padded to TPU-friendly sizes."""
    _, n = xs.shape
    mp, kk = wr.shape
    dtype = xs.dtype

    kern = functools.partial(
        _conv_kernel, kernel_size=tuple(kernel_size), shifts=shifts,
        strides=strides, blocks=blocks, dim_order=dim_order, kxp=kxp)

    def full_spec(shape):
        ndim = len(shape)
        return pl.BlockSpec(shape, lambda i, _nd=ndim: (0,) * _nd)

    out_shape = (jax.ShapeDtypeStruct((mp, n), jnp.float32),
                 jax.ShapeDtypeStruct((mp, n), jnp.float32))

    # VMEM budget from the actual resident footprint (double-buffered in/out
    # plus the im2col scratch) plus headroom; capped well under every
    # generation's physical VMEM (v7x: 64 MiB per TensorCore).
    isz = dtype.itemsize
    resident = (2 * (xs.size + wr.size + wi.size) * isz      # pipelined inputs
                + 2 * (br.size + bi.size) * 4
                + 2 * 2 * mp * n * 4                         # pipelined outputs
                + kk * n * isz)                              # im2col scratch
    vmem_limit = int(min(48 * 1024 * 1024, resident + (8 << 20)))

    return pl.pallas_call(
        kern,
        out_shape=out_shape,
        grid_spec=pltpu.PrefetchScalarGridSpec(
            num_scalar_prefetch=0,
            grid=(1,),                       # whole problem resident in VMEM
            in_specs=[full_spec(xs.shape), full_spec(wr.shape),
                      full_spec(wi.shape), full_spec(br.shape),
                      full_spec(bi.shape)],
            out_specs=(full_spec((mp, n)), full_spec((mp, n))),
            scratch_shapes=[pltpu.VMEM((kk, n), dtype)]),
        compiler_params=pltpu.CompilerParams(
            dimension_semantics=("arbitrary",),
            vmem_limit_bytes=vmem_limit),
    )(xs, wr, wi, br, bi)


# ------------------------- Module re-implementation -------------------------- #

class CConvolutionPallas:
    """JAX/Pallas port of qcd_ml.nn.non_gauge.convolution.C_Convolution."""

    def __init__(self, n_input, n_output, kernel_size, bias=True, nd=4, key=None,
                 compute_dtype=jnp.float32):
        self.nd = nd
        self.n_input = n_input
        self.n_output = n_output
        if isinstance(kernel_size, int):
            self.kernel_size = (kernel_size,) * nd
        else:
            self.kernel_size = tuple(kernel_size)
            assert len(self.kernel_size) == nd
        self.padding = self._padding()
        self.stride = [1] * nd
        self.compute_dtype = jnp.dtype(compute_dtype)
        # Offset enumeration order: blocked dims shallow, global-roll dim (0)
        # deepest (blocks[0] == N always).  Weight packing uses the same order.
        self.dim_order = tuple(range(1, nd)) + (0,)

        if key is None:
            key = jax.random.PRNGKey(0)
        kw_r, kw_i, kb_r, kb_i = jax.random.split(key, 4)
        wshape = (n_input, n_output, *self.kernel_size)
        scale = np.float32(np.sqrt(0.5))
        self.weights = (scale * jax.random.normal(kw_r, wshape, jnp.float32)
                        + 1j * scale * jax.random.normal(kw_i, wshape, jnp.float32)
                        ).astype(jnp.complex64)
        if bias:
            self.biases = (scale * jax.random.normal(kb_r, (n_output,), jnp.float32)
                           + 1j * scale * jax.random.normal(kb_i, (n_output,), jnp.float32)
                           ).astype(jnp.complex64)
        else:
            self.biases = None

        self._prepare_packed_params()

    # -- exact mirrors of the PyTorch helpers (used by the reference) ---------- #

    def _padding(self):
        padding = []
        for ks in reversed(self.kernel_size):
            if ks % 2 == 0:
                padding.append((ks - 1) // 2)
                padding.append(ks // 2)
            else:
                padding.append(ks // 2)
                padding.append(ks // 2)
        return padding

    def _circular_pad(self, U):
        for i, ks in enumerate(self.kernel_size):
            if ks > 1:
                dim = i + 1
                L = U.shape[dim]
                p_l, p_r = self.padding[2 * i], self.padding[2 * i + 1]
                parts = []
                if p_l > 0:
                    parts.append(jax.lax.slice_in_dim(U, L - p_l, L, axis=dim))
                parts.append(U)
                if p_r > 0:
                    parts.append(jax.lax.slice_in_dim(U, 0, p_r, axis=dim))
                if len(parts) > 1:
                    U = jnp.concatenate(parts, axis=dim)
        return U

    @staticmethod
    def _unfold(U, dim, ks):
        # torch.Tensor.unfold(dim, ks, step=1): window dim appended at the end.
        L = U.shape[dim]
        new_len = L - ks + 1
        windows = [jax.lax.slice_in_dim(U, w, w + new_len, axis=dim) for w in range(ks)]
        return jnp.stack(windows, axis=U.ndim)

    # -- one-time packing of weights/biases into kernel layout ----------------- #

    def _prepare_packed_params(self):
        KO = int(np.prod(self.kernel_size))
        Mp = _round_up(max(self.n_output, 1), 8)
        KXp = _round_up(2 * self.n_input, 8)

        # (n_input, n_output, k_0..k_{nd-1})
        #   -> (k_{dim_order[0]}, ..., k_{dim_order[-1]}, n_output, n_input)
        #   -> (KO, n_output, n_input): offsets flattened row-major in the same
        #      order the kernel recursion enumerates them.
        perm = tuple(2 + d for d in self.dim_order) + (1, 0)
        w = jnp.transpose(self.weights, perm).reshape(KO, self.n_output, self.n_input)
        wr = jnp.real(w).astype(jnp.float32)
        wi = jnp.imag(w).astype(jnp.float32)
        # Per-offset K-stacked complex blocks:
        #   out_re = [Wr | -Wi] @ [Xr; Xi],   out_im = [Wi | Wr] @ [Xr; Xi]
        wri = jnp.concatenate([wr, -wi], axis=2)          # (KO, n_out, 2*n_in)
        wir = jnp.concatenate([wi, wr], axis=2)
        pad = ((0, 0), (0, Mp - self.n_output), (0, KXp - 2 * self.n_input))
        wri = jnp.pad(wri, pad)                           # (KO, Mp, KXp)
        wir = jnp.pad(wir, pad)
        # Single lane-dense 2-D weight slabs (Mp, KO*KXp).
        self._wr = jnp.transpose(wri, (1, 0, 2)).reshape(Mp, KO * KXp).astype(self.compute_dtype)
        self._wi = jnp.transpose(wir, (1, 0, 2)).reshape(Mp, KO * KXp).astype(self.compute_dtype)

        if self.biases is not None:
            br = jnp.real(self.biases).astype(jnp.float32)
            bi = jnp.imag(self.biases).astype(jnp.float32)
        else:
            br = jnp.zeros((self.n_output,), jnp.float32)
            bi = jnp.zeros((self.n_output,), jnp.float32)
        self._br = jnp.pad(br, (0, Mp - self.n_output)).reshape(Mp, 1)
        self._bi = jnp.pad(bi, (0, Mp - self.n_output)).reshape(Mp, 1)

        self._Mp, self._KXp, self._KO = Mp, KXp, KO

    # -- forward --------------------------------------------------------------- #

    def __call__(self, U):
        nu = U.ndim
        if nu <= self.nd:
            raise ValueError(f"shape mismatch: got {nu} but expected bigger than {self.nd}")
        nd = self.nd

        lattice = tuple(int(s) for s in U.shape[1:1 + nd])
        extra = tuple(int(s) for s in U.shape[1 + nd:])
        E = int(np.prod(extra)) if extra else 1
        N = int(np.prod(lattice)) * E
        if N % 128 != 0:
            # TODO(synk): non-128-multiple flattened sizes would need a
            #             lane-masked layout; not required for typical lattices.
            raise NotImplementedError("flattened lattice*extra size must be a multiple of 128")

        # Host prep: only tiny pad/stack work (no im2col, no KO-fold copies).
        x = U.reshape(self.n_input, N)
        xs = jnp.concatenate([jnp.real(x), jnp.imag(x)], axis=0).astype(self.compute_dtype)
        if self._KXp > 2 * self.n_input:
            xs = jnp.pad(xs, ((0, self._KXp - 2 * self.n_input), (0, 0)))

        # Static geometry for the in-kernel shifted views.
        strides = []
        st = E
        for d in range(nd - 1, -1, -1):
            strides.append(st)
            st *= lattice[d]
        strides = tuple(reversed(strides))                        # stride of dim d
        blocks = tuple(int(lattice[d] * strides[d]) for d in range(nd))
        pad_left = tuple(self.padding[2 * d] for d in range(nd))  # mirrors module indexing
        shifts = tuple(tuple(k - pad_left[d] for k in range(self.kernel_size[d]))
                       for d in range(nd))

        out_r, out_i = _conv_forward(
            xs, self._wr, self._wi, self._br, self._bi,
            kernel_size=self.kernel_size, shifts=shifts, strides=strides,
            blocks=blocks, dim_order=self.dim_order, kxp=self._KXp)

        out = (out_r[:self.n_output] + 1j * out_i[:self.n_output]).astype(jnp.complex64)
        return out.reshape((self.n_output,) + lattice + extra)


# ------------------------------- Reference ----------------------------------- #

def reference_forward(module, U):
    """Pure-JAX mirror of the PyTorch forward (for correctness checking)."""
    nu = U.ndim
    Up = module._circular_pad(U)
    for i, ks in enumerate(module.kernel_size):
        Up = module._unfold(Up, i + 1, ks)
    dim0 = (0,) + tuple(range(2, module.nd + 2))
    dim1 = (0,) + tuple(range(nu, module.nd + nu))
    out = jnp.tensordot(module.weights, Up, axes=(dim0, dim1),
                        precision=jax.lax.Precision.HIGHEST)
    if module.biases is not None:
        out = out + module.biases.reshape((-1,) + (1,) * (nu - 1))
    return out


# --------------------------------- Main --------------------------------------- #

if __name__ == "__main__":
    root = jax.random.PRNGKey(0)
    key_a, key_b = jax.random.split(root)

    def run_case(name, key, *, n_input, n_output, kernel_size, nd, lattice, extra):
        k_mod, k_ur, k_ui = jax.random.split(key, 3)
        mod = CConvolutionPallas(n_input, n_output, kernel_size,
                                 bias=True, nd=nd, key=k_mod)
        in_shape = (n_input,) + lattice + extra
        U = (jax.random.normal(k_ur, in_shape, jnp.float32)
             + 1j * jax.random.normal(k_ui, in_shape, jnp.float32)).astype(jnp.complex64)

        out = jax.block_until_ready(mod(U))
        ref = jax.block_until_ready(reference_forward(mod, U))

        assert out.shape == (n_output,) + lattice + extra, (name, out.shape)
        assert out.dtype == jnp.complex64, (name, out.dtype)
        np.testing.assert_allclose(np.asarray(out), np.asarray(ref),
                                   rtol=2e-3, atol=2e-3, err_msg=name)

    # Primary case: the module's native 4-D lattice with a trailing internal index.
    run_case("cubic-3^4", key_a, n_input=4, n_output=4, kernel_size=3, nd=4,
             lattice=(4, 4, 4, 4), extra=(4,))
    # Shift-direction stress test (review concern): even kernel (asymmetric
    # circular pad), non-cubic lattice, padded channel counts.
    run_case("even-noncubic", key_b, n_input=3, n_output=5, kernel_size=2, nd=3,
             lattice=(8, 4, 2), extra=(8,))

    print("KERNEL_OK")
</pallas_src>

<mosaic_0001>
module attributes {stable_mosaic.version = 11 : i64} {
  func.func @_conv_kernel(%arg0: i32, %arg1: memref<8x1024xf32, #tpu.memory_space<vmem>>, %arg2: memref<8x648xf32, #tpu.memory_space<vmem>>, %arg3: memref<8x648xf32, #tpu.memory_space<vmem>>, %arg4: memref<8x1xf32, #tpu.memory_space<vmem>>, %arg5: memref<8x1xf32, #tpu.memory_space<vmem>>, %arg6: memref<8x1024xf32, #tpu.memory_space<vmem>>, %arg7: memref<8x1024xf32, #tpu.memory_space<vmem>>, %arg8: memref<648x1024xf32, #tpu.memory_space<vmem>>) attributes {dimension_semantics = [#tpu.dimension_semantics<arbitrary>], iteration_bounds = array<i64: 1>, scalar_prefetch = 0 : i64, scratch_operands = 1 : i64, tpu.core_type = #tpu.core_type<tc>, window_params = [{pipeline_mode = #tpu.pipeline_mode<synchronous>, transform_indices = @transform_0, window_bounds = array<i64: 8, 1024>}, {pipeline_mode = #tpu.pipeline_mode<synchronous>, transform_indices = @transform_1, window_bounds = array<i64: 8, 648>}, {pipeline_mode = #tpu.pipeline_mode<synchronous>, transform_indices = @transform_2, window_bounds = array<i64: 8, 648>}, {pipeline_mode = #tpu.pipeline_mode<synchronous>, transform_indices = @transform_3, window_bounds = array<i64: 8, 1>}, {pipeline_mode = #tpu.pipeline_mode<synchronous>, transform_indices = @transform_4, window_bounds = array<i64: 8, 1>}, {pipeline_mode = #tpu.pipeline_mode<synchronous>, transform_indices = @transform_5, window_bounds = array<i64: 8, 1024>}, {pipeline_mode = #tpu.pipeline_mode<synchronous>, transform_indices = @transform_6, window_bounds = array<i64: 8, 1024>}]} {
    %c0 = arith.constant 0 : index
    %c0_0 = arith.constant 0 : index
    %0 = vector.load %arg1[%c0, %c0_0] : memref<8x1024xf32, #tpu.memory_space<vmem>>, vector<8x1024xf32>
    %c64_i32 = arith.constant 64 : i32
    %1 = tpu.dynamic_rotate %0 by %c64_i32 dim 1 : vector<8x1024xf32>, i32 -> vector<8x1024xf32>
    %c832_i32 = arith.constant 832 : i32
    %2 = tpu.dynamic_rotate %0 by %c832_i32 dim 1 : vector<8x1024xf32>, i32 -> vector<8x1024xf32>
    %3 = tpu.iota {dimensions = array<i32: 1>} : vector<8x1024xi32>
    %c256_i32 = arith.constant 256 : i32
    %c0_i32 = arith.constant 0 : i32
    %4 = arith.cmpi eq, %c256_i32, %c0_i32 : i32
    %c1_i32 = arith.constant 1 : i32
    %5 = arith.select %4, %c1_i32, %c256_i32 : i32
    %6 = vector.broadcast %5 : i32 to vector<8x1024xi32>
    %7 = arith.remsi %3, %6 : vector<8x1024xi32>
    %c0_i32_1 = arith.constant 0 : i32
    %8 = vector.broadcast %c0_i32_1 : i32 to vector<8x1024xi32>
    %9 = arith.cmpi ne, %7, %8 : vector<8x1024xi32>
    %c0_i32_2 = arith.constant 0 : i32
    %10 = vector.broadcast %c0_i32_2 : i32 to vector<8x1024xi32>
    %11 = arith.cmpi slt, %7, %10 : vector<8x1024xi32>
    %c0_i32_3 = arith.constant 0 : i32
    %12 = arith.cmpi slt, %5, %c0_i32_3 : i32
    %13 = vector.broadcast %12 : i1 to vector<8x1024xi1>
    %14 = vector.broadcast %13 : vector<8x1024xi1> to vector<8x1024xi1>
    %15 = arith.xori %11, %14 : vector<8x1024xi1>
    %16 = arith.andi %15, %9 : vector<8x1024xi1>
    %17 = vector.broadcast %5 : i32 to vector<8x1024xi32>
    %18 = arith.addi %7, %17 : vector<8x1024xi32>
    %19 = arith.select %16, %18, %7 : vector<8x1024xi1>, vector<8x1024xi32>
    %c64_i32_4 = arith.constant 64 : i32
    %20 = vector.broadcast %c64_i32_4 : i32 to vector<8x1024xi32>
    %21 = arith.cmpi sge, %19, %20 : vector<8x1024xi32>
    %22 = arith.select %21, %1, %2 : vector<8x1024xi1>, vector<8x1024xf32>
    %c16_i32 = arith.constant 16 : i32
    %23 = tpu.dynamic_rotate %22 by %c16_i32 dim 1 : vector<8x1024xf32>, i32 -> vector<8x1024xf32>
    %c976_i32 = arith.constant 976 : i32
    %24 = tpu.dynamic_rotate %22 by %c976_i32 dim 1 : vector<8x1024xf32>, i32 -> vector<8x1024xf32>
    %25 = tpu.iota {dimensions = array<i32: 1>} : vector<8x1024xi32>
    %c64_i32_5 = arith.constant 64 : i32
    %c0_i32_6 = arith.constant 0 : i32
    %26 = arith.cmpi eq, %c64_i32_5, %c0_i32_6 : i32
    %c1_i32_7 = arith.constant 1 : i32
    %27 = arith.select %26, %c1_i32_7, %c64_i32_5 : i32
    %28 = vector.broadcast %27 : i32 to vector<8x1024xi32>
    %29 = arith.remsi %25, %28 : vector<8x1024xi32>
    %c0_i32_8 = arith.constant 0 : i32
    %30 = vector.broadcast %c0_i32_8 : i32 to vector<8x1024xi32>
    %31 = arith.cmpi ne, %29, %30 : vector<8x1024xi32>
    %c0_i32_9 = arith.constant 0 : i32
    %32 = vector.broadcast %c0_i32_9 : i32 to vector<8x1024xi32>
    %33 = arith.cmpi slt, %29, %32 : vector<8x1024xi32>
    %c0_i32_10 = arith.constant 0 : i32
    %34 = arith.cmpi slt, %27, %c0_i32_10 : i32
    %35 = vector.broadcast %34 : i1 to vector<8x1024xi1>
    %36 = vector.broadcast %35 : vector<8x1024xi1> to vector<8x1024xi1>
    %37 = arith.xori %33, %36 : vector<8x1024xi1>
    %38 = arith.andi %37, %31 : vector<8x1024xi1>
    %39 = vector.broadcast %27 : i32 to vector<8x1024xi32>
    %40 = arith.addi %29, %39 : vector<8x1024xi32>
    %41 = arith.select %38, %40, %29 : vector<8x1024xi1>, vector<8x1024xi32>
    %c16_i32_11 = arith.constant 16 : i32
    %42 = vector.broadcast %c16_i32_11 : i32 to vector<8x1024xi32>
    %43 = arith.cmpi sge, %41, %42 : vector<8x1024xi32>
    %44 = arith.select %43, %23, %24 : vector<8x1024xi1>, vector<8x1024xf32>
    %c4_i32 = arith.constant 4 : i32
    %45 = tpu.dynamic_rotate %44 by %c4_i32 dim 1 : vector<8x1024xf32>, i32 -> vector<8x1024xf32>
    %c1012_i32 = arith.constant 1012 : i32
    %46 = tpu.dynamic_rotate %44 by %c1012_i32 dim 1 : vector<8x1024xf32>, i32 -> vector<8x1024xf32>
    %47 = tpu.iota {dimensions = array<i32: 1>} : vector<8x1024xi32>
    %c16_i32_12 = arith.constant 16 : i32
    %c0_i32_13 = arith.constant 0 : i32
    %48 = arith.cmpi eq, %c16_i32_12, %c0_i32_13 : i32
    %c1_i32_14 = arith.constant 1 : i32
    %49 = arith.select %48, %c1_i32_14, %c16_i32_12 : i32
    %50 = vector.broadcast %49 : i32 to vector<8x1024xi32>
    %51 = arith.remsi %47, %50 : vector<8x1024xi32>
    %c0_i32_15 = arith.constant 0 : i32
    %52 = vector.broadcast %c0_i32_15 : i32 to vector<8x1024xi32>
    %53 = arith.cmpi ne, %51, %52 : vector<8x1024xi32>
    %c0_i32_16 = arith.constant 0 : i32
    %54 = vector.broadcast %c0_i32_16 : i32 to vector<8x1024xi32>
    %55 = arith.cmpi slt, %51, %54 : vector<8x1024xi32>
    %c0_i32_17 = arith.constant 0 : i32
    %56 = arith.cmpi slt, %49, %c0_i32_17 : i32
    %57 = vector.broadcast %56 : i1 to vector<8x1024xi1>
    %58 = vector.broadcast %57 : vector<8x1024xi1> to vector<8x1024xi1>
    %59 = arith.xori %55, %58 : vector<8x1024xi1>
    %60 = arith.andi %59, %53 : vector<8x1024xi1>
    %61 = vector.broadcast %49 : i32 to vector<8x1024xi32>
    %62 = arith.addi %51, %61 : vector<8x1024xi32>
    %63 = arith.select %60, %62, %51 : vector<8x1024xi1>, vector<8x1024xi32>
    %c4_i32_18 = arith.constant 4 : i32
    %64 = vector.broadcast %c4_i32_18 : i32 to vector<8x1024xi32>
    %65 = arith.cmpi sge, %63, %64 : vector<8x1024xi32>
    %66 = arith.select %65, %45, %46 : vector<8x1024xi1>, vector<8x1024xf32>
    %c256_i32_19 = arith.constant 256 : i32
    %67 = tpu.dynamic_rotate %66 by %c256_i32_19 dim 1 : vector<8x1024xf32>, i32 -> vector<8x1024xf32>
    %c0_20 = arith.constant 0 : index
    %c0_21 = arith.constant 0 : index
    %68 = vector.load %arg8[%c0_20, %c0_21] : memref<648x1024xf32, #tpu.memory_space<vmem>>, vector<8x1024xf32>
    tpu.vector_store %arg8[%c0_20, %c0_21], %67 {strides = array<i32>} : memref<648x1024xf32, #tpu.memory_space<vmem>>, vector<8x1024xf32>,
    %c8 = arith.constant 8 : index
    %c0_22 = arith.constant 0 : index
    %69 = vector.load %arg8[%c8, %c0_22] : memref<648x1024xf32, #tpu.memory_space<vmem>>, vector<8x1024xf32>
    tpu.vector_store %arg8[%c8, %c0_22], %66 {strides = array<i32>} : memref<648x1024xf32, #tpu.memory_space<vmem>>, vector<8x1024xf32>,
    %c768_i32 = arith.constant 768 : i32
    %70 = tpu.dynamic_rotate %66 by %c768_i32 dim 1 : vector<8x1024xf32>, i32 -> vector<8x1024xf32>
    %c16 = arith.constant 16 : index
    %c0_23 = arith.constant 0 : index
    %71 = vector.load %arg8[%c16, %c0_23] : memref<648x1024xf32, #tpu.memory_space<vmem>>, vector<8x1024xf32>
    tpu.vector_store %arg8[%c16, %c0_23], %70 {strides = array<i32>} : memref<648x1024xf32, #tpu.memory_space<vmem>>, vector<8x1024xf32>,
    %c256_i32_24 = arith.constant 256 : i32
    %72 = tpu.dynamic_rotate %44 by %c256_i32_24 dim 1 : vector<8x1024xf32>, i32 -> vector<8x1024xf32>
    %c24 = arith.constant 24 : index
    %c0_25 = arith.constant 0 : index
    %73 = vector.load %arg8[%c24, %c0_25] : memref<648x1024xf32, #tpu.memory_space<vmem>>, vector<8x1024xf32>
    tpu.vector_store %arg8[%c24, %c0_25], %72 {strides = array<i32>} : memref<648x1024xf32, #tpu.memory_space<vmem>>, vector<8x1024xf32>,
    %c32 = arith.constant 32 : index
    %c0_26 = arith.constant 0 : index
    %74 = vector.load %arg8[%c32, %c0_26] : memref<648x1024xf32, #tpu.memory_space<vmem>>, vector<8x1024xf32>
    tpu.vector_store %arg8[%c32, %c0_26], %44 {strides = array<i32>} : memref<648x1024xf32, #tpu.memory_space<vmem>>, vector<8x1024xf32>,
    %c768_i32_27 = arith.constant 768 : i32
    %75 = tpu.dynamic_rotate %44 by %c768_i32_27 dim 1 : vector<8x1024xf32>, i32 -> vector<8x1024xf32>
    %c40 = arith.constant 40 : index
    %c0_28 = arith.constant 0 : index
    %76 = vector.load %arg8[%c40, %c0_28] : memref<648x1024xf32, #tpu.memory_space<vmem>>, vector<8x1024xf32>
    tpu.vector_store %arg8[%c40, %c0_28], %75 {strides = array<i32>} : memref<648x1024xf32, #tpu.memory_space<vmem>>, vector<8x1024xf32>,
    %c12_i32 = arith.constant 12 : i32
    %77 = tpu.dynamic_rotate %44 by %c12_i32 dim 1 : vector<8x1024xf32>, i32 -> vector<8x1024xf32>
    %c1020_i32 = arith.constant 1020 : i32
    %78 = tpu.dynamic_rotate %44 by %c1020_i32 dim 1 : vector<8x1024xf32>, i32 -> vector<8x1024xf32>
    %79 = tpu.iota {dimensions = array<i32: 1>} : vector<8x1024xi32>
    %c16_i32_29 = arith.constant 16 : i32
    %c0_i32_30 = arith.constant 0 : i32
    %80 = arith.cmpi eq, %c16_i32_29, %c0_i32_30 : i32
    %c1_i32_31 = arith.constant 1 : i32
    %81 = arith.select %80, %c1_i32_31, %c16_i32_29 : i32
    %82 = vector.broadcast %81 : i32 to vector<8x1024xi32>
    %83 = arith.remsi %79, %82 : vector<8x1024xi32>
    %c0_i32_32 = arith.constant 0 : i32
    %84 = vector.broadcast %c0_i32_32 : i32 to vector<8x1024xi32>
    %85 = arith.cmpi ne, %83, %84 : vector<8x1024xi32>
    %c0_i32_33 = arith.constant 0 : i32
    %86 = vector.broadcast %c0_i32_33 : i32 to vector<8x1024xi32>
    %87 = arith.cmpi slt, %83, %86 : vector<8x1024xi32>
    %c0_i32_34 = arith.constant 0 : i32
    %88 = arith.cmpi slt, %81, %c0_i32_34 : i32
    %89 = vector.broadcast %88 : i1 to vector<8x1024xi1>
    %90 = vector.broadcast %89 : vector<8x1024xi1> to vector<8x1024xi1>
    %91 = arith.xori %87, %90 : vector<8x1024xi1>
    %92 = arith.andi %91, %85 : vector<8x1024xi1>
    %93 = vector.broadcast %81 : i32 to vector<8x1024xi32>
    %94 = arith.addi %83, %93 : vector<8x1024xi32>
    %95 = arith.select %92, %94, %83 : vector<8x1024xi1>, vector<8x1024xi32>
    %c12_i32_35 = arith.constant 12 : i32
    %96 = vector.broadcast %c12_i32_35 : i32 to vector<8x1024xi32>
    %97 = arith.cmpi sge, %95, %96 : vector<8x1024xi32>
    %98 = arith.select %97, %77, %78 : vector<8x1024xi1>, vector<8x1024xf32>
    %c256_i32_36 = arith.constant 256 : i32
    %99 = tpu.dynamic_rotate %98 by %c256_i32_36 dim 1 : vector<8x1024xf32>, i32 -> vector<8x1024xf32>
    %c48 = arith.constant 48 : index
    %c0_37 = arith.constant 0 : index
    %100 = vector.load %arg8[%c48, %c0_37] : memref<648x1024xf32, #tpu.memory_space<vmem>>, vector<8x1024xf32>
    tpu.vector_store %arg8[%c48, %c0_37], %99 {strides = array<i32>} : memref<648x1024xf32, #tpu.memory_space<vmem>>, vector<8x1024xf32>,
    %c56 = arith.constant 56 : index
    %c0_38 = arith.constant 0 : index
    %101 = vector.load %arg8[%c56, %c0_38] : memref<648x1024xf32, #tpu.memory_space<vmem>>, vector<8x1024xf32>
    tpu.vector_store %arg8[%c56, %c0_38], %98 {strides = array<i32>} : memref<648x1024xf32, #tpu.memory_space<vmem>>, vector<8x1024xf32>,
    %c768_i32_39 = arith.constant 768 : i32
    %102 = tpu.dynamic_rotate %98 by %c768_i32_39 dim 1 : vector<8x1024xf32>, i32 -> vector<8x1024xf32>
    %c64 = arith.constant 64 : index
    %c0_40 = arith.constant 0 : index
    %103 = vector.load %arg8[%c64, %c0_40] : memref<648x1024xf32, #tpu.memory_space<vmem>>, vector<8x1024xf32>
    tpu.vector_store %arg8[%c64, %c0_40], %102 {strides = array<i32>} : memref<648x1024xf32, #tpu.memory_space<vmem>>, vector<8x1024xf32>,
    %c4_i32_41 = arith.constant 4 : i32
    %104 = tpu.dynamic_rotate %22 by %c4_i32_41 dim 1 : vector<8x1024xf32>, i32 -> vector<8x1024xf32>
    %c1012_i32_42 = arith.constant 1012 : i32
    %105 = tpu.dynamic_rotate %22 by %c1012_i32_42 dim 1 : vector<8x1024xf32>, i32 -> vector<8x1024xf32>
    %106 = tpu.iota {dimensions = array<i32: 1>} : vector<8x1024xi32>
    %c16_i32_43 = arith.constant 16 : i32
    %c0_i32_44 = arith.constant 0 : i32
    %107 = arith.cmpi eq, %c16_i32_43, %c0_i32_44 : i32
    %c1_i32_45 = arith.constant 1 : i32
    %108 = arith.select %107, %c1_i32_45, %c16_i32_43 : i32
    %109 = vector.broadcast %108 : i32 to vector<8x1024xi32>
    %110 = arith.remsi %106, %109 : vector<8x1024xi32>
    %c0_i32_46 = arith.constant 0 : i32
    %111 = vector.broadcast %c0_i32_46 : i32 to vector<8x1024xi32>
    %112 = arith.cmpi ne, %110, %111 : vector<8x1024xi32>
    %c0_i32_47 = arith.constant 0 : i32
    %113 = vector.broadcast %c0_i32_47 : i32 to vector<8x1024xi32>
    %114 = arith.cmpi slt, %110, %113 : vector<8x1024xi32>
    %c0_i32_48 = arith.constant 0 : i32
    %115 = arith.cmpi slt, %108, %c0_i32_48 : i32
    %116 = vector.broadcast %115 : i1 to vector<8x1024xi1>
    %117 = vector.broadcast %116 : vector<8x1024xi1> to vector<8x1024xi1>
    %118 = arith.xori %114, %117 : vector<8x1024xi1>
    %119 = arith.andi %118, %112 : vector<8x1024xi1>
    %120 = vector.broadcast %108 : i32 to vector<8x1024xi32>
    %121 = arith.addi %110, %120 : vector<8x1024xi32>
    %122 = arith.select %119, %121, %110 : vector<8x1024xi1>, vector<8x1024xi32>
    %c4_i32_49 = arith.constant 4 : i32
    %123 = vector.broadcast %c4_i32_49 : i32 to vector<8x1024xi32>
    %124 = arith.cmpi sge, %122, %123 : vector<8x1024xi32>
    %125 = arith.select %124, %104, %105 : vector<8x1024xi1>, vector<8x1024xf32>
    %c256_i32_50 = arith.constant 256 : i32
    %126 = tpu.dynamic_rotate %125 by %c256_i32_50 dim 1 : vector<8x1024xf32>, i32 -> vector<8x1024xf32>
    %c72 = arith.constant 72 : index
    %c0_51 = arith.constant 0 : index
    %127 = vector.load %arg8[%c72, %c0_51] : memref<648x1024xf32, #tpu.memory_space<vmem>>, vector<8x1024xf32>
    tpu.vector_store %arg8[%c72, %c0_51], %126 {strides = array<i32>} : memref<648x1024xf32, #tpu.memory_space<vmem>>, vector<8x1024xf32>,
    %c80 = arith.constant 80 : index
    %c0_52 = arith.constant 0 : index
    %128 = vector.load %arg8[%c80, %c0_52] : memref<648x1024xf32, #tpu.memory_space<vmem>>, vector<8x1024xf32>
    tpu.vector_store %arg8[%c80, %c0_52], %125 {strides = array<i32>} : memref<648x1024xf32, #tpu.memory_space<vmem>>, vector<8x1024xf32>,
    %c768_i32_53 = arith.constant 768 : i32
    %129 = tpu.dynamic_rotate %125 by %c768_i32_53 dim 1 : vector<8x1024xf32>, i32 -> vector<8x1024xf32>
    %c88 = arith.constant 88 : index
    %c0_54 = arith.constant 0 : index
    %130 = vector.load %arg8[%c88, %c0_54] : memref<648x1024xf32, #tpu.memory_space<vmem>>, vector<8x1024xf32>
    tpu.vector_store %arg8[%c88, %c0_54], %129 {strides = array<i32>} : memref<648x1024xf32, #tpu.memory_space<vmem>>, vector<8x1024xf32>,
    %c256_i32_55 = arith.constant 256 : i32
    %131 = tpu.dynamic_rotate %22 by %c256_i32_55 dim 1 : vector<8x1024xf32>, i32 -> vector<8x1024xf32>
    %c96 = arith.constant 96 : index
    %c0_56 = arith.constant 0 : index
    %132 = vector.load %arg8[%c96, %c0_56] : memref<648x1024xf32, #tpu.memory_space<vmem>>, vector<8x1024xf32>
    tpu.vector_store %arg8[%c96, %c0_56], %131 {strides = array<i32>} : memref<648x1024xf32, #tpu.memory_space<vmem>>, vector<8x1024xf32>,
    %c104 = arith.constant 104 : index
    %c0_57 = arith.constant 0 : index
    %133 = vector.load %arg8[%c104, %c0_57] : memref<648x1024xf32, #tpu.memory_space<vmem>>, vector<8x1024xf32>
    tpu.vector_store %arg8[%c104, %c0_57], %22 {strides = array<i32>} : memref<648x1024xf32, #tpu.memory_space<vmem>>, vector<8x1024xf32>,
    %c768_i32_58 = arith.constant 768 : i32
    %134 = tpu.dynamic_rotate %22 by %c768_i32_58 dim 1 : vector<8x1024xf32>, i32 -> vector<8x1024xf32>
    %c112 = arith.constant 112 : index
    %c0_59 = arith.constant 0 : index
    %135 = vector.load %arg8[%c112, %c0_59] : memref<648x1024xf32, #tpu.memory_space<vmem>>, vector<8x1024xf32>
    tpu.vector_store %arg8[%c112, %c0_59], %134 {strides = array<i32>} : memref<648x1024xf32, #tpu.memory_space<vmem>>, vector<8x1024xf32>,
    %c12_i32_60 = arith.constant 12 : i32
    %136 = tpu.dynamic_rotate %22 by %c12_i32_60 dim 1 : vector<8x1024xf32>, i32 -> vector<8x1024xf32>
    %c1020_i32_61 = arith.constant 1020 : i32
    %137 = tpu.dynamic_rotate %22 by %c1020_i32_61 dim 1 : vector<8x1024xf32>, i32 -> vector<8x1024xf32>
    %138 = tpu.iota {dimensions = array<i32: 1>} : vector<8x1024xi32>
    %c16_i32_62 = arith.constant 16 : i32
    %c0_i32_63 = arith.constant 0 : i32
    %139 = arith.cmpi eq, %c16_i32_62, %c0_i32_63 : i32
    %c1_i32_64 = arith.constant 1 : i32
    %140 = arith.select %139, %c1_i32_64, %c16_i32_62 : i32
    %141 = vector.broadcast %140 : i32 to vector<8x1024xi32>
    %142 = arith.remsi %138, %141 : vector<8x1024xi32>
    %c0_i32_65 = arith.constant 0 : i32
    %143 = vector.broadcast %c0_i32_65 : i32 to vector<8x1024xi32>
    %144 = arith.cmpi ne, %142, %143 : vector<8x1024xi32>
    %c0_i32_66 = arith.constant 0 : i32
    %145 = vector.broadcast %c0_i32_66 : i32 to vector<8x1024xi32>
    %146 = arith.cmpi slt, %142, %145 : vector<8x1024xi32>
    %c0_i32_67 = arith.constant 0 : i32
    %147 = arith.cmpi slt, %140, %c0_i32_67 : i32
    %148 = vector.broadcast %147 : i1 to vector<8x1024xi1>
    %149 = vector.broadcast %148 : vector<8x1024xi1> to vector<8x1024xi1>
    %150 = arith.xori %146, %149 : vector<8x1024xi1>
    %151 = arith.andi %150, %144 : vector<8x1024xi1>
    %152 = vector.broadcast %140 : i32 to vector<8x1024xi32>
    %153 = arith.addi %142, %152 : vector<8x1024xi32>
    %154 = arith.select %151, %153, %142 : vector<8x1024xi1>, vector<8x1024xi32>
    %c12_i32_68 = arith.constant 12 : i32
    %155 = vector.broadcast %c12_i32_68 : i32 to vector<8x1024xi32>
    %156 = arith.cmpi sge, %154, %155 : vector<8x1024xi32>
    %157 = arith.select %156, %136, %137 : vector<8x1024xi1>, vector<8x1024xf32>
    %c256_i32_69 = arith.constant 256 : i32
    %158 = tpu.dynamic_rotate %157 by %c256_i32_69 dim 1 : vector<8x1024xf32>, i32 -> vector<8x1024xf32>
    %c120 = arith.constant 120 : index
    %c0_70 = arith.constant 0 : index
    %159 = vector.load %arg8[%c120, %c0_70] : memref<648x1024xf32, #tpu.memory_space<vmem>>, vector<8x1024xf32>
    tpu.vector_store %arg8[%c120, %c0_70], %158 {strides = array<i32>} : memref<648x1024xf32, #tpu.memory_space<vmem>>, vector<8x1024xf32>,
    %c128 = arith.constant 128 : index
    %c0_71 = arith.constant 0 : index
    %160 = vector.load %arg8[%c128, %c0_71] : memref<648x1024xf32, #tpu.memory_space<vmem>>, vector<8x1024xf32>
    tpu.vector_store %arg8[%c128, %c0_71], %157 {strides = array<i32>} : memref<648x1024xf32, #tpu.memory_space<vmem>>, vector<8x1024xf32>,
    %c768_i32_72 = arith.constant 768 : i32
    %161 = tpu.dynamic_rotate %157 by %c768_i32_72 dim 1 : vector<8x1024xf32>, i32 -> vector<8x1024xf32>
    %c136 = arith.constant 136 : index
    %c0_73 = arith.constant 0 : index
    %162 = vector.load %arg8[%c136, %c0_73] : memref<648x1024xf32, #tpu.memory_space<vmem>>, vector<8x1024xf32>
    tpu.vector_store %arg8[%c136, %c0_73], %161 {strides = array<i32>} : memref<648x1024xf32, #tpu.memory_space<vmem>>, vector<8x1024xf32>,
    %c48_i32 = arith.constant 48 : i32
    %163 = tpu.dynamic_rotate %22 by %c48_i32 dim 1 : vector<8x1024xf32>, i32 -> vector<8x1024xf32>
    %c1008_i32 = arith.constant 1008 : i32
    %164 = tpu.dynamic_rotate %22 by %c1008_i32 dim 1 : vector<8x1024xf32>, i32 -> vector<8x1024xf32>
    %165 = tpu.iota {dimensions = array<i32: 1>} : vector<8x1024xi32>
    %c64_i32_74 = arith.constant 64 : i32
    %c0_i32_75 = arith.constant 0 : i32
    %166 = arith.cmpi eq, %c64_i32_74, %c0_i32_75 : i32
    %c1_i32_76 = arith.constant 1 : i32
    %167 = arith.select %166, %c1_i32_76, %c64_i32_74 : i32
    %168 = vector.broadcast %167 : i32 to vector<8x1024xi32>
    %169 = arith.remsi %165, %168 : vector<8x1024xi32>
    %c0_i32_77 = arith.constant 0 : i32
    %170 = vector.broadcast %c0_i32_77 : i32 to vector<8x1024xi32>
    %171 = arith.cmpi ne, %169, %170 : vector<8x1024xi32>
    %c0_i32_78 = arith.constant 0 : i32
    %172 = vector.broadcast %c0_i32_78 : i32 to vector<8x1024xi32>
    %173 = arith.cmpi slt, %169, %172 : vector<8x1024xi32>
    %c0_i32_79 = arith.constant 0 : i32
    %174 = arith.cmpi slt, %167, %c0_i32_79 : i32
    %175 = vector.broadcast %174 : i1 to vector<8x1024xi1>
    %176 = vector.broadcast %175 : vector<8x1024xi1> to vector<8x1024xi1>
    %177 = arith.xori %173, %176 : vector<8x1024xi1>
    %178 = arith.andi %177, %171 : vector<8x1024xi1>
    %179 = vector.broadcast %167 : i32 to vector<8x1024xi32>
    %180 = arith.addi %169, %179 : vector<8x1024xi32>
    %181 = arith.select %178, %180, %169 : vector<8x1024xi1>, vector<8x1024xi32>
    %c48_i32_80 = arith.constant 48 : i32
    %182 = vector.broadcast %c48_i32_80 : i32 to vector<8x1024xi32>
    %183 = arith.cmpi sge, %181, %182 : vector<8x1024xi32>
    %184 = arith.select %183, %163, %164 : vector<8x1024xi1>, vector<8x1024xf32>
    %c4_i32_81 = arith.constant 4 : i32
    %185 = tpu.dynamic_rotate %184 by %c4_i32_81 dim 1 : vector<8x1024xf32>, i32 -> vector<8x1024xf32>
    %c1012_i32_82 = arith.constant 1012 : i32
    %186 = tpu.dynamic_rotate %184 by %c1012_i32_82 dim 1 : vector<8x1024xf32>, i32 -> vector<8x1024xf32>
    %187 = tpu.iota {dimensions = array<i32: 1>} : vector<8x1024xi32>
    %c16_i32_83 = arith.constant 16 : i32
    %c0_i32_84 = arith.constant 0 : i32
    %188 = arith.cmpi eq, %c16_i32_83, %c0_i32_84 : i32
    %c1_i32_85 = arith.constant 1 : i32
    %189 = arith.select %188, %c1_i32_85, %c16_i32_83 : i32
    %190 = vector.broadcast %189 : i32 to vector<8x1024xi32>
    %191 = arith.remsi %187, %190 : vector<8x1024xi32>
    %c0_i32_86 = arith.constant 0 : i32
    %192 = vector.broadcast %c0_i32_86 : i32 to vector<8x1024xi32>
    %193 = arith.cmpi ne, %191, %192 : vector<8x1024xi32>
    %c0_i32_87 = arith.constant 0 : i32
    %194 = vector.broadcast %c0_i32_87 : i32 to vector<8x1024xi32>
    %195 = arith.cmpi slt, %191, %194 : vector<8x1024xi32>
    %c0_i32_88 = arith.constant 0 : i32
    %196 = arith.cmpi slt, %189, %c0_i32_88 : i32
    %197 = vector.broadcast %196 : i1 to vector<8x1024xi1>
    %198 = vector.broadcast %197 : vector<8x1024xi1> to vector<8x1024xi1>
    %199 = arith.xori %195, %198 : vector<8x1024xi1>
    %200 = arith.andi %199, %193 : vector<8x1024xi1>
    %201 = vector.broadcast %189 : i32 to vector<8x1024xi32>
    %202 = arith.addi %191, %201 : vector<8x1024xi32>
    %203 = arith.select %200, %202, %191 : vector<8x1024xi1>, vector<8x1024xi32>
    %c4_i32_89 = arith.constant 4 : i32
    %204 = vector.broadcast %c4_i32_89 : i32 to vector<8x1024xi32>
    %205 = arith.cmpi sge, %203, %204 : vector<8x1024xi32>
    %206 = arith.select %205, %185, %186 : vector<8x1024xi1>, vector<8x1024xf32>
    %c256_i32_90 = arith.constant 256 : i32
    %207 = tpu.dynamic_rotate %206 by %c256_i32_90 dim 1 : vector<8x1024xf32>, i32 -> vector<8x1024xf32>
    %c144 = arith.constant 144 : index
    %c0_91 = arith.constant 0 : index
    %208 = vector.load %arg8[%c144, %c0_91] : memref<648x1024xf32, #tpu.memory_space<vmem>>, vector<8x1024xf32>
    tpu.vector_store %arg8[%c144, %c0_91], %207 {strides = array<i32>} : memref<648x1024xf32, #tpu.memory_space<vmem>>, vector<8x1024xf32>,
    %c152 = arith.constant 152 : index
    %c0_92 = arith.constant 0 : index
    %209 = vector.load %arg8[%c152, %c0_92] : memref<648x1024xf32, #tpu.memory_space<vmem>>, vector<8x1024xf32>
    tpu.vector_store %arg8[%c152, %c0_92], %206 {strides = array<i32>} : memref<648x1024xf32, #tpu.memory_space<vmem>>, vector<8x1024xf32>,
    %c768_i32_93 = arith.constant 768 : i32
    %210 = tpu.dynamic_rotate %206 by %c768_i32_93 dim 1 : vector<8x1024xf32>, i32 -> vector<8x1024xf32>
    %c160 = arith.constant 160 : index
    %c0_94 = arith.constant 0 : index
    %211 = vector.load %arg8[%c160, %c0_94] : memref<648x1024xf32, #tpu.memory_space<vmem>>, vector<8x1024xf32>
    tpu.vector_store %arg8[%c160, %c0_94], %210 {strides = array<i32>} : memref<648x1024xf32, #tpu.memory_space<vmem>>, vector<8x1024xf32>,
    %c256_i32_95 = arith.constant 256 : i32
    %212 = tpu.dynamic_rotate %184 by %c256_i32_95 dim 1 : vector<8x1024xf32>, i32 -> vector<8x1024xf32>
    %c168 = arith.constant 168 : index
    %c0_96 = arith.constant 0 : index
    %213 = vector.load %arg8[%c168, %c0_96] : memref<648x1024xf32, #tpu.memory_space<vmem>>, vector<8x1024xf32>
    tpu.vector_store %arg8[%c168, %c0_96], %212 {strides = array<i32>} : memref<648x1024xf32, #tpu.memory_space<vmem>>, vector<8x1024xf32>,
    %c176 = arith.constant 176 : index
    %c0_97 = arith.constant 0 : index
    %214 = vector.load %arg8[%c176, %c0_97] : memref<648x1024xf32, #tpu.memory_space<vmem>>, vector<8x1024xf32>
    tpu.vector_store %arg8[%c176, %c0_97], %184 {strides = array<i32>} : memref<648x1024xf32, #tpu.memory_space<vmem>>, vector<8x1024xf32>,
    %c768_i32_98 = arith.constant 768 : i32
    %215 = tpu.dynamic_rotate %184 by %c768_i32_98 dim 1 : vector<8x1024xf32>, i32 -> vector<8x1024xf32>
    %c184 = arith.constant 184 : index
    %c0_99 = arith.constant 0 : index
    %216 = vector.load %arg8[%c184, %c0_99] : memref<648x1024xf32, #tpu.memory_space<vmem>>, vector<8x1024xf32>
    tpu.vector_store %arg8[%c184, %c0_99], %215 {strides = array<i32>} : memref<648x1024xf32, #tpu.memory_space<vmem>>, vector<8x1024xf32>,
    %c12_i32_100 = arith.constant 12 : i32
    %217 = tpu.dynamic_rotate %184 by %c12_i32_100 dim 1 : vector<8x1024xf32>, i32 -> vector<8x1024xf32>
    %c1020_i32_101 = arith.constant 1020 : i32
    %218 = tpu.dynamic_rotate %184 by %c1020_i32_101 dim 1 : vector<8x1024xf32>, i32 -> vector<8x1024xf32>
    %219 = tpu.iota {dimensions = array<i32: 1>} : vector<8x1024xi32>
    %c16_i32_102 = arith.constant 16 : i32
    %c0_i32_103 = arith.constant 0 : i32
    %220 = arith.cmpi eq, %c16_i32_102, %c0_i32_103 : i32
    %c1_i32_104 = arith.constant 1 : i32
    %221 = arith.select %220, %c1_i32_104, %c16_i32_102 : i32
    %222 = vector.broadcast %221 : i32 to vector<8x1024xi32>
    %223 = arith.remsi %219, %222 : vector<8x1024xi32>
    %c0_i32_105 = arith.constant 0 : i32
    %224 = vector.broadcast %c0_i32_105 : i32 to vector<8x1024xi32>
    %225 = arith.cmpi ne, %223, %224 : vector<8x1024xi32>
    %c0_i32_106 = arith.constant 0 : i32
    %226 = vector.broadcast %c0_i32_106 : i32 to vector<8x1024xi32>
    %227 = arith.cmpi slt, %223, %226 : vector<8x1024xi32>
    %c0_i32_107 = arith.constant 0 : i32
    %228 = arith.cmpi slt, %221, %c0_i32_107 : i32
    %229 = vector.broadcast %228 : i1 to vector<8x1024xi1>
    %230 = vector.broadcast %229 : vector<8x1024xi1> to vector<8x1024xi1>
    %231 = arith.xori %227, %230 : vector<8x1024xi1>
    %232 = arith.andi %231, %225 : vector<8x1024xi1>
    %233 = vector.broadcast %221 : i32 to vector<8x1024xi32>
    %234 = arith.addi %223, %233 : vector<8x1024xi32>
    %235 = arith.select %232, %234, %223 : vector<8x1024xi1>, vector<8x1024xi32>
    %c12_i32_108 = arith.constant 12 : i32
    %236 = vector.broadcast %c12_i32_108 : i32 to vector<8x1024xi32>
    %237 = arith.cmpi sge, %235, %236 : vector<8x1024xi32>
    %238 = arith.select %237, %217, %218 : vector<8x1024xi1>, vector<8x1024xf32>
    %c256_i32_109 = arith.constant 256 : i32
    %239 = tpu.dynamic_rotate %238 by %c256_i32_109 dim 1 : vector<8x1024xf32>, i32 -> vector<8x1024xf32>
    %c192 = arith.constant 192 : index
    %c0_110 = arith.constant 0 : index
    %240 = vector.load %arg8[%c192, %c0_110] : memref<648x1024xf32, #tpu.memory_space<vmem>>, vector<8x1024xf32>
    tpu.vector_store %arg8[%c192, %c0_110], %239 {strides = array<i32>} : memref<648x1024xf32, #tpu.memory_space<vmem>>, vector<8x1024xf32>,
    %c200 = arith.constant 200 : index
    %c0_111 = arith.constant 0 : index
    %241 = vector.load %arg8[%c200, %c0_111] : memref<648x1024xf32, #tpu.memory_space<vmem>>, vector<8x1024xf32>
    tpu.vector_store %arg8[%c200, %c0_111], %238 {strides = array<i32>} : memref<648x1024xf32, #tpu.memory_space<vmem>>, vector<8x1024xf32>,
    %c768_i32_112 = arith.constant 768 : i32
    %242 = tpu.dynamic_rotate %238 by %c768_i32_112 dim 1 : vector<8x1024xf32>, i32 -> vector<8x1024xf32>
    %c208 = arith.constant 208 : index
    %c0_113 = arith.constant 0 : index
    %243 = vector.load %arg8[%c208, %c0_113] : memref<648x1024xf32, #tpu.memory_space<vmem>>, vector<8x1024xf32>
    tpu.vector_store %arg8[%c208, %c0_113], %242 {strides = array<i32>} : memref<648x1024xf32, #tpu.memory_space<vmem>>, vector<8x1024xf32>,
    %c16_i32_114 = arith.constant 16 : i32
    %244 = tpu.dynamic_rotate %0 by %c16_i32_114 dim 1 : vector<8x1024xf32>, i32 -> vector<8x1024xf32>
    %c976_i32_115 = arith.constant 976 : i32
    %245 = tpu.dynamic_rotate %0 by %c976_i32_115 dim 1 : vector<8x1024xf32>, i32 -> vector<8x1024xf32>
    %246 = tpu.iota {dimensions = array<i32: 1>} : vector<8x1024xi32>
    %c64_i32_116 = arith.constant 64 : i32
    %c0_i32_117 = arith.constant 0 : i32
    %247 = arith.cmpi eq, %c64_i32_116, %c0_i32_117 : i32
    %c1_i32_118 = arith.constant 1 : i32
    %248 = arith.select %247, %c1_i32_118, %c64_i32_116 : i32
    %249 = vector.broadcast %248 : i32 to vector<8x1024xi32>
    %250 = arith.remsi %246, %249 : vector<8x1024xi32>
    %c0_i32_119 = arith.constant 0 : i32
    %251 = vector.broadcast %c0_i32_119 : i32 to vector<8x1024xi32>
    %252 = arith.cmpi ne, %250, %251 : vector<8x1024xi32>
    %c0_i32_120 = arith.constant 0 : i32
    %253 = vector.broadcast %c0_i32_120 : i32 to vector<8x1024xi32>
    %254 = arith.cmpi slt, %250, %253 : vector<8x1024xi32>
    %c0_i32_121 = arith.constant 0 : i32
    %255 = arith.cmpi slt, %248, %c0_i32_121 : i32
    %256 = vector.broadcast %255 : i1 to vector<8x1024xi1>
    %257 = vector.broadcast %256 : vector<8x1024xi1> to vector<8x1024xi1>
    %258 = arith.xori %254, %257 : vector<8x1024xi1>
    %259 = arith.andi %258, %252 : vector<8x1024xi1>
    %260 = vector.broadcast %248 : i32 to vector<8x1024xi32>
    %261 = arith.addi %250, %260 : vector<8x1024xi32>
    %262 = arith.select %259, %261, %250 : vector<8x1024xi1>, vector<8x1024xi32>
    %c16_i32_122 = arith.constant 16 : i32
    %263 = vector.broadcast %c16_i32_122 : i32 to vector<8x1024xi32>
    %264 = arith.cmpi sge, %262, %263 : vector<8x1024xi32>
    %265 = arith.select %264, %244, %245 : vector<8x1024xi1>, vector<8x1024xf32>
    %c4_i32_123 = arith.constant 4 : i32
    %266 = tpu.dynamic_rotate %265 by %c4_i32_123 dim 1 : vector<8x1024xf32>, i32 -> vector<8x1024xf32>
    %c1012_i32_124 = arith.constant 1012 : i32
    %267 = tpu.dynamic_rotate %265 by %c1012_i32_124 dim 1 : vector<8x1024xf32>, i32 -> vector<8x1024xf32>
    %268 = tpu.iota {dimensions = array<i32: 1>} : vector<8x1024xi32>
    %c16_i32_125 = arith.constant 16 : i32
    %c0_i32_126 = arith.constant 0 : i32
    %269 = arith.cmpi eq, %c16_i32_125, %c0_i32_126 : i32
    %c1_i32_127 = arith.constant 1 : i32
    %270 = arith.select %269, %c1_i32_127, %c16_i32_125 : i32
    %271 = vector.broadcast %270 : i32 to vector<8x1024xi32>
    %272 = arith.remsi %268, %271 : vector<8x1024xi32>
    %c0_i32_128 = arith.constant 0 : i32
    %273 = vector.broadcast %c0_i32_128 : i32 to vector<8x1024xi32>
    %274 = arith.cmpi ne, %272, %273 : vector<8x1024xi32>
    %c0_i32_129 = arith.constant 0 : i32
    %275 = vector.broadcast %c0_i32_129 : i32 to vector<8x1024xi32>
    %276 = arith.cmpi slt, %272, %275 : vector<8x1024xi32>
    %c0_i32_130 = arith.constant 0 : i32
    %277 = arith.cmpi slt, %270, %c0_i32_130 : i32
    %278 = vector.broadcast %277 : i1 to vector<8x1024xi1>
    %279 = vector.broadcast %278 : vector<8x1024xi1> to vector<8x1024xi1>
    %280 = arith.xori %276, %279 : vector<8x1024xi1>
    %281 = arith.andi %280, %274 : vector<8x1024xi1>
    %282 = vector.broadcast %270 : i32 to vector<8x1024xi32>
    %283 = arith.addi %272, %282 : vector<8x1024xi32>
    %284 = arith.select %281, %283, %272 : vector<8x1024xi1>, vector<8x1024xi32>
    %c4_i32_131 = arith.constant 4 : i32
    %285 = vector.broadcast %c4_i32_131 : i32 to vector<8x1024xi32>
    %286 = arith.cmpi sge, %284, %285 : vector<8x1024xi32>
    %287 = arith.select %286, %266, %267 : vector<8x1024xi1>, vector<8x1024xf32>
    %c256_i32_132 = arith.constant 256 : i32
    %288 = tpu.dynamic_rotate %287 by %c256_i32_132 dim 1 : vector<8x1024xf32>, i32 -> vector<8x1024xf32>
    %c216 = arith.constant 216 : index
    %c0_133 = arith.constant 0 : index
    %289 = vector.load %arg8[%c216, %c0_133] : memref<648x1024xf32, #tpu.memory_space<vmem>>, vector<8x1024xf32>
    tpu.vector_store %arg8[%c216, %c0_133], %288 {strides = array<i32>} : memref<648x1024xf32, #tpu.memory_space<vmem>>, vector<8x1024xf32>,
    %c224 = arith.constant 224 : index
    %c0_134 = arith.constant 0 : index
    %290 = vector.load %arg8[%c224, %c0_134] : memref<648x1024xf32, #tpu.memory_space<vmem>>, vector<8x1024xf32>
    tpu.vector_store %arg8[%c224, %c0_134], %287 {strides = array<i32>} : memref<648x1024xf32, #tpu.memory_space<vmem>>, vector<8x1024xf32>,
    %c768_i32_135 = arith.constant 768 : i32
    %291 = tpu.dynamic_rotate %287 by %c768_i32_135 dim 1 : vector<8x1024xf32>, i32 -> vector<8x1024xf32>
    %c232 = arith.constant 232 : index
    %c0_136 = arith.constant 0 : index
    %292 = vector.load %arg8[%c232, %c0_136] : memref<648x1024xf32, #tpu.memory_space<vmem>>, vector<8x1024xf32>
    tpu.vector_store %arg8[%c232, %c0_136], %291 {strides = array<i32>} : memref<648x1024xf32, #tpu.memory_space<vmem>>, vector<8x1024xf32>,
    %c256_i32_137 = arith.constant 256 : i32
    %293 = tpu.dynamic_rotate %265 by %c256_i32_137 dim 1 : vector<8x1024xf32>, i32 -> vector<8x1024xf32>
    %c240 = arith.constant 240 : index
    %c0_138 = arith.constant 0 : index
    %294 = vector.load %arg8[%c240, %c0_138] : memref<648x1024xf32, #tpu.memory_space<vmem>>, vector<8x1024xf32>
    tpu.vector_store %arg8[%c240, %c0_138], %293 {strides = array<i32>} : memref<648x1024xf32, #tpu.memory_space<vmem>>, vector<8x1024xf32>,
    %c248 = arith.constant 248 : index
    %c0_139 = arith.constant 0 : index
    %295 = vector.load %arg8[%c248, %c0_139] : memref<648x1024xf32, #tpu.memory_space<vmem>>, vector<8x1024xf32>
    tpu.vector_store %arg8[%c248, %c0_139], %265 {strides = array<i32>} : memref<648x1024xf32, #tpu.memory_space<vmem>>, vector<8x1024xf32>,
    %c768_i32_140 = arith.constant 768 : i32
    %296 = tpu.dynamic_rotate %265 by %c768_i32_140 dim 1 : vector<8x1024xf32>, i32 -> vector<8x1024xf32>
    %c256 = arith.constant 256 : index
    %c0_141 = arith.constant 0 : index
    %297 = vector.load %arg8[%c256, %c0_141] : memref<648x1024xf32, #tpu.memory_space<vmem>>, vector<8x1024xf32>
    tpu.vector_store %arg8[%c256, %c0_141], %296 {strides = array<i32>} : memref<648x1024xf32, #tpu.memory_space<vmem>>, vector<8x1024xf32>,
    %c12_i32_142 = arith.constant 12 : i32
    %298 = tpu.dynamic_rotate %265 by %c12_i32_142 dim 1 : vector<8x1024xf32>, i32 -> vector<8x1024xf32>
    %c1020_i32_143 = arith.constant 1020 : i32
    %299 = tpu.dynamic_rotate %265 by %c1020_i32_143 dim 1 : vector<8x1024xf32>, i32 -> vector<8x1024xf32>
    %300 = tpu.iota {dimensions = array<i32: 1>} : vector<8x1024xi32>
    %c16_i32_144 = arith.constant 16 : i32
    %c0_i32_145 = arith.constant 0 : i32
    %301 = arith.cmpi eq, %c16_i32_144, %c0_i32_145 : i32
    %c1_i32_146 = arith.constant 1 : i32
    %302 = arith.select %301, %c1_i32_146, %c16_i32_144 : i32
    %303 = vector.broadcast %302 : i32 to vector<8x1024xi32>
    %304 = arith.remsi %300, %303 : vector<8x1024xi32>
    %c0_i32_147 = arith.constant 0 : i32
    %305 = vector.broadcast %c0_i32_147 : i32 to vector<8x1024xi32>
    %306 = arith.cmpi ne, %304, %305 : vector<8x1024xi32>
    %c0_i32_148 = arith.constant 0 : i32
    %307 = vector.broadcast %c0_i32_148 : i32 to vector<8x1024xi32>
    %308 = arith.cmpi slt, %304, %307 : vector<8x1024xi32>
    %c0_i32_149 = arith.constant 0 : i32
    %309 = arith.cmpi slt, %302, %c0_i32_149 : i32
    %310 = vector.broadcast %309 : i1 to vector<8x1024xi1>
    %311 = vector.broadcast %310 : vector<8x1024xi1> to vector<8x1024xi1>
    %312 = arith.xori %308, %311 : vector<8x1024xi1>
    %313 = arith.andi %312, %306 : vector<8x1024xi1>
    %314 = vector.broadcast %302 : i32 to vector<8x1024xi32>
    %315 = arith.addi %304, %314 : vector<8x1024xi32>
    %316 = arith.select %313, %315, %304 : vector<8x1024xi1>, vector<8x1024xi32>
    %c12_i32_150 = arith.constant 12 : i32
    %317 = vector.broadcast %c12_i32_150 : i32 to vector<8x1024xi32>
    %318 = arith.cmpi sge, %316, %317 : vector<8x1024xi32>
    %319 = arith.select %318, %298, %299 : vector<8x1024xi1>, vector<8x1024xf32>
    %c256_i32_151 = arith.constant 256 : i32
    %320 = tpu.dynamic_rotate %319 by %c256_i32_151 dim 1 : vector<8x1024xf32>, i32 -> vector<8x1024xf32>
    %c264 = arith.constant 264 : index
    %c0_152 = arith.constant 0 : index
    %321 = vector.load %arg8[%c264, %c0_152] : memref<648x1024xf32, #tpu.memory_space<vmem>>, vector<8x1024xf32>
    tpu.vector_store %arg8[%c264, %c0_152], %320 {strides = array<i32>} : memref<648x1024xf32, #tpu.memory_space<vmem>>, vector<8x1024xf32>,
    %c272 = arith.constant 272 : index
    %c0_153 = arith.constant 0 : index
    %322 = vector.load %arg8[%c272, %c0_153] : memref<648x1024xf32, #tpu.memory_space<vmem>>, vector<8x1024xf32>
    tpu.vector_store %arg8[%c272, %c0_153], %319 {strides = array<i32>} : memref<648x1024xf32, #tpu.memory_space<vmem>>, vector<8x1024xf32>,
    %c768_i32_154 = arith.constant 768 : i32
    %323 = tpu.dynamic_rotate %319 by %c768_i32_154 dim 1 : vector<8x1024xf32>, i32 -> vector<8x1024xf32>
    %c280 = arith.constant 280 : index
    %c0_155 = arith.constant 0 : index
    %324 = vector.load %arg8[%c280, %c0_155] : memref<648x1024xf32, #tpu.memory_space<vmem>>, vector<8x1024xf32>
    tpu.vector_store %arg8[%c280, %c0_155], %323 {strides = array<i32>} : memref<648x1024xf32, #tpu.memory_space<vmem>>, vector<8x1024xf32>,
    %c4_i32_156 = arith.constant 4 : i32
    %325 = tpu.dynamic_rotate %0 by %c4_i32_156 dim 1 : vector<8x1024xf32>, i32 -> vector<8x1024xf32>
    %c1012_i32_157 = arith.constant 1012 : i32
    %326 = tpu.dynamic_rotate %0 by %c1012_i32_157 dim 1 : vector<8x1024xf32>, i32 -> vector<8x1024xf32>
    %327 = tpu.iota {dimensions = array<i32: 1>} : vector<8x1024xi32>
    %c16_i32_158 = arith.constant 16 : i32
    %c0_i32_159 = arith.constant 0 : i32
    %328 = arith.cmpi eq, %c16_i32_158, %c0_i32_159 : i32
    %c1_i32_160 = arith.constant 1 : i32
    %329 = arith.select %328, %c1_i32_160, %c16_i32_158 : i32
    %330 = vector.broadcast %329 : i32 to vector<8x1024xi32>
    %331 = arith.remsi %327, %330 : vector<8x1024xi32>
    %c0_i32_161 = arith.constant 0 : i32
    %332 = vector.broadcast %c0_i32_161 : i32 to vector<8x1024xi32>
    %333 = arith.cmpi ne, %331, %332 : vector<8x1024xi32>
    %c0_i32_162 = arith.constant 0 : i32
    %334 = vector.broadcast %c0_i32_162 : i32 to vector<8x1024xi32>
    %335 = arith.cmpi slt, %331, %334 : vector<8x1024xi32>
    %c0_i32_163 = arith.constant 0 : i32
    %336 = arith.cmpi slt, %329, %c0_i32_163 : i32
    %337 = vector.broadcast %336 : i1 to vector<8x1024xi1>
    %338 = vector.broadcast %337 : vector<8x1024xi1> to vector<8x1024xi1>
    %339 = arith.xori %335, %338 : vector<8x1024xi1>
    %340 = arith.andi %339, %333 : vector<8x1024xi1>
    %341 = vector.broadcast %329 : i32 to vector<8x1024xi32>
    %342 = arith.addi %331, %341 : vector<8x1024xi32>
    %343 = arith.select %340, %342, %331 : vector<8x1024xi1>, vector<8x1024xi32>
    %c4_i32_164 = arith.constant 4 : i32
    %344 = vector.broadcast %c4_i32_164 : i32 to vector<8x1024xi32>
    %345 = arith.cmpi sge, %343, %344 : vector<8x1024xi32>
    %346 = arith.select %345, %325, %326 : vector<8x1024xi1>, vector<8x1024xf32>
    %c256_i32_165 = arith.constant 256 : i32
    %347 = tpu.dynamic_rotate %346 by %c256_i32_165 dim 1 : vector<8x1024xf32>, i32 -> vector<8x1024xf32>
    %c288 = arith.constant 288 : index
    %c0_166 = arith.constant 0 : index
    %348 = vector.load %arg8[%c288, %c0_166] : memref<648x1024xf32, #tpu.memory_space<vmem>>, vector<8x1024xf32>
    tpu.vector_store %arg8[%c288, %c0_166], %347 {strides = array<i32>} : memref<648x1024xf32, #tpu.memory_space<vmem>>, vector<8x1024xf32>,
    %c296 = arith.constant 296 : index
    %c0_167 = arith.constant 0 : index
    %349 = vector.load %arg8[%c296, %c0_167] : memref<648x1024xf32, #tpu.memory_space<vmem>>, vector<8x1024xf32>
    tpu.vector_store %arg8[%c296, %c0_167], %346 {strides = array<i32>} : memref<648x1024xf32, #tpu.memory_space<vmem>>, vector<8x1024xf32>,
    %c768_i32_168 = arith.constant 768 : i32
    %350 = tpu.dynamic_rotate %346 by %c768_i32_168 dim 1 : vector<8x1024xf32>, i32 -> vector<8x1024xf32>
    %c304 = arith.constant 304 : index
    %c0_169 = arith.constant 0 : index
    %351 = vector.load %arg8[%c304, %c0_169] : memref<648x1024xf32, #tpu.memory_space<vmem>>, vector<8x1024xf32>
    tpu.vector_store %arg8[%c304, %c0_169], %350 {strides = array<i32>} : memref<648x1024xf32, #tpu.memory_space<vmem>>, vector<8x1024xf32>,
    %c256_i32_170 = arith.constant 256 : i32
    %352 = tpu.dynamic_rotate %0 by %c256_i32_170 dim 1 : vector<8x1024xf32>, i32 -> vector<8x1024xf32>
    %c312 = arith.constant 312 : index
    %c0_171 = arith.constant 0 : index
    %353 = vector.load %arg8[%c312, %c0_171] : memref<648x1024xf32, #tpu.memory_space<vmem>>, vector<8x1024xf32>
    tpu.vector_store %arg8[%c312, %c0_171], %352 {strides = array<i32>} : memref<648x1024xf32, #tpu.memory_space<vmem>>, vector<8x1024xf32>,
    %c320 = arith.constant 320 : index
    %c0_172 = arith.constant 0 : index
    %354 = vector.load %arg8[%c320, %c0_172] : memref<648x1024xf32, #tpu.memory_space<vmem>>, vector<8x1024xf32>
    tpu.vector_store %arg8[%c320, %c0_172], %0 {strides = array<i32>} : memref<648x1024xf32, #tpu.memory_space<vmem>>, vector<8x1024xf32>,
    %c768_i32_173 = arith.constant 768 : i32
    %355 = tpu.dynamic_rotate %0 by %c768_i32_173 dim 1 : vector<8x1024xf32>, i32 -> vector<8x1024xf32>
    %c328 = arith.constant 328 : index
    %c0_174 = arith.constant 0 : index
    %356 = vector.load %arg8[%c328, %c0_174] : memref<648x1024xf32, #tpu.memory_space<vmem>>, vector<8x1024xf32>
    tpu.vector_store %arg8[%c328, %c0_174], %355 {strides = array<i32>} : memref<648x1024xf32, #tpu.memory_space<vmem>>, vector<8x1024xf32>,
    %c12_i32_175 = arith.constant 12 : i32
    %357 = tpu.dynamic_rotate %0 by %c12_i32_175 dim 1 : vector<8x1024xf32>, i32 -> vector<8x1024xf32>
    %c1020_i32_176 = arith.constant 1020 : i32
    %358 = tpu.dynamic_rotate %0 by %c1020_i32_176 dim 1 : vector<8x1024xf32>, i32 -> vector<8x1024xf32>
    %359 = tpu.iota {dimensions = array<i32: 1>} : vector<8x1024xi32>
    %c16_i32_177 = arith.constant 16 : i32
    %c0_i32_178 = arith.constant 0 : i32
    %360 = arith.cmpi eq, %c16_i32_177, %c0_i32_178 : i32
    %c1_i32_179 = arith.constant 1 : i32
    %361 = arith.select %360, %c1_i32_179, %c16_i32_177 : i32
    %362 = vector.broadcast %361 : i32 to vector<8x1024xi32>
    %363 = arith.remsi %359, %362 : vector<8x1024xi32>
    %c0_i32_180 = arith.constant 0 : i32
    %364 = vector.broadcast %c0_i32_180 : i32 to vector<8x1024xi32>
    %365 = arith.cmpi ne, %363, %364 : vector<8x1024xi32>
    %c0_i32_181 = arith.constant 0 : i32
    %366 = vector.broadcast %c0_i32_181 : i32 to vector<8x1024xi32>
    %367 = arith.cmpi slt, %363, %366 : vector<8x1024xi32>
    %c0_i32_182 = arith.constant 0 : i32
    %368 = arith.cmpi slt, %361, %c0_i32_182 : i32
    %369 = vector.broadcast %368 : i1 to vector<8x1024xi1>
    %370 = vector.broadcast %369 : vector<8x1024xi1> to vector<8x1024xi1>
    %371 = arith.xori %367, %370 : vector<8x1024xi1>
    %372 = arith.andi %371, %365 : vector<8x1024xi1>
    %373 = vector.broadcast %361 : i32 to vector<8x1024xi32>
    %374 = arith.addi %363, %373 : vector<8x1024xi32>
    %375 = arith.select %372, %374, %363 : vector<8x1024xi1>, vector<8x1024xi32>
    %c12_i32_183 = arith.constant 12 : i32
    %376 = vector.broadcast %c12_i32_183 : i32 to vector<8x1024xi32>
    %377 = arith.cmpi sge, %375, %376 : vector<8x1024xi32>
    %378 = arith.select %377, %357, %358 : vector<8x1024xi1>, vector<8x1024xf32>
    %c256_i32_184 = arith.constant 256 : i32
    %379 = tpu.dynamic_rotate %378 by %c256_i32_184 dim 1 : vector<8x1024xf32>, i32 -> vector<8x1024xf32>
    %c336 = arith.constant 336 : index
    %c0_185 = arith.constant 0 : index
    %380 = vector.load %arg8[%c336, %c0_185] : memref<648x1024xf32, #tpu.memory_space<vmem>>, vector<8x1024xf32>
    tpu.vector_store %arg8[%c336, %c0_185], %379 {strides = array<i32>} : memref<648x1024xf32, #tpu.memory_space<vmem>>, vector<8x1024xf32>,
    %c344 = arith.constant 344 : index
    %c0_186 = arith.constant 0 : index
    %381 = vector.load %arg8[%c344, %c0_186] : memref<648x1024xf32, #tpu.memory_space<vmem>>, vector<8x1024xf32>
    tpu.vector_store %arg8[%c344, %c0_186], %378 {strides = array<i32>} : memref<648x1024xf32, #tpu.memory_space<vmem>>, vector<8x1024xf32>,
    %c768_i32_187 = arith.constant 768 : i32
    %382 = tpu.dynamic_rotate %378 by %c768_i32_187 dim 1 : vector<8x1024xf32>, i32 -> vector<8x1024xf32>
    %c352 = arith.constant 352 : index
    %c0_188 = arith.constant 0 : index
    %383 = vector.load %arg8[%c352, %c0_188] : memref<648x1024xf32, #tpu.memory_space<vmem>>, vector<8x1024xf32>
    tpu.vector_store %arg8[%c352, %c0_188], %382 {strides = array<i32>} : memref<648x1024xf32, #tpu.memory_space<vmem>>, vector<8x1024xf32>,
    %c48_i32_189 = arith.constant 48 : i32
    %384 = tpu.dynamic_rotate %0 by %c48_i32_189 dim 1 : vector<8x1024xf32>, i32 -> vector<8x1024xf32>
    %c1008_i32_190 = arith.constant 1008 : i32
    %385 = tpu.dynamic_rotate %0 by %c1008_i32_190 dim 1 : vector<8x1024xf32>, i32 -> vector<8x1024xf32>
    %386 = tpu.iota {dimensions = array<i32: 1>} : vector<8x1024xi32>
    %c64_i32_191 = arith.constant 64 : i32
    %c0_i32_192 = arith.constant 0 : i32
    %387 = arith.cmpi eq, %c64_i32_191, %c0_i32_192 : i32
    %c1_i32_193 = arith.constant 1 : i32
    %388 = arith.select %387, %c1_i32_193, %c64_i32_191 : i32
    %389 = vector.broadcast %388 : i32 to vector<8x1024xi32>
    %390 = arith.remsi %386, %389 : vector<8x1024xi32>
    %c0_i32_194 = arith.constant 0 : i32
    %391 = vector.broadcast %c0_i32_194 : i32 to vector<8x1024xi32>
    %392 = arith.cmpi ne, %390, %391 : vector<8x1024xi32>
    %c0_i32_195 = arith.constant 0 : i32
    %393 = vector.broadcast %c0_i32_195 : i32 to vector<8x1024xi32>
    %394 = arith.cmpi slt, %390, %393 : vector<8x1024xi32>
    %c0_i32_196 = arith.constant 0 : i32
    %395 = arith.cmpi slt, %388, %c0_i32_196 : i32
    %396 = vector.broadcast %395 : i1 to vector<8x1024xi1>
    %397 = vector.broadcast %396 : vector<8x1024xi1> to vector<8x1024xi1>
    %398 = arith.xori %394, %397 : vector<8x1024xi1>
    %399 = arith.andi %398, %392 : vector<8x1024xi1>
    %400 = vector.broadcast %388 : i32 to vector<8x1024xi32>
    %401 = arith.addi %390, %400 : vector<8x1024xi32>
    %402 = arith.select %399, %401, %390 : vector<8x1024xi1>, vector<8x1024xi32>
    %c48_i32_197 = arith.constant 48 : i32
    %403 = vector.broadcast %c48_i32_197 : i32 to vector<8x1024xi32>
    %404 = arith.cmpi sge, %402, %403 : vector<8x1024xi32>
    %405 = arith.select %404, %384, %385 : vector<8x1024xi1>, vector<8x1024xf32>
    %c4_i32_198 = arith.constant 4 : i32
    %406 = tpu.dynamic_rotate %405 by %c4_i32_198 dim 1 : vector<8x1024xf32>, i32 -> vector<8x1024xf32>
    %c1012_i32_199 = arith.constant 1012 : i32
    %407 = tpu.dynamic_rotate %405 by %c1012_i32_199 dim 1 : vector<8x1024xf32>, i32 -> vector<8x1024xf32>
    %408 = tpu.iota {dimensions = array<i32: 1>} : vector<8x1024xi32>
    %c16_i32_200 = arith.constant 16 : i32
    %c0_i32_201 = arith.constant 0 : i32
    %409 = arith.cmpi eq, %c16_i32_200, %c0_i32_201 : i32
    %c1_i32_202 = arith.constant 1 : i32
    %410 = arith.select %409, %c1_i32_202, %c16_i32_200 : i32
    %411 = vector.broadcast %410 : i32 to vector<8x1024xi32>
    %412 = arith.remsi %408, %411 : vector<8x1024xi32>
    %c0_i32_203 = arith.constant 0 : i32
    %413 = vector.broadcast %c0_i32_203 : i32 to vector<8x1024xi32>
    %414 = arith.cmpi ne, %412, %413 : vector<8x1024xi32>
    %c0_i32_204 = arith.constant 0 : i32
    %415 = vector.broadcast %c0_i32_204 : i32 to vector<8x1024xi32>
    %416 = arith.cmpi slt, %412, %415 : vector<8x1024xi32>
    %c0_i32_205 = arith.constant 0 : i32
    %417 = arith.cmpi slt, %410, %c0_i32_205 : i32
    %418 = vector.broadcast %417 : i1 to vector<8x1024xi1>
    %419 = vector.broadcast %418 : vector<8x1024xi1> to vector<8x1024xi1>
    %420 = arith.xori %416, %419 : vector<8x1024xi1>
    %421 = arith.andi %420, %414 : vector<8x1024xi1>
    %422 = vector.broadcast %410 : i32 to vector<8x1024xi32>
    %423 = arith.addi %412, %422 : vector<8x1024xi32>
    %424 = arith.select %421, %423, %412 : vector<8x1024xi1>, vector<8x1024xi32>
    %c4_i32_206 = arith.constant 4 : i32
    %425 = vector.broadcast %c4_i32_206 : i32 to vector<8x1024xi32>
    %426 = arith.cmpi sge, %424, %425 : vector<8x1024xi32>
    %427 = arith.select %426, %406, %407 : vector<8x1024xi1>, vector<8x1024xf32>
    %c256_i32_207 = arith.constant 256 : i32
    %428 = tpu.dynamic_rotate %427 by %c256_i32_207 dim 1 : vector<8x1024xf32>, i32 -> vector<8x1024xf32>
    %c360 = arith.constant 360 : index
    %c0_208 = arith.constant 0 : index
    %429 = vector.load %arg8[%c360, %c0_208] : memref<648x1024xf32, #tpu.memory_space<vmem>>, vector<8x1024xf32>
    tpu.vector_store %arg8[%c360, %c0_208], %428 {strides = array<i32>} : memref<648x1024xf32, #tpu.memory_space<vmem>>, vector<8x1024xf32>,
    %c368 = arith.constant 368 : index
    %c0_209 = arith.constant 0 : index
    %430 = vector.load %arg8[%c368, %c0_209] : memref<648x1024xf32, #tpu.memory_space<vmem>>, vector<8x1024xf32>
    tpu.vector_store %arg8[%c368, %c0_209], %427 {strides = array<i32>} : memref<648x1024xf32, #tpu.memory_space<vmem>>, vector<8x1024xf32>,
    %c768_i32_210 = arith.constant 768 : i32
    %431 = tpu.dynamic_rotate %427 by %c768_i32_210 dim 1 : vector<8x1024xf32>, i32 -> vector<8x1024xf32>
    %c376 = arith.constant 376 : index
    %c0_211 = arith.constant 0 : index
    %432 = vector.load %arg8[%c376, %c0_211] : memref<648x1024xf32, #tpu.memory_space<vmem>>, vector<8x1024xf32>
    tpu.vector_store %arg8[%c376, %c0_211], %431 {strides = array<i32>} : memref<648x1024xf32, #tpu.memory_space<vmem>>, vector<8x1024xf32>,
    %c256_i32_212 = arith.constant 256 : i32
    %433 = tpu.dynamic_rotate %405 by %c256_i32_212 dim 1 : vector<8x1024xf32>, i32 -> vector<8x1024xf32>
    %c384 = arith.constant 384 : index
    %c0_213 = arith.constant 0 : index
    %434 = vector.load %arg8[%c384, %c0_213] : memref<648x1024xf32, #tpu.memory_space<vmem>>, vector<8x1024xf32>
    tpu.vector_store %arg8[%c384, %c0_213], %433 {strides = array<i32>} : memref<648x1024xf32, #tpu.memory_space<vmem>>, vector<8x1024xf32>,
    %c392 = arith.constant 392 : index
    %c0_214 = arith.constant 0 : index
    %435 = vector.load %arg8[%c392, %c0_214] : memref<648x1024xf32, #tpu.memory_space<vmem>>, vector<8x1024xf32>
    tpu.vector_store %arg8[%c392, %c0_214], %405 {strides = array<i32>} : memref<648x1024xf32, #tpu.memory_space<vmem>>, vector<8x1024xf32>,
    %c768_i32_215 = arith.constant 768 : i32
    %436 = tpu.dynamic_rotate %405 by %c768_i32_215 dim 1 : vector<8x1024xf32>, i32 -> vector<8x1024xf32>
    %c400 = arith.constant 400 : index
    %c0_216 = arith.constant 0 : index
    %437 = vector.load %arg8[%c400, %c0_216] : memref<648x1024xf32, #tpu.memory_space<vmem>>, vector<8x1024xf32>
    tpu.vector_store %arg8[%c400, %c0_216], %436 {strides = array<i32>} : memref<648x1024xf32, #tpu.memory_space<vmem>>, vector<8x1024xf32>,
    %c12_i32_217 = arith.constant 12 : i32
    %438 = tpu.dynamic_rotate %405 by %c12_i32_217 dim 1 : vector<8x1024xf32>, i32 -> vector<8x1024xf32>
    %c1020_i32_218 = arith.constant 1020 : i32
    %439 = tpu.dynamic_rotate %405 by %c1020_i32_218 dim 1 : vector<8x1024xf32>, i32 -> vector<8x1024xf32>
    %440 = tpu.iota {dimensions = array<i32: 1>} : vector<8x1024xi32>
    %c16_i32_219 = arith.constant 16 : i32
    %c0_i32_220 = arith.constant 0 : i32
    %441 = arith.cmpi eq, %c16_i32_219, %c0_i32_220 : i32
    %c1_i32_221 = arith.constant 1 : i32
    %442 = arith.select %441, %c1_i32_221, %c16_i32_219 : i32
    %443 = vector.broadcast %442 : i32 to vector<8x1024xi32>
    %444 = arith.remsi %440, %443 : vector<8x1024xi32>
    %c0_i32_222 = arith.constant 0 : i32
    %445 = vector.broadcast %c0_i32_222 : i32 to vector<8x1024xi32>
    %446 = arith.cmpi ne, %444, %445 : vector<8x1024xi32>
    %c0_i32_223 = arith.constant 0 : i32
    %447 = vector.broadcast %c0_i32_223 : i32 to vector<8x1024xi32>
    %448 = arith.cmpi slt, %444, %447 : vector<8x1024xi32>
    %c0_i32_224 = arith.constant 0 : i32
    %449 = arith.cmpi slt, %442, %c0_i32_224 : i32
    %450 = vector.broadcast %449 : i1 to vector<8x1024xi1>
    %451 = vector.broadcast %450 : vector<8x1024xi1> to vector<8x1024xi1>
    %452 = arith.xori %448, %451 : vector<8x1024xi1>
    %453 = arith.andi %452, %446 : vector<8x1024xi1>
    %454 = vector.broadcast %442 : i32 to vector<8x1024xi32>
    %455 = arith.addi %444, %454 : vector<8x1024xi32>
    %456 = arith.select %453, %455, %444 : vector<8x1024xi1>, vector<8x1024xi32>
    %c12_i32_225 = arith.constant 12 : i32
    %457 = vector.broadcast %c12_i32_225 : i32 to vector<8x1024xi32>
    %458 = arith.cmpi sge, %456, %457 : vector<8x1024xi32>
    %459 = arith.select %458, %438, %439 : vector<8x1024xi1>, vector<8x1024xf32>
    %c256_i32_226 = arith.constant 256 : i32
    %460 = tpu.dynamic_rotate %459 by %c256_i32_226 dim 1 : vector<8x1024xf32>, i32 -> vector<8x1024xf32>
    %c408 = arith.constant 408 : index
    %c0_227 = arith.constant 0 : index
    %461 = vector.load %arg8[%c408, %c0_227] : memref<648x1024xf32, #tpu.memory_space<vmem>>, vector<8x1024xf32>
    tpu.vector_store %arg8[%c408, %c0_227], %460 {strides = array<i32>} : memref<648x1024xf32, #tpu.memory_space<vmem>>, vector<8x1024xf32>,
    %c416 = arith.constant 416 : index
    %c0_228 = arith.constant 0 : index
    %462 = vector.load %arg8[%c416, %c0_228] : memref<648x1024xf32, #tpu.memory_space<vmem>>, vector<8x1024xf32>
    tpu.vector_store %arg8[%c416, %c0_228], %459 {strides = array<i32>} : memref<648x1024xf32, #tpu.memory_space<vmem>>, vector<8x1024xf32>,
    %c768_i32_229 = arith.constant 768 : i32
    %463 = tpu.dynamic_rotate %459 by %c768_i32_229 dim 1 : vector<8x1024xf32>, i32 -> vector<8x1024xf32>
    %c424 = arith.constant 424 : index
    %c0_230 = arith.constant 0 : index
    %464 = vector.load %arg8[%c424, %c0_230] : memref<648x1024xf32, #tpu.memory_space<vmem>>, vector<8x1024xf32>
    tpu.vector_store %arg8[%c424, %c0_230], %463 {strides = array<i32>} : memref<648x1024xf32, #tpu.memory_space<vmem>>, vector<8x1024xf32>,
    %c192_i32 = arith.constant 192 : i32
    %465 = tpu.dynamic_rotate %0 by %c192_i32 dim 1 : vector<8x1024xf32>, i32 -> vector<8x1024xf32>
    %c960_i32 = arith.constant 960 : i32
    %466 = tpu.dynamic_rotate %0 by %c960_i32 dim 1 : vector<8x1024xf32>, i32 -> vector<8x1024xf32>
    %467 = tpu.iota {dimensions = array<i32: 1>} : vector<8x1024xi32>
    %c256_i32_231 = arith.constant 256 : i32
    %c0_i32_232 = arith.constant 0 : i32
    %468 = arith.cmpi eq, %c256_i32_231, %c0_i32_232 : i32
    %c1_i32_233 = arith.constant 1 : i32
    %469 = arith.select %468, %c1_i32_233, %c256_i32_231 : i32
    %470 = vector.broadcast %469 : i32 to vector<8x1024xi32>
    %471 = arith.remsi %467, %470 : vector<8x1024xi32>
    %c0_i32_234 = arith.constant 0 : i32
    %472 = vector.broadcast %c0_i32_234 : i32 to vector<8x1024xi32>
    %473 = arith.cmpi ne, %471, %472 : vector<8x1024xi32>
    %c0_i32_235 = arith.constant 0 : i32
    %474 = vector.broadcast %c0_i32_235 : i32 to vector<8x1024xi32>
    %475 = arith.cmpi slt, %471, %474 : vector<8x1024xi32>
    %c0_i32_236 = arith.constant 0 : i32
    %476 = arith.cmpi slt, %469, %c0_i32_236 : i32
    %477 = vector.broadcast %476 : i1 to vector<8x1024xi1>
    %478 = vector.broadcast %477 : vector<8x1024xi1> to vector<8x1024xi1>
    %479 = arith.xori %475, %478 : vector<8x1024xi1>
    %480 = arith.andi %479, %473 : vector<8x1024xi1>
    %481 = vector.broadcast %469 : i32 to vector<8x1024xi32>
    %482 = arith.addi %471, %481 : vector<8x1024xi32>
    %483 = arith.select %480, %482, %471 : vector<8x1024xi1>, vector<8x1024xi32>
    %c192_i32_237 = arith.constant 192 : i32
    %484 = vector.broadcast %c192_i32_237 : i32 to vector<8x1024xi32>
    %485 = arith.cmpi sge, %483, %484 : vector<8x1024xi32>
    %486 = arith.select %485, %465, %466 : vector<8x1024xi1>, vector<8x1024xf32>
    %c16_i32_238 = arith.constant 16 : i32
    %487 = tpu.dynamic_rotate %486 by %c16_i32_238 dim 1 : vector<8x1024xf32>, i32 -> vector<8x1024xf32>
    %c976_i32_239 = arith.constant 976 : i32
    %488 = tpu.dynamic_rotate %486 by %c976_i32_239 dim 1 : vector<8x1024xf32>, i32 -> vector<8x1024xf32>
    %489 = tpu.iota {dimensions = array<i32: 1>} : vector<8x1024xi32>
    %c64_i32_240 = arith.constant 64 : i32
    %c0_i32_241 = arith.constant 0 : i32
    %490 = arith.cmpi eq, %c64_i32_240, %c0_i32_241 : i32
    %c1_i32_242 = arith.constant 1 : i32
    %491 = arith.select %490, %c1_i32_242, %c64_i32_240 : i32
    %492 = vector.broadcast %491 : i32 to vector<8x1024xi32>
    %493 = arith.remsi %489, %492 : vector<8x1024xi32>
    %c0_i32_243 = arith.constant 0 : i32
    %494 = vector.broadcast %c0_i32_243 : i32 to vector<8x1024xi32>
    %495 = arith.cmpi ne, %493, %494 : vector<8x1024xi32>
    %c0_i32_244 = arith.constant 0 : i32
    %496 = vector.broadcast %c0_i32_244 : i32 to vector<8x1024xi32>
    %497 = arith.cmpi slt, %493, %496 : vector<8x1024xi32>
    %c0_i32_245 = arith.constant 0 : i32
    %498 = arith.cmpi slt, %491, %c0_i32_245 : i32
    %499 = vector.broadcast %498 : i1 to vector<8x1024xi1>
    %500 = vector.broadcast %499 : vector<8x1024xi1> to vector<8x1024xi1>
    %501 = arith.xori %497, %500 : vector<8x1024xi1>
    %502 = arith.andi %501, %495 : vector<8x1024xi1>
    %503 = vector.broadcast %491 : i32 to vector<8x1024xi32>
    %504 = arith.addi %493, %503 : vector<8x1024xi32>
    %505 = arith.select %502, %504, %493 : vector<8x1024xi1>, vector<8x1024xi32>
    %c16_i32_246 = arith.constant 16 : i32
    %506 = vector.broadcast %c16_i32_246 : i32 to vector<8x1024xi32>
    %507 = arith.cmpi sge, %505, %506 : vector<8x1024xi32>
    %508 = arith.select %507, %487, %488 : vector<8x1024xi1>, vector<8x1024xf32>
    %c4_i32_247 = arith.constant 4 : i32
    %509 = tpu.dynamic_rotate %508 by %c4_i32_247 dim 1 : vector<8x1024xf32>, i32 -> vector<8x1024xf32>
    %c1012_i32_248 = arith.constant 1012 : i32
    %510 = tpu.dynamic_rotate %508 by %c1012_i32_248 dim 1 : vector<8x1024xf32>, i32 -> vector<8x1024xf32>
    %511 = tpu.iota {dimensions = array<i32: 1>} : vector<8x1024xi32>
    %c16_i32_249 = arith.constant 16 : i32
    %c0_i32_250 = arith.constant 0 : i32
    %512 = arith.cmpi eq, %c16_i32_249, %c0_i32_250 : i32
    %c1_i32_251 = arith.constant 1 : i32
    %513 = arith.select %512, %c1_i32_251, %c16_i32_249 : i32
    %514 = vector.broadcast %513 : i32 to vector<8x1024xi32>
    %515 = arith.remsi %511, %514 : vector<8x1024xi32>
    %c0_i32_252 = arith.constant 0 : i32
    %516 = vector.broadcast %c0_i32_252 : i32 to vector<8x1024xi32>
    %517 = arith.cmpi ne, %515, %516 : vector<8x1024xi32>
    %c0_i32_253 = arith.constant 0 : i32
    %518 = vector.broadcast %c0_i32_253 : i32 to vector<8x1024xi32>
    %519 = arith.cmpi slt, %515, %518 : vector<8x1024xi32>
    %c0_i32_254 = arith.constant 0 : i32
    %520 = arith.cmpi slt, %513, %c0_i32_254 : i32
    %521 = vector.broadcast %520 : i1 to vector<8x1024xi1>
    %522 = vector.broadcast %521 : vector<8x1024xi1> to vector<8x1024xi1>
    %523 = arith.xori %519, %522 : vector<8x1024xi1>
    %524 = arith.andi %523, %517 : vector<8x1024xi1>
    %525 = vector.broadcast %513 : i32 to vector<8x1024xi32>
    %526 = arith.addi %515, %525 : vector<8x1024xi32>
    %527 = arith.select %524, %526, %515 : vector<8x1024xi1>, vector<8x1024xi32>
    %c4_i32_255 = arith.constant 4 : i32
    %528 = vector.broadcast %c4_i32_255 : i32 to vector<8x1024xi32>
    %529 = arith.cmpi sge, %527, %528 : vector<8x1024xi32>
    %530 = arith.select %529, %509, %510 : vector<8x1024xi1>, vector<8x1024xf32>
    %c256_i32_256 = arith.constant 256 : i32
    %531 = tpu.dynamic_rotate %530 by %c256_i32_256 dim 1 : vector<8x1024xf32>, i32 -> vector<8x1024xf32>
    %c432 = arith.constant 432 : index
    %c0_257 = arith.constant 0 : index
    %532 = vector.load %arg8[%c432, %c0_257] : memref<648x1024xf32, #tpu.memory_space<vmem>>, vector<8x1024xf32>
    tpu.vector_store %arg8[%c432, %c0_257], %531 {strides = array<i32>} : memref<648x1024xf32, #tpu.memory_space<vmem>>, vector<8x1024xf32>,
    %c440 = arith.constant 440 : index
    %c0_258 = arith.constant 0 : index
    %533 = vector.load %arg8[%c440, %c0_258] : memref<648x1024xf32, #tpu.memory_space<vmem>>, vector<8x1024xf32>
    tpu.vector_store %arg8[%c440, %c0_258], %530 {strides = array<i32>} : memref<648x1024xf32, #tpu.memory_space<vmem>>, vector<8x1024xf32>,
    %c768_i32_259 = arith.constant 768 : i32
    %534 = tpu.dynamic_rotate %530 by %c768_i32_259 dim 1 : vector<8x1024xf32>, i32 -> vector<8x1024xf32>
    %c448 = arith.constant 448 : index
    %c0_260 = arith.constant 0 : index
    %535 = vector.load %arg8[%c448, %c0_260] : memref<648x1024xf32, #tpu.memory_space<vmem>>, vector<8x1024xf32>
    tpu.vector_store %arg8[%c448, %c0_260], %534 {strides = array<i32>} : memref<648x1024xf32, #tpu.memory_space<vmem>>, vector<8x1024xf32>,
    %c256_i32_261 = arith.constant 256 : i32
    %536 = tpu.dynamic_rotate %508 by %c256_i32_261 dim 1 : vector<8x1024xf32>, i32 -> vector<8x1024xf32>
    %c456 = arith.constant 456 : index
    %c0_262 = arith.constant 0 : index
    %537 = vector.load %arg8[%c456, %c0_262] : memref<648x1024xf32, #tpu.memory_space<vmem>>, vector<8x1024xf32>
    tpu.vector_store %arg8[%c456, %c0_262], %536 {strides = array<i32>} : memref<648x1024xf32, #tpu.memory_space<vmem>>, vector<8x1024xf32>,
    %c464 = arith.constant 464 : index
    %c0_263 = arith.constant 0 : index
    %538 = vector.load %arg8[%c464, %c0_263] : memref<648x1024xf32, #tpu.memory_space<vmem>>, vector<8x1024xf32>
    tpu.vector_store %arg8[%c464, %c0_263], %508 {strides = array<i32>} : memref<648x1024xf32, #tpu.memory_space<vmem>>, vector<8x1024xf32>,
    %c768_i32_264 = arith.constant 768 : i32
    %539 = tpu.dynamic_rotate %508 by %c768_i32_264 dim 1 : vector<8x1024xf32>, i32 -> vector<8x1024xf32>
    %c472 = arith.constant 472 : index
    %c0_265 = arith.constant 0 : index
    %540 = vector.load %arg8[%c472, %c0_265] : memref<648x1024xf32, #tpu.memory_space<vmem>>, vector<8x1024xf32>
    tpu.vector_store %arg8[%c472, %c0_265], %539 {strides = array<i32>} : memref<648x1024xf32, #tpu.memory_space<vmem>>, vector<8x1024xf32>,
    %c12_i32_266 = arith.constant 12 : i32
    %541 = tpu.dynamic_rotate %508 by %c12_i32_266 dim 1 : vector<8x1024xf32>, i32 -> vector<8x1024xf32>
    %c1020_i32_267 = arith.constant 1020 : i32
    %542 = tpu.dynamic_rotate %508 by %c1020_i32_267 dim 1 : vector<8x1024xf32>, i32 -> vector<8x1024xf32>
    %543 = tpu.iota {dimensions = array<i32: 1>} : vector<8x1024xi32>
    %c16_i32_268 = arith.constant 16 : i32
    %c0_i32_269 = arith.constant 0 : i32
    %544 = arith.cmpi eq, %c16_i32_268, %c0_i32_269 : i32
    %c1_i32_270 = arith.constant 1 : i32
    %545 = arith.select %544, %c1_i32_270, %c16_i32_268 : i32
    %546 = vector.broadcast %545 : i32 to vector<8x1024xi32>
    %547 = arith.remsi %543, %546 : vector<8x1024xi32>
    %c0_i32_271 = arith.constant 0 : i32
    %548 = vector.broadcast %c0_i32_271 : i32 to vector<8x1024xi32>
    %549 = arith.cmpi ne, %547, %548 : vector<8x1024xi32>
    %c0_i32_272 = arith.constant 0 : i32
    %550 = vector.broadcast %c0_i32_272 : i32 to vector<8x1024xi32>
    %551 = arith.cmpi slt, %547, %550 : vector<8x1024xi32>
    %c0_i32_273 = arith.constant 0 : i32
    %552 = arith.cmpi slt, %545, %c0_i32_273 : i32
    %553 = vector.broadcast %552 : i1 to vector<8x1024xi1>
    %554 = vector.broadcast %553 : vector<8x1024xi1> to vector<8x1024xi1>
    %555 = arith.xori %551, %554 : vector<8x1024xi1>
    %556 = arith.andi %555, %549 : vector<8x1024xi1>
    %557 = vector.broadcast %545 : i32 to vector<8x1024xi32>
    %558 = arith.addi %547, %557 : vector<8x1024xi32>
    %559 = arith.select %556, %558, %547 : vector<8x1024xi1>, vector<8x1024xi32>
    %c12_i32_274 = arith.constant 12 : i32
    %560 = vector.broadcast %c12_i32_274 : i32 to vector<8x1024xi32>
    %561 = arith.cmpi sge, %559, %560 : vector<8x1024xi32>
    %562 = arith.select %561, %541, %542 : vector<8x1024xi1>, vector<8x1024xf32>
    %c256_i32_275 = arith.constant 256 : i32
    %563 = tpu.dynamic_rotate %562 by %c256_i32_275 dim 1 : vector<8x1024xf32>, i32 -> vector<8x1024xf32>
    %c480 = arith.constant 480 : index
    %c0_276 = arith.constant 0 : index
    %564 = vector.load %arg8[%c480, %c0_276] : memref<648x1024xf32, #tpu.memory_space<vmem>>, vector<8x1024xf32>
    tpu.vector_store %arg8[%c480, %c0_276], %563 {strides = array<i32>} : memref<648x1024xf32, #tpu.memory_space<vmem>>, vector<8x1024xf32>,
    %c488 = arith.constant 488 : index
    %c0_277 = arith.constant 0 : index
    %565 = vector.load %arg8[%c488, %c0_277] : memref<648x1024xf32, #tpu.memory_space<vmem>>, vector<8x1024xf32>
    tpu.vector_store %arg8[%c488, %c0_277], %562 {strides = array<i32>} : memref<648x1024xf32, #tpu.memory_space<vmem>>, vector<8x1024xf32>,
    %c768_i32_278 = arith.constant 768 : i32
    %566 = tpu.dynamic_rotate %562 by %c768_i32_278 dim 1 : vector<8x1024xf32>, i32 -> vector<8x1024xf32>
    %c496 = arith.constant 496 : index
    %c0_279 = arith.constant 0 : index
    %567 = vector.load %arg8[%c496, %c0_279] : memref<648x1024xf32, #tpu.memory_space<vmem>>, vector<8x1024xf32>
    tpu.vector_store %arg8[%c496, %c0_279], %566 {strides = array<i32>} : memref<648x1024xf32, #tpu.memory_space<vmem>>, vector<8x1024xf32>,
    %c4_i32_280 = arith.constant 4 : i32
    %568 = tpu.dynamic_rotate %486 by %c4_i32_280 dim 1 : vector<8x1024xf32>, i32 -> vector<8x1024xf32>
    %c1012_i32_281 = arith.constant 1012 : i32
    %569 = tpu.dynamic_rotate %486 by %c1012_i32_281 dim 1 : vector<8x1024xf32>, i32 -> vector<8x1024xf32>
    %570 = tpu.iota {dimensions = array<i32: 1>} : vector<8x1024xi32>
    %c16_i32_282 = arith.constant 16 : i32
    %c0_i32_283 = arith.constant 0 : i32
    %571 = arith.cmpi eq, %c16_i32_282, %c0_i32_283 : i32
    %c1_i32_284 = arith.constant 1 : i32
    %572 = arith.select %571, %c1_i32_284, %c16_i32_282 : i32
    %573 = vector.broadcast %572 : i32 to vector<8x1024xi32>
    %574 = arith.remsi %570, %573 : vector<8x1024xi32>
    %c0_i32_285 = arith.constant 0 : i32
    %575 = vector.broadcast %c0_i32_285 : i32 to vector<8x1024xi32>
    %576 = arith.cmpi ne, %574, %575 : vector<8x1024xi32>
    %c0_i32_286 = arith.constant 0 : i32
    %577 = vector.broadcast %c0_i32_286 : i32 to vector<8x1024xi32>
    %578 = arith.cmpi slt, %574, %577 : vector<8x1024xi32>
    %c0_i32_287 = arith.constant 0 : i32
    %579 = arith.cmpi slt, %572, %c0_i32_287 : i32
    %580 = vector.broadcast %579 : i1 to vector<8x1024xi1>
    %581 = vector.broadcast %580 : vector<8x1024xi1> to vector<8x1024xi1>
    %582 = arith.xori %578, %581 : vector<8x1024xi1>
    %583 = arith.andi %582, %576 : vector<8x1024xi1>
    %584 = vector.broadcast %572 : i32 to vector<8x1024xi32>
    %585 = arith.addi %574, %584 : vector<8x1024xi32>
    %586 = arith.select %583, %585, %574 : vector<8x1024xi1>, vector<8x1024xi32>
    %c4_i32_288 = arith.constant 4 : i32
    %587 = vector.broadcast %c4_i32_288 : i32 to vector<8x1024xi32>
    %588 = arith.cmpi sge, %586, %587 : vector<8x1024xi32>
    %589 = arith.select %588, %568, %569 : vector<8x1024xi1>, vector<8x1024xf32>
    %c256_i32_289 = arith.constant 256 : i32
    %590 = tpu.dynamic_rotate %589 by %c256_i32_289 dim 1 : vector<8x1024xf32>, i32 -> vector<8x1024xf32>
    %c504 = arith.constant 504 : index
    %c0_290 = arith.constant 0 : index
    %591 = vector.load %arg8[%c504, %c0_290] : memref<648x1024xf32, #tpu.memory_space<vmem>>, vector<8x1024xf32>
    tpu.vector_store %arg8[%c504, %c0_290], %590 {strides = array<i32>} : memref<648x1024xf32, #tpu.memory_space<vmem>>, vector<8x1024xf32>,
    %c512 = arith.constant 512 : index
    %c0_291 = arith.constant 0 : index
    %592 = vector.load %arg8[%c512, %c0_291] : memref<648x1024xf32, #tpu.memory_space<vmem>>, vector<8x1024xf32>
    tpu.vector_store %arg8[%c512, %c0_291], %589 {strides = array<i32>} : memref<648x1024xf32, #tpu.memory_space<vmem>>, vector<8x1024xf32>,
    %c768_i32_292 = arith.constant 768 : i32
    %593 = tpu.dynamic_rotate %589 by %c768_i32_292 dim 1 : vector<8x1024xf32>, i32 -> vector<8x1024xf32>
    %c520 = arith.constant 520 : index
    %c0_293 = arith.constant 0 : index
    %594 = vector.load %arg8[%c520, %c0_293] : memref<648x1024xf32, #tpu.memory_space<vmem>>, vector<8x1024xf32>
    tpu.vector_store %arg8[%c520, %c0_293], %593 {strides = array<i32>} : memref<648x1024xf32, #tpu.memory_space<vmem>>, vector<8x1024xf32>,
    %c256_i32_294 = arith.constant 256 : i32
    %595 = tpu.dynamic_rotate %486 by %c256_i32_294 dim 1 : vector<8x1024xf32>, i32 -> vector<8x1024xf32>
    %c528 = arith.constant 528 : index
    %c0_295 = arith.constant 0 : index
    %596 = vector.load %arg8[%c528, %c0_295] : memref<648x1024xf32, #tpu.memory_space<vmem>>, vector<8x1024xf32>
    tpu.vector_store %arg8[%c528, %c0_295], %595 {strides = array<i32>} : memref<648x1024xf32, #tpu.memory_space<vmem>>, vector<8x1024xf32>,
    %c536 = arith.constant 536 : index
    %c0_296 = arith.constant 0 : index
    %597 = vector.load %arg8[%c536, %c0_296] : memref<648x1024xf32, #tpu.memory_space<vmem>>, vector<8x1024xf32>
    tpu.vector_store %arg8[%c536, %c0_296], %486 {strides = array<i32>} : memref<648x1024xf32, #tpu.memory_space<vmem>>, vector<8x1024xf32>,
    %c768_i32_297 = arith.constant 768 : i32
    %598 = tpu.dynamic_rotate %486 by %c768_i32_297 dim 1 : vector<8x1024xf32>, i32 -> vector<8x1024xf32>
    %c544 = arith.constant 544 : index
    %c0_298 = arith.constant 0 : index
    %599 = vector.load %arg8[%c544, %c0_298] : memref<648x1024xf32, #tpu.memory_space<vmem>>, vector<8x1024xf32>
    tpu.vector_store %arg8[%c544, %c0_298], %598 {strides = array<i32>} : memref<648x1024xf32, #tpu.memory_space<vmem>>, vector<8x1024xf32>,
    %c12_i32_299 = arith.constant 12 : i32
    %600 = tpu.dynamic_rotate %486 by %c12_i32_299 dim 1 : vector<8x1024xf32>, i32 -> vector<8x1024xf32>
    %c1020_i32_300 = arith.constant 1020 : i32
    %601 = tpu.dynamic_rotate %486 by %c1020_i32_300 dim 1 : vector<8x1024xf32>, i32 -> vector<8x1024xf32>
    %602 = tpu.iota {dimensions = array<i32: 1>} : vector<8x1024xi32>
    %c16_i32_301 = arith.constant 16 : i32
    %c0_i32_302 = arith.constant 0 : i32
    %603 = arith.cmpi eq, %c16_i32_301, %c0_i32_302 : i32
    %c1_i32_303 = arith.constant 1 : i32
    %604 = arith.select %603, %c1_i32_303, %c16_i32_301 : i32
    %605 = vector.broadcast %604 : i32 to vector<8x1024xi32>
    %606 = arith.remsi %602, %605 : vector<8x1024xi32>
    %c0_i32_304 = arith.constant 0 : i32
    %607 = vector.broadcast %c0_i32_304 : i32 to vector<8x1024xi32>
    %608 = arith.cmpi ne, %606, %607 : vector<8x1024xi32>
    %c0_i32_305 = arith.constant 0 : i32
    %609 = vector.broadcast %c0_i32_305 : i32 to vector<8x1024xi32>
    %610 = arith.cmpi slt, %606, %609 : vector<8x1024xi32>
    %c0_i32_306 = arith.constant 0 : i32
    %611 = arith.cmpi slt, %604, %c0_i32_306 : i32
    %612 = vector.broadcast %611 : i1 to vector<8x1024xi1>
    %613 = vector.broadcast %612 : vector<8x1024xi1> to vector<8x1024xi1>
    %614 = arith.xori %610, %613 : vector<8x1024xi1>
    %615 = arith.andi %614, %608 : vector<8x1024xi1>
    %616 = vector.broadcast %604 : i32 to vector<8x1024xi32>
    %617 = arith.addi %606, %616 : vector<8x1024xi32>
    %618 = arith.select %615, %617, %606 : vector<8x1024xi1>, vector<8x1024xi32>
    %c12_i32_307 = arith.constant 12 : i32
    %619 = vector.broadcast %c12_i32_307 : i32 to vector<8x1024xi32>
    %620 = arith.cmpi sge, %618, %619 : vector<8x1024xi32>
    %621 = arith.select %620, %600, %601 : vector<8x1024xi1>, vector<8x1024xf32>
    %c256_i32_308 = arith.constant 256 : i32
    %622 = tpu.dynamic_rotate %621 by %c256_i32_308 dim 1 : vector<8x1024xf32>, i32 -> vector<8x1024xf32>
    %c552 = arith.constant 552 : index
    %c0_309 = arith.constant 0 : index
    %623 = vector.load %arg8[%c552, %c0_309] : memref<648x1024xf32, #tpu.memory_space<vmem>>, vector<8x1024xf32>
    tpu.vector_store %arg8[%c552, %c0_309], %622 {strides = array<i32>} : memref<648x1024xf32, #tpu.memory_space<vmem>>, vector<8x1024xf32>,
    %c560 = arith.constant 560 : index
    %c0_310 = arith.constant 0 : index
    %624 = vector.load %arg8[%c560, %c0_310] : memref<648x1024xf32, #tpu.memory_space<vmem>>, vector<8x1024xf32>
    tpu.vector_store %arg8[%c560, %c0_310], %621 {strides = array<i32>} : memref<648x1024xf32, #tpu.memory_space<vmem>>, vector<8x1024xf32>,
    %c768_i32_311 = arith.constant 768 : i32
    %625 = tpu.dynamic_rotate %621 by %c768_i32_311 dim 1 : vector<8x1024xf32>, i32 -> vector<8x1024xf32>
    %c568 = arith.constant 568 : index
    %c0_312 = arith.constant 0 : index
    %626 = vector.load %arg8[%c568, %c0_312] : memref<648x1024xf32, #tpu.memory_space<vmem>>, vector<8x1024xf32>
    tpu.vector_store %arg8[%c568, %c0_312], %625 {strides = array<i32>} : memref<648x1024xf32, #tpu.memory_space<vmem>>, vector<8x1024xf32>,
    %c48_i32_313 = arith.constant 48 : i32
    %627 = tpu.dynamic_rotate %486 by %c48_i32_313 dim 1 : vector<8x1024xf32>, i32 -> vector<8x1024xf32>
    %c1008_i32_314 = arith.constant 1008 : i32
    %628 = tpu.dynamic_rotate %486 by %c1008_i32_314 dim 1 : vector<8x1024xf32>, i32 -> vector<8x1024xf32>
    %629 = tpu.iota {dimensions = array<i32: 1>} : vector<8x1024xi32>
    %c64_i32_315 = arith.constant 64 : i32
    %c0_i32_316 = arith.constant 0 : i32
    %630 = arith.cmpi eq, %c64_i32_315, %c0_i32_316 : i32
    %c1_i32_317 = arith.constant 1 : i32
    %631 = arith.select %630, %c1_i32_317, %c64_i32_315 : i32
    %632 = vector.broadcast %631 : i32 to vector<8x1024xi32>
    %633 = arith.remsi %629, %632 : vector<8x1024xi32>
    %c0_i32_318 = arith.constant 0 : i32
    %634 = vector.broadcast %c0_i32_318 : i32 to vector<8x1024xi32>
    %635 = arith.cmpi ne, %633, %634 : vector<8x1024xi32>
    %c0_i32_319 = arith.constant 0 : i32
    %636 = vector.broadcast %c0_i32_319 : i32 to vector<8x1024xi32>
    %637 = arith.cmpi slt, %633, %636 : vector<8x1024xi32>
    %c0_i32_320 = arith.constant 0 : i32
    %638 = arith.cmpi slt, %631, %c0_i32_320 : i32
    %639 = vector.broadcast %638 : i1 to vector<8x1024xi1>
    %640 = vector.broadcast %639 : vector<8x1024xi1> to vector<8x1024xi1>
    %641 = arith.xori %637, %640 : vector<8x1024xi1>
    %642 = arith.andi %641, %635 : vector<8x1024xi1>
    %643 = vector.broadcast %631 : i32 to vector<8x1024xi32>
    %644 = arith.addi %633, %643 : vector<8x1024xi32>
    %645 = arith.select %642, %644, %633 : vector<8x1024xi1>, vector<8x1024xi32>
    %c48_i32_321 = arith.constant 48 : i32
    %646 = vector.broadcast %c48_i32_321 : i32 to vector<8x1024xi32>
    %647 = arith.cmpi sge, %645, %646 : vector<8x1024xi32>
    %648 = arith.select %647, %627, %628 : vector<8x1024xi1>, vector<8x1024xf32>
    %c4_i32_322 = arith.constant 4 : i32
    %649 = tpu.dynamic_rotate %648 by %c4_i32_322 dim 1 : vector<8x1024xf32>, i32 -> vector<8x1024xf32>
    %c1012_i32_323 = arith.constant 1012 : i32
    %650 = tpu.dynamic_rotate %648 by %c1012_i32_323 dim 1 : vector<8x1024xf32>, i32 -> vector<8x1024xf32>
    %651 = tpu.iota {dimensions = array<i32: 1>} : vector<8x1024xi32>
    %c16_i32_324 = arith.constant 16 : i32
    %c0_i32_325 = arith.constant 0 : i32
    %652 = arith.cmpi eq, %c16_i32_324, %c0_i32_325 : i32
    %c1_i32_326 = arith.constant 1 : i32
    %653 = arith.select %652, %c1_i32_326, %c16_i32_324 : i32
    %654 = vector.broadcast %653 : i32 to vector<8x1024xi32>
    %655 = arith.remsi %651, %654 : vector<8x1024xi32>
    %c0_i32_327 = arith.constant 0 : i32
    %656 = vector.broadcast %c0_i32_327 : i32 to vector<8x1024xi32>
    %657 = arith.cmpi ne, %655, %656 : vector<8x1024xi32>
    %c0_i32_328 = arith.constant 0 : i32
    %658 = vector.broadcast %c0_i32_328 : i32 to vector<8x1024xi32>
    %659 = arith.cmpi slt, %655, %658 : vector<8x1024xi32>
    %c0_i32_329 = arith.constant 0 : i32
    %660 = arith.cmpi slt, %653, %c0_i32_329 : i32
    %661 = vector.broadcast %660 : i1 to vector<8x1024xi1>
    %662 = vector.broadcast %661 : vector<8x1024xi1> to vector<8x1024xi1>
    %663 = arith.xori %659, %662 : vector<8x1024xi1>
    %664 = arith.andi %663, %657 : vector<8x1024xi1>
    %665 = vector.broadcast %653 : i32 to vector<8x1024xi32>
    %666 = arith.addi %655, %665 : vector<8x1024xi32>
    %667 = arith.select %664, %666, %655 : vector<8x1024xi1>, vector<8x1024xi32>
    %c4_i32_330 = arith.constant 4 : i32
    %668 = vector.broadcast %c4_i32_330 : i32 to vector<8x1024xi32>
    %669 = arith.cmpi sge, %667, %668 : vector<8x1024xi32>
    %670 = arith.select %669, %649, %650 : vector<8x1024xi1>, vector<8x1024xf32>
    %c256_i32_331 = arith.constant 256 : i32
    %671 = tpu.dynamic_rotate %670 by %c256_i32_331 dim 1 : vector<8x1024xf32>, i32 -> vector<8x1024xf32>
    %c576 = arith.constant 576 : index
    %c0_332 = arith.constant 0 : index
    %672 = vector.load %arg8[%c576, %c0_332] : memref<648x1024xf32, #tpu.memory_space<vmem>>, vector<8x1024xf32>
    tpu.vector_store %arg8[%c576, %c0_332], %671 {strides = array<i32>} : memref<648x1024xf32, #tpu.memory_space<vmem>>, vector<8x1024xf32>,
    %c584 = arith.constant 584 : index
    %c0_333 = arith.constant 0 : index
    %673 = vector.load %arg8[%c584, %c0_333] : memref<648x1024xf32, #tpu.memory_space<vmem>>, vector<8x1024xf32>
    tpu.vector_store %arg8[%c584, %c0_333], %670 {strides = array<i32>} : memref<648x1024xf32, #tpu.memory_space<vmem>>, vector<8x1024xf32>,
    %c768_i32_334 = arith.constant 768 : i32
    %674 = tpu.dynamic_rotate %670 by %c768_i32_334 dim 1 : vector<8x1024xf32>, i32 -> vector<8x1024xf32>
    %c592 = arith.constant 592 : index
    %c0_335 = arith.constant 0 : index
    %675 = vector.load %arg8[%c592, %c0_335] : memref<648x1024xf32, #tpu.memory_space<vmem>>, vector<8x1024xf32>
    tpu.vector_store %arg8[%c592, %c0_335], %674 {strides = array<i32>} : memref<648x1024xf32, #tpu.memory_space<vmem>>, vector<8x1024xf32>,
    %c256_i32_336 = arith.constant 256 : i32
    %676 = tpu.dynamic_rotate %648 by %c256_i32_336 dim 1 : vector<8x1024xf32>, i32 -> vector<8x1024xf32>
    %c600 = arith.constant 600 : index
    %c0_337 = arith.constant 0 : index
    %677 = vector.load %arg8[%c600, %c0_337] : memref<648x1024xf32, #tpu.memory_space<vmem>>, vector<8x1024xf32>
    tpu.vector_store %arg8[%c600, %c0_337], %676 {strides = array<i32>} : memref<648x1024xf32, #tpu.memory_space<vmem>>, vector<8x1024xf32>,
    %c608 = arith.constant 608 : index
    %c0_338 = arith.constant 0 : index
    %678 = vector.load %arg8[%c608, %c0_338] : memref<648x1024xf32, #tpu.memory_space<vmem>>, vector<8x1024xf32>
    tpu.vector_store %arg8[%c608, %c0_338], %648 {strides = array<i32>} : memref<648x1024xf32, #tpu.memory_space<vmem>>, vector<8x1024xf32>,
    %c768_i32_339 = arith.constant 768 : i32
    %679 = tpu.dynamic_rotate %648 by %c768_i32_339 dim 1 : vector<8x1024xf32>, i32 -> vector<8x1024xf32>
    %c616 = arith.constant 616 : index
    %c0_340 = arith.constant 0 : index
    %680 = vector.load %arg8[%c616, %c0_340] : memref<648x1024xf32, #tpu.memory_space<vmem>>, vector<8x1024xf32>
    tpu.vector_store %arg8[%c616, %c0_340], %679 {strides = array<i32>} : memref<648x1024xf32, #tpu.memory_space<vmem>>, vector<8x1024xf32>,
    %c12_i32_341 = arith.constant 12 : i32
    %681 = tpu.dynamic_rotate %648 by %c12_i32_341 dim 1 : vector<8x1024xf32>, i32 -> vector<8x1024xf32>
    %c1020_i32_342 = arith.constant 1020 : i32
    %682 = tpu.dynamic_rotate %648 by %c1020_i32_342 dim 1 : vector<8x1024xf32>, i32 -> vector<8x1024xf32>
    %683 = tpu.iota {dimensions = array<i32: 1>} : vector<8x1024xi32>
    %c16_i32_343 = arith.constant 16 : i32
    %c0_i32_344 = arith.constant 0 : i32
    %684 = arith.cmpi eq, %c16_i32_343, %c0_i32_344 : i32
    %c1_i32_345 = arith.constant 1 : i32
    %685 = arith.select %684, %c1_i32_345, %c16_i32_343 : i32
    %686 = vector.broadcast %685 : i32 to vector<8x1024xi32>
    %687 = arith.remsi %683, %686 : vector<8x1024xi32>
    %c0_i32_346 = arith.constant 0 : i32
    %688 = vector.broadcast %c0_i32_346 : i32 to vector<8x1024xi32>
    %689 = arith.cmpi ne, %687, %688 : vector<8x1024xi32>
    %c0_i32_347 = arith.constant 0 : i32
    %690 = vector.broadcast %c0_i32_347 : i32 to vector<8x1024xi32>
    %691 = arith.cmpi slt, %687, %690 : vector<8x1024xi32>
    %c0_i32_348 = arith.constant 0 : i32
    %692 = arith.cmpi slt, %685, %c0_i32_348 : i32
    %693 = vector.broadcast %692 : i1 to vector<8x1024xi1>
    %694 = vector.broadcast %693 : vector<8x1024xi1> to vector<8x1024xi1>
    %695 = arith.xori %691, %694 : vector<8x1024xi1>
    %696 = arith.andi %695, %689 : vector<8x1024xi1>
    %697 = vector.broadcast %685 : i32 to vector<8x1024xi32>
    %698 = arith.addi %687, %697 : vector<8x1024xi32>
    %699 = arith.select %696, %698, %687 : vector<8x1024xi1>, vector<8x1024xi32>
    %c12_i32_349 = arith.constant 12 : i32
    %700 = vector.broadcast %c12_i32_349 : i32 to vector<8x1024xi32>
    %701 = arith.cmpi sge, %699, %700 : vector<8x1024xi32>
    %702 = arith.select %701, %681, %682 : vector<8x1024xi1>, vector<8x1024xf32>
    %c256_i32_350 = arith.constant 256 : i32
    %703 = tpu.dynamic_rotate %702 by %c256_i32_350 dim 1 : vector<8x1024xf32>, i32 -> vector<8x1024xf32>
    %c624 = arith.constant 624 : index
    %c0_351 = arith.constant 0 : index
    %704 = vector.load %arg8[%c624, %c0_351] : memref<648x1024xf32, #tpu.memory_space<vmem>>, vector<8x1024xf32>
    tpu.vector_store %arg8[%c624, %c0_351], %703 {strides = array<i32>} : memref<648x1024xf32, #tpu.memory_space<vmem>>, vector<8x1024xf32>,
    %c632 = arith.constant 632 : index
    %c0_352 = arith.constant 0 : index
    %705 = vector.load %arg8[%c632, %c0_352] : memref<648x1024xf32, #tpu.memory_space<vmem>>, vector<8x1024xf32>
    tpu.vector_store %arg8[%c632, %c0_352], %702 {strides = array<i32>} : memref<648x1024xf32, #tpu.memory_space<vmem>>, vector<8x1024xf32>,
    %c768_i32_353 = arith.constant 768 : i32
    %706 = tpu.dynamic_rotate %702 by %c768_i32_353 dim 1 : vector<8x1024xf32>, i32 -> vector<8x1024xf32>
    %c640 = arith.constant 640 : index
    %c0_354 = arith.constant 0 : index
    %707 = vector.load %arg8[%c640, %c0_354] : memref<648x1024xf32, #tpu.memory_space<vmem>>, vector<8x1024xf32>
    tpu.vector_store %arg8[%c640, %c0_354], %706 {strides = array<i32>} : memref<648x1024xf32, #tpu.memory_space<vmem>>, vector<8x1024xf32>,
    %c0_355 = arith.constant 0 : index
    %c0_356 = arith.constant 0 : index
    %708 = vector.load %arg8[%c0_355, %c0_356] : memref<648x1024xf32, #tpu.memory_space<vmem>>, vector<648x1024xf32>
    %c0_357 = arith.constant 0 : index
    %c0_358 = arith.constant 0 : index
    %709 = vector.load %arg2[%c0_357, %c0_358] : memref<8x648xf32, #tpu.memory_space<vmem>>, vector<8x648xf32>
    %cst = arith.constant dense<0.000000e+00> : vector<8x1024xf32>
    %710 = tpu.matmul %709, %708, %cst {dimension_numbers = #tpu.dot_dimension_numbers<[1], [0], [0], [1], [0, 0, 1, 1], [], []>} : vector<8x648xf32>, vector<648x1024xf32>, vector<8x1024xf32> -> vector<8x1024xf32>
    %c0_359 = arith.constant 0 : index
    %c0_360 = arith.constant 0 : index
    %711 = vector.load %arg4[%c0_359, %c0_360] : memref<8x1xf32, #tpu.memory_space<vmem>>, vector<8x1xf32>
    %712 = vector.broadcast %711 : vector<8x1xf32> to vector<8x1024xf32>
    %713 = arith.addf %710, %712 : vector<8x1024xf32>
    %c0_361 = arith.constant 0 : index
    %c0_362 = arith.constant 0 : index
    %714 = vector.load %arg6[%c0_361, %c0_362] : memref<8x1024xf32, #tpu.memory_space<vmem>>, vector<8x1024xf32>
    tpu.vector_store %arg6[%c0_361, %c0_362], %713 {strides = array<i32>} : memref<8x1024xf32, #tpu.memory_space<vmem>>, vector<8x1024xf32>,
    %c0_363 = arith.constant 0 : index
    %c0_364 = arith.constant 0 : index
    %715 = vector.load %arg3[%c0_363, %c0_364] : memref<8x648xf32, #tpu.memory_space<vmem>>, vector<8x648xf32>
    %cst_365 = arith.constant dense<0.000000e+00> : vector<8x1024xf32>
    %716 = tpu.matmul %715, %708, %cst_365 {dimension_numbers = #tpu.dot_dimension_numbers<[1], [0], [0], [1], [0, 0, 1, 1], [], []>} : vector<8x648xf32>, vector<648x1024xf32>, vector<8x1024xf32> -> vector<8x1024xf32>
    %c0_366 = arith.constant 0 : index
    %c0_367 = arith.constant 0 : index
    %717 = vector.load %arg5[%c0_366, %c0_367] : memref<8x1xf32, #tpu.memory_space<vmem>>, vector<8x1xf32>
    %718 = vector.broadcast %717 : vector<8x1xf32> to vector<8x1024xf32>
    %719 = arith.addf %716, %718 : vector<8x1024xf32>
    %c0_368 = arith.constant 0 : index
    %c0_369 = arith.constant 0 : index
    %720 = vector.load %arg7[%c0_368, %c0_369] : memref<8x1024xf32, #tpu.memory_space<vmem>>, vector<8x1024xf32>
    tpu.vector_store %arg7[%c0_368, %c0_369], %719 {strides = array<i32>} : memref<8x1024xf32, #tpu.memory_space<vmem>>, vector<8x1024xf32>,
    return
  }
  func.func @transform_0(%arg0: i32) -> (i32, i32) {
    %c0_i32 = arith.constant 0 : i32
    %c0_i32_0 = arith.constant 0 : i32
    %c0_i32_1 = arith.constant 0 : i32
    return %c0_i32, %c0_i32_0 : i32, i32
  }
  func.func @transform_1(%arg0: i32) -> (i32, i32) {
    %c0_i32 = arith.constant 0 : i32
    %c0_i32_0 = arith.constant 0 : i32
    %c0_i32_1 = arith.constant 0 : i32
    return %c0_i32, %c0_i32_0 : i32, i32
  }
  func.func @transform_2(%arg0: i32) -> (i32, i32) {
    %c0_i32 = arith.constant 0 : i32
    %c0_i32_0 = arith.constant 0 : i32
    %c0_i32_1 = arith.constant 0 : i32
    return %c0_i32, %c0_i32_0 : i32, i32
  }
  func.func @transform_3(%arg0: i32) -> (i32, i32) {
    %c0_i32 = arith.constant 0 : i32
    %c0_i32_0 = arith.constant 0 : i32
    %c0_i32_1 = arith.constant 0 : i32
    return %c0_i32, %c0_i32_0 : i32, i32
  }
  func.func @transform_4(%arg0: i32) -> (i32, i32) {
    %c0_i32 = arith.constant 0 : i32
    %c0_i32_0 = arith.constant 0 : i32
    %c0_i32_1 = arith.constant 0 : i32
    return %c0_i32, %c0_i32_0 : i32, i32
  }
  func.func @transform_5(%arg0: i32) -> (i32, i32) {
    %c0_i32 = arith.constant 0 : i32
    %c0_i32_0 = arith.constant 0 : i32
    %c0_i32_1 = arith.constant 0 : i32
    return %c0_i32, %c0_i32_0 : i32, i32
  }
  func.func @transform_6(%arg0: i32) -> (i32, i32) {
    %c0_i32 = arith.constant 0 : i32
    %c0_i32_0 = arith.constant 0 : i32
    %c0_i32_1 = arith.constant 0 : i32
    return %c0_i32, %c0_i32_0 : i32, i32
  }
}

</mosaic_0001>

<bundles_post_ra>
// kernel: tpu_custom_call.1
= control target key start
LH: loop header
LB: loop body
LE: loop exit
PB: predicated region body
PF: predicated region fallthrough
CT: control target
= control target key end

     0   :  { %12 = vsyncpa [#allocation4], 0  ;;  %s11219_s0 = inlined_call_operand.hbm [shape: f32[8,1024], index: 0, kind: input, shape index: {}]   ;;  %s11220_s1 = inlined_call_operand.hbm [shape: f32[8,648], index: 1, kind: input, shape index: {}]   ;;  %s11221_s2 = inlined_call_operand.hbm [shape: f32[8,648], index: 2, kind: input, shape index: {}]   ;;  %s11222_s3 = inlined_call_operand.vmem [shape: f32[8,1], index: 3, kind: input, shape index: {}]   ;;  %s11223_s4 = inlined_call_operand.vmem [shape: f32[8,1], index: 4, kind: input, shape index: {}]   ;;  %s11224_s5 = inlined_call_operand.hbm [shape: f32[8,1024], index: 5, kind: output, shape index: {0}]   ;;  %s11225_s6 = inlined_call_operand.hbm [shape: f32[8,1024], index: 6, kind: output, shape index: {1}]  }
   0x1   :  { %13 = vsyncpa [#allocation7], 0 }
   0x2   :  { %14 = vsyncpa [#allocation5], 0  ;;  %s32_s23 = sshll.u32 %s11220_s1, 4  ;;  %s33_s23 = int_to_ptr.hbm [resolvable:$true] %s32_s23 }
   0x3   :  { %15 = vsyncpa [#allocation11], 0  ;;  %s6252_s24 = smov [#allocation6]   ;;  %s21_s28 = sshll.u32 %s11219_s0, 4  ;;  %s22_s28 = int_to_ptr.hbm [resolvable:$true] %s21_s28 }
   0x4   :  { %s34_s25 = sshll.u32 %s6252_s24, 4  ;;  %s6253_s29 = smov [#allocation3]   ;;  %s35_s25 = int_to_ptr.vmem [resolvable:$true] %s34_s25 }
   0x5   :  { %37 = dma.hbm_to_vmem [thread:$0]  %s33_s23, 768, %s35_s25, [#allocation7]  }
   0x6   :  { %s23_s30 = sshll.u32 %s6253_s29, 4  ;;  %s43_s9 = sshll.u32 %s11221_s2, 4  ;;  %s24_s30 = int_to_ptr.vmem [resolvable:$true] %s23_s30  ;;  %s44_s9 = int_to_ptr.hbm [resolvable:$true] %s43_s9 }
   0x7   :  { %26 = dma.hbm_to_vmem [thread:$0]  %s22_s28, 1024, %s24_s30, [#allocation4]  }
   0x8   :  { %s6254_s1 = smov [#allocation8]  }
   0x9   :  { %s45_s10 = sshll.u32 %s6254_s1, 4  ;;  %s46_s10 = int_to_ptr.vmem [resolvable:$true] %s45_s10 }
   0xa   :  { %48 = dma.hbm_to_vmem [thread:$0]  %s44_s9, 768, %s46_s10, [#allocation7]  }
   0xb   :  { %6244 = dma.done.wait [#allocation4], 1024  }
   0xc   :  { %6245 = vsyncadd [#allocation4], 4294966272 }
   0xd   :  { %6246 = dma.done.wait [#allocation7], 1536  }
   0xe   :  { %6247 = vsyncadd [#allocation7], 4294965760  ;;  %v69_v0 = vld [vmem:[#allocation3 + $0x20] sm:$0xff]  ;;  %v70_v1 = vld [vmem:[#allocation3 + $0x28] sm:$0xff]  ;;  %s6255_s0 = smov 64   ;;  %s6256_s2 = smov 16   ;;  %v89_v12 = vlaneseq }
   0xf   :  { %v65_v2 = vld [vmem:[#allocation3] sm:$0xff]  ;;  %v5149_v3 = vpack.i.bf16 %v70_v1, %v69_v0  ;;  %v66_v4 = vld [vmem:[#allocation3 + $0x8] sm:$0xff]  ;;  %v71_v6 = vld [vmem:[#allocation3 + $0x30] sm:$0xff]  ;;  %s6257_s11 = smov 80   ;;  %s6258_s12 = smov 4  }
  0x10   :  { %v6311_v5 = vpack.i.bf16 %v66_v4, %v65_v2  ;;  %v72_v7 = vld [vmem:[#allocation3 + $0x38] sm:$0xff]  ;;  %v67_v8 = vld [vmem:[#allocation3 + $0x10] sm:$0xff]  ;;  %v6324_v13 = vand.u32 127, %v89_v12  ;;  %s6259_s13 = smov 116   ;;  %s6260_s14 = smov 12  }
  0x11   :  { %5150 = vrot.lane.b32.xlu1 %v5149_v3, %s6255_s0  ;;  %v68_v9 = vld [vmem:[#allocation3 + $0x18] sm:$0xff]  ;;  %v5154_v10 = vpack.i.bf16 %v72_v7, %v71_v6  ;;  %s6261_s15 = smov 124   ;;  %s6262_s16 = smov 48  }
  0x12   :  { %5140 = vrot.lane.b32.xlu0 %v6311_v5, %s6255_s0  ;;  %5160 = vrot.lane.b32.xlu2 %v6311_v5, %s6256_s2  ;;  %v5144_v11 = vpack.i.bf16 %v68_v9, %v67_v8  ;;  %v6327_v14 = vadd.s32 768, %v6324_v13  ;;  %v6330_v15 = vadd.s32 896, %v6324_v13  ;;  %v6333_v17 = vadd.s32 512, %v6324_v13  ;;  %s6263_s17 = smov 112   ;;  %s5081_s24 = sshll.u32 %s11224_s5, 4  ;;  %s5082_s24 = int_to_ptr.hbm [resolvable:$true] %s5081_s24 }
  0x13   :  { %v6336_v19 = vadd.s32 128, %v6324_v13  ;;  %v6339_v20 = vadd.s32 640, %v6324_v13  ;;  %v6344_v23 = vadd.s32 256, %v6324_v13  ;;  %v6347_v24 = vadd.s32 384, %v6324_v13  ;;  %s6266_s5 = smov [#allocation10]   ;;  %s5092_s28 = sshll.u32 %s11225_s6, 4  ;;  %s5093_s28 = int_to_ptr.hbm [resolvable:$true] %s5092_s28 }
  0x14   :  { %v153_v21 = vand.u32 255, %v6327_v14  ;;  %v160_v22 = vand.u32 255, %v6330_v15  ;;  %v111_v25 = vand.u32 255, %v6324_v13  ;;  %v139_v26 = vand.u32 255, %v6333_v17  ;;  %s5090_s25 = sshll.u32 %s6266_s5, 4  ;;  %s5091_s25 = int_to_ptr.vmem [resolvable:$true] %s5090_s25 }
  0x15   :  { %v118_v27 = vand.u32 255, %v6336_v19  ;;  %vm91_vm0 = vcmp.lt.s32.totalorder %v6324_v13, 64  ;;  %v146_v28 = vand.u32 255, %v6339_v20  ;;  %v125_v31 = vand.u32 255, %v6344_v23 }
  0x16   :  { %vm6354_vm1 = vcmp.ge.s32.totalorder %v153_v21, 64  ;;  %vm6358_vm2 = vcmp.ge.s32.totalorder %v160_v22, 192  ;;  %v132_v32 = vand.u32 255, %v6347_v24  ;;  %vm6364_vm3 = vcmp.ge.s32.totalorder %v111_v25, 64 }
  0x17   :  { %vm6368_vm4 = vcmp.ge.s32.totalorder %v139_v26, 64  ;;  %vm6372_vm5 = vcmp.ge.s32.totalorder %v118_v27, 192  ;;  %vm1784_vm6 = vcmp.ge.s32.totalorder %v146_v28, 192  ;;  %vm205_vm8 = vcmp.ge.s32.totalorder %v125_v31, 64 }
  0x18   :  { %vm1782_vm7 = vcmp.ge.s32.totalorder %v132_v32, 192  ;;  %v11233_v7 = vand.u32 63, %v6324_v13  ;;  %vm11262_vm9 = vcmp.lt.s32.totalorder %v6324_v13, 16  ;;  %vm11257_vm10 = vcmp.lt.s32.totalorder %v6324_v13, 80 }
  0x19   :  { %5155 = vrot.lane.b32.xlu1 %v5154_v10, %s6255_s0  ;;  %v11227_v28 = vand.u32 63, %v6327_v14  ;;  %v12063_v32 = vmov 0 }
  0x1a   :  { %5145 = vrot.lane.b32.xlu0 %v5144_v11, %s6255_s0  ;;  %5175 = vrot.lane.b32.xlu2 %v5154_v10, %s6256_s2  ;;  %vm6487_vm11 = vcmp.ge.s32.totalorder %v11233_v7, 16 }
  0x1b   :  { %vm6520_vm12 = vcmp.ge.s32.totalorder %v11227_v28, 16 }
  0x1c   :  { %v12064_v32 = vsel %vm6520_vm12, 4294967295, %v12063_v32 }
  0x1d   :  { %12065 = vst [vmem:[#allocation30_spill] sm:$0xff] %v12064_v32 }
  0x21   :  { %5170 = vrot.lane.b32.xlu1 %v5149_v3, %s6256_s2 }
  0x22   :  { %5165 = vrot.lane.b32.xlu0 %v5144_v11, %s6256_s2  ;;  %5190 = vrot.lane.b32.xlu2 %v5149_v3, %s6257_s11 }
  0x29   :  { %5185 = vrot.lane.b32.xlu1 %v5144_v11, %s6257_s11 }
  0x2a   :  { %5180 = vrot.lane.b32.xlu0 %v6311_v5, %s6257_s11 }
  0x32   :  { %5195 = vrot.lane.b32.xlu0 %v5154_v10, %s6257_s11  ;;  %v12059_v10 = vmov 0 }
  0x33   :  { %v12060_v10 = vsel %vm6487_vm11, 4294967295, %v12059_v10 }
  0x34   :  { %12061 = vst [vmem:[#allocation28_spill] sm:$0xff] %v12060_v10 }
  0x6c   :  { %v6466_v2 = vpop.permute.xlu2 %5160 }
  0x6d   :  { %v5162_v4 = vunpack.i.l.bf16 %v6466_v2  ;;  %v5163_v37 = vunpack.i.h.bf16 %v6466_v2 }
  0x74   :  { %v6477_v6 = vpop.permute.xlu2 %5175 }
  0x75   :  { %v5178_v8 = vunpack.i.h.bf16 %v6477_v6  ;;  %v5177_v22 = vunpack.i.l.bf16 %v6477_v6 }
  0x7c   :  { %v5191_v36 = vpop.permute.xlu2 %5190 }
  0x83   :  { %v5151_v16 = vpop.permute.xlu1 %5150 }
  0x84   :  { %v5141_v18 = vpop.permute.xlu0 %5140  ;;  %v5153_v33 = vunpack.i.h.bf16 %v5151_v16  ;;  %v5152_v34 = vunpack.i.l.bf16 %v5151_v16  ;;  %v1138_v16 = vsel %vm11262_vm9, %v5178_v8, %v5162_v4 }
  0x85   :  { %v5142_v38 = vunpack.i.l.bf16 %v5141_v18  ;;  %v5143_v43 = vunpack.i.h.bf16 %v5141_v18 }
  0x86   :  { %v6386_v49 = vsel %vm91_vm0, %v5152_v34, %v5153_v33 }
  0x87   :  { %12048 = vst [vmem:[#allocation17_spill] sm:$0xff] %v6386_v49  ;;  %v6412_v57 = vsel %vm91_vm0, %v5142_v38, %v5143_v43 }
  0x88   :  { %12053 = vst [vmem:[#allocation22_spill] sm:$0xff] %v6412_v57 }
  0x8b   :  { %v5156_v35 = vpop.permute.xlu1 %5155 }
  0x8c   :  { %v5158_v39 = vunpack.i.h.bf16 %v5156_v35  ;;  %v5157_v40 = vunpack.i.l.bf16 %v5156_v35  ;;  %v5146_v42 = vpop.permute.xlu0 %5145 }
  0x8d   :  { %v5148_v44 = vunpack.i.h.bf16 %v5146_v42  ;;  %v5147_v45 = vunpack.i.l.bf16 %v5146_v42  ;;  %v11232_v42 = vand.u32 63, %v6333_v17 }
  0x8e   :  { %v6378_v46 = vsel %vm91_vm0, %v5157_v40, %v5158_v39  ;;  %v93_v47 = vsel %vm91_vm0, %v5153_v33, %v5157_v40  ;;  %v99_v48 = vsel %vm91_vm0, %v5158_v39, %v5142_v38  ;;  %v11230_v38 = vand.u32 63, %v6336_v19 }
  0x8f   :  { %12047 = vst [vmem:[#allocation16_spill] sm:$0xff] %v6378_v46  ;;  %v6390_v50 = vsel %vm6354_vm1, %v93_v47, %v99_v48  ;;  %v6394_v51 = vsel %vm6358_vm2, %v93_v47, %v99_v48  ;;  %v95_v52 = vsel %vm91_vm0, %v5148_v44, %v5152_v34  ;;  %v97_v55 = vsel %vm91_vm0, %v5143_v43, %v5147_v45 }
  0x90   :  { %12049 = vst [vmem:[#allocation18_spill] sm:$0xff] %v6390_v50  ;;  %v6400_v53 = vsel %vm6368_vm4, %v95_v52, %v93_v47  ;;  %v6402_v54 = vsel %vm1784_vm6, %v95_v52, %v93_v47  ;;  %v6408_v56 = vpack.i.bf16 %v6378_v46, %v6390_v50  ;;  %v6416_v58 = vsel %vm6364_vm3, %v99_v48, %v97_v55 }
  0x91   :  { %12050 = vst [vmem:[#allocation19_spill] sm:$0xff] %v6394_v51  ;;  %v6420_v59 = vsel %vm6372_vm5, %v99_v48, %v97_v55  ;;  %v6422_v60 = vsel %vm1782_vm7, %v97_v55, %v95_v52  ;;  %v6426_v61 = vpack.i.bf16 %v6386_v49, %v6400_v53  ;;  %v6432_v62 = vpack.i.bf16 %v6412_v57, %v6416_v58 }
  0x92   :  { %12051 = vst [vmem:[#allocation20_spill] sm:$0xff] %v6400_v53  ;;  %5215 = vrot.lane.b32.xlu1 %v6408_v56, %s6256_s2  ;;  %v6440_v63 = vsel %vm91_vm0, %v5147_v45, %v5148_v44  ;;  %v6442_v0 = vsel %vm205_vm8, %v97_v55, %v95_v52  ;;  %v5193_v43 = vunpack.i.h.bf16 %v5191_v36  ;;  %v5192_v44 = vunpack.i.l.bf16 %v5191_v36 }
  0x93   :  { %12052 = vst [vmem:[#allocation21_spill] sm:$0xff] %v6402_v54  ;;  %5210 = vrot.lane.b32.xlu0 %v6426_v61, %s6256_s2  ;;  %5200 = vrot.lane.b32.xlu2 %v6432_v62, %s6256_s2  ;;  %v6446_v1 = vpack.i.bf16 %v6440_v63, %v6442_v0  ;;  %v5171_v25 = vpop.permute.xlu1 %5170  ;;  %v11231_v45 = vand.u32 63, %v6339_v20  ;;  %v1137_v47 = vsel %vm11262_vm9, %v5162_v4, %v5163_v37  ;;  %vm6556_vm13 = vcmp.ge.s32.totalorder %v11230_v38, 16 }
  0x94   :  { %12054 = vst [vmem:[#allocation23_spill] sm:$0xff] %v6416_v58  ;;  %v6468_v3 = vpop.permute.xlu0 %5165  ;;  %v5173_v27 = vunpack.i.h.bf16 %v5171_v25  ;;  %v5172_v41 = vunpack.i.l.bf16 %v5171_v25  ;;  %v12067_v48 = vmov 0  ;;  %vm6570_vm14 = vcmp.ge.s32.totalorder %v11232_v42, 16 }
  0x95   :  { %12055 = vst [vmem:[#allocation24_spill] sm:$0xff] %v6420_v59  ;;  %v5168_v40 = vunpack.i.h.bf16 %v6468_v3  ;;  %v12068_v48 = vsel %vm6556_vm13, 4294967295, %v12067_v48  ;;  %v12070_v4 = vmov 0  ;;  %vm6578_vm15 = vcmp.ge.s32.totalorder %v11231_v45, 16 }
  0x96   :  { %12056 = vst [vmem:[#allocation25_spill] sm:$0xff] %v6422_v60  ;;  %v1132_v30 = vsel %vm11262_vm9, %v5173_v27, %v5177_v22  ;;  %v1133_v55 = vsel %vm11262_vm9, %v5172_v41, %v5173_v27  ;;  %v12071_v4 = vsel %vm6570_vm14, 4294967295, %v12070_v4  ;;  %v11226_v25 = vand.u32 63, %v6330_v15 }
  0x97   :  { %12057 = vst [vmem:[#allocation26_spill] sm:$0xff] %v6440_v63  ;;  %v1134_v2 = vsel %vm11262_vm9, %v5168_v40, %v5172_v41  ;;  %v11228_v36 = vand.u32 63, %v6347_v24  ;;  %vm11274_vm3 = vcmp.lt.s32.totalorder %v6324_v13, 4  ;;  %vm11276_vm6 = vcmp.lt.s32.totalorder %v6324_v13, 116 }
  0x98   :  { %12058 = vst [vmem:[#allocation27_spill] sm:$0xff] %v6442_v0  ;;  %vm6612_vm0 = vcmp.ge.s32.totalorder %v11226_v25, 16 }
  0x99   :  { %12069 = vst [vmem:[#allocation32_spill] sm:$0xff] %v12068_v48  ;;  %vm6641_vm2 = vcmp.ge.s32.totalorder %v11228_v36, 16 }
  0x9a   :  { %5230 = vrot.lane.b32.xlu1 %v6426_v61, %s6257_s11  ;;  %12072 = vst [vmem:[#allocation33_spill] sm:$0xff] %v12071_v4 }
  0x9b   :  { %5225 = vrot.lane.b32.xlu0 %v6446_v1, %s6257_s11  ;;  %5205 = vrot.lane.b32.xlu2 %v6446_v1, %s6256_s2  ;;  %v5186_v35 = vpop.permute.xlu1 %5185 }
  0x9c   :  { %v6483_v9 = vpop.permute.xlu0 %5180  ;;  %v5187_v39 = vunpack.i.l.bf16 %v5186_v35  ;;  %v5188_v41 = vunpack.i.h.bf16 %v5186_v35 }
  0x9d   :  { %v5183_v11 = vunpack.i.h.bf16 %v6483_v9  ;;  %v5182_v12 = vunpack.i.l.bf16 %v6483_v9  ;;  %v12083_v9 = vmov 0 }
  0x9f   :  { %v1161_v18 = vsel %vm11257_vm10, %v5182_v12, %v5183_v11  ;;  %v1160_v52 = vsel %vm11257_vm10, %v5183_v11, %v5187_v39  ;;  %v12073_v11 = vmov 0 }
  0xa0   :  { %v6503_v21 = vsel %vm6487_vm11, %v1138_v16, %v1161_v18  ;;  %v1157_v16 = vsel %vm11257_vm10, %v5192_v44, %v5193_v43  ;;  %v12074_v11 = vsel %vm6578_vm15, 4294967295, %v12073_v11 }
  0xa1   :  { %12062 = vst [vmem:[#allocation29_spill] sm:$0xff] %v6503_v21  ;;  %3143 = vmatpush.msra.mxu1 %v6503_v21 }
  0xa2   :  { %5240 = vrot.lane.b32.xlu1 %v6432_v62, %s6258_s12  ;;  %12075 = vst [vmem:[#allocation34_spill] sm:$0xff] %v12074_v11 }
  0xa3   :  { %5250 = vrot.lane.b32.xlu0 %v6426_v61, %s6258_s12  ;;  %5220 = vrot.lane.b32.xlu2 %v6432_v62, %s6257_s11 }
  0xa4   :  { %v5196_v26 = vpop.permute.xlu0 %5195 }
  0xa5   :  { %v5198_v29 = vunpack.i.h.bf16 %v5196_v26  ;;  %v5197_v31 = vunpack.i.l.bf16 %v5196_v26  ;;  %v6595_v26 = vsel %vm6570_vm14, %v1134_v2, %v1157_v16 }
  0xa6   :  { %12077 = vst [vmem:[#allocation36_spill] sm:$0xff] %v6595_v26 }
  0xa7   :  { %v1155_v33 = vsel %vm11257_vm10, %v5197_v31, %v5198_v29  ;;  %v1156_v18 = vsel %vm11257_vm10, %v5193_v43, %v5197_v31  ;;  %v5167_v31 = vunpack.i.l.bf16 %v6468_v3  ;;  %v12079_v43 = vmov 0 }
  0xa8   :  { %v6532_v34 = vsel %vm6520_vm12, %v1132_v30, %v1155_v33  ;;  %v6599_v27 = vsel %vm6578_vm15, %v1133_v55, %v1156_v18  ;;  %v11229_v33 = vand.u32 63, %v6344_v23  ;;  %v12080_v43 = vsel %vm6612_vm0, 4294967295, %v12079_v43 }
  0xa9   :  { %12066 = vst [vmem:[#allocation31_spill] sm:$0xff] %v6532_v34  ;;  %3144 = vmatpush.msra.mxu1 %v6532_v34  ;;  %v1162_v3 = vsel %vm11257_vm10, %v5198_v29, %v5182_v12  ;;  %v5369_v6 = vpack.i.bf16 %v6599_v27, %v6595_v26  ;;  %v1159_v12 = vsel %vm11257_vm10, %v5187_v39, %v5188_v41  ;;  %v12086_v29 = vmov 0 }
  0xaa   :  { %5255 = vrot.lane.b32.xlu1 %v6408_v56, %s6258_s12  ;;  %12078 = vst [vmem:[#allocation37_spill] sm:$0xff] %v6599_v27  ;;  %vm6633_vm1 = vcmp.ge.s32.totalorder %v11229_v33, 16  ;;  %v12087_v29 = vsel %vm6641_vm2, 4294967295, %v12086_v29 }
  0xab   :  { %5265 = vrot.lane.b32.xlu0 %v6446_v1, %s6259_s13  ;;  %5235 = vrot.lane.b32.xlu2 %v6408_v56, %s6257_s11  ;;  %12081 = vst [vmem:[#allocation38_spill] sm:$0xff] %v12080_v43  ;;  %v12084_v9 = vsel %vm6633_vm1, 4294967295, %v12083_v9 }
  0xac   :  { %12085 = vst [vmem:[#allocation40_spill] sm:$0xff] %v12084_v9 }
  0xad   :  { %12088 = vst [vmem:[#allocation41_spill] sm:$0xff] %v12087_v29 }
  0xb2   :  { %5270 = vrot.lane.b32.xlu1 %v6426_v61, %s6259_s13 }
  0xb3   :  { %5280 = vrot.lane.b32.xlu0 %v6432_v62, %s6260_s14  ;;  %5245 = vrot.lane.b32.xlu2 %v6446_v1, %s6258_s12 }
  0xba   :  { %5285 = vrot.lane.b32.xlu1 %v6446_v1, %s6260_s14 }
  0xbb   :  { %5295 = vrot.lane.b32.xlu0 %v6408_v56, %s6260_s14  ;;  %5260 = vrot.lane.b32.xlu2 %v6432_v62, %s6259_s13 }
  0xc2   :  { %5300 = vrot.lane.b32.xlu1 %v6432_v62, %s6261_s15 }
  0xc3   :  { %5310 = vrot.lane.b32.xlu0 %v6426_v61, %s6261_s15  ;;  %5275 = vrot.lane.b32.xlu2 %v6408_v56, %s6259_s13 }
  0xca   :  { %5315 = vrot.lane.b32.xlu1 %v6408_v56, %s6261_s15 }
  0xcb   :  { %5325 = vrot.lane.b32.xlu0 %v6446_v1, %s6262_s16  ;;  %5290 = vrot.lane.b32.xlu2 %v6426_v61, %s6260_s14 }
  0xd2   :  { %5330 = vrot.lane.b32.xlu1 %v6426_v61, %s6262_s16 }
  0xd3   :  { %5340 = vrot.lane.b32.xlu0 %v6432_v62, %s6263_s17  ;;  %5305 = vrot.lane.b32.xlu2 %v6446_v1, %s6261_s15 }
  0xda   :  { %5345 = vrot.lane.b32.xlu1 %v6446_v1, %s6263_s17  ;;  %v6586_v1 = vsel %vm6556_vm13, %v1137_v47, %v1160_v52 }
  0xdb   :  { %12076 = vst [vmem:[#allocation35_spill] sm:$0xff] %v6586_v1  ;;  %5355 = vrot.lane.b32.xlu0 %v6408_v56, %s6263_s17  ;;  %5320 = vrot.lane.b32.xlu2 %v6432_v62, %s6262_s16  ;;  %v5359_v30 = vpack.i.bf16 %v6586_v1, %v6503_v21  ;;  %v1131_v62 = vsel %vm11262_vm9, %v5177_v22, %v5178_v8 }
  0xdc   :  { %v1135_v8 = vsel %vm11262_vm9, %v5167_v31, %v5168_v40  ;;  %v1136_v22 = vsel %vm11262_vm9, %v5163_v37, %v5167_v31  ;;  %v6629_v35 = vsel %vm6612_vm0, %v1131_v62, %v1162_v3  ;;  %v1158_v37 = vsel %vm11257_vm10, %v5188_v41, %v5192_v44 }
  0xdd   :  { %12082 = vst [vmem:[#allocation39_spill] sm:$0xff] %v6629_v35  ;;  %v5374_v40 = vpack.i.bf16 %v6629_v35, %v6532_v34  ;;  %v6654_v39 = vsel %vm6633_vm1, %v1136_v22, %v1159_v12  ;;  %v6658_v47 = vsel %vm6641_vm2, %v1135_v8, %v1158_v37 }
  0xde   :  { %12089 = vst [vmem:[#allocation42_spill] sm:$0xff] %v6654_v39  ;;  %v5384_v52 = vpack.i.bf16 %v6658_v47, %v6654_v39 }
  0xdf   :  { %12090 = vst [vmem:[#allocation43_spill] sm:$0xff] %v6658_v47 }
  0xe2   :  { %5360 = vrot.lane.b32.xlu1 %v5359_v30, %s6258_s12 }
  0xe3   :  { %5370 = vrot.lane.b32.xlu0 %v5369_v6, %s6258_s12  ;;  %5335 = vrot.lane.b32.xlu2 %v6408_v56, %s6262_s16 }
  0xea   :  { %5375 = vrot.lane.b32.xlu1 %v5374_v40, %s6258_s12 }
  0xeb   :  { %5385 = vrot.lane.b32.xlu0 %v5384_v52, %s6259_s13  ;;  %5350 = vrot.lane.b32.xlu2 %v6426_v61, %s6263_s17 }
  0xed   :  { %v5201_v56 = vpop.permute.xlu2 %5200 }
  0xee   :  { %v5203_v18 = vunpack.i.h.bf16 %v5201_v56  ;;  %v5202_v31 = vunpack.i.l.bf16 %v5201_v56 }
  0xf0   :  { %v242_v37 = vsel %vm11262_vm9, %v5202_v31, %v5203_v18 }
  0xf2   :  { %5390 = vrot.lane.b32.xlu1 %v5369_v6, %s6259_s13 }
  0xf3   :  { %5400 = vrot.lane.b32.xlu0 %v5359_v30, %s6260_s14  ;;  %5365 = vrot.lane.b32.xlu2 %v5384_v52, %s6258_s12 }
  0xf5   :  { %v6669_v44 = vpop.permute.xlu2 %5205 }
  0xf6   :  { %v5208_v62 = vunpack.i.h.bf16 %v6669_v44  ;;  %v5207_v41 = vunpack.i.l.bf16 %v6669_v44 }
  0xf8   :  { %v240_v25 = vsel %vm11262_vm9, %v5207_v41, %v5208_v62  ;;  %v241_v44 = vsel %vm11262_vm9, %v5203_v18, %v5207_v41 }
  0xfa   :  { %5405 = vrot.lane.b32.xlu1 %v5384_v52, %s6260_s14 }
  0xfb   :  { %5415 = vrot.lane.b32.xlu0 %v5374_v40, %s6260_s14  ;;  %5380 = vrot.lane.b32.xlu2 %v5359_v30, %s6259_s13 }
  0xfd   :  { %v5221_v55 = vpop.permute.xlu2 %5220 }
  0xfe   :  { %v5223_v8 = vunpack.i.h.bf16 %v5221_v55  ;;  %v5222_v22 = vunpack.i.l.bf16 %v5221_v55 }
 0x102   :  { %5420 = vrot.lane.b32.xlu1 %v5359_v30, %s6261_s15 }
 0x103   :  { %5430 = vrot.lane.b32.xlu0 %v5369_v6, %s6261_s15  ;;  %5395 = vrot.lane.b32.xlu2 %v5374_v40, %s6259_s13 }
 0x104   :  { %v5216_v61 = vpop.permute.xlu1 %5215 }
 0x105   :  { %v6677_v2 = vpop.permute.xlu0 %5210  ;;  %v5236_v16 = vpop.permute.xlu2 %5235  ;;  %v5218_v3 = vunpack.i.h.bf16 %v5216_v61  ;;  %v5217_v38 = vunpack.i.l.bf16 %v5216_v61 }
 0x106   :  { %v5213_v33 = vunpack.i.h.bf16 %v6677_v2  ;;  %v5238_v45 = vunpack.i.h.bf16 %v5236_v16  ;;  %v5237_v42 = vunpack.i.l.bf16 %v5236_v16 }
 0x10a   :  { %5435 = vrot.lane.b32.xlu1 %v5374_v40, %s6261_s15  ;;  %v243_v40 = vsel %vm11262_vm9, %v5218_v3, %v5202_v31 }
 0x10b   :  { %5410 = vrot.lane.b32.xlu2 %v5369_v6, %s6260_s14  ;;  %v267_v6 = vsel %vm11257_vm10, %v5222_v22, %v5223_v8 }
 0x10c   :  { %v5231_v30 = vpop.permute.xlu1 %5230  ;;  %v6704_v31 = vsel %vm6487_vm11, %v243_v40, %v267_v6  ;;  %v5212_v6 = vunpack.i.l.bf16 %v6677_v2  ;;  %vm12157_vm11 = vcmp.lt.s32.totalorder %v6324_v13, 124 }
 0x10d   :  { %v5232_v12 = vunpack.i.l.bf16 %v5231_v30  ;;  %v5226_v56 = vpop.permute.xlu0 %5225  ;;  %v6687_v28 = vpop.permute.xlu2 %5245  ;;  %12091 = vst [vmem:[#allocation44_spill] sm:$0xff] %v6704_v31  ;;  %v5233_v40 = vunpack.i.h.bf16 %v5231_v30  ;;  %v11241_v30 = vand.u32 15, %v6336_v19 }
 0x10e   :  { %v5228_v55 = vunpack.i.h.bf16 %v5226_v56  ;;  %v5227_v36 = vunpack.i.l.bf16 %v5226_v56  ;;  %v268_v56 = vsel %vm11257_vm10, %v5238_v45, %v5222_v22  ;;  %v238_v2 = vsel %vm11262_vm9, %v5212_v6, %v5213_v33 }
 0x10f   :  { %v262_v27 = vsel %vm11257_vm10, %v5233_v40, %v5237_v42  ;;  %vm6807_vm5 = vcmp.ge.s32.totalorder %v11241_v30, 4  ;;  %v463_v30 = vand.u32 15, %v6333_v17  ;;  %v12120_v1 = vunpack.i.l.bf16 %v6687_v28 }
 0x110   :  { %v265_v7 = vsel %vm11257_vm10, %v5227_v36, %v5228_v55  ;;  %v266_v34 = vsel %vm11257_vm10, %v5223_v8, %v5227_v36  ;;  %v264_v18 = vsel %vm11257_vm10, %v5228_v55, %v5232_v12 }
 0x111   :  { %v6708_v41 = vsel %vm6556_vm13, %v242_v37, %v266_v34  ;;  %v6712_v61 = vsel %vm6633_vm1, %v241_v44, %v265_v7  ;;  %v6716_v16 = vsel %vm6641_vm2, %v240_v25, %v264_v18  ;;  %v236_v34 = vsel %vm11262_vm9, %v5217_v38, %v5218_v3  ;;  %vm12158_vm1 = vmmov %vm12157_vm11 }
 0x112   :  { %12092 = vst [vmem:[#allocation45_spill] sm:$0xff] %v6708_v41  ;;  %v6720_v36 = vpack.i.bf16 %v6716_v16, %v6712_v61  ;;  %v6724_v8 = vpack.i.bf16 %v6708_v41, %v6704_v31  ;;  %v237_v37 = vsel %vm11262_vm9, %v5213_v33, %v5217_v38  ;;  %v261_v25 = vsel %vm11257_vm10, %v5237_v42, %v5238_v45  ;;  %vm12161_vm2 = vmmov %vm12158_vm1 }
 0x113   :  { %12093 = vst [vmem:[#allocation46_spill] sm:$0xff] %v6712_v61  ;;  %5425 = vrot.lane.b32.xlu2 %v5384_v52, %s6261_s15  ;;  %v6756_v22 = vsel %vm6520_vm12, %v237_v37, %v261_v25  ;;  %v6760_v55 = vsel %vm6612_vm0, %v236_v34, %v268_v56  ;;  %v11240_v18 = vand.u32 15, %v6330_v15  ;;  %v239_v25 = vsel %vm11262_vm9, %v5208_v62, %v5212_v6 }
 0x114   :  { %12094 = vst [vmem:[#allocation47_spill] sm:$0xff] %v6716_v16  ;;  %v6731_v7 = vpop.permute.xlu1 %5240  ;;  %5450 = vrot.lane.b32.xlu1 %v6720_v36, %s6258_s12  ;;  %5445 = vrot.lane.b32.xlu0 %v6724_v8, %s6258_s12  ;;  %v6771_v37 = vpack.i.bf16 %v6760_v55, %v6756_v22  ;;  %v6799_v62 = vsel %vm6578_vm15, %v238_v2, %v262_v27  ;;  %v12101_v6 = vmov 0  ;;  %vm6880_vm9 = vcmp.ge.s32.totalorder %v463_v30, 4 }
 0x115   :  { %v11238_v3 = vunpack.i.h.bf16 %v6731_v7  ;;  %v11239_v38 = vunpack.i.l.bf16 %v6731_v7  ;;  %v6744_v52 = vpop.permute.xlu0 %5250  ;;  %v6746_v44 = vpop.permute.xlu2 %5260  ;;  %12095 = vst [vmem:[#allocation48_spill] sm:$0xff] %v6756_v22  ;;  %vm6789_vm4 = vcmp.ge.s32.totalorder %v11240_v18, 4  ;;  %v12102_v6 = vsel %vm6807_vm5, 4294967295, %v12101_v6 }
 0x116   :  { %12096 = vst [vmem:[#allocation49_spill] sm:$0xff] %v6760_v55  ;;  %v12103_v26 = vunpack.i.h.bf16 %v6746_v44  ;;  %v5252_v2 = vunpack.i.l.bf16 %v6744_v52  ;;  %vm11292_vm12 = vcmp.lt.s32.totalorder %v6324_v13, 124  ;;  %vm12141_vm15 = vcmp.lt.s32.totalorder %v6324_v13, 12 }
 0x117   :  { %v703_v45 = vsel %vm11274_vm3, %v11239_v38, %v11238_v3  ;;  %v263_v3 = vsel %vm11257_vm10, %v5232_v12, %v5233_v40  ;;  %12100 = vst [vmem:[#allocation51_spill] sm:$0xff] %v6799_v62  ;;  %vm11278_vm10 = vcmp.lt.s32.totalorder %v6324_v13, 12  ;;  %vm12156_vm0 = vcmp.lt.s32.totalorder %v6324_v13, 12 }
 0x118   :  { %v6795_v33 = vsel %vm6570_vm14, %v239_v25, %v263_v3  ;;  %v456_v3 = vand.u32 15, %v6347_v24  ;;  %v12104_v25 = vunpack.i.l.bf16 %v6746_v44  ;;  %vm12143_vm14 = vmmov %vm12141_vm15 }
 0x119   :  { %12099 = vst [vmem:[#allocation50_spill] sm:$0xff] %v6795_v33  ;;  %vm12159_vm13 = vmmov %vm12156_vm0 }
 0x11a   :  { %vm6851_vm7 = vcmp.ge.s32.totalorder %v456_v3, 4 }
 0x11b   :  { %5440 = vrot.lane.b32.xlu2 %v6311_v5, %s6258_s12  ;;  %v12097_v5 = vmov 0 }
 0x11c   :  { %v6775_v34 = vpop.permute.xlu1 %5255  ;;  %5465 = vrot.lane.b32.xlu1 %v6724_v8, %s6259_s13  ;;  %5460 = vrot.lane.b32.xlu0 %v6771_v37, %s6258_s12  ;;  %v12098_v5 = vsel %vm6789_vm4, 4294967295, %v12097_v5 }
 0x11d   :  { %v11246_v42 = vunpack.i.h.bf16 %v6775_v34  ;;  %v11247_v12 = vunpack.i.l.bf16 %v6775_v34  ;;  %v6801_v56 = vpop.permute.xlu0 %5265  ;;  %v6803_v40 = vpop.permute.xlu2 %5275 }
 0x11e   :  { %v11252_v18 = vunpack.i.l.bf16 %v6801_v56  ;;  %v12105_v47 = vunpack.i.h.bf16 %v6803_v40  ;;  %v12119_v35 = vunpack.i.l.bf16 %v6803_v40 }
 0x11f   :  { %v697_v27 = vsel %vm11274_vm3, %v11247_v12, %v11246_v42  ;;  %v6833_v42 = vpack.i.bf16 %v6799_v62, %v6795_v33  ;;  %v5248_v12 = vunpack.i.h.bf16 %v6687_v28  ;;  %v12115_v33 = vunpack.i.h.bf16 %v6744_v52 }
 0x120   :  { %v726_v53 = vsel %vm11276_vm6, %v12103_v26, %v11252_v18  ;;  %v728_v38 = vsel %vm11276_vm6, %v12105_v47, %v12104_v25  ;;  %v12108_v18 = vmov 0 }
 0x121   :  { %v6845_v21 = vsel %vm6807_vm5, %v703_v45, %v726_v53  ;;  %v6849_v26 = vsel %vm6789_vm4, %v697_v27, %v728_v38  ;;  %v12109_v18 = vsel %vm6851_vm7, 4294967295, %v12108_v18  ;;  %v12111_v45 = vand.u32 15, %v6339_v20 }
 0x122   :  { %12106 = vst [vmem:[#allocation52_spill] sm:$0xff] %v6845_v21  ;;  %v12112_v27 = vmov 0  ;;  %v699_v62 = vsel %vm11274_vm3, %v5252_v2, %v12115_v33  ;;  %v700_v21 = vsel %vm11274_vm3, %v5248_v12, %v5252_v2 }
 0x123   :  { %12107 = vst [vmem:[#allocation53_spill] sm:$0xff] %v6849_v26  ;;  %5455 = vrot.lane.b32.xlu2 %v6833_v42, %s6258_s12  ;;  %vm6866_vm8 = vcmp.ge.s32.totalorder %v12111_v45, 4  ;;  %v701_v26 = vsel %vm11274_vm3, %v12120_v1, %v5248_v12  ;;  %v12121_v45 = vunpack.i.h.bf16 %v6801_v56 }
 0x124   :  { %12110 = vst [vmem:[#allocation54_spill] sm:$0xff] %v12109_v18  ;;  %v5271_v47 = vpop.permute.xlu1 %5270  ;;  %5480 = vrot.lane.b32.xlu1 %v6771_v37, %s6259_s13  ;;  %5475 = vrot.lane.b32.xlu0 %v6833_v42, %s6259_s13  ;;  %v12113_v27 = vsel %vm6866_vm8, 4294967295, %v12112_v27 }
 0x125   :  { %v5273_v53 = vunpack.i.h.bf16 %v5271_v47  ;;  %v5272_v38 = vunpack.i.l.bf16 %v5271_v47  ;;  %12114 = vst [vmem:[#allocation55_spill] sm:$0xff] %v12113_v27  ;;  %v6876_v55 = vpop.permute.xlu0 %5280  ;;  %v6878_v41 = vpop.permute.xlu2 %5290  ;;  %v12116_v47 = vmov 0 }
 0x126   :  { %v12117_v47 = vsel %vm6880_vm9, 4294967295, %v12116_v47 }
 0x127   :  { %12118 = vst [vmem:[#allocation56_spill] sm:$0xff] %v12117_v47  ;;  %v722_v33 = vsel %vm11276_vm6, %v5273_v53, %v12119_v35  ;;  %v723_v25 = vsel %vm11276_vm6, %v5272_v38, %v5273_v53  ;;  %v724_v16 = vsel %vm11276_vm6, %v12121_v45, %v5272_v38  ;;  %v12123_v35 = vunpack.i.h.bf16 %v6876_v55 }
 0x128   :  { %v6904_v39 = vsel %vm6866_vm8, %v699_v62, %v722_v33  ;;  %v12124_v53 = vunpack.i.l.bf16 %v6876_v55  ;;  %v6914_v1 = vsel %vm6851_vm7, %v701_v26, %v724_v16  ;;  %v6918_v12 = vsel %vm6880_vm9, %v700_v21, %v723_v25 }
 0x129   :  { %12122 = vst [vmem:[#allocation57_spill] sm:$0xff] %v6904_v39  ;;  %v12129_v25 = vand.u32 15, %v6336_v19  ;;  %v12130_v45 = vmov 0  ;;  %vm6956_vm6 = vcmp.ge.s32.totalorder %v456_v3, 12  ;;  %v12136_v39 = vmov 0 }
 0x12a   :  { %v807_v32 = vsel %vm11278_vm10, %v12124_v53, %v12123_v35  ;;  %12125 = vst [vmem:[#allocation58_spill] sm:$0xff] %v6914_v1  ;;  %v5292_v53 = vunpack.i.l.bf16 %v6878_v41  ;;  %vm12217_vm7 = vcmp.lt.s32.totalorder %v6324_v13, 112 }
 0x12b   :  { %12126 = vst [vmem:[#allocation59_spill] sm:$0xff] %v6918_v12  ;;  %5470 = vrot.lane.b32.xlu2 %v6720_v36, %s6259_s13  ;;  %vm6940_vm3 = vcmp.ge.s32.totalorder %v12129_v25, 12 }
 0x12c   :  { %v6922_v62 = vpop.permute.xlu1 %5285  ;;  %5495 = vrot.lane.b32.xlu1 %v6833_v42, %s6260_s14  ;;  %5490 = vrot.lane.b32.xlu0 %v6720_v36, %s6260_s14  ;;  %v12131_v45 = vsel %vm6940_vm3, 4294967295, %v12130_v45 }
 0x12d   :  { %v6928_v2 = vpop.permute.xlu0 %5295  ;;  %v6930_v38 = vpop.permute.xlu2 %5305  ;;  %v5288_v35 = vunpack.i.h.bf16 %v6922_v62  ;;  %v12142_v10 = vunpack.i.l.bf16 %v6922_v62 }
 0x12e   :  { %12127 = vst [vmem:[#allocation60_spill] sm:$0xff] %v6928_v2  ;;  %v11277_v16 = vunpack.i.h.bf16 %v6928_v2  ;;  %v5297_v21 = vunpack.i.l.bf16 %v6928_v2  ;;  %v12139_v3 = vunpack.i.l.bf16 %v6930_v38  ;;  %v12144_v9 = vunpack.i.h.bf16 %v6930_v38 }
 0x12f   :  { %12128 = vst [vmem:[#allocation61_spill] sm:$0xff] %v6930_v38  ;;  %v804_v43 = vsel %vm12141_vm15, %v5288_v35, %v5292_v53 }
 0x130   :  { %v801_v26 = vsel %vm11278_vm10, %v5297_v21, %v11277_v16  ;;  %v12133_v16 = vmov 0  ;;  %vm6960_vm10 = vcmp.ge.s32.totalorder %v463_v30, 12 }
 0x131   :  { %v12134_v16 = vsel %vm6956_vm6, 4294967295, %v12133_v16  ;;  %v12137_v39 = vsel %vm6960_vm10, 4294967295, %v12136_v39 }
 0x132   :  { %12135 = vst [vmem:[#allocation63_spill] sm:$0xff] %v12134_v16 }
 0x133   :  { %5485 = vrot.lane.b32.xlu2 %v6724_v8, %s6260_s14  ;;  %12138 = vst [vmem:[#allocation64_spill] sm:$0xff] %v12137_v39 }
 0x134   :  { %v6946_v33 = vpop.permute.xlu1 %5300  ;;  %5510 = vrot.lane.b32.xlu1 %v6720_v36, %s6261_s15  ;;  %5505 = vrot.lane.b32.xlu0 %v6724_v8, %s6261_s15  ;;  %v805_v36 = vsel %vm12143_vm14, %v12142_v10, %v5288_v35  ;;  %v5293_v10 = vunpack.i.h.bf16 %v6878_v41 }
 0x135   :  { %12132 = vst [vmem:[#allocation62_spill] sm:$0xff] %v6946_v33  ;;  %v11289_v25 = vunpack.i.h.bf16 %v6946_v33  ;;  %v5311_v12 = vpop.permute.xlu0 %5310  ;;  %v6966_v1 = vpop.permute.xlu2 %5320  ;;  %v12160_v29 = vunpack.i.l.bf16 %v6946_v33 }
 0x136   :  { %v5313_v8 = vunpack.i.h.bf16 %v5311_v12  ;;  %v5312_v11 = vunpack.i.l.bf16 %v5311_v12  ;;  %v803_v48 = vsel %vm12159_vm13, %v5292_v53, %v5293_v10 }
 0x137   :  { %v830_v30 = vsel %vm11292_vm12, %v11289_v25, %v12139_v3  ;;  %v477_v25 = vand.u32 15, %v6327_v14 }
 0x138   :  { %v6977_v4 = vsel %vm6940_vm3, %v807_v32, %v830_v30  ;;  %v827_v12 = vsel %vm11292_vm12, %v5312_v11, %v5313_v8  ;;  %v828_v3 = vsel %vm11292_vm12, %v12144_v9, %v5312_v11 }
 0x139   :  { %12140 = vst [vmem:[#allocation65_spill] sm:$0xff] %v6977_v4  ;;  %v6993_v32 = vsel %vm6956_vm6, %v805_v36, %v828_v3  ;;  %v6997_v30 = vsel %vm6960_vm10, %v804_v43, %v827_v12  ;;  %vm7003_vm14 = vcmp.ge.s32.totalorder %v477_v25, 12  ;;  %v12147_v4 = vmov 0 }
 0x13a   :  { %12145 = vst [vmem:[#allocation66_spill] sm:$0xff] %v6993_v32  ;;  %v12148_v4 = vsel %vm7003_vm14, 4294967295, %v12147_v4  ;;  %v12149_v43 = vand.u32 15, %v6330_v15  ;;  %v12150_v36 = vmov 0  ;;  %v12153_v32 = vmov 0 }
 0x13b   :  { %12146 = vst [vmem:[#allocation67_spill] sm:$0xff] %v6997_v30  ;;  %5500 = vrot.lane.b32.xlu2 %v6771_v37, %s6260_s14  ;;  %v12152_v30 = vand.u32 15, %v6339_v20  ;;  %vm12214_vm6 = vcmp.lt.s32.totalorder %v6324_v13, 48 }
 0x13c   :  { %v5316_v35 = vpop.permute.xlu1 %5315  ;;  %5520 = vrot.lane.b32.xlu0 %v6771_v37, %s6261_s15  ;;  %vm7011_vm15 = vcmp.ge.s32.totalorder %v12149_v43, 12  ;;  %vm12215_vm3 = vmmov %vm12214_vm6 }
 0x13d   :  { %v5318_v11 = vunpack.i.h.bf16 %v5316_v35  ;;  %v5317_v9 = vunpack.i.l.bf16 %v5316_v35  ;;  %v12151_v36 = vsel %vm7011_vm15, 4294967295, %v12150_v36  ;;  %v7016_v12 = vpop.permute.xlu0 %5325  ;;  %v7018_v3 = vpop.permute.xlu2 %5335  ;;  %vm7022_vm12 = vcmp.ge.s32.totalorder %v12152_v30, 12  ;;  %vm12216_vm8 = vmmov %vm12215_vm3 }
 0x13e   :  { %v12154_v32 = vsel %vm7022_vm12, 4294967295, %v12153_v32  ;;  %v802_v35 = vsel %vm12156_vm0, %v5293_v10, %v5297_v21  ;;  %v11304_v21 = vand.u32 15, %v6324_v13  ;;  %vm12218_vm9 = vmmov %vm12215_vm3 }
 0x13f   :  { %12155 = vst [vmem:[#allocation68_spill] sm:$0xff] %v12154_v32  ;;  %v825_v43 = vsel %vm12157_vm11, %v5317_v9, %v5318_v11  ;;  %v826_v41 = vsel %vm12158_vm1, %v5313_v8, %v5317_v9  ;;  %v832_v30 = vsel %vm12161_vm2, %v5318_v11, %v12160_v29  ;;  %vm7054_vm11 = vcmp.ge.s32.totalorder %v477_v25, 4 }
 0x140   :  { %v7041_v37 = vsel %vm7003_vm14, %v802_v35, %v825_v43  ;;  %v7047_v2 = vsel %vm7011_vm15, %v801_v26, %v832_v30  ;;  %v7051_v53 = vsel %vm7022_vm12, %v803_v48, %v826_v41  ;;  %v12165_v29 = vmov 0 }
 0x141   :  { %12162 = vst [vmem:[#allocation69_spill] sm:$0xff] %v7041_v37  ;;  %3123 = vmatpush.msra.mxu0 %v7041_v37  ;;  %v12166_v29 = vsel %vm7054_vm11, 4294967295, %v12165_v29  ;;  %v12167_v8 = vand.u32 15, %v6344_v23  ;;  %vm7070_vm0 = vcmp.ge.s32.totalorder %v11304_v21, 4  ;;  %v12170_v48 = vmov 0 }
 0x142   :  { %12163 = vst [vmem:[#allocation70_spill] sm:$0xff] %v7047_v2  ;;  %v12171_v48 = vsel %vm7070_vm0, 4294967295, %v12170_v48  ;;  %v12172_v25 = vunpack.i.h.bf16 %v6801_v56  ;;  %v12173_v11 = vunpack.i.l.bf16 %v6801_v56  ;;  %vm12174_vm1 = vcmp.lt.s32.totalorder %v6324_v13, 116 }
 0x143   :  { %12164 = vst [vmem:[#allocation71_spill] sm:$0xff] %v7051_v53  ;;  %3124 = vmatpush.msra.mxu0 %v6442_v0  ;;  %vm7060_vm13 = vcmp.ge.s32.totalorder %v12167_v8, 4  ;;  %5515 = vrot.lane.b32.xlu2 %v6833_v42, %s6261_s15  ;;  %v12175_v41 = vunpack.i.l.bf16 %v6775_v34  ;;  %v12176_v35 = vunpack.i.h.bf16 %v6744_v52  ;;  %vm12177_vm2 = vcmp.lt.s32.totalorder %v6324_v13, 4 }
 0x144   :  { %v7066_v26 = vpop.permute.xlu1 %5330  ;;  %v725_v9 = vsel %vm12174_vm1, %v12173_v11, %v12172_v25  ;;  %v12178_v43 = vunpack.i.l.bf16 %v6731_v7  ;;  %v12179_v30 = vunpack.i.h.bf16 %v6775_v34  ;;  %vm12180_vm14 = vmmov %vm12177_vm2  ;;  %v12181_v21 = vunpack.i.h.bf16 %v6803_v40 }
 0x145   :  { %v698_v42 = vsel %vm12177_vm2, %v12176_v35, %v12175_v41  ;;  %v12182_v56 = vunpack.i.l.bf16 %v6803_v40  ;;  %3125 = vmatpush.msra.mxu0 %v6416_v58  ;;  %v7099_v52 = vpop.permute.xlu0 %5340  ;;  %v5351_v11 = vpop.permute.xlu2 %5350  ;;  %v12183_v41 = vunpack.i.l.bf16 %v6687_v28  ;;  %v12184_v35 = vunpack.i.h.bf16 %v6731_v7 }
 0x146   :  { %v704_v8 = vsel %vm12180_vm14, %v12179_v30, %v12178_v43  ;;  %v12185_v43 = vunpack.i.h.bf16 %v6746_v44  ;;  %v12186_v30 = vunpack.i.l.bf16 %v6746_v44  ;;  %vm12187_vm14 = vmmov %vm12174_vm1  ;;  %v12203_v37 = vand.u32 63, %v6336_v19 }
 0x147   :  { %v721_v25 = vsel %vm12174_vm1, %v12182_v56, %v12181_v21  ;;  %v702_v34 = vsel %vm12177_vm2, %v12184_v35, %v12183_v41  ;;  %3126 = vmatpush.msra.mxu0 %v6390_v50  ;;  %v5323_v21 = vunpack.i.h.bf16 %v6966_v1  ;;  %v5322_v56 = vunpack.i.l.bf16 %v6966_v1 }
 0x148   :  { %v727_v40 = vsel %vm12187_vm14, %v12186_v30, %v12185_v43  ;;  %v7118_v28 = vsel %vm7060_vm13, %v702_v34, %v725_v9  ;;  %v7126_v44 = vsel %vm7054_vm11, %v698_v42, %v721_v25  ;;  %v5328_v41 = vunpack.i.h.bf16 %v7016_v12 }
 0x149   :  { %12188 = vst [vmem:[#allocation72_spill] sm:$0xff] %v7118_v28  ;;  %v7122_v7 = vsel %vm7070_vm0, %v704_v8, %v727_v40  ;;  %v12191_v35 = vand.u32 63, %v6324_v13  ;;  %v12192_v43 = vmov 0  ;;  %3127 = vmatpush.msra.mxu0 %v7118_v28  ;;  %v5327_v9 = vunpack.i.l.bf16 %v7016_v12 }
 0x14a   :  { %12189 = vst [vmem:[#allocation73_spill] sm:$0xff] %v7122_v7  ;;  %v5343_v8 = vunpack.i.h.bf16 %v7099_v52  ;;  %v5342_v42 = vunpack.i.l.bf16 %v7099_v52  ;;  %v5332_v25 = vunpack.i.l.bf16 %v7066_v26  ;;  %v12195_v1 = vand.u32 63, %v6333_v17 }
 0x14b   :  { %12190 = vst [vmem:[#allocation74_spill] sm:$0xff] %v7126_v44  ;;  %vm7133_vm2 = vcmp.ge.s32.totalorder %v12191_v35, 48  ;;  %v12196_v34 = vmov 0  ;;  %v5353_v30 = vunpack.i.h.bf16 %v5351_v11  ;;  %v5352_v40 = vunpack.i.l.bf16 %v5351_v11  ;;  %3128 = vmatpush.msra.mxu0 %v7122_v7 }
 0x14c   :  { %v12193_v43 = vsel %vm7133_vm2, 4294967295, %v12192_v43  ;;  %vm7144_vm14 = vcmp.ge.s32.totalorder %v12195_v1, 48  ;;  %v12199_v35 = vand.u32 63, %v6339_v20  ;;  %v12200_v12 = vmov 0  ;;  %v5346_v53 = vpop.permute.xlu1 %5345 }
 0x14d   :  { %12194 = vst [vmem:[#allocation75_spill] sm:$0xff] %v12193_v43  ;;  %v12197_v34 = vsel %vm7144_vm14, 4294967295, %v12196_v34  ;;  %v5338_v52 = vunpack.i.h.bf16 %v7018_v3  ;;  %vm7158_vm1 = vcmp.ge.s32.totalorder %v12203_v37, 48  ;;  %v12204_v17 = vmov 0  ;;  %3129 = vmatpush.msra.mxu0 %v7126_v44  ;;  %v5356_v58 = vpop.permute.xlu0 %5355  ;;  %v7186_v0 = vpop.permute.xlu2 %5365 }
 0x14e   :  { %12198 = vst [vmem:[#allocation76_spill] sm:$0xff] %v12197_v34  ;;  %vm7151_vm10 = vcmp.ge.s32.totalorder %v12199_v35, 48  ;;  %v12205_v17 = vsel %vm7158_vm1, 4294967295, %v12204_v17  ;;  %v12206_v1 = vand.u32 63, %v6344_v23  ;;  %v12207_v11 = vmov 0 }
 0x14f   :  { %v12201_v12 = vsel %vm7151_vm10, 4294967295, %v12200_v12  ;;  %v12210_v20 = vand.u32 63, %v6347_v24  ;;  %v12211_v35 = vmov 0  ;;  %v888_v19 = vsel %vm12214_vm6, %v5322_v56, %v5323_v21  ;;  %vm12219_vm6 = vmmov %vm12217_vm7 }
 0x150   :  { %12202 = vst [vmem:[#allocation77_spill] sm:$0xff] %v12201_v12  ;;  %vm7164_vm12 = vcmp.ge.s32.totalorder %v12206_v1, 48  ;;  %v5333_v37 = vunpack.i.h.bf16 %v7066_v26  ;;  %v5348_v50 = vunpack.i.h.bf16 %v5346_v53  ;;  %v5347_v7 = vunpack.i.l.bf16 %v5346_v53  ;;  %vm12220_vm11 = vmmov %vm12219_vm6 }
 0x151   :  { %v12208_v11 = vsel %vm7164_vm12, 4294967295, %v12207_v11  ;;  %vm7170_vm15 = vcmp.ge.s32.totalorder %v12210_v20, 48  ;;  %v886_v1 = vsel %vm12215_vm3, %v5327_v9, %v5328_v41  ;;  %v887_v24 = vsel %vm12216_vm8, %v5323_v21, %v5327_v9  ;;  %vm12221_vm3 = vmmov %vm12219_vm6 }
 0x152   :  { %12209 = vst [vmem:[#allocation78_spill] sm:$0xff] %v12208_v11  ;;  %v12212_v35 = vsel %vm7170_vm15, 4294967295, %v12211_v35  ;;  %v913_v20 = vsel %vm12217_vm7, %v5342_v42, %v5343_v8  ;;  %v885_v28 = vsel %vm12218_vm9, %v5328_v41, %v5332_v25  ;;  %v909_v53 = vsel %vm12219_vm6, %v5352_v40, %v5353_v30  ;;  %vm12222_vm7 = vmmov %vm12221_vm3 }
 0x153   :  { %12213 = vst [vmem:[#allocation79_spill] sm:$0xff] %v12212_v35  ;;  %v5357_v26 = vunpack.i.l.bf16 %v5356_v58  ;;  %v910_v44 = vsel %vm12220_vm11, %v5348_v50, %v5352_v40  ;;  %v911_v2 = vsel %vm12221_vm3, %v5347_v7, %v5348_v50  ;;  %v889_v21 = vsel %vm12216_vm8, %v5338_v52, %v5322_v56  ;;  %vm12225_vm9 = vmmov %vm12216_vm8 }
 0x154   :  { %v912_v9 = vsel %vm12222_vm7, %v5343_v8, %v5347_v7  ;;  %v7200_v41 = vsel %vm7164_vm12, %v887_v24, %v911_v2  ;;  %v7204_v33 = vsel %vm7170_vm15, %v886_v1, %v910_v44  ;;  %v884_v40 = vsel %vm12225_vm9, %v5332_v25, %v5333_v37  ;;  %vm12226_vm11 = vmmov %vm12221_vm3  ;;  %v5361_v24 = vpop.permute.xlu1 %5360 }
 0x155   :  { %12223 = vst [vmem:[#allocation80_spill] sm:$0xff] %v7200_v41  ;;  %v5358_v38 = vunpack.i.h.bf16 %v5356_v58  ;;  %v908_v50 = vsel %vm12226_vm11, %v5353_v30, %v5357_v26  ;;  %v7212_v56 = vsel %vm7158_vm1, %v888_v19, %v912_v9  ;;  %v7216_v7 = vsel %vm7133_vm2, %v889_v21, %v913_v20  ;;  %vm12239_vm8 = vmmov %vm12222_vm7  ;;  %v5381_v9 = vpop.permute.xlu2 %5380 }
 0x156   :  { %12224 = vst [vmem:[#allocation81_spill] sm:$0xff] %v7204_v33  ;;  %v7220_v2 = vsel %vm7144_vm14, %v885_v28, %v909_v53  ;;  %v7224_v44 = vsel %vm7151_vm10, %v884_v40, %v908_v50  ;;  %v5337_v58 = vunpack.i.l.bf16 %v7018_v3  ;;  %v7229_v8 = vpack.i.bf16 %v7204_v33, %v7200_v41  ;;  %vm12240_vm11 = vmmov %vm12225_vm9 }
 0x157   :  { %12227 = vst [vmem:[#allocation82_spill] sm:$0xff] %v7212_v56  ;;  %v7233_v25 = vpack.i.bf16 %v7212_v56, %v7216_v7  ;;  %v7237_v30 = vpack.i.bf16 %v7224_v44, %v7220_v2  ;;  %v12231_v28 = vand.u32 63, %v6327_v14  ;;  %v12232_v19 = vmov 0 }
 0x158   :  { %12228 = vst [vmem:[#allocation83_spill] sm:$0xff] %v7216_v7  ;;  %v12235_v3 = vand.u32 63, %v6330_v15  ;;  %v12236_v1 = vmov 0  ;;  %v907_v20 = vsel %vm12239_vm8, %v5357_v26, %v5358_v38  ;;  %v914_v53 = vsel %vm12222_vm7, %v5358_v38, %v5342_v42  ;;  %5530 = vrot.lane.b32.xlu2 %v7229_v8, %s6258_s12  ;;  %v5371_v15 = vpop.permute.xlu0 %5370 }
 0x159   :  { %12229 = vst [vmem:[#allocation84_spill] sm:$0xff] %v7220_v2  ;;  %vm7241_vm6 = vcmp.ge.s32.totalorder %v12231_v28, 48  ;;  %5525 = vrot.lane.b32.xlu1 %v7233_v25, %s6258_s12  ;;  %v5363_v14 = vunpack.i.h.bf16 %v5361_v24  ;;  %v5362_v21 = vunpack.i.l.bf16 %v5361_v24  ;;  %5535 = vrot.lane.b32.xlu0 %v7237_v30, %s6258_s12  ;;  %v882_v40 = vsel %vm12225_vm9, %v5337_v58, %v5338_v52 }
 0x15a   :  { %12230 = vst [vmem:[#allocation85_spill] sm:$0xff] %v7224_v44  ;;  %v12233_v19 = vsel %vm7241_vm6, 4294967295, %v12232_v19  ;;  %vm7247_vm3 = vcmp.ge.s32.totalorder %v12235_v3, 48  ;;  %v883_v26 = vsel %vm12240_vm11, %v5333_v37, %v5337_v58  ;;  %vm12241_vm8 = vcmp.lt.s32.totalorder %v6324_v13, 4 }
 0x15b   :  { %12234 = vst [vmem:[#allocation86_spill] sm:$0xff] %v12233_v19  ;;  %v12237_v1 = vsel %vm7247_vm3, 4294967295, %v12236_v1  ;;  %v1193_v38 = vsel %vm12241_vm8, %v5362_v21, %v5363_v14  ;;  %v7269_v42 = vsel %vm7241_vm6, %v883_v26, %v907_v20  ;;  %v7273_v50 = vsel %vm7247_vm3, %v882_v40, %v914_v53  ;;  %vm12244_vm7 = vmmov %vm12241_vm8 }
 0x15c   :  { %12238 = vst [vmem:[#allocation87_spill] sm:$0xff] %v12237_v1  ;;  %v7277_v28 = vpack.i.bf16 %v7273_v50, %v7269_v42  ;;  %v5376_v3 = vpop.permute.xlu1 %5375  ;;  %v5367_v58 = vunpack.i.l.bf16 %v7186_v0  ;;  %v5383_v24 = vunpack.i.h.bf16 %v5381_v9  ;;  %v5382_v20 = vunpack.i.l.bf16 %v5381_v9  ;;  %vm12245_vm9 = vmmov %vm12244_vm7 }
 0x15d   :  { %12242 = vst [vmem:[#allocation88_spill] sm:$0xff] %v7269_v42  ;;  %v5378_v52 = vunpack.i.h.bf16 %v5376_v3  ;;  %v5377_v37 = vunpack.i.l.bf16 %v5376_v3  ;;  %v5396_v40 = vpop.permute.xlu2 %5395  ;;  %v5373_v26 = vunpack.i.h.bf16 %v5371_v15  ;;  %vm12246_vm11 = vcmp.lt.s32.totalorder %v6324_v13, 116  ;;  %vm12248_vm6 = vmmov %vm12244_vm7 }
 0x15e   :  { %12243 = vst [vmem:[#allocation89_spill] sm:$0xff] %v7273_v50  ;;  %v5398_v56 = vunpack.i.h.bf16 %v5396_v40  ;;  %v5397_v33 = vunpack.i.l.bf16 %v5396_v40  ;;  %v1192_v3 = vsel %vm12245_vm9, %v5363_v14, %v5367_v58  ;;  %vm12247_vm8 = vmmov %vm12246_vm11  ;;  %v5372_v34 = vunpack.i.l.bf16 %v5371_v15 }
 0x15f   :  { %v1187_v50 = vsel %vm12244_vm7, %v5377_v37, %v5378_v52  ;;  %v1194_v12 = vsel %vm12248_vm6, %v5378_v52, %v5362_v21  ;;  %vm12249_vm10 = vmmov %vm12247_vm8  ;;  %v5368_v52 = vunpack.i.h.bf16 %v7186_v0  ;;  %vm12265_vm14 = vnez %v12117_v47 }
 0x160   :  { %5545 = vrot.lane.b32.xlu2 %v7233_v25, %s6259_s13  ;;  %v5386_v53 = vpop.permute.xlu0 %5385  ;;  %vm12250_vm7 = vmmov %vm12247_vm8  ;;  %vm12294_vm15 = vnez %v12154_v32  ;;  %v7611_v35 = vpack.i.bf16 %v6386_v49, %v6422_v60 }
 0x161   :  { %5540 = vrot.lane.b32.xlu1 %v7277_v28, %s6258_s12  ;;  %5550 = vrot.lane.b32.xlu0 %v7229_v8, %s6259_s13  ;;  %v5388_v44 = vunpack.i.h.bf16 %v5386_v53  ;;  %v5387_v2 = vunpack.i.l.bf16 %v5386_v53  ;;  %v1217_v53 = vsel %vm12249_vm10, %v5382_v20, %v5383_v24  ;;  %v1218_v1 = vsel %vm12250_vm7, %v5398_v56, %v5382_v20  ;;  %vm12252_vm9 = vmmov %vm12248_vm6 }
 0x162   :  { %v1188_v14 = vsel %vm12252_vm9, %v5373_v26, %v5377_v37  ;;  %v7315_v15 = vsel %vm6789_vm4, %v1187_v50, %v1218_v1  ;;  %vm12257_vm10 = vmmov %vm12248_vm6  ;;  %vm12260_vm6 = vnez %v12166_v29  ;;  %12311 = vst [vmem:[#allocation118_spill] sm:$0xff] %v7611_v35 }
 0x163   :  { %v1215_v19 = vsel %vm12246_vm11, %v5387_v2, %v5388_v44  ;;  %v1216_v9 = vsel %vm12247_vm8, %v5383_v24, %v5387_v2  ;;  %vm12253_vm11 = vmmov %vm12250_vm7  ;;  %12255 = vst [vmem:[#allocation92_spill] sm:$0xff] %v7315_v15 }
 0x164   :  { %v7302_v40 = vsel %vm7060_vm13, %v1192_v3, %v1215_v19  ;;  %v1211_v2 = vsel %vm12253_vm11, %v5397_v33, %v5398_v56  ;;  %v7311_v21 = vsel %vm6807_vm5, %v1193_v38, %v1216_v9  ;;  %v7320_v19 = vsel %vm7070_vm0, %v1194_v12, %v1217_v53  ;;  %v5391_v37 = vpop.permute.xlu1 %5390  ;;  %vm12262_vm8 = vmmov %vm12250_vm7 }
 0x165   :  { %12251 = vst [vmem:[#allocation90_spill] sm:$0xff] %v7302_v40  ;;  %3145 = vmatpush.msra.mxu1 %v7302_v40  ;;  %v5393_v56 = vunpack.i.h.bf16 %v5391_v37  ;;  %v5392_v24 = vunpack.i.l.bf16 %v5391_v37  ;;  %v1190_v38 = vsel %vm12257_vm10, %v5368_v52, %v5372_v34  ;;  %v7333_v12 = vpop.permute.xlu2 %5410  ;;  %v7337_v1 = vsel %vm12260_vm6, %v1188_v14, %v1211_v2  ;;  %vm12263_vm11 = vmmov %vm12252_vm9 }
 0x166   :  { %12254 = vst [vmem:[#allocation91_spill] sm:$0xff] %v7311_v21  ;;  %v1191_v53 = vsel %vm12252_vm9, %v5367_v58, %v5368_v52  ;;  %v1189_v37 = vsel %vm12263_vm11, %v5372_v34, %v5373_v26  ;;  %vm12264_vm10 = vmmov %vm12250_vm7  ;;  %vm12270_vm9 = vnez %v12113_v27 }
 0x167   :  { %12256 = vst [vmem:[#allocation93_spill] sm:$0xff] %v7320_v19  ;;  %3146 = vmatpush.msra.mxu1 %v7320_v19  ;;  %v1212_v3 = vsel %vm12262_vm8, %v5393_v56, %v5397_v33  ;;  %v1213_v9 = vsel %vm12250_vm7, %v5392_v24, %v5393_v56  ;;  %v1214_v14 = vsel %vm12264_vm10, %v5388_v44, %v5392_v24  ;;  %vm12267_vm8 = vcmp.lt.s32.totalorder %v6324_v13, 12 }
 0x168   :  { %5560 = vrot.lane.b32.xlu2 %v7277_v28, %s6259_s13  ;;  %v7331_v0 = vpop.permute.xlu0 %5400  ;;  %12259 = vst [vmem:[#allocation95_spill] sm:$0xff] %v7333_v12  ;;  %v7354_v2 = vsel %vm12265_vm14, %v1190_v38, %v1213_v9  ;;  %vm12268_vm7 = vnez %v12109_v18  ;;  %v7368_v34 = vsel %vm12270_vm9, %v1189_v37, %v1212_v3  ;;  %vm12275_vm11 = vmmov %vm12267_vm8  ;;  %vm12279_vm10 = vcmp.lt.s32.totalorder %v6324_v13, 124 }
 0x169   :  { %5555 = vrot.lane.b32.xlu1 %v7237_v30, %s6259_s13  ;;  %5565 = vrot.lane.b32.xlu0 %v7233_v25, %s6260_s14  ;;  %12258 = vst [vmem:[#allocation94_spill] sm:$0xff] %v7331_v0  ;;  %v11370_v50 = vunpack.i.h.bf16 %v7331_v0  ;;  %v11369_v20 = vunpack.i.l.bf16 %v7331_v0  ;;  %v7364_v58 = vsel %vm12268_vm7, %v1191_v53, %v1214_v14  ;;  %vm12282_vm3 = vmmov %vm12279_vm10  ;;  %v11394_v19 = vunpack.i.l.bf16 %v7333_v12 }
 0x16a   :  { %12261 = vst [vmem:[#allocation96_spill] sm:$0xff] %v7337_v1  ;;  %3147 = vmatpush.msra.mxu1 %v7337_v1 }
 0x16b   :  { %12266 = vst [vmem:[#allocation97_spill] sm:$0xff] %v7354_v2  ;;  %v1297_v33 = vsel %vm12267_vm8, %v11369_v20, %v11370_v50  ;;  %vm12280_vm8 = vnez %v12131_v45 }
 0x16c   :  { %12269 = vst [vmem:[#allocation98_spill] sm:$0xff] %v7364_v58  ;;  %v7370_v44 = vpop.permute.xlu1 %5405 }
 0x16d   :  { %12271 = vst [vmem:[#allocation99_spill] sm:$0xff] %v7368_v34  ;;  %v7380_v52 = vpop.permute.xlu2 %5425  ;;  %v11379_v9 = vunpack.i.h.bf16 %v7370_v44  ;;  %v11380_v53 = vunpack.i.l.bf16 %v7370_v44  ;;  %v7430_v34 = vld [vmem:[#allocation3 + $0x30] sm:$0xff] }
 0x16e   :  { %12272 = vst [vmem:[#allocation100_spill] sm:$0xff] %v7370_v44  ;;  %v11377_v37 = vunpack.i.l.bf16 %v7380_v52  ;;  %v11386_v20 = vunpack.i.h.bf16 %v7380_v52 }
 0x16f   :  { %12274 = vst [vmem:[#allocation102_spill] sm:$0xff] %v7380_v52 }
 0x170   :  { %5575 = vrot.lane.b32.xlu2 %v7237_v30, %s6260_s14  ;;  %v7378_v26 = vpop.permute.xlu0 %5415 }
 0x171   :  { %5570 = vrot.lane.b32.xlu1 %v7229_v8, %s6260_s14  ;;  %5580 = vrot.lane.b32.xlu0 %v7277_v28, %s6260_s14  ;;  %12273 = vst [vmem:[#allocation101_spill] sm:$0xff] %v7378_v26  ;;  %v11368_v56 = vunpack.i.h.bf16 %v7378_v26  ;;  %v11367_v24 = vunpack.i.l.bf16 %v7378_v26 }
 0x173   :  { %v1291_v38 = vsel %vm12275_vm11, %v11367_v24, %v11368_v56 }
 0x174   :  { %v7390_v3 = vpop.permute.xlu1 %5420 }
 0x175   :  { %12276 = vst [vmem:[#allocation103_spill] sm:$0xff] %v7390_v3  ;;  %v11376_v14 = vunpack.i.h.bf16 %v7390_v3  ;;  %v7404_v56 = vpop.permute.xlu2 %5440 }
 0x176   :  { %12278 = vst [vmem:[#allocation105_spill] sm:$0xff] %v7404_v56 }
 0x178   :  { %5590 = vrot.lane.b32.xlu2 %v7229_v8, %s6261_s15  ;;  %v7402_v24 = vpop.permute.xlu0 %5430  ;;  %v1320_v8 = vsel %vm12279_vm10, %v11376_v14, %v11377_v37  ;;  %v6078_v14 = vld [vmem:[#allocation3 + $0x38] sm:$0xff]  ;;  %vm12285_vm10 = vnez %v12134_v16 }
 0x179   :  { %5585 = vrot.lane.b32.xlu1 %v7233_v25, %s6261_s15  ;;  %5595 = vrot.lane.b32.xlu0 %v7237_v30, %s6261_s15  ;;  %12277 = vst [vmem:[#allocation104_spill] sm:$0xff] %v7402_v24  ;;  %v11385_v50 = vunpack.i.l.bf16 %v7402_v24  ;;  %v7416_v25 = vsel %vm12280_vm8, %v1297_v33, %v1320_v8  ;;  %v1295_v30 = vsel %vm12275_vm11, %v11380_v53, %v11379_v9  ;;  %v6079_v8 = vld [vmem:[#allocation3 + $0x10] sm:$0xff]  ;;  %v6080_v37 = vld [vmem:[#allocation3 + $0x18] sm:$0xff]  ;;  %v11397_v53 = vunpack.i.h.bf16 %v7333_v12 }
 0x17a   :  { %12281 = vst [vmem:[#allocation106_spill] sm:$0xff] %v7416_v25  ;;  %v7433_v33 = vpack.i.bf16 %v6078_v14, %v7430_v34  ;;  %v7435_v25 = vpack.i.bf16 %v6080_v37, %v6079_v8 }
 0x17b   :  { %v1318_v1 = vsel %vm12282_vm3, %v11386_v20, %v11385_v50  ;;  %v11398_v50 = vunpack.i.h.bf16 %v7402_v24  ;;  %v11400_v20 = vunpack.i.l.bf16 %v7390_v3  ;;  %vm12288_vm3 = vmmov %vm12275_vm11  ;;  %vm12289_vm11 = vcmp.lt.s32.totalorder %v6324_v13, 124  ;;  %v6083_v24 = vld [vmem:[#allocation3 + $0x28] sm:$0xff] }
 0x17c   :  { %12283 = vst [vmem:[#allocation107_spill] sm:$0xff] %v7433_v33  ;;  %v7439_v9 = vsel %vm12285_vm10, %v1295_v30, %v1318_v1  ;;  %v7443_v40 = vpop.permute.xlu1 %5435  ;;  %v1293_v30 = vsel %vm12288_vm3, %v11394_v19, %v11397_v53  ;;  %vm12291_vm2 = vmmov %vm12289_vm11  ;;  %vm12292_vm3 = vnez %v12151_v36  ;;  %v7603_v43 = vpack.i.bf16 %v7430_v34, %v6083_v24 }
 0x17d   :  { %12284 = vst [vmem:[#allocation108_spill] sm:$0xff] %v7435_v25  ;;  %v11399_v15 = vunpack.i.l.bf16 %v7443_v40  ;;  %v7455_v1 = vpop.permute.xlu2 %5455  ;;  %v7623_v34 = vpack.i.bf16 %v6422_v60, %v6440_v63 }
 0x17e   :  { %12286 = vst [vmem:[#allocation109_spill] sm:$0xff] %v7439_v9  ;;  %v11409_v21 = vunpack.i.h.bf16 %v7455_v1  ;;  %v5457_v58 = vunpack.i.l.bf16 %v7455_v1 }
 0x17f   :  { %12287 = vst [vmem:[#allocation110_spill] sm:$0xff] %v7443_v40  ;;  %v1316_v2 = vsel %vm12289_vm11, %v11398_v50, %v11399_v15  ;;  %v6081_v50 = vld [vmem:[#allocation3 + $0x8] sm:$0xff]  ;;  %vm12297_vm11 = vcmp.lt.s32.totalorder %v6324_v13, 4 }
 0x180   :  { %5615 = vrot.lane.b32.xlu2 %v7433_v33, %s6258_s12  ;;  %v7483_v53 = vsel %vm12294_vm15, %v1293_v30, %v1316_v2  ;;  %v7485_v15 = vpack.i.bf16 %v6079_v8, %v6081_v50  ;;  %12308 = vst [vmem:[#allocation117_spill] sm:$0xff] %v7603_v43 }
 0x181   :  { %5605 = vrot.lane.b32.xlu1 %v7277_v28, %s6261_s15  ;;  %5600 = vrot.lane.b32.xlu0 %v7435_v25, %s6258_s12  ;;  %v12290_v28 = vunpack.i.h.bf16 %v7443_v40  ;;  %12295 = vst [vmem:[#allocation112_spill] sm:$0xff] %v7483_v53  ;;  %v6084_v40 = vld [vmem:[#allocation3] sm:$0xff] }
 0x182   :  { %12296 = vst [vmem:[#allocation113_spill] sm:$0xff] %v7485_v15  ;;  %v7491_v26 = vpack.i.bf16 %v6081_v50, %v6084_v40  ;;  %v7508_v53 = vpack.i.bf16 %v6078_v14, %v6084_v40 }
 0x183   :  { %v1322_v9 = vsel %vm12291_vm2, %v12290_v28, %v11400_v20  ;;  %v400_v28 = vsel %vm12297_vm11, %v5457_v58, %v11409_v21  ;;  %v6082_v20 = vld [vmem:[#allocation3 + $0x20] sm:$0xff]  ;;  %vm12300_vm2 = vmmov %vm12297_vm11 }
 0x184   :  { %v7479_v19 = vsel %vm12292_vm3, %v1291_v38, %v1322_v9  ;;  %v5609_v12 = vpack.i.bf16 %v6083_v24, %v6082_v20  ;;  %12298 = vst [vmem:[#allocation114_spill] sm:$0xff] %v7491_v26  ;;  %vm12301_vm11 = vmmov %vm12300_vm2  ;;  %v5634_v0 = vpack.i.bf16 %v6082_v20, %v6080_v37 }
 0x185   :  { %12293 = vst [vmem:[#allocation111_spill] sm:$0xff] %v7479_v19  ;;  %v7498_v2 = vpop.permute.xlu2 %5470  ;;  %vm12302_vm12 = vmmov %vm12300_vm2 }
 0x186   :  { %v7500_v38 = vpop.permute.xlu1 %5450  ;;  %v7502_v9 = vpop.permute.xlu0 %5445  ;;  %12299 = vst [vmem:[#allocation115_spill] sm:$0xff] %v7508_v53  ;;  %v11432_v20 = vunpack.i.l.bf16 %v7498_v2 }
 0x187   :  { %v5453_v8 = vunpack.i.h.bf16 %v7500_v38  ;;  %v11420_v30 = vunpack.i.l.bf16 %v7500_v38  ;;  %v11422_v50 = vunpack.i.h.bf16 %v7502_v9  ;;  %v11421_v21 = vunpack.i.l.bf16 %v7502_v9 }
 0x188   :  { %5630 = vrot.lane.b32.xlu2 %v7485_v15, %s6263_s17 }
 0x189   :  { %5610 = vrot.lane.b32.xlu1 %v5609_v12, %s6258_s12  ;;  %5620 = vrot.lane.b32.xlu0 %v7491_v26, %s6262_s16  ;;  %v401_v19 = vsel %vm12300_vm2, %v5453_v8, %v5457_v58  ;;  %v402_v3 = vsel %vm12301_vm11, %v11420_v30, %v5453_v8  ;;  %v404_v52 = vsel %vm12302_vm12, %v11421_v21, %v11422_v50  ;;  %vm12303_vm12 = vcmp.lt.s32.totalorder %v6324_v13, 12 }
 0x18a   :  { %vm12304_vm2 = vcmp.lt.s32.totalorder %v6324_v13, 116  ;;  %v7561_v26 = vpack.i.bf16 %v6420_v59, %v6412_v57 }
 0x18b   :  { %vm12307_vm1 = vmmov %vm12304_vm2 }
 0x18d   :  { %v7527_v40 = vpop.permute.xlu2 %5485 }
 0x18e   :  { %v11433_v58 = vunpack.i.h.bf16 %v7527_v40  ;;  %v11428_v14 = vunpack.i.l.bf16 %v7527_v40  ;;  %v7531_v8 = vpop.permute.xlu1 %5465  ;;  %v7533_v30 = vpop.permute.xlu0 %5460 }
 0x18f   :  { %v11429_v37 = vunpack.i.h.bf16 %v7531_v8  ;;  %v11431_v21 = vunpack.i.h.bf16 %v7533_v30  ;;  %v11430_v50 = vunpack.i.l.bf16 %v7533_v30 }
 0x190   :  { %5645 = vrot.lane.b32.xlu2 %v7508_v53, %s6263_s17 }
 0x191   :  { %5625 = vrot.lane.b32.xlu1 %v7435_v25, %s6262_s16  ;;  %5635 = vrot.lane.b32.xlu0 %v5634_v0, %s6263_s17  ;;  %v7545_v0 = vsel %vm12303_vm12, %v11428_v14, %v11433_v58  ;;  %v428_v44 = vsel %vm12304_vm2, %v11429_v37, %v11432_v20  ;;  %v398_v56 = vsel %vm12301_vm11, %v11430_v50, %v11431_v21  ;;  %v11451_v50 = vunpack.i.l.bf16 %v7531_v8  ;;  %vm12306_vm11 = vmmov %vm12304_vm2 }
 0x192   :  { %v7565_v14 = vsel %vm6807_vm5, %v404_v52, %v428_v44 }
 0x193   :  { %12305 = vst [vmem:[#allocation116_spill] sm:$0xff] %v7565_v14 }
 0x195   :  { %v7572_v37 = vpop.permute.xlu2 %5500 }
 0x196   :  { %v11446_v21 = vunpack.i.h.bf16 %v7572_v37  ;;  %v11445_v20 = vunpack.i.l.bf16 %v7572_v37  ;;  %v7577_v58 = vpop.permute.xlu1 %5480  ;;  %v5476_v44 = vpop.permute.xlu0 %5475 }
 0x197   :  { %v11449_v52 = vunpack.i.h.bf16 %v7577_v58  ;;  %v11450_v14 = vunpack.i.l.bf16 %v7577_v58  ;;  %v5478_v53 = vunpack.i.h.bf16 %v5476_v44  ;;  %v5477_v25 = vunpack.i.l.bf16 %v5476_v44 }
 0x198   :  { %5660 = vrot.lane.b32.xlu2 %v7561_v26, %s6256_s2 }
 0x199   :  { %5640 = vrot.lane.b32.xlu1 %v7433_v33, %s6262_s16  ;;  %5650 = vrot.lane.b32.xlu0 %v5609_v12, %s6262_s16  ;;  %v7588_v12 = vsel %vm12303_vm12, %v11445_v20, %v11446_v21  ;;  %v430_v15 = vsel %vm12304_vm2, %v11449_v52, %v11451_v50  ;;  %v424_v44 = vsel %vm12306_vm11, %v5478_v53, %v11450_v14  ;;  %v12309_v20 = vunpack.i.h.bf16 %v7498_v2  ;;  %vm12310_vm12 = vmmov %vm12307_vm1 }
 0x19a   :  { %v425_v33 = vsel %vm12307_vm1, %v5477_v25, %v5478_v53  ;;  %v7615_v52 = vsel %vm6789_vm4, %v398_v56, %v430_v15  ;;  %v7619_v14 = vsel %vm12270_vm9, %v400_v28, %v424_v44  ;;  %vm12316_vm1 = vcmp.lt.s32.totalorder %v6324_v13, 124 }
 0x19b   :  { %v426_v21 = vsel %vm12310_vm12, %v12309_v20, %v5477_v25  ;;  %12312 = vst [vmem:[#allocation119_spill] sm:$0xff] %v7615_v52  ;;  %v7631_v53 = vsel %vm12265_vm14, %v401_v19, %v425_v33  ;;  %vm12317_vm2 = vcmp.lt.s32.totalorder %v6324_v13, 12  ;;  %vm12320_vm9 = vnez %v12137_v39 }
 0x19c   :  { %12313 = vst [vmem:[#allocation120_spill] sm:$0xff] %v7619_v14  ;;  %v7627_v24 = vsel %vm12268_vm7, %v402_v3, %v426_v21  ;;  %vm12318_vm11 = vmmov %vm12317_vm2  ;;  %v7659_v52 = vpack.i.bf16 %v6394_v51, %v6378_v46 }
 0x19d   :  { %12314 = vst [vmem:[#allocation121_spill] sm:$0xff] %v7627_v24  ;;  %v5516_v15 = vpop.permute.xlu2 %5515  ;;  %vm12319_vm12 = vmmov %vm12317_vm2 }
 0x19e   :  { %12315 = vst [vmem:[#allocation122_spill] sm:$0xff] %v7631_v53  ;;  %v5518_v56 = vunpack.i.h.bf16 %v5516_v15  ;;  %v5517_v25 = vunpack.i.l.bf16 %v5516_v15  ;;  %v5496_v28 = vpop.permute.xlu1 %5495  ;;  %v5491_v20 = vpop.permute.xlu0 %5490  ;;  %v5689_v15 = vpack.i.bf16 %v6402_v54, %v6386_v49 }
 0x19f   :  { %v5498_v21 = vunpack.i.h.bf16 %v5496_v28  ;;  %v5497_v3 = vunpack.i.l.bf16 %v5496_v28  ;;  %v5493_v44 = vunpack.i.h.bf16 %v5491_v20  ;;  %v5492_v50 = vunpack.i.l.bf16 %v5491_v20 }
 0x1a0   :  { %5675 = vrot.lane.b32.xlu2 %v7611_v35, %s6257_s11  ;;  %v635_v19 = vsel %vm12316_vm1, %v5517_v25, %v5518_v56  ;;  %v7655_v20 = vpack.i.bf16 %v6440_v63, %v6420_v59  ;;  %v12323_v59 = vand.u32 15, %v6344_v23  ;;  %v12324_v35 = vmov 0 }
 0x1a1   :  { %5655 = vrot.lane.b32.xlu1 %v7603_v43, %s6263_s17  ;;  %5665 = vrot.lane.b32.xlu0 %v7623_v34, %s6256_s2  ;;  %v610_v33 = vsel %vm12317_vm2, %v5497_v3, %v5498_v21  ;;  %v611_v53 = vsel %vm12318_vm11, %v5493_v44, %v5497_v3  ;;  %v612_v14 = vsel %vm12319_vm12, %v5492_v50, %v5493_v44  ;;  %vm12327_vm11 = vcmp.lt.s32.totalorder %v6324_v13, 124 }
 0x1a2   :  { %v7651_v28 = vsel %vm12320_vm9, %v611_v53, %v635_v19  ;;  %12322 = vst [vmem:[#allocation124_spill] sm:$0xff] %v7655_v20  ;;  %vm7668_vm1 = vcmp.ge.s32.totalorder %v12323_v59, 12  ;;  %vm12328_vm12 = vmmov %vm12327_vm11 }
 0x1a3   :  { %12321 = vst [vmem:[#allocation123_spill] sm:$0xff] %v7651_v28  ;;  %v12325_v35 = vsel %vm7668_vm1, 4294967295, %v12324_v35  ;;  %vm12329_vm9 = vmmov %vm12327_vm11 }
 0x1a4   :  { %vm12330_vm14 = vmmov %vm12329_vm9 }
 0x1a6   :  { %v5511_v3 = vpop.permute.xlu1 %5510  ;;  %v5506_v44 = vpop.permute.xlu0 %5505 }
 0x1a7   :  { %v5513_v53 = vunpack.i.h.bf16 %v5511_v3  ;;  %v5512_v19 = vunpack.i.l.bf16 %v5511_v3  ;;  %v5508_v28 = vunpack.i.h.bf16 %v5506_v44  ;;  %v5507_v24 = vunpack.i.l.bf16 %v5506_v44 }
 0x1a8   :  { %5690 = vrot.lane.b32.xlu2 %v5689_v15, %s6256_s2  ;;  %v5704_v15 = vpack.i.bf16 %v6394_v51, %v6440_v63 }
 0x1a9   :  { %5670 = vrot.lane.b32.xlu1 %v7655_v20, %s6257_s11  ;;  %5680 = vrot.lane.b32.xlu0 %v7659_v52, %s6256_s2  ;;  %v12326_v20 = vunpack.i.h.bf16 %v7527_v40  ;;  %v636_v11 = vsel %vm12327_vm11, %v5513_v53, %v5517_v25  ;;  %v637_v3 = vsel %vm12328_vm12, %v5512_v19, %v5513_v53  ;;  %v638_v23 = vsel %vm12329_vm9, %v5508_v28, %v5512_v19 }
 0x1aa   :  { %v639_v59 = vsel %vm12330_vm14, %v5507_v24, %v5508_v28  ;;  %v7692_v63 = vsel %vm12285_vm10, %v612_v14, %v636_v11  ;;  %v7702_v25 = vpack.i.bf16 %v6394_v51, %v6412_v57  ;;  %v7706_v28 = vpack.i.bf16 %v6378_v46, %v6402_v54  ;;  %vm12336_vm14 = vmmov %vm12317_vm2 }
 0x1ab   :  { %v613_v43 = vsel %vm12317_vm2, %v12326_v20, %v5492_v50  ;;  %12332 = vst [vmem:[#allocation126_spill] sm:$0xff] %v7692_v63  ;;  %v7697_v50 = vsel %vm12280_vm8, %v7545_v0, %v638_v23  ;;  %v12335_v11 = vunpack.i.h.bf16 %v7572_v37  ;;  %v12337_v0 = vand.u32 15, %v6324_v13  ;;  %vm12344_vm8 = vmmov %vm12328_vm12 }
 0x1ac   :  { %v7688_v44 = vsel %vm7668_vm1, %v613_v43, %v637_v3  ;;  %12333 = vst [vmem:[#allocation127_spill] sm:$0xff] %v7697_v50  ;;  %v12334_v43 = vunpack.i.l.bf16 %v7527_v40  ;;  %v12338_v20 = vmov 0  ;;  %vm12342_vm11 = vcmp.lt.s32.totalorder %v6324_v13, 4 }
 0x1ad   :  { %12331 = vst [vmem:[#allocation125_spill] sm:$0xff] %v7688_v44  ;;  %3130 = vmatpush.msra.mxu0 %v7688_v44  ;;  %vm7717_vm9 = vcmp.ge.s32.totalorder %v12337_v0, 12  ;;  %vm12345_vm10 = vnez %v12148_v4 }
 0x1ae   :  { %v615_v14 = vsel %vm12336_vm14, %v12335_v11, %v12334_v43  ;;  %v12339_v20 = vsel %vm7717_vm9, 4294967295, %v12338_v20  ;;  %v5521_v19 = vpop.permute.xlu0 %5520  ;;  %v12341_v11 = vunpack.i.l.bf16 %v7572_v37  ;;  %vm12343_vm14 = vmmov %vm12328_vm12 }
 0x1af   :  { %v7727_v40 = vsel %vm7717_vm9, %v615_v14, %v639_v59  ;;  %v5523_v23 = vunpack.i.h.bf16 %v5521_v19  ;;  %v5522_v43 = vunpack.i.l.bf16 %v5521_v19 }
 0x1b0   :  { %5705 = vrot.lane.b32.xlu2 %v5704_v15, %s6262_s16  ;;  %12340 = vst [vmem:[#allocation128_spill] sm:$0xff] %v7727_v40  ;;  %3131 = vmatpush.msra.mxu0 %v7727_v40  ;;  %v609_v0 = vsel %vm12317_vm2, %v5498_v21, %v12341_v11  ;;  %vm12354_vm2 = vmmov %vm12342_vm11 }
 0x1b1   :  { %5685 = vrot.lane.b32.xlu1 %v7702_v25, %s6257_s11  ;;  %5695 = vrot.lane.b32.xlu0 %v7706_v28, %s6257_s11  ;;  %v633_v14 = vsel %vm12328_vm12, %v5522_v43, %v5523_v23  ;;  %v634_v40 = vsel %vm12343_vm14, %v5518_v56, %v5522_v43  ;;  %v640_v19 = vsel %vm12344_vm8, %v5523_v23, %v5507_v24  ;;  %v12350_v56 = vunpack.i.l.bf16 %v7498_v2  ;;  %vm12360_vm12 = vmmov %vm12354_vm2 }
 0x1b2   :  { %v7730_v53 = vpop.permute.xlu2 %5530  ;;  %v7752_v37 = vsel %vm12345_vm10, %v609_v0, %v633_v14  ;;  %v7757_v21 = vsel %vm12292_vm3, %v7588_v12, %v640_v19  ;;  %v7761_v11 = vsel %vm12294_vm15, %v610_v33, %v634_v40  ;;  %v12349_v12 = vunpack.i.h.bf16 %v7498_v2 }
 0x1b3   :  { %v5533_v15 = vunpack.i.h.bf16 %v7730_v53  ;;  %v11475_v3 = vunpack.i.l.bf16 %v7730_v53  ;;  %12346 = vst [vmem:[#allocation129_spill] sm:$0xff] %v7752_v37  ;;  %3132 = vmatpush.msra.mxu0 %v7752_v37  ;;  %vm12351_vm8 = vcmp.lt.s32.totalorder %v6324_v13, 116  ;;  %v12352_v40 = vunpack.i.l.bf16 %v7500_v38 }
 0x1b4   :  { %12347 = vst [vmem:[#allocation130_spill] sm:$0xff] %v7757_v21  ;;  %v427_v33 = vsel %vm12351_vm8, %v12350_v56, %v12349_v12  ;;  %v12353_v23 = vunpack.i.h.bf16 %v7502_v9  ;;  %v12355_v0 = vunpack.i.h.bf16 %v7531_v8  ;;  %v12356_v14 = vunpack.i.l.bf16 %v7531_v8  ;;  %vm12364_vm14 = vmmov %vm12351_vm8 }
 0x1b5   :  { %v7742_v59 = vsel %vm12342_vm11, %v11475_v3, %v5533_v15  ;;  %12348 = vst [vmem:[#allocation131_spill] sm:$0xff] %v7761_v11  ;;  %3133 = vmatpush.msra.mxu0 %v6712_v61  ;;  %vm12357_vm11 = vmmov %vm12351_vm8  ;;  %v12358_v2 = vunpack.i.l.bf16 %v7502_v9  ;;  %v12359_v12 = vunpack.i.h.bf16 %v7533_v30  ;;  %v5734_v56 = vpack.i.bf16 %v6386_v49, %v6402_v54 }
 0x1b6   :  { %v403_v43 = vsel %vm12354_vm2, %v12353_v23, %v12352_v40  ;;  %v429_v19 = vsel %vm12357_vm11, %v12356_v14, %v12355_v0  ;;  %v12362_v8 = vunpack.i.h.bf16 %v7577_v58  ;;  %v12363_v23 = vunpack.i.l.bf16 %v7577_v58  ;;  %vm12368_vm8 = vmmov %vm12354_vm2 }
 0x1b7   :  { %3134 = vmatpush.msra.mxu0 %v6704_v31  ;;  %v405_v38 = vsel %vm12360_vm12, %v12359_v12, %v12358_v2  ;;  %v7803_v40 = vsel %vm7060_vm13, %v403_v43, %v427_v33  ;;  %v12366_v43 = vunpack.i.l.bf16 %v7533_v30  ;;  %v12367_v58 = vunpack.i.h.bf16 %v7455_v1  ;;  %vm12370_vm2 = vmmov %vm12357_vm11 }
 0x1b8   :  { %5720 = vrot.lane.b32.xlu2 %v7706_v28, %s6262_s16  ;;  %12361 = vst [vmem:[#allocation132_spill] sm:$0xff] %v7803_v40  ;;  %v423_v9 = vsel %vm12364_vm14, %v12363_v23, %v12362_v8  ;;  %v7819_v33 = vsel %vm7070_vm0, %v405_v38, %v429_v19  ;;  %v5729_v30 = vpack.i.bf16 %v6422_v60, %v6386_v49  ;;  %vm12371_vm11 = vcmp.lt.s32.totalorder %v6324_v13, 12  ;;  %vm12372_vm12 = vmmov %vm12368_vm8 }
 0x1b9   :  { %5700 = vrot.lane.b32.xlu1 %v7561_v26, %s6262_s16  ;;  %5710 = vrot.lane.b32.xlu0 %v7561_v26, %s6263_s17  ;;  %12365 = vst [vmem:[#allocation133_spill] sm:$0xff] %v7819_v33  ;;  %v399_v0 = vsel %vm12368_vm8, %v12367_v58, %v12366_v43  ;;  %vm12373_vm14 = vmmov %vm12368_vm8 }
 0x1ba   :  { %v7771_v24 = vpop.permute.xlu2 %5545  ;;  %3135 = vmatpush.msra.mxu0 %v6756_v22 }
 0x1bb   :  { %v11474_v2 = vunpack.i.l.bf16 %v7771_v24  ;;  %v11501_v31 = vunpack.i.h.bf16 %v7771_v24 }
 0x1bc   :  { %3136 = vmatpush.msra.mxu0 %v7803_v40 }
 0x1be   :  { %3137 = vmatpush.msra.mxu0 %v7819_v33 }
 0x1c0   :  { %5735 = vrot.lane.b32.xlu2 %v5734_v56, %s6263_s17  ;;  %v7834_v56 = vsel %vm12260_vm6, %v399_v0, %v423_v9 }
 0x1c1   :  { %5715 = vrot.lane.b32.xlu1 %v7623_v34, %s6263_s17  ;;  %5725 = vrot.lane.b32.xlu0 %v7659_v52, %s6263_s17  ;;  %12369 = vst [vmem:[#allocation134_spill] sm:$0xff] %v7834_v56 }
 0x1c2   :  { %v7828_v14 = vpop.permute.xlu2 %5560  ;;  %3138 = vmatpush.msra.mxu0 %v7834_v56 }
 0x1c3   :  { %v11473_v12 = vunpack.i.h.bf16 %v7828_v14  ;;  %v11507_v44 = vunpack.i.l.bf16 %v7828_v14 }
 0x1c5   :  { %v978_v1 = vsel %vm12370_vm2, %v11473_v12, %v11474_v2  ;;  %vm12374_vm2 = vmmov %vm12368_vm8 }
 0x1c9   :  { %5730 = vrot.lane.b32.xlu1 %v5729_v30, %s6262_s16 }
 0x1ca   :  { %v7846_v19 = vpop.permute.xlu2 %5575 }
 0x1cb   :  { %v7848_v38 = vpop.permute.xlu1 %5525  ;;  %v11482_v8 = vunpack.i.h.bf16 %v7846_v19  ;;  %v5577_v23 = vunpack.i.l.bf16 %v7846_v19  ;;  %v7854_v58 = vpop.permute.xlu0 %5535 }
 0x1cc   :  { %v11491_v9 = vunpack.i.h.bf16 %v7848_v38  ;;  %v11489_v43 = vunpack.i.l.bf16 %v7848_v38  ;;  %v11490_v0 = vunpack.i.h.bf16 %v7854_v58  ;;  %v5537_v12 = vunpack.i.l.bf16 %v7854_v58 }
 0x1cd   :  { %v7862_v30 = vsel %vm12371_vm11, %v5577_v23, %v11482_v8  ;;  %vm12375_vm11 = vcmp.lt.s32.totalorder %v6324_v13, 116 }
 0x1ce   :  { %v953_v2 = vsel %vm12372_vm12, %v11489_v43, %v11491_v9  ;;  %v949_v3 = vsel %vm12373_vm14, %v5537_v12, %v11490_v0  ;;  %v950_v56 = vsel %vm12368_vm8, %v5533_v15, %v5537_v12  ;;  %vm12378_vm12 = vmmov %vm12374_vm2 }
 0x1cf   :  { %vm12380_vm14 = vmmov %vm12375_vm11 }
 0x1d0   :  { %vm12381_vm8 = vmmov %vm12375_vm11 }
 0x1d2   :  { %v5591_v22 = vpop.permute.xlu2 %5590 }
 0x1d3   :  { %v7876_v37 = vpop.permute.xlu1 %5540  ;;  %v7880_v40 = vpop.permute.xlu0 %5550 }
 0x1d4   :  { %v11497_v8 = vunpack.i.h.bf16 %v7876_v37  ;;  %v11496_v33 = vunpack.i.l.bf16 %v7876_v37  ;;  %v11502_v43 = vunpack.i.l.bf16 %v7880_v40 }
 0x1d6   :  { %v947_v15 = vsel %vm12374_vm2, %v11496_v33, %v11497_v8  ;;  %v976_v12 = vsel %vm12375_vm11, %v11501_v31, %v11502_v43  ;;  %vm12383_vm2 = vmmov %vm12381_vm8  ;;  %vm12384_vm11 = vcmp.lt.s32.totalorder %v6324_v13, 12 }
 0x1d7   :  { %v7898_v0 = vsel %vm6807_vm5, %v953_v2, %v976_v12  ;;  %v7902_v9 = vsel %vm6789_vm4, %v947_v15, %v978_v1 }
 0x1d8   :  { %12376 = vst [vmem:[#allocation135_spill] sm:$0xff] %v7898_v0  ;;  %v5592_v0 = vunpack.i.l.bf16 %v5591_v22 }
 0x1d9   :  { %12377 = vst [vmem:[#allocation136_spill] sm:$0xff] %v7902_v9 }
 0x1da   :  { %v7904_v61 = vpop.permute.xlu2 %5615 }
 0x1db   :  { %v11505_v8 = vunpack.i.h.bf16 %v7904_v61  ;;  %v11506_v11 = vunpack.i.l.bf16 %v7904_v61  ;;  %v5556_v60 = vpop.permute.xlu1 %5555  ;;  %v5566_v31 = vpop.permute.xlu0 %5565 }
 0x1dc   :  { %v5558_v43 = vunpack.i.h.bf16 %v5556_v60  ;;  %v5557_v21 = vunpack.i.l.bf16 %v5556_v60  ;;  %v5568_v2 = vunpack.i.h.bf16 %v5566_v31  ;;  %v5567_v12 = vunpack.i.l.bf16 %v5566_v31 }
 0x1dd   :  { %v7916_v1 = vsel %vm12378_vm12, %v11506_v11, %v11505_v8  ;;  %v12382_v60 = vunpack.i.h.bf16 %v7880_v40  ;;  %vm12386_vm12 = vnez %v12117_v47 }
 0x1de   :  { %12379 = vst [vmem:[#allocation137_spill] sm:$0xff] %v7916_v1  ;;  %v972_v15 = vsel %vm12380_vm14, %v5558_v43, %v11507_v44  ;;  %v973_v33 = vsel %vm12381_vm8, %v5557_v21, %v5558_v43  ;;  %v1057_v9 = vsel %vm12384_vm11, %v5567_v12, %v5568_v2  ;;  %vm12388_vm14 = vnez %v12113_v27 }
 0x1df   :  { %v974_v31 = vsel %vm12383_vm2, %v12382_v60, %v5557_v21  ;;  %v7937_v11 = vsel %vm12386_vm12, %v950_v56, %v973_v33  ;;  %v7941_v43 = vsel %vm12388_vm14, %v949_v3, %v972_v15  ;;  %v5593_v44 = vunpack.i.h.bf16 %v5591_v22  ;;  %vm12391_vm2 = vmmov %vm12384_vm11 }
 0x1e0   :  { %v7933_v8 = vsel %vm12268_vm7, %v7742_v59, %v974_v31  ;;  %12387 = vst [vmem:[#allocation139_spill] sm:$0xff] %v7937_v11  ;;  %vm12390_vm8 = vcmp.lt.s32.totalorder %v6324_v13, 124  ;;  %vm12392_vm11 = vmmov %vm12391_vm2  ;;  %vm12402_vm7 = vnez %v12134_v16 }
 0x1e1   :  { %12385 = vst [vmem:[#allocation138_spill] sm:$0xff] %v7933_v8  ;;  %v1079_v59 = vsel %vm12390_vm8, %v5592_v0, %v5593_v44  ;;  %vm12393_vm14 = vmmov %vm12391_vm2  ;;  %v12507_v8 = vld [vmem:[#allocation41_spill] sm:$0xff] }
 0x1e2   :  { %12389 = vst [vmem:[#allocation140_spill] sm:$0xff] %v7941_v43  ;;  %vm12394_vm12 = vmmov %vm12391_vm2  ;;  %v7957_v56 = vpop.permute.xlu2 %5630 }
 0x1e3   :  { %v5571_v50 = vpop.permute.xlu1 %5570  ;;  %v5581_v21 = vpop.permute.xlu0 %5580  ;;  %vm12396_vm8 = vmmov %vm12391_vm2 }
 0x1e4   :  { %v5573_v60 = vunpack.i.h.bf16 %v5571_v50  ;;  %v5572_v49 = vunpack.i.l.bf16 %v5571_v50  ;;  %v5583_v63 = vunpack.i.h.bf16 %v5581_v21  ;;  %v5582_v1 = vunpack.i.l.bf16 %v5581_v21 }
 0x1e6   :  { %v1054_v31 = vsel %vm12391_vm2, %v5573_v60, %v5577_v23  ;;  %v1055_v33 = vsel %vm12392_vm11, %v5572_v49, %v5573_v60  ;;  %v1056_v3 = vsel %vm12393_vm14, %v5568_v2, %v5572_v49  ;;  %v1051_v22 = vsel %vm12394_vm12, %v5582_v1, %v5583_v63 }
 0x1e7   :  { %v7955_v50 = vsel %vm7668_vm1, %v1056_v3, %v1079_v59  ;;  %v1058_v49 = vsel %vm12396_vm8, %v5583_v63, %v5567_v12  ;;  %vm12397_vm14 = vcmp.lt.s32.totalorder %v6324_v13, 124  ;;  %vm12404_vm8 = vnez %v12131_v45 }
 0x1e8   :  { %12395 = vst [vmem:[#allocation141_spill] sm:$0xff] %v7955_v50  ;;  %3148 = vmatpush.msra.mxu1 %v7955_v50  ;;  %vm12398_vm12 = vmmov %vm12397_vm14 }
 0x1e9   :  { %vm12399_vm2 = vmmov %vm12398_vm12 }
 0x1ea   :  { %vm12400_vm11 = vmmov %vm12399_vm2  ;;  %v7987_v12 = vpop.permute.xlu2 %5645 }
 0x1eb   :  { %v5586_v15 = vpop.permute.xlu1 %5585  ;;  %v5596_v21 = vpop.permute.xlu0 %5595 }
 0x1ec   :  { %v5588_v23 = vunpack.i.h.bf16 %v5586_v15  ;;  %v5587_v43 = vunpack.i.l.bf16 %v5586_v15  ;;  %v5598_v11 = vunpack.i.h.bf16 %v5596_v21  ;;  %v5597_v60 = vunpack.i.l.bf16 %v5596_v21 }
 0x1ee   :  { %v1080_v2 = vsel %vm12397_vm14, %v5588_v23, %v5592_v0  ;;  %v1081_v59 = vsel %vm12398_vm12, %v5587_v43, %v5588_v23  ;;  %v1077_v3 = vsel %vm12399_vm2, %v5597_v60, %v5598_v11  ;;  %v1078_v27 = vsel %vm12400_vm11, %v5593_v44, %v5597_v60  ;;  %vm12410_vm11 = vmmov %vm12399_vm2 }
 0x1ef   :  { %v7972_v15 = vsel %vm7717_vm9, %v1058_v49, %v1081_v59  ;;  %v7976_v21 = vsel %vm12402_vm7, %v1055_v33, %v1078_v27  ;;  %v7980_v63 = vsel %vm12404_vm8, %v1057_v9, %v1080_v2  ;;  %vm12406_vm14 = vnez %v12137_v39  ;;  %v12496_v39 = vld [vmem:[#allocation77_spill] sm:$0xff] }
 0x1f0   :  { %12401 = vst [vmem:[#allocation142_spill] sm:$0xff] %v7972_v15  ;;  %v7984_v0 = vsel %vm12406_vm14, %v1054_v31, %v1077_v3  ;;  %3149 = vmatpush.msra.mxu1 %v7972_v15  ;;  %v12408_v9 = vunpack.i.h.bf16 %v7846_v19  ;;  %vm12409_vm12 = vcmp.lt.s32.totalorder %v6324_v13, 12  ;;  %vm12411_vm14 = vmmov %vm12399_vm2 }
 0x1f1   :  { %12403 = vst [vmem:[#allocation143_spill] sm:$0xff] %v7976_v21 }
 0x1f2   :  { %12405 = vst [vmem:[#allocation144_spill] sm:$0xff] %v7980_v63  ;;  %v1052_v2 = vsel %vm12409_vm12, %v12408_v9, %v5582_v1  ;;  %vm12415_vm12 = vcmp.lt.s32.totalorder %v6324_v13, 4  ;;  %v12513_v63 = vld [vmem:[#allocation40_spill] sm:$0xff] }
 0x1f3   :  { %12407 = vst [vmem:[#allocation145_spill] sm:$0xff] %v7984_v0  ;;  %v5606_v44 = vpop.permute.xlu1 %5605  ;;  %v7989_v23 = vpop.permute.xlu0 %5600  ;;  %v12493_v0 = vld [vmem:[#allocation76_spill] sm:$0xff] }
 0x1f4   :  { %v5608_v60 = vunpack.i.h.bf16 %v5606_v44  ;;  %v5607_v49 = vunpack.i.l.bf16 %v5606_v44  ;;  %v5603_v27 = vunpack.i.h.bf16 %v7989_v23  ;;  %v12414_v19 = vunpack.i.l.bf16 %v7989_v23 }
 0x1f6   :  { %v1075_v31 = vsel %vm12399_vm2, %v5607_v49, %v5608_v60  ;;  %v1076_v59 = vsel %vm12410_vm11, %v5598_v11, %v5607_v49  ;;  %v1082_v3 = vsel %vm12411_vm14, %v5608_v60, %v5587_v43  ;;  %v8015_v1 = vsel %vm12415_vm12, %v12414_v19, %v5603_v27  ;;  %vm12423_vm2 = vmmov %vm12415_vm12 }
 0x1f7   :  { %v8005_v44 = vsel %vm12345_vm10, %v1052_v2, %v1075_v31  ;;  %v8009_v33 = vsel %vm12292_vm3, %v1051_v22, %v1082_v3  ;;  %12416 = vst [vmem:[#allocation148_spill] sm:$0xff] %v8015_v1  ;;  %v8020_v11 = vsel %vm12294_vm15, %v7862_v30, %v1076_v59  ;;  %v12418_v43 = vunpack.i.h.bf16 %v7880_v40  ;;  %v8032_v2 = vpop.permute.xlu2 %5660  ;;  %vm12426_vm11 = vmmov %vm12423_vm2 }
 0x1f8   :  { %12412 = vst [vmem:[#allocation146_spill] sm:$0xff] %v8005_v44  ;;  %3150 = vmatpush.msra.mxu1 %v8005_v44  ;;  %v12419_v22 = vunpack.i.l.bf16 %v7880_v40  ;;  %vm12420_vm14 = vcmp.lt.s32.totalorder %v6324_v13, 116  ;;  %v12421_v30 = vunpack.i.l.bf16 %v7730_v53  ;;  %v12422_v59 = vunpack.i.h.bf16 %v7848_v38  ;;  %vm12428_vm12 = vmmov %vm12423_vm2 }
 0x1f9   :  { %12413 = vst [vmem:[#allocation147_spill] sm:$0xff] %v8009_v33  ;;  %v12424_v40 = vunpack.i.l.bf16 %v7848_v38  ;;  %v12427_v44 = vunpack.i.l.bf16 %v7904_v61 }
 0x1fa   :  { %12417 = vst [vmem:[#allocation149_spill] sm:$0xff] %v8020_v11  ;;  %3151 = vmatpush.msra.mxu1 %v7200_v41  ;;  %v975_v60 = vsel %vm12420_vm14, %v12419_v22, %v12418_v43  ;;  %v952_v19 = vsel %vm12423_vm2, %v12422_v59, %v12421_v30  ;;  %v12425_v43 = vunpack.i.h.bf16 %v7876_v37  ;;  %vm12431_vm14 = vmmov %vm12423_vm2  ;;  %v5633_v59 = vunpack.i.h.bf16 %v7957_v56 }
 0x1fb   :  { %v5611_v49 = vpop.permute.xlu1 %5610  ;;  %v8030_v9 = vpop.permute.xlu0 %5620  ;;  %v8056_v53 = vsel %vm7060_vm13, %v952_v19, %v975_v60  ;;  %v12435_v60 = vunpack.i.l.bf16 %v7771_v24  ;;  %v12437_v19 = vunpack.i.l.bf16 %v7876_v37  ;;  %v12449_v11 = vunpack.i.l.bf16 %v7828_v14 }
 0x1fc   :  { %v5613_v31 = vunpack.i.h.bf16 %v5611_v49  ;;  %v5612_v3 = vunpack.i.l.bf16 %v5611_v49  ;;  %3152 = vmatpush.msra.mxu1 %v7216_v7  ;;  %v954_v22 = vsel %vm12426_vm11, %v12425_v43, %v12424_v40  ;;  %12430 = vst [vmem:[#allocation151_spill] sm:$0xff] %v8056_v53  ;;  %v5632_v40 = vunpack.i.l.bf16 %v7957_v56 }
 0x1fd   :  { %v5622_v43 = vunpack.i.l.bf16 %v8030_v9  ;;  %vm12436_vm11 = vcmp.lt.s32.totalorder %v6324_v13, 116 }
 0x1fe   :  { %v8051_v49 = vsel %vm12428_vm12, %v5613_v31, %v12427_v44  ;;  %3153 = vmatpush.msra.mxu1 %v7269_v42  ;;  %v8060_v38 = vsel %vm12431_vm14, %v5612_v3, %v5613_v31  ;;  %v8064_v30 = vsel %vm12423_vm2, %v5603_v27, %v5612_v3  ;;  %v5623_v44 = vunpack.i.h.bf16 %v8030_v9  ;;  %vm12439_vm12 = vmmov %vm12423_vm2 }
 0x1ff   :  { %12429 = vst [vmem:[#allocation150_spill] sm:$0xff] %v8051_v49  ;;  %v12434_v42 = vunpack.i.h.bf16 %v7771_v24  ;;  %v12438_v27 = vunpack.i.h.bf16 %v7854_v58  ;;  %v12441_v9 = vunpack.i.l.bf16 %v6922_v62  ;;  %v12442_v24 = vunpack.i.h.bf16 %v6876_v55  ;;  %v12450_v62 = vld [vmem:[#allocation62_spill] sm:$0xff]  ;;  %v8131_v7 = vpop.permute.xlu2 %5675  ;;  %v12526_v49 = vld [vmem:[#allocation33_spill] sm:$0xff] }
 0x200   :  { %12432 = vst [vmem:[#allocation152_spill] sm:$0xff] %v8060_v38  ;;  %3154 = vmatpush.msra.mxu1 %v8056_v53  ;;  %vm12443_vm14 = vcmp.lt.s32.totalorder %v6324_v13, 12  ;;  %vm12447_vm2 = vcmp.lt.s32.totalorder %v6324_v13, 124 }
 0x201   :  { %12433 = vst [vmem:[#allocation153_spill] sm:$0xff] %v8064_v30  ;;  %v977_v31 = vsel %vm12436_vm11, %v12435_v60, %v12434_v42  ;;  %v948_v3 = vsel %vm12439_vm12, %v12438_v27, %v12437_v19  ;;  %v806_v42 = vsel %vm12443_vm14, %v12442_v24, %v12441_v9  ;;  %v12444_v60 = vld [vmem:[#allocation61_spill] sm:$0xff]  ;;  %v12448_v27 = vunpack.i.h.bf16 %v7828_v14  ;;  %vm12453_vm12 = vmmov %vm12447_vm2 }
 0x202   :  { %v8085_v56 = vsel %vm7070_vm0, %v954_v22, %v977_v31  ;;  %v12445_v37 = vunpack.i.h.bf16 %v12444_v60  ;;  %v12446_v58 = vunpack.i.l.bf16 %v12444_v60  ;;  %v12451_v31 = vunpack.i.h.bf16 %v12450_v62 }
 0x203   :  { %12440 = vst [vmem:[#allocation154_spill] sm:$0xff] %v8085_v56  ;;  %v971_v22 = vsel %vm12436_vm11, %v12449_v11, %v12448_v27  ;;  %3155 = vmatpush.msra.mxu1 %v8085_v56  ;;  %v12452_v9 = vunpack.i.l.bf16 %v12450_v62  ;;  %vm12454_vm14 = vcmp.lt.s32.totalorder %v6324_v13, 112  ;;  %v5636_v14 = vpop.permute.xlu0 %5635  ;;  %v12457_v62 = vunpack.i.l.bf16 %v6876_v55 }
 0x204   :  { %v829_v19 = vsel %vm12447_vm2, %v12446_v58, %v12445_v37  ;;  %v1584_v60 = vsel %vm12454_vm14, %v5632_v40, %v5633_v59  ;;  %vm12455_vm2 = vcmp.lt.s32.totalorder %v6324_v13, 48  ;;  %v5626_v58 = vpop.permute.xlu1 %5625  ;;  %v8118_v11 = vsel %vm12260_vm6, %v948_v3, %v971_v22 }
 0x205   :  { %v831_v24 = vsel %vm12453_vm12, %v12452_v9, %v12451_v31  ;;  %v1561_v37 = vsel %vm12455_vm2, %v5622_v43, %v5623_v44  ;;  %12456 = vst [vmem:[#allocation61_spill] sm:$0xff] %v8118_v11  ;;  %v5628_v27 = vunpack.i.h.bf16 %v5626_v58  ;;  %v5627_v38 = vunpack.i.l.bf16 %v5626_v58  ;;  %3156 = vmatpush.msra.mxu1 %v8118_v11  ;;  %v12458_v31 = vld [vmem:[#allocation60_spill] sm:$0xff]  ;;  %vm12462_vm12 = vmmov %vm12455_vm2  ;;  %v12479_v11 = vld [vmem:[#allocation75_spill] sm:$0xff] }
 0x206   :  { %v5638_v30 = vunpack.i.h.bf16 %v5636_v14  ;;  %v5637_v56 = vunpack.i.l.bf16 %v5636_v14  ;;  %v12459_v9 = vunpack.i.h.bf16 %v12458_v31  ;;  %vm12460_vm11 = vcmp.lt.s32.totalorder %v6324_v13, 12  ;;  %vm12463_vm14 = vmmov %vm12455_vm2 }
 0x207   :  { %v8129_v1 = vsel %vm7668_vm1, %v806_v42, %v829_v19  ;;  %v1559_v3 = vsel %vm12462_vm12, %v5627_v38, %v5628_v27  ;;  %v1560_v22 = vsel %vm12463_vm14, %v5623_v44, %v5627_v38  ;;  %vm12464_vm2 = vcmp.lt.s32.totalorder %v6324_v13, 112  ;;  %v12468_v19 = vld [vmem:[#allocation78_spill] sm:$0xff]  ;;  %v8191_v15 = vpop.permute.xlu2 %5690 }
 0x208   :  { %v808_v53 = vsel %vm12460_vm11, %v12459_v9, %v12457_v62  ;;  %12461 = vst [vmem:[#allocation62_spill] sm:$0xff] %v8129_v1  ;;  %v1582_v55 = vsel %vm12464_vm2, %v5637_v56, %v5638_v30  ;;  %vm12465_vm15 = vmmov %vm12464_vm2  ;;  %3157 = vmatpush.msra.mxu1 %v8129_v1  ;;  %vm12466_vm11 = vnez %v12205_v17  ;;  %vm12469_vm7 = vnez %v12468_v19  ;;  %v12471_v62 = vld [vmem:[#allocation79_spill] sm:$0xff] }
 0x209   :  { %v1583_v58 = vsel %vm12465_vm15, %v5633_v59, %v5637_v56  ;;  %v8144_v42 = vsel %vm12466_vm11, %v1561_v37, %v1584_v60  ;;  %vm12472_vm12 = vnez %v12471_v62  ;;  %v8156_v38 = vsel %vm7717_vm9, %v808_v53, %v831_v24  ;;  %vm12475_vm15 = vmmov %vm12464_vm2  ;;  %v12482_v1 = vld [vmem:[#allocation87_spill] sm:$0xff] }
 0x20a   :  { %12467 = vst [vmem:[#allocation60_spill] sm:$0xff] %v8144_v42  ;;  %v8148_v14 = vsel %vm12469_vm7, %v1560_v22, %v1583_v58  ;;  %v8152_v31 = vsel %vm12472_vm12, %v1559_v3, %v1582_v55  ;;  %v5648_v59 = vunpack.i.h.bf16 %v7987_v12  ;;  %3158 = vmatpush.msra.mxu1 %v8156_v38  ;;  %v5647_v60 = vunpack.i.l.bf16 %v7987_v12  ;;  %vm12476_vm14 = vmmov %vm12464_vm2 }
 0x20b   :  { %12470 = vst [vmem:[#allocation78_spill] sm:$0xff] %v8148_v14  ;;  %v8162_v44 = vpack.i.bf16 %v8152_v31, %v8148_v14  ;;  %v8166_v56 = vpack.i.bf16 %v8148_v14, %v8144_v42  ;;  %v5651_v24 = vpop.permute.xlu0 %5650  ;;  %vm12477_vm2 = vcmp.lt.s32.totalorder %v6324_v13, 48  ;;  %vm12480_vm10 = vnez %v12479_v11  ;;  %v12522_v14 = vld [vmem:[#allocation38_spill] sm:$0xff] }
 0x20c   :  { %12473 = vst [vmem:[#allocation79_spill] sm:$0xff] %v8152_v31  ;;  %v5641_v53 = vpop.permute.xlu1 %5640  ;;  %v1586_v37 = vsel %vm12475_vm15, %v5648_v59, %v5647_v60  ;;  %v5652_v22 = vunpack.i.l.bf16 %v5651_v24  ;;  %v1585_v55 = vsel %vm12476_vm14, %v5647_v60, %v5632_v40  ;;  %vm12478_vm3 = vmmov %vm12477_vm2  ;;  %vm12483_vm8 = vnez %v12482_v1 }
 0x20d   :  { %12474 = vst [vmem:[#allocation155_spill] sm:$0xff] %v8156_v38  ;;  %5745 = vrot.lane.b32.xlu1 %v8162_v44, %s6259_s13  ;;  %5740 = vrot.lane.b32.xlu0 %v8166_v56, %s6258_s12  ;;  %v5643_v9 = vunpack.i.h.bf16 %v5641_v53  ;;  %v5642_v3 = vunpack.i.l.bf16 %v5641_v53  ;;  %vm12485_vm15 = vmmov %vm12477_vm2  ;;  %v5653_v60 = vunpack.i.h.bf16 %v5651_v24  ;;  %v12491_v50 = vunpack.i.l.bf16 %v8191_v15 }
 0x20e   :  { %v1558_v53 = vsel %vm12485_vm15, %v5628_v27, %v5652_v22  ;;  %vm12487_vm14 = vmmov %vm12477_vm2  ;;  %vm12492_vm1 = vcmp.lt.s32.totalorder %v6324_v13, 16  ;;  %vm12508_vm6 = vnez %v12507_v8  ;;  %v12516_v8 = vld [vmem:[#allocation113_spill] sm:$0xff] }
 0x20f   :  { %v1555_v12 = vsel %vm12477_vm2, %v5642_v3, %v5643_v9  ;;  %v1562_v58 = vsel %vm12478_vm3, %v5643_v9, %v5622_v43  ;;  %vm12486_vm3 = vmmov %vm12477_vm2  ;;  %v1556_v24 = vsel %vm12487_vm14, %v5653_v60, %v5642_v3  ;;  %vm12488_vm2 = vcmp.lt.s32.totalorder %v6324_v13, 112 }
 0x210   :  { %v8183_v38 = vsel %vm12480_vm10, %v1562_v58, %v1585_v55  ;;  %v8187_v41 = vsel %vm12483_vm8, %v1555_v12, %v1586_v37  ;;  %v1557_v55 = vsel %vm12486_vm3, %v5652_v22, %v5653_v60  ;;  %vm12489_vm15 = vmmov %vm12488_vm2  ;;  %vm12494_vm3 = vnez %v12493_v0 }
 0x211   :  { %12481 = vst [vmem:[#allocation75_spill] sm:$0xff] %v8183_v38  ;;  %v8195_v40 = vpack.i.bf16 %v8187_v41, %v8183_v38  ;;  %v8199_v43 = vpack.i.bf16 %v8144_v42, %v8183_v38  ;;  %vm12490_vm9 = vmmov %vm12488_vm2  ;;  %vm12497_vm14 = vnez %v12496_v39 }
 0x212   :  { %12484 = vst [vmem:[#allocation87_spill] sm:$0xff] %v8187_v41  ;;  %vm12504_vm4 = vmmov %vm12492_vm1 }
 0x213   :  { %5750 = vrot.lane.b32.xlu2 %v8195_v40, %s6258_s12  ;;  %v5666_v9 = vpop.permute.xlu0 %5665 }
 0x214   :  { %v5656_v27 = vpop.permute.xlu1 %5655  ;;  %v5668_v42 = vunpack.i.h.bf16 %v5666_v9 }
 0x215   :  { %5760 = vrot.lane.b32.xlu1 %v7706_v28, %s6258_s12  ;;  %5755 = vrot.lane.b32.xlu0 %v8199_v43, %s6259_s13  ;;  %v5658_v12 = vunpack.i.h.bf16 %v5656_v27  ;;  %v5657_v58 = vunpack.i.l.bf16 %v5656_v27 }
 0x216   :  { %v1814_v22 = vsel %vm12492_vm1, %v5668_v42, %v12491_v50 }
 0x217   :  { %v1579_v28 = vsel %vm12488_vm2, %v5658_v12, %v5648_v59  ;;  %v1580_v37 = vsel %vm12489_vm15, %v5657_v58, %v5658_v12  ;;  %v1581_v47 = vsel %vm12490_vm9, %v5638_v30, %v5657_v58  ;;  %v12499_v59 = vld [vmem:[#allocation86_spill] sm:$0xff]  ;;  %v5667_v12 = vunpack.i.l.bf16 %v5666_v9  ;;  %vm12502_vm9 = vmmov %vm12492_vm1 }
 0x218   :  { %v8224_v27 = vsel %vm12494_vm3, %v1558_v53, %v1581_v47  ;;  %v8228_v3 = vsel %vm12497_vm14, %v1557_v55, %v1580_v37  ;;  %vm12500_vm2 = vnez %v12499_v59  ;;  %v5663_v47 = vunpack.i.h.bf16 %v8032_v2 }
 0x219   :  { %12495 = vst [vmem:[#allocation76_spill] sm:$0xff] %v8224_v27  ;;  %v8232_v60 = vsel %vm12500_vm2, %v1556_v24, %v1579_v28  ;;  %v5662_v53 = vunpack.i.l.bf16 %v8032_v2  ;;  %v5678_v37 = vunpack.i.h.bf16 %v8131_v7  ;;  %v5677_v55 = vunpack.i.l.bf16 %v8131_v7 }
 0x21a   :  { %12498 = vst [vmem:[#allocation77_spill] sm:$0xff] %v8228_v3  ;;  %v8236_v30 = vpack.i.bf16 %v8187_v41, %v8232_v60  ;;  %v8240_v50 = vpack.i.bf16 %v8232_v60, %v8228_v3  ;;  %v1815_v24 = vsel %vm12492_vm1, %v5667_v12, %v5668_v42  ;;  %vm12503_vm15 = vcmp.lt.s32.totalorder %v6324_v13, 80 }
 0x21b   :  { %12501 = vst [vmem:[#allocation86_spill] sm:$0xff] %v8232_v60  ;;  %5765 = vrot.lane.b32.xlu2 %v7659_v52, %s6259_s13  ;;  %v5681_v58 = vpop.permute.xlu0 %5680  ;;  %v1817_v41 = vsel %vm12502_vm9, %v5662_v53, %v5663_v47  ;;  %v1838_v7 = vsel %vm12503_vm15, %v5677_v55, %v5678_v37  ;;  %v1816_v32 = vsel %vm12504_vm4, %v5663_v47, %v5667_v12  ;;  %vm12505_vm5 = vmmov %vm12503_vm15  ;;  %v12519_v60 = vld [vmem:[#allocation28_spill] sm:$0xff] }
 0x21c   :  { %v5671_v9 = vpop.permute.xlu1 %5670  ;;  %vm12506_vm0 = vmmov %vm12505_vm5  ;;  %v8266_v42 = vsel %vm12508_vm6, %v1815_v24, %v1838_v7  ;;  %vm12514_vm9 = vnez %v12513_v63  ;;  %vm12520_vm15 = vnez %v12519_v60 }
 0x21d   :  { %5775 = vrot.lane.b32.xlu1 %v8236_v30, %s6259_s13  ;;  %5770 = vrot.lane.b32.xlu0 %v8240_v50, %s6258_s12  ;;  %v5673_v28 = vunpack.i.h.bf16 %v5671_v9  ;;  %v5672_v2 = vunpack.i.l.bf16 %v5671_v9  ;;  %12509 = vst [vmem:[#allocation41_spill] sm:$0xff] %v8266_v42  ;;  %v12510_v9 = vld [vmem:[#allocation32_spill] sm:$0xff]  ;;  %vm12518_vm6 = vmmov %vm12506_vm0 }
 0x21e   :  { %vm12511_vm1 = vnez %v12510_v9 }
 0x21f   :  { %v1839_v16 = vsel %vm12505_vm5, %v5673_v28, %v5677_v55  ;;  %v1840_v18 = vsel %vm12506_vm0, %v5672_v2, %v5673_v28  ;;  %v5683_v55 = vunpack.i.h.bf16 %v5681_v58  ;;  %v5682_v28 = vunpack.i.l.bf16 %v5681_v58  ;;  %vm12517_vm5 = vmmov %vm12504_vm4 }
 0x220   :  { %v8270_v33 = vsel %vm12511_vm1, %v1817_v41, %v1840_v18  ;;  %v8274_v21 = vsel %vm12514_vm9, %v1816_v32, %v1839_v16  ;;  %vm12523_vm1 = vnez %v12522_v14  ;;  %vm12525_vm9 = vmmov %vm12506_vm0 }
 0x221   :  { %12512 = vst [vmem:[#allocation32_spill] sm:$0xff] %v8270_v33  ;;  %v5779_v12 = vpack.i.bf16 %v8274_v21, %v8270_v33  ;;  %v5784_v47 = vpack.i.bf16 %v8266_v42, %v8274_v21  ;;  %v1818_v24 = vsel %vm12504_vm4, %v5683_v55, %v5662_v53  ;;  %v1811_v7 = vsel %vm12517_vm5, %v5682_v28, %v5683_v55  ;;  %vm12529_vm5 = vmmov %vm12506_vm0 }
 0x222   :  { %12515 = vst [vmem:[#allocation40_spill] sm:$0xff] %v8274_v21  ;;  %v5693_v55 = vunpack.i.h.bf16 %v8191_v15  ;;  %vm12527_vm4 = vnez %v12526_v49  ;;  %v12531_v49 = vunpack.i.l.bf16 %v8191_v15  ;;  %v12540_v15 = vld [vmem:[#allocation115_spill] sm:$0xff] }
 0x223   :  { %5780 = vrot.lane.b32.xlu2 %v5779_v12, %s6260_s14  ;;  %v5696_v41 = vpop.permute.xlu0 %5695 }
 0x224   :  { %v5686_v18 = vpop.permute.xlu1 %5685  ;;  %v5697_v32 = vunpack.i.l.bf16 %v5696_v41 }
 0x225   :  { %5790 = vrot.lane.b32.xlu1 %v12516_v8, %s6260_s14  ;;  %5785 = vrot.lane.b32.xlu0 %v5784_v47, %s6261_s15  ;;  %v5688_v63 = vunpack.i.h.bf16 %v5686_v18  ;;  %v5687_v16 = vunpack.i.l.bf16 %v5686_v18  ;;  %v5698_v8 = vunpack.i.h.bf16 %v5696_v41 }
 0x226   :  { %v1837_v53 = vsel %vm12525_vm9, %v5678_v37, %v5697_v32  ;;  %v12530_v37 = vld [vmem:[#allocation108_spill] sm:$0xff] }
 0x227   :  { %v1841_v58 = vsel %vm12506_vm0, %v5687_v16, %v5672_v2  ;;  %v1842_v9 = vsel %vm12518_vm6, %v5688_v63, %v5687_v16  ;;  %v8305_v2 = vsel %vm12527_vm4, %v1814_v22, %v1837_v53  ;;  %v1835_v14 = vsel %vm12529_vm5, %v5698_v8, %v5688_v63  ;;  %v12542_v53 = vld [vmem:[#allocation107_spill] sm:$0xff] }
 0x228   :  { %v8294_v38 = vsel %vm12520_vm15, %v1818_v24, %v1841_v58  ;;  %v8298_v18 = vsel %vm12523_vm1, %v1811_v7, %v1842_v9  ;;  %12528 = vst [vmem:[#allocation38_spill] sm:$0xff] %v8305_v2  ;;  %v1836_v16 = vsel %vm12506_vm0, %v5697_v32, %v5698_v8  ;;  %vm12532_vm6 = vcmp.lt.s32.totalorder %v6324_v13, 16  ;;  %v12534_v7 = vld [vmem:[#allocation34_spill] sm:$0xff] }
 0x229   :  { %12521 = vst [vmem:[#allocation113_spill] sm:$0xff] %v8294_v38  ;;  %v5804_v41 = vpack.i.bf16 %v8270_v33, %v8294_v38  ;;  %v5799_v60 = vpack.i.bf16 %v8298_v18, %v8294_v38  ;;  %v1813_v22 = vsel %vm12532_vm6, %v12531_v49, %v5693_v55  ;;  %vm12533_vm15 = vmmov %vm12532_vm6  ;;  %vm12535_vm1 = vnez %v12534_v7  ;;  %v12537_v32 = vld [vmem:[#allocation30_spill] sm:$0xff] }
 0x22a   :  { %12524 = vst [vmem:[#allocation28_spill] sm:$0xff] %v8298_v18  ;;  %v1812_v24 = vsel %vm12533_vm15, %v5693_v55, %v5682_v28  ;;  %v8327_v63 = vsel %vm12535_vm1, %v1813_v22, %v1836_v16  ;;  %vm12538_vm9 = vnez %v12537_v32  ;;  %v12541_v8 = vld [vmem:[#allocation114_spill] sm:$0xff]  ;;  %v12543_v55 = vld [vmem:[#allocation117_spill] sm:$0xff]  ;;  %vm12544_vm4 = vcmp.lt.s32.totalorder %v6324_v13, 112 }
 0x22b   :  { %5795 = vrot.lane.b32.xlu2 %v12530_v37, %s6261_s15  ;;  %12536 = vst [vmem:[#allocation33_spill] sm:$0xff] %v8327_v63  ;;  %v8331_v58 = vsel %vm12538_vm9, %v1812_v24, %v1835_v14  ;;  %v8355_v14 = vpop.permute.xlu2 %5705  ;;  %v5711_v49 = vpop.permute.xlu0 %5710  ;;  %vm12545_vm5 = vmmov %vm12544_vm4  ;;  %vm12547_vm6 = vcmp.lt.s32.totalorder %v6324_v13, 48 }
 0x22c   :  { %12539 = vst [vmem:[#allocation108_spill] sm:$0xff] %v8331_v58  ;;  %v5819_v9 = vpack.i.bf16 %v8331_v58, %v8327_v63  ;;  %v5824_v28 = vpack.i.bf16 %v8298_v18, %v8331_v58  ;;  %v5701_v16 = vpop.permute.xlu1 %5700  ;;  %vm12546_vm0 = vmmov %vm12544_vm4  ;;  %v6014_v18 = vpack.i.bf16 %v8305_v2, %v6402_v54 }
 0x22d   :  { %5805 = vrot.lane.b32.xlu1 %v5804_v41, %s6261_s15  ;;  %5800 = vrot.lane.b32.xlu0 %v5799_v60, %s6260_s14  ;;  %vm12548_vm15 = vmmov %vm12546_vm0 }
 0x22e   :  { %vm12549_vm1 = vmmov %vm12547_vm6 }
 0x22f   :  { %vm12550_vm9 = vmmov %vm12549_vm1 }
 0x233   :  { %5810 = vrot.lane.b32.xlu2 %v12540_v15, %s6260_s14  ;;  %v5702_v15 = vunpack.i.l.bf16 %v5701_v16 }
 0x235   :  { %5820 = vrot.lane.b32.xlu1 %v5819_v9, %s6260_s14  ;;  %5815 = vrot.lane.b32.xlu0 %v12541_v8, %s6261_s15 }
 0x23b   :  { %5825 = vrot.lane.b32.xlu2 %v5824_v28, %s6261_s15 }
 0x23d   :  { %5835 = vrot.lane.b32.xlu1 %v12542_v53, %s6261_s15  ;;  %5830 = vrot.lane.b32.xlu0 %v12543_v55, %s6260_s14  ;;  %v5707_v55 = vunpack.i.l.bf16 %v8355_v14 }
 0x243   :  { %5840 = vrot.lane.b32.xlu2 %v5779_v12, %s6258_s12  ;;  %v5721_v12 = vpop.permute.xlu2 %5720 }
 0x244   :  { %v5723_v24 = vunpack.i.h.bf16 %v5721_v12  ;;  %v5722_v7 = vunpack.i.l.bf16 %v5721_v12 }
 0x245   :  { %5850 = vrot.lane.b32.xlu1 %v12530_v37, %s6259_s13  ;;  %5845 = vrot.lane.b32.xlu0 %v5784_v47, %s6259_s13  ;;  %v5716_v47 = vpop.permute.xlu1 %5715 }
 0x246   :  { %v5718_v32 = vunpack.i.h.bf16 %v5716_v47  ;;  %v2236_v12 = vsel %vm12549_vm1, %v5722_v7, %v5723_v24 }
 0x24b   :  { %5855 = vrot.lane.b32.xlu2 %v5799_v60, %s6258_s12  ;;  %v5717_v60 = vunpack.i.l.bf16 %v5716_v47  ;;  %v5736_v47 = vpop.permute.xlu2 %5735 }
 0x24c   :  { %v5737_v19 = vunpack.i.l.bf16 %v5736_v47 }
 0x24d   :  { %5865 = vrot.lane.b32.xlu1 %v12541_v8, %s6259_s13  ;;  %5860 = vrot.lane.b32.xlu0 %v5804_v41, %s6259_s13  ;;  %v5726_v41 = vpop.permute.xlu0 %5725  ;;  %v5713_v8 = vunpack.i.h.bf16 %v5711_v49 }
 0x24e   :  { %v5728_v37 = vunpack.i.h.bf16 %v5726_v41  ;;  %v5727_v22 = vunpack.i.l.bf16 %v5726_v41  ;;  %v5731_v41 = vpop.permute.xlu1 %5730 }
 0x253   :  { %5870 = vrot.lane.b32.xlu2 %v5819_v9, %s6258_s12  ;;  %v5703_v9 = vunpack.i.h.bf16 %v5701_v16 }
 0x255   :  { %5880 = vrot.lane.b32.xlu1 %v12542_v53, %s6259_s13  ;;  %5875 = vrot.lane.b32.xlu0 %v5824_v28, %s6259_s13  ;;  %v5712_v28 = vunpack.i.l.bf16 %v5711_v49  ;;  %v5708_v53 = vunpack.i.h.bf16 %v8355_v14  ;;  %v2263_v49 = vsel %vm12548_vm15, %v5717_v60, %v5718_v32 }
 0x257   :  { %v2235_v16 = vsel %vm12547_vm6, %v5723_v24, %v5708_v53  ;;  %vm12571_vm6 = vcmp.lt.s32.totalorder %v6324_v13, 4 }
 0x258   :  { %vm12572_vm15 = vmmov %vm12571_vm6 }
 0x25b   :  { %5885 = vrot.lane.b32.xlu2 %v8166_v56, %s6260_s14  ;;  %v2259_v56 = vsel %vm12545_vm5, %v5727_v22, %v5728_v37  ;;  %vm12552_vm5 = vmmov %vm12546_vm0 }
 0x25c   :  { %v2265_v14 = vsel %vm12552_vm5, %v5712_v28, %v5713_v8 }
 0x25d   :  { %5895 = vrot.lane.b32.xlu1 %v8195_v40, %s6260_s14  ;;  %5890 = vrot.lane.b32.xlu0 %v8162_v44, %s6261_s15  ;;  %v2264_v40 = vsel %vm12544_vm4, %v5713_v8, %v5717_v60  ;;  %v2266_v44 = vsel %vm12546_vm0, %v5728_v37, %v5712_v28  ;;  %vm12551_vm4 = vmmov %vm12549_vm1  ;;  %v8401_v37 = vsel %vm12500_vm2, %v2236_v12, %v2259_v56  ;;  %vm12570_vm2 = vcmp.lt.s32.totalorder %v6324_v13, 116 }
 0x25e   :  { %vm12553_vm0 = vmmov %vm12549_vm1  ;;  %12555 = vst [vmem:[#allocation30_spill] sm:$0xff] %v8401_v37  ;;  %v8405_v24 = vsel %vm12483_vm8, %v2235_v16, %v2266_v44  ;;  %v5939_v44 = vpack.i.bf16 %v8305_v2, %v8401_v37 }
 0x25f   :  { %v2240_v60 = vsel %vm12553_vm0, %v5703_v9, %v5707_v55  ;;  %12556 = vst [vmem:[#allocation115_spill] sm:$0xff] %v8405_v24  ;;  %v5924_v17 = vpack.i.bf16 %v8405_v24, %v8401_v37  ;;  %vm12562_vm8 = vmmov %vm12553_vm0 }
 0x260   :  { %vm12576_vm1 = vmmov %vm12571_vm6 }
 0x263   :  { %5900 = vrot.lane.b32.xlu2 %v8199_v43, %s6261_s15  ;;  %v2242_v43 = vsel %vm12551_vm4, %v5708_v53, %v5702_v15  ;;  %vm12578_vm4 = vmmov %vm12570_vm2 }
 0x264   :  { %v8413_v8 = vsel %vm12480_vm10, %v2242_v43, %v2265_v14  ;;  %vm12560_vm10 = vmmov %vm12552_vm5 }
 0x265   :  { %5910 = vrot.lane.b32.xlu1 %v8236_v30, %s6261_s15  ;;  %5905 = vrot.lane.b32.xlu0 %v8240_v50, %s6260_s14  ;;  %v2241_v30 = vsel %vm12550_vm9, %v5702_v15, %v5703_v9  ;;  %v8409_v15 = vsel %vm12469_vm7, %v2240_v60, %v2263_v49  ;;  %12558 = vst [vmem:[#allocation107_spill] sm:$0xff] %v8413_v8  ;;  %v5732_v9 = vunpack.i.l.bf16 %v5731_v41  ;;  %vm12559_vm7 = vmmov %vm12553_vm0  ;;  %v5738_v49 = vunpack.i.h.bf16 %v5736_v47 }
 0x266   :  { %v8397_v50 = vsel %vm12466_vm11, %v2241_v30, %v2264_v40  ;;  %12557 = vst [vmem:[#allocation114_spill] sm:$0xff] %v8409_v15  ;;  %v2260_v53 = vsel %vm12560_vm10, %v5737_v19, %v5727_v22  ;;  %v5733_v40 = vunpack.i.h.bf16 %v5731_v41  ;;  %v5929_v16 = vpack.i.bf16 %v8405_v24, %v8413_v8  ;;  %vm12563_vm11 = vmmov %vm12552_vm5 }
 0x267   :  { %12554 = vst [vmem:[#allocation34_spill] sm:$0xff] %v8397_v50  ;;  %v5914_v59 = vpack.i.bf16 %v8397_v50, %v8413_v8  ;;  %v5919_v1 = vpack.i.bf16 %v8409_v15, %v8397_v50  ;;  %v2237_v11 = vsel %vm12559_vm7, %v5732_v9, %v5722_v7  ;;  %v2262_v39 = vsel %vm12563_vm11, %v5718_v32, %v5738_v49  ;;  %vm12577_vm9 = vmmov %vm12576_vm1 }
 0x268   :  { %v8432_v56 = vsel %vm12497_vm14, %v2237_v11, %v2260_v53  ;;  %v2239_v12 = vsel %vm12562_vm8, %v5707_v55, %v5733_v40  ;;  %v5944_v55 = vpack.i.bf16 %v8409_v15, %v6394_v51  ;;  %vm12565_vm14 = vmmov %vm12553_vm0  ;;  %vm12580_vm0 = vnez %v12166_v29 }
 0x269   :  { %12561 = vst [vmem:[#allocation117_spill] sm:$0xff] %v8432_v56  ;;  %v5934_v7 = vpack.i.bf16 %v8266_v42, %v8432_v56  ;;  %v8451_v30 = vsel %vm12472_vm12, %v2239_v12, %v2262_v39  ;;  %v2238_v32 = vsel %vm12565_vm14, %v5733_v40, %v5732_v9  ;;  %vm12567_vm12 = vmmov %vm12552_vm5  ;;  %vm12582_vm7 = vnez %v12171_v48 }
 0x26a   :  { %12564 = vst [vmem:[#allocation156_spill] sm:$0xff] %v8451_v30  ;;  %v5954_v47 = vpack.i.bf16 %v8413_v8, %v8451_v30  ;;  %v5949_v43 = vpack.i.bf16 %v8451_v30, %v6412_v57  ;;  %v2261_v41 = vsel %vm12567_vm12, %v5738_v49, %v5737_v19  ;;  %v5964_v49 = vpack.i.bf16 %v8401_v37, %v8397_v50  ;;  %vm12579_vm5 = vmmov %vm12570_vm2 }
 0x26b   :  { %5915 = vrot.lane.b32.xlu2 %v5914_v59, %s6260_s14  ;;  %vm12584_vm10 = vnez %v12102_v6  ;;  %vm12588_vm8 = vmmov %vm12570_vm2 }
 0x26c   :  { %vm12589_vm11 = vmmov %vm12570_vm2 }
 0x26d   :  { %5925 = vrot.lane.b32.xlu1 %v5924_v17, %s6260_s14  ;;  %5920 = vrot.lane.b32.xlu0 %v5919_v1, %s6261_s15  ;;  %v8426_v28 = vpop.permute.xlu2 %5750  ;;  %v8476_v1 = vsel %vm12494_vm3, %v2238_v32, %v2261_v41  ;;  %vm12575_vm3 = vmmov %vm12570_vm2 }
 0x26e   :  { %12569 = vst [vmem:[#allocation159_spill] sm:$0xff] %v8476_v1  ;;  %v5752_v9 = vunpack.i.l.bf16 %v8426_v28  ;;  %vm12590_vm14 = vmmov %vm12576_vm1 }
 0x26f   :  { %vm12591_vm12 = vmmov %vm12576_vm1 }
 0x273   :  { %5930 = vrot.lane.b32.xlu2 %v5929_v16, %s6261_s15 }
 0x275   :  { %5940 = vrot.lane.b32.xlu1 %v5939_v44, %s6261_s15  ;;  %5935 = vrot.lane.b32.xlu0 %v5934_v7, %s6260_s14  ;;  %v8447_v22 = vpop.permute.xlu2 %5765  ;;  %v5969_v44 = vpack.i.bf16 %v8413_v8, %v8409_v15  ;;  %v5959_v7 = vpack.i.bf16 %v8397_v50, %v8476_v1 }
 0x276   :  { %v11584_v12 = vunpack.i.h.bf16 %v8447_v22  ;;  %v11581_v39 = vunpack.i.l.bf16 %v8447_v22 }
 0x27b   :  { %5945 = vrot.lane.b32.xlu2 %v5944_v55, %s6258_s12 }
 0x27d   :  { %5955 = vrot.lane.b32.xlu1 %v5954_v47, %s6258_s12  ;;  %5950 = vrot.lane.b32.xlu0 %v5949_v43, %s6259_s13  ;;  %v8466_v14 = vpop.permute.xlu2 %5780  ;;  %v5753_v47 = vunpack.i.h.bf16 %v8426_v28 }
 0x27f   :  { %v8464_v62 = vpop.permute.xlu1 %5745  ;;  %v8472_v59 = vpop.permute.xlu0 %5740 }
 0x280   :  { %12566 = vst [vmem:[#allocation157_spill] sm:$0xff] %v8464_v62  ;;  %v11580_v60 = vunpack.i.h.bf16 %v8464_v62  ;;  %v5747_v17 = vunpack.i.l.bf16 %v8464_v62  ;;  %v11583_v11 = vunpack.i.h.bf16 %v8472_v59  ;;  %v5742_v53 = vunpack.i.l.bf16 %v8472_v59 }
 0x281   :  { %12568 = vst [vmem:[#allocation158_spill] sm:$0xff] %v8472_v59 }
 0x282   :  { %v1639_v19 = vsel %vm12570_vm2, %v5747_v17, %v11580_v60  ;;  %v1616_v40 = vsel %vm12571_vm6, %v5742_v53, %v11583_v11  ;;  %v1617_v0 = vsel %vm12572_vm15, %v5752_v9, %v5742_v53  ;;  %vm12593_vm2 = vnez %v12098_v5 }
 0x283   :  { %v8495_v16 = vsel %vm7060_vm13, %v1616_v40, %v1639_v19  ;;  %5960 = vrot.lane.b32.xlu2 %v5959_v7, %s6259_s13  ;;  %v1618_v7 = vsel %vm12577_vm9, %v5753_v47, %v5752_v9  ;;  %v5979_v9 = vpack.i.bf16 %v8401_v37, %v8405_v24  ;;  %vm12598_vm6 = vcmp.lt.s32.totalorder %v6324_v13, 124 }
 0x284   :  { %12573 = vst [vmem:[#allocation160_spill] sm:$0xff] %v8495_v16  ;;  %3163 = vmatpush.msra.mxu2 %v8495_v16  ;;  %vm12599_vm15 = vcmp.lt.s32.totalorder %v6324_v13, 12  ;;  %vm12603_vm9 = vmmov %vm12598_vm6 }
 0x285   :  { %5970 = vrot.lane.b32.xlu1 %v5969_v44, %s6259_s13  ;;  %5965 = vrot.lane.b32.xlu0 %v5964_v49, %s6258_s12  ;;  %v8510_v43 = vpop.permute.xlu2 %5795  ;;  %v2075_v44 = vsel %vm12575_vm3, %v11581_v39, %v11584_v12  ;;  %vm12600_vm3 = vmmov %vm12599_vm15 }
 0x286   :  { %v12625_v59 = vunpack.i.l.bf16 %v8510_v43 }
 0x287   :  { %v8508_v55 = vpop.permute.xlu1 %5760  ;;  %v5756_v53 = vpop.permute.xlu0 %5755 }
 0x288   :  { %12574 = vst [vmem:[#allocation161_spill] sm:$0xff] %v8508_v55  ;;  %v11585_v32 = vunpack.i.h.bf16 %v8508_v55  ;;  %v11582_v41 = vunpack.i.l.bf16 %v8508_v55  ;;  %v5758_v19 = vunpack.i.h.bf16 %v5756_v53  ;;  %v5757_v40 = vunpack.i.l.bf16 %v5756_v53 }
 0x28a   :  { %v2052_v28 = vsel %vm12576_vm1, %v11582_v41, %v11585_v32  ;;  %v1640_v49 = vsel %vm12578_vm4, %v5758_v19, %v5747_v17  ;;  %v1641_v53 = vsel %vm12579_vm5, %v5757_v40, %v5758_v19  ;;  %v5974_v41 = vpack.i.bf16 %v8432_v56, %v8405_v24  ;;  %vm12602_vm1 = vmmov %vm12600_vm3 }
 0x28b   :  { %v8534_v60 = vsel %vm12580_vm0, %v2052_v28, %v2075_v44  ;;  %v8538_v39 = vsel %vm12582_vm7, %v1618_v7, %v1641_v53  ;;  %v8547_v17 = vsel %vm12584_vm10, %v1617_v0, %v1640_v49  ;;  %v11596_v32 = vunpack.i.h.bf16 %v8510_v43  ;;  %vm12607_vm5 = vmmov %vm12598_vm6 }
 0x28c   :  { %12581 = vst [vmem:[#allocation162_spill] sm:$0xff] %v8534_v60  ;;  %3183 = vmatpush.msra.mxu3 %v8534_v60  ;;  %3164 = vmatpush.msra.mxu2 %v8538_v39  ;;  %v11597_v60 = vunpack.i.l.bf16 %v8510_v43  ;;  %vm12604_vm4 = vnez %v12325_v35 }
 0x28d   :  { %12583 = vst [vmem:[#allocation163_spill] sm:$0xff] %v8538_v39  ;;  %5985 = vrot.lane.b32.xlu1 %v7623_v34, %s6260_s14  ;;  %5975 = vrot.lane.b32.xlu2 %v5974_v41, %s6258_s12  ;;  %v8556_v44 = vpop.permute.xlu2 %5810 }
 0x28e   :  { %12585 = vst [vmem:[#allocation164_spill] sm:$0xff] %v8547_v17  ;;  %5980 = vrot.lane.b32.xlu0 %v5979_v9, %s6259_s13 }
 0x28f   :  { %v8554_v19 = vpop.permute.xlu1 %5775  ;;  %v8560_v53 = vpop.permute.xlu0 %5770 }
 0x290   :  { %12586 = vst [vmem:[#allocation165_spill] sm:$0xff] %v8554_v19  ;;  %v5778_v28 = vunpack.i.h.bf16 %v8554_v19  ;;  %v11589_v7 = vunpack.i.l.bf16 %v8554_v19  ;;  %v5773_v0 = vunpack.i.h.bf16 %v8560_v53  ;;  %v11590_v49 = vunpack.i.l.bf16 %v8560_v53 }
 0x291   :  { %12587 = vst [vmem:[#allocation166_spill] sm:$0xff] %v8560_v53 }
 0x292   :  { %v1635_v41 = vsel %vm12588_vm8, %v11589_v7, %v5778_v28  ;;  %v1642_v9 = vsel %vm12589_vm11, %v5778_v28, %v5757_v40  ;;  %v1611_v11 = vsel %vm12590_vm14, %v5773_v0, %v5753_v47  ;;  %v1612_v12 = vsel %vm12591_vm12, %v11590_v49, %v5773_v0  ;;  %v12595_v47 = vld [vmem:[#allocation124_spill] sm:$0xff]  ;;  %v12596_v28 = vld [vmem:[#allocation118_spill] sm:$0xff]  ;;  %vm12608_vm8 = vmmov %vm12607_vm5 }
 0x293   :  { %v8580_v19 = vsel %vm12580_vm0, %v1612_v12, %v1635_v41  ;;  %v8584_v7 = vsel %vm12593_vm2, %v1611_v11, %v1642_v9  ;;  %v5812_v40 = vunpack.i.l.bf16 %v8556_v44  ;;  %v5782_v0 = vunpack.i.l.bf16 %v8466_v14  ;;  %vm12609_vm11 = vmmov %vm12607_vm5 }
 0x294   :  { %12592 = vst [vmem:[#allocation167_spill] sm:$0xff] %v8580_v19  ;;  %3165 = vmatpush.msra.mxu2 %v8580_v19  ;;  %v1503_v9 = vsel %vm12598_vm6, %v11597_v60, %v11596_v32  ;;  %v12601_v32 = vunpack.i.h.bf16 %v8466_v14  ;;  %vm12610_vm14 = vmmov %vm12602_vm1  ;;  %vm12613_vm6 = vnez %v12339_v20 }
 0x295   :  { %12594 = vst [vmem:[#allocation168_spill] sm:$0xff] %v8584_v7  ;;  %6000 = vrot.lane.b32.xlu1 %v12595_v47, %s6261_s15  ;;  %5990 = vrot.lane.b32.xlu2 %v12596_v28, %s6261_s15  ;;  %v8598_v11 = vpop.permute.xlu2 %5825  ;;  %vm12611_vm12 = vmmov %vm12602_vm1 }
 0x296   :  { %5995 = vrot.lane.b32.xlu0 %v7561_v26, %s6260_s14  ;;  %v1976_v60 = vsel %vm12602_vm1, %v5782_v0, %v12601_v32 }
 0x297   :  { %v8596_v41 = vpop.permute.xlu1 %5790  ;;  %v8608_v26 = vpop.permute.xlu0 %5785 }
 0x298   :  { %12597 = vst [vmem:[#allocation124_spill] sm:$0xff] %v8596_v41  ;;  %v11603_v47 = vunpack.i.h.bf16 %v8596_v41  ;;  %v5792_v49 = vunpack.i.l.bf16 %v8596_v41  ;;  %v11604_v12 = vunpack.i.h.bf16 %v8608_v26  ;;  %v5787_v19 = vunpack.i.l.bf16 %v8608_v26 }
 0x29a   :  { %v1480_v53 = vsel %vm12599_vm15, %v5792_v49, %v11603_v47  ;;  %v1481_v39 = vsel %vm12600_vm3, %v5812_v40, %v5792_v49  ;;  %v1999_v16 = vsel %vm12603_vm9, %v5787_v19, %v11604_v12  ;;  %vm12615_vm15 = vnez %v12131_v45  ;;  %vm12617_vm3 = vmmov %vm12602_vm1 }
 0x29b   :  { %v8630_v41 = vsel %vm12604_vm4, %v1480_v53, %v1503_v9  ;;  %v8634_v49 = vsel %vm12604_vm4, %v1976_v60, %v1999_v16  ;;  %v5828_v53 = vunpack.i.h.bf16 %v8598_v11  ;;  %vm12619_vm1 = vmmov %vm12607_vm5 }
 0x29c   :  { %12605 = vst [vmem:[#allocation118_spill] sm:$0xff] %v8630_v41  ;;  %3166 = vmatpush.msra.mxu2 %v8630_v41  ;;  %3184 = vmatpush.msra.mxu3 %v8634_v49  ;;  %vm12620_vm9 = vmmov %vm12617_vm3 }
 0x29d   :  { %12606 = vst [vmem:[#allocation169_spill] sm:$0xff] %v8634_v49  ;;  %6015 = vrot.lane.b32.xlu1 %v6014_v18, %s6260_s14  ;;  %6005 = vrot.lane.b32.xlu2 %v7659_v52, %s6260_s14  ;;  %v8643_v47 = vpop.permute.xlu2 %5840  ;;  %v12618_v49 = vunpack.i.l.bf16 %v8598_v11 }
 0x29e   :  { %6010 = vrot.lane.b32.xlu0 %v7702_v25, %s6261_s15 }
 0x29f   :  { %v5806_v32 = vpop.permute.xlu1 %5805  ;;  %v5801_v16 = vpop.permute.xlu0 %5800 }
 0x2a0   :  { %v5808_v9 = vunpack.i.h.bf16 %v5806_v32  ;;  %v5807_v60 = vunpack.i.l.bf16 %v5806_v32  ;;  %v5803_v12 = vunpack.i.h.bf16 %v5801_v16  ;;  %v5802_v41 = vunpack.i.l.bf16 %v5801_v16  ;;  %v12612_v32 = vld [vmem:[#allocation24_spill] sm:$0xff] }
 0x2a1   :  { %v6029_v17 = vpack.i.bf16 %v12612_v32, %v8305_v2 }
 0x2a2   :  { %v2000_v33 = vsel %vm12607_vm5, %v5808_v9, %v5787_v19  ;;  %v2001_v18 = vsel %vm12608_vm8, %v5807_v60, %v5808_v9  ;;  %v2002_v52 = vsel %vm12609_vm11, %v5828_v53, %v5807_v60  ;;  %v1977_v25 = vsel %vm12610_vm14, %v5802_v41, %v5782_v0  ;;  %vm12621_vm5 = vmmov %vm12617_vm3 }
 0x2a3   :  { %v1978_v7 = vsel %vm12611_vm12, %v5803_v12, %v5802_v41  ;;  %v6019_v19 = vpack.i.bf16 %v8327_v63, %v6378_v46  ;;  %v6024_v9 = vpack.i.bf16 %v6412_v57, %v8266_v42  ;;  %v8668_v60 = vsel %vm12615_vm15, %v1977_v25, %v2000_v33  ;;  %vm12626_vm11 = vmmov %vm12619_vm1 }
 0x2a4   :  { %v8660_v16 = vsel %vm12613_vm6, %v1978_v7, %v2001_v18  ;;  %12616 = vst [vmem:[#allocation171_spill] sm:$0xff] %v8668_v60  ;;  %v5813_v0 = vunpack.i.h.bf16 %v8556_v44  ;;  %v1995_v42 = vsel %vm12619_vm1, %v12618_v49, %v5828_v53  ;;  %vm12624_vm8 = vcmp.lt.s32.totalorder %v6324_v13, 4  ;;  %vm12627_vm14 = vmmov %vm12619_vm1 }
 0x2a5   :  { %12614 = vst [vmem:[#allocation170_spill] sm:$0xff] %v8660_v16  ;;  %3185 = vmatpush.msra.mxu3 %v8660_v16  ;;  %6030 = vrot.lane.b32.xlu1 %v6029_v17, %s6259_s13  ;;  %v8678_v18 = vpop.permute.xlu2 %5855  ;;  %vm12628_vm12 = vnez %v12148_v4 }
 0x2a6   :  { %6020 = vrot.lane.b32.xlu2 %v6019_v19, %s6261_s15  ;;  %6025 = vrot.lane.b32.xlu0 %v6024_v9, %s6258_s12  ;;  %v1482_v17 = vsel %vm12617_vm3, %v5813_v0, %v5812_v40  ;;  %v6044_v9 = vpack.i.bf16 %v12612_v32, %v8152_v31  ;;  %v12622_v40 = vunpack.i.l.bf16 %v8643_v47  ;;  %vm12630_vm3 = vnez %v12151_v36  ;;  %v12834_v36 = vld [vmem:[#allocation25_spill] sm:$0xff] }
 0x2a7   :  { %v8676_v7 = vpop.permute.xlu1 %5820  ;;  %v5816_v16 = vpop.permute.xlu0 %5815 }
 0x2a8   :  { %v5823_v33 = vunpack.i.h.bf16 %v8676_v7  ;;  %v11620_v44 = vunpack.i.l.bf16 %v8676_v7  ;;  %v5818_v41 = vunpack.i.h.bf16 %v5816_v16  ;;  %v5817_v19 = vunpack.i.l.bf16 %v5816_v16 }
 0x2a9   :  { %v12623_v16 = vunpack.i.l.bf16 %v8678_v18 }
 0x2aa   :  { %v1971_v60 = vsel %vm12620_vm9, %v5823_v33, %v5803_v12  ;;  %v1972_v25 = vsel %vm12621_vm5, %v11620_v44, %v5823_v33  ;;  %v1504_v49 = vsel %vm12626_vm11, %v5818_v41, %v12625_v59  ;;  %v1505_v12 = vsel %vm12627_vm14, %v5817_v19, %v5818_v41  ;;  %vm12637_vm9 = vmmov %vm12619_vm1 }
 0x2ab   :  { %v8704_v62 = vsel %vm12624_vm8, %v12623_v16, %v12622_v40  ;;  %v8714_v53 = vsel %vm12628_vm12, %v1972_v25, %v1995_v42  ;;  %v8718_v33 = vsel %vm12630_vm3, %v1971_v60, %v2002_v52  ;;  %v8722_v40 = vsel %vm12613_vm6, %v1482_v17, %v1505_v12  ;;  %vm12638_vm5 = vmmov %vm12624_vm8 }
 0x2ac   :  { %12629 = vst [vmem:[#allocation172_spill] sm:$0xff] %v8714_v53  ;;  %3186 = vmatpush.msra.mxu3 %v8714_v53  ;;  %v8727_v59 = vsel %vm12615_vm15, %v1481_v39, %v1504_v49  ;;  %3167 = vmatpush.msra.mxu2 %v8722_v40  ;;  %v11623_v60 = vunpack.i.h.bf16 %v8678_v18  ;;  %vm12639_vm8 = vcmp.lt.s32.totalorder %v6324_v13, 12  ;;  %vm12647_vm14 = vmmov %vm12638_vm5 }
 0x2ad   :  { %12631 = vst [vmem:[#allocation173_spill] sm:$0xff] %v8718_v33  ;;  %6045 = vrot.lane.b32.xlu1 %v6044_v9, %s6258_s12  ;;  %v8738_v52 = vpop.permute.xlu2 %5870  ;;  %vm12640_vm11 = vmmov %vm12639_vm8 }
 0x2ae   :  { %12632 = vst [vmem:[#allocation174_spill] sm:$0xff] %v8722_v40  ;;  %6035 = vrot.lane.b32.xlu2 %v7623_v34, %s6258_s12  ;;  %6040 = vrot.lane.b32.xlu0 %v12596_v28, %s6259_s13  ;;  %v11622_v25 = vunpack.i.h.bf16 %v8738_v52 }
 0x2af   :  { %12633 = vst [vmem:[#allocation175_spill] sm:$0xff] %v8727_v59  ;;  %3187 = vmatpush.msra.mxu3 %v8274_v21  ;;  %v8736_v42 = vpop.permute.xlu1 %5835  ;;  %v8744_v17 = vpop.permute.xlu0 %5830 }
 0x2b0   :  { %12634 = vst [vmem:[#allocation176_spill] sm:$0xff] %v8736_v42  ;;  %v5838_v39 = vunpack.i.h.bf16 %v8736_v42  ;;  %v11621_v41 = vunpack.i.l.bf16 %v8736_v42  ;;  %v5833_v34 = vunpack.i.h.bf16 %v8744_v17  ;;  %v11624_v28 = vunpack.i.l.bf16 %v8744_v17 }
 0x2b1   :  { %12635 = vst [vmem:[#allocation177_spill] sm:$0xff] %v8738_v52  ;;  %3188 = vmatpush.msra.mxu3 %v8294_v38  ;;  %v8761_v49 = vsel %vm12638_vm5, %v11622_v25, %v11623_v60  ;;  %v12649_v42 = vunpack.i.h.bf16 %v8643_v47  ;;  %v12681_v38 = vunpack.i.h.bf16 %v8738_v52 }
 0x2b2   :  { %12636 = vst [vmem:[#allocation178_spill] sm:$0xff] %v8744_v17  ;;  %v1499_v9 = vsel %vm12619_vm1, %v11621_v41, %v5838_v39  ;;  %v1506_v16 = vsel %vm12637_vm9, %v5838_v39, %v5817_v19  ;;  %v1475_v12 = vsel %vm12639_vm8, %v5833_v34, %v5813_v0  ;;  %v1476_v44 = vsel %vm12640_vm11, %v11624_v28, %v5833_v34  ;;  %v12642_v41 = vld [vmem:[#allocation26_spill] sm:$0xff]  ;;  %vm12651_vm9 = vmmov %vm12638_vm5 }
 0x2b3   :  { %3189 = vmatpush.msra.mxu3 %v8331_v58  ;;  %v6059_v19 = vpack.i.bf16 %v8451_v30, %v8224_v27  ;;  %v8774_v39 = vsel %vm12628_vm12, %v1476_v44, %v1499_v9  ;;  %v6049_v25 = vpack.i.bf16 %v12642_v41, %v8224_v27  ;;  %v6054_v0 = vpack.i.bf16 %v8409_v15, %v8152_v31  ;;  %v6085_v34 = vld [vmem:[#allocation3 + $0x10] sm:$0xff]  ;;  %v12645_v58 = vld [vmem:[#allocation105_spill] sm:$0xff]  ;;  %vm12658_vm8 = vmmov %vm12651_vm9 }
 0x2b4   :  { %12641 = vst [vmem:[#allocation179_spill] sm:$0xff] %v8774_v39  ;;  %v8782_v60 = vsel %vm12630_vm3, %v1475_v12, %v1506_v16  ;;  %3168 = vmatpush.msra.mxu2 %v8774_v39  ;;  %v11637_v53 = vunpack.i.h.bf16 %v12645_v58  ;;  %vm12648_vm1 = vcmp.lt.s32.totalorder %v6324_v13, 116  ;;  %v6087_v31 = vld [vmem:[#allocation3 + $0x30] sm:$0xff] }
 0x2b5   :  { %12643 = vst [vmem:[#allocation26_spill] sm:$0xff] %v8782_v60  ;;  %6060 = vrot.lane.b32.xlu1 %v6059_v19, %s6261_s15  ;;  %v8791_v28 = vpop.permute.xlu2 %5885  ;;  %vm12653_vm5 = vmmov %vm12648_vm1  ;;  %v12662_v60 = vunpack.i.l.bf16 %v8678_v18 }
 0x2b6   :  { %6050 = vrot.lane.b32.xlu2 %v6049_v25, %s6259_s13  ;;  %6055 = vrot.lane.b32.xlu0 %v6054_v0, %s6260_s14  ;;  %v6086_v0 = vld [vmem:[#allocation3] sm:$0xff]  ;;  %v12650_v25 = vunpack.i.l.bf16 %v8643_v47  ;;  %vm12659_vm11 = vmmov %vm12648_vm1 }
 0x2b7   :  { %3169 = vmatpush.msra.mxu2 %v6085_v34  ;;  %v8789_v9 = vpop.permute.xlu1 %5850  ;;  %v8796_v39 = vpop.permute.xlu0 %5845  ;;  %v12646_v34 = vunpack.i.l.bf16 %v7989_v23 }
 0x2b8   :  { %12644 = vst [vmem:[#allocation180_spill] sm:$0xff] %v8789_v9  ;;  %v11638_v16 = vunpack.i.h.bf16 %v8789_v9  ;;  %v5852_v12 = vunpack.i.l.bf16 %v8789_v9  ;;  %v5847_v19 = vunpack.i.l.bf16 %v8796_v39  ;;  %v1872_v40 = vsel %vm12651_vm9, %v12650_v25, %v12649_v42  ;;  %vm12665_vm9 = vmmov %vm12653_vm5 }
 0x2b9   :  { %3170 = vmatpush.msra.mxu2 %v6086_v0  ;;  %v1376_v44 = vsel %vm12647_vm14, %v11637_v53, %v12646_v34  ;;  %v12652_v0 = vunpack.i.h.bf16 %v8796_v39  ;;  %vm12661_vm14 = vmmov %vm12648_vm1  ;;  %v12883_v35 = vunpack.i.h.bf16 %v8796_v39 }
 0x2ba   :  { %v1399_v17 = vsel %vm12648_vm1, %v5852_v12, %v11638_v16  ;;  %v8828_v16 = vld [vmem:[#allocation3 + $0x18] sm:$0xff]  ;;  %vm12664_vm1 = vmmov %vm12658_vm8 }
 0x2bb   :  { %v1895_v23 = vsel %vm12653_vm5, %v5847_v19, %v12652_v0  ;;  %3171 = vmatpush.msra.mxu2 %v6087_v31  ;;  %v8822_v34 = vsel %vm7060_vm13, %v1376_v44, %v1399_v17  ;;  %12656 = vst [vmem:[#allocation183_spill] sm:$0xff] %v8828_v16  ;;  %v6064_v42 = vpack.i.bf16 %v8828_v16, %v8451_v30  ;;  %v11646_v17 = vunpack.i.l.bf16 %v12645_v58 }
 0x2bc   :  { %12654 = vst [vmem:[#allocation181_spill] sm:$0xff] %v8822_v34  ;;  %v8826_v53 = vsel %vm7060_vm13, %v1872_v40, %v1895_v23 }
 0x2bd   :  { %12655 = vst [vmem:[#allocation182_spill] sm:$0xff] %v8826_v53  ;;  %3172 = vmatpush.msra.mxu2 %v8822_v34  ;;  %3190 = vmatpush.msra.mxu3 %v8826_v53  ;;  %v8839_v40 = vpop.permute.xlu2 %5900 }
 0x2be   :  { %6065 = vrot.lane.b32.xlu1 %v6064_v42, %s6260_s14  ;;  %1603 = vrot.lane.b32.xlu2 %v8224_v27, %s6258_s12  ;;  %v12657_v42 = vunpack.i.h.bf16 %v7904_v61 }
 0x2bf   :  { %1629 = vrot.lane.b32.xlu0 %v8228_v3, %s6259_s13  ;;  %v5866_v31 = vpop.permute.xlu1 %5865  ;;  %v5861_v0 = vpop.permute.xlu0 %5860 }
 0x2c0   :  { %v5868_v44 = vunpack.i.h.bf16 %v5866_v31  ;;  %v5867_v25 = vunpack.i.l.bf16 %v5866_v31  ;;  %v5863_v23 = vunpack.i.h.bf16 %v5861_v0  ;;  %v5862_v34 = vunpack.i.l.bf16 %v5861_v0 }
 0x2c1   :  { %v1378_v9 = vsel %vm12658_vm8, %v12657_v42, %v11646_v17  ;;  %v12663_v31 = vunpack.i.h.bf16 %v8678_v18  ;;  %v8873_v18 = vld [vmem:[#allocation3 + $0x20] sm:$0xff]  ;;  %vm12676_vm8 = vcmp.lt.s32.totalorder %v6324_v13, 12 }
 0x2c2   :  { %v8850_v53 = vsel %vm12659_vm11, %v5868_v44, %v5852_v12  ;;  %v1401_v16 = vsel %vm12661_vm14, %v5867_v25, %v5868_v44  ;;  %v1896_v61 = vsel %vm12665_vm9, %v5863_v23, %v5847_v19  ;;  %v1897_v42 = vsel %vm12653_vm5, %v5862_v34, %v5863_v23  ;;  %12668 = vst [vmem:[#allocation187_spill] sm:$0xff] %v8873_v18  ;;  %vm12683_vm14 = vmmov %vm12664_vm1 }
 0x2c3   :  { %12660 = vst [vmem:[#allocation184_spill] sm:$0xff] %v8850_v53  ;;  %v1874_v0 = vsel %vm12664_vm1, %v12663_v31, %v12662_v60  ;;  %v8866_v12 = vsel %vm12582_vm7, %v1378_v9, %v1401_v16  ;;  %v6069_v60 = vpack.i.bf16 %v8873_v18, %v8476_v1  ;;  %v8880_v19 = vsel %vm12584_vm10, %v8704_v62, %v1896_v61  ;;  %v6090_v16 = vld [vmem:[#allocation3 + $0x28] sm:$0xff]  ;;  %v12674_v9 = vld [vmem:[#allocation94_spill] sm:$0xff]  ;;  %vm12685_vm1 = vmmov %vm12653_vm5 }
 0x2c4   :  { %12666 = vst [vmem:[#allocation185_spill] sm:$0xff] %v8866_v12  ;;  %3173 = vmatpush.msra.mxu2 %v8866_v12  ;;  %v8871_v44 = vsel %vm12582_vm7, %v1874_v0, %v1897_v42  ;;  %v12672_v42 = vld [vmem:[#allocation100_spill] sm:$0xff]  ;;  %v12675_v12 = vunpack.i.h.bf16 %v12674_v9  ;;  %vm12680_vm11 = vcmp.lt.s32.totalorder %v6324_v13, 124  ;;  %vm12686_vm9 = vmmov %vm12685_vm1 }
 0x2c5   :  { %12667 = vst [vmem:[#allocation186_spill] sm:$0xff] %v8871_v44  ;;  %3191 = vmatpush.msra.mxu3 %v8871_v44  ;;  %v8890_v31 = vpop.permute.xlu2 %5915  ;;  %v12673_v17 = vunpack.i.l.bf16 %v12672_v42  ;;  %v12677_v44 = vld [vmem:[#allocation102_spill] sm:$0xff]  ;;  %v12682_v42 = vunpack.i.l.bf16 %v8738_v52  ;;  %vm12688_vm5 = vmmov %vm12685_vm1 }
 0x2c6   :  { %12669 = vst [vmem:[#allocation188_spill] sm:$0xff] %v8880_v19  ;;  %1493 = vrot.lane.b32.xlu1 %v6090_v16, %s6261_s15  ;;  %6070 = vrot.lane.b32.xlu2 %v6069_v60, %s6261_s15  ;;  %v12678_v19 = vunpack.i.h.bf16 %v12677_v44  ;;  %v12679_v59 = vunpack.i.l.bf16 %v12677_v44  ;;  %v12690_v52 = vld [vmem:[#allocation150_spill] sm:$0xff] }
 0x2c7   :  { %1467 = vrot.lane.b32.xlu0 %v8873_v18, %s6260_s14  ;;  %v8888_v23 = vpop.permute.xlu1 %5880  ;;  %v8894_v61 = vpop.permute.xlu0 %5875  ;;  %v1296_v60 = vsel %vm12676_vm8, %v12675_v12, %v12673_v17  ;;  %v1868_v21 = vsel %vm12683_vm14, %v12682_v42, %v12681_v38  ;;  %vm12689_vm8 = vmmov %vm12685_vm1  ;;  %v12692_v42 = vld [vmem:[#allocation137_spill] sm:$0xff]  ;;  %vm12703_vm14 = vcmp.lt.s32.totalorder %v6324_v13, 12 }
 0x2c8   :  { %12670 = vst [vmem:[#allocation189_spill] sm:$0xff] %v8888_v23  ;;  %v5883_v0 = vunpack.i.h.bf16 %v8888_v23  ;;  %v5878_v53 = vunpack.i.h.bf16 %v8894_v61  ;;  %v1319_v62 = vsel %vm12680_vm11, %v12679_v59, %v12678_v19  ;;  %v12684_v17 = vunpack.i.l.bf16 %v8888_v23 }
 0x2c9   :  { %12671 = vst [vmem:[#allocation190_spill] sm:$0xff] %v8894_v61  ;;  %v12687_v44 = vunpack.i.l.bf16 %v8894_v61  ;;  %v12749_v61 = vld [vmem:[#allocation130_spill] sm:$0xff] }
 0x2ca   :  { %v1395_v12 = vsel %vm12685_vm1, %v12684_v17, %v5883_v0  ;;  %v1402_v58 = vsel %vm12686_vm9, %v5883_v0, %v5867_v25  ;;  %v1898_v19 = vsel %vm12689_vm8, %v5878_v53, %v5862_v34  ;;  %v12696_v34 = vld [vmem:[#allocation103_spill] sm:$0xff]  ;;  %vm12707_vm1 = vmmov %vm12680_vm11 }
 0x2cb   :  { %v1891_v59 = vsel %vm12688_vm5, %v12687_v44, %v5878_v53  ;;  %v8931_v38 = vsel %vm12580_vm0, %v12690_v52, %v1395_v12  ;;  %v8936_v17 = vsel %vm12593_vm2, %v12692_v42, %v1402_v58  ;;  %v8946_v53 = vsel %vm12593_vm2, %v8761_v49, %v1898_v19  ;;  %v12701_v49 = vld [vmem:[#allocation101_spill] sm:$0xff]  ;;  %v12704_v19 = vld [vmem:[#allocation110_spill] sm:$0xff]  ;;  %vm12712_vm9 = vmmov %vm12703_vm14 }
 0x2cc   :  { %12691 = vst [vmem:[#allocation94_spill] sm:$0xff] %v8931_v38  ;;  %3174 = vmatpush.msra.mxu2 %v8931_v38  ;;  %v8941_v25 = vsel %vm12580_vm0, %v1868_v21, %v1891_v59  ;;  %v12697_v0 = vunpack.i.h.bf16 %v12696_v34  ;;  %v12698_v52 = vunpack.i.l.bf16 %v12696_v34  ;;  %v8961_v21 = vsel %vm12604_vm4, %v1296_v60, %v1319_v62  ;;  %vm12713_vm5 = vmmov %vm12712_vm9 }
 0x2cd   :  { %12693 = vst [vmem:[#allocation102_spill] sm:$0xff] %v8936_v17  ;;  %3192 = vmatpush.msra.mxu3 %v8941_v25  ;;  %v12700_v58 = vunpack.i.l.bf16 %v12674_v9  ;;  %v12702_v44 = vunpack.i.h.bf16 %v12701_v49  ;;  %v12705_v42 = vunpack.i.h.bf16 %v12704_v19  ;;  %v12706_v34 = vunpack.i.l.bf16 %v12704_v19  ;;  %v8980_v62 = vpop.permute.xlu2 %5930  ;;  %vm12716_vm8 = vmmov %vm12713_vm5  ;;  %v12744_v17 = vld [vmem:[#allocation126_spill] sm:$0xff] }
 0x2ce   :  { %12694 = vst [vmem:[#allocation150_spill] sm:$0xff] %v8941_v25  ;;  %v1321_v12 = vsel %vm12680_vm11, %v12698_v52, %v12697_v0  ;;  %1707 = vrot.lane.b32.xlu1 %v8224_v27, %s6260_s14  ;;  %1859 = vrot.lane.b32.xlu2 %v8305_v2, %s6258_s12  ;;  %v5887_v38 = vunpack.i.l.bf16 %v8791_v28  ;;  %vm12717_vm11 = vmmov %vm12707_vm1 }
 0x2cf   :  { %12695 = vst [vmem:[#allocation137_spill] sm:$0xff] %v8946_v53  ;;  %v1298_v59 = vsel %vm12703_vm14, %v12702_v44, %v12700_v58  ;;  %v1315_v0 = vsel %vm12707_vm1, %v12706_v34, %v12705_v42  ;;  %1885 = vrot.lane.b32.xlu0 %v8327_v63, %s6259_s13  ;;  %3175 = vmatpush.msra.mxu2 %v8961_v21  ;;  %v5896_v9 = vpop.permute.xlu1 %5895  ;;  %v8982_v44 = vpop.permute.xlu0 %5890  ;;  %v12709_v42 = vunpack.i.l.bf16 %v12701_v49  ;;  %v12710_v34 = vld [vmem:[#allocation95_spill] sm:$0xff]  ;;  %v5903_v63 = vunpack.i.h.bf16 %v8839_v40  ;;  %vm12718_vm14 = vmmov %vm12707_vm1 }
 0x2d0   :  { %12699 = vst [vmem:[#allocation103_spill] sm:$0xff] %v8961_v21  ;;  %v5898_v60 = vunpack.i.h.bf16 %v5896_v9  ;;  %v5897_v58 = vunpack.i.l.bf16 %v5896_v9  ;;  %v8986_v19 = vsel %vm12613_vm6, %v1298_v59, %v1321_v12  ;;  %v12711_v52 = vunpack.i.h.bf16 %v12710_v34  ;;  %vm12719_vm1 = vmmov %vm12713_vm5 }
 0x2d1   :  { %12708 = vst [vmem:[#allocation101_spill] sm:$0xff] %v8986_v19  ;;  %v11670_v23 = vunpack.i.h.bf16 %v8982_v44  ;;  %v5892_v21 = vunpack.i.l.bf16 %v8982_v44  ;;  %3176 = vmatpush.msra.mxu2 %v8986_v19  ;;  %v5902_v9 = vunpack.i.l.bf16 %v8839_v40  ;;  %v12715_v59 = vunpack.i.h.bf16 %v8791_v28 }
 0x2d2   :  { %v1292_v25 = vsel %vm12712_vm9, %v12711_v52, %v12709_v42  ;;  %v1721_v12 = vsel %vm12713_vm5, %v5897_v58, %v5887_v38  ;;  %v1722_v19 = vsel %vm12719_vm1, %v5898_v60, %v5897_v58  ;;  %vm12723_vm9 = vmmov %vm12717_vm11  ;;  %v9033_v58 = vld [vmem:[#allocation6 + $0x10] sm:$0xff] }
 0x2d3   :  { %v9003_v49 = vsel %vm12628_vm12, %v1292_v25, %v1315_v0  ;;  %v1720_v52 = vsel %vm12716_vm8, %v5887_v38, %v12715_v59  ;;  %v1743_v42 = vsel %vm12717_vm11, %v5892_v21, %v11670_v23  ;;  %v1744_v40 = vsel %vm12718_vm14, %v5903_v63, %v5892_v21  ;;  %v12722_v0 = vld [vmem:[#allocation42_spill] sm:$0xff]  ;;  %12724 = vst [vmem:[#allocation193_spill] sm:$0xff] %v9033_v58  ;;  %vm12729_vm5 = vmmov %vm12723_vm9 }
 0x2d4   :  { %12714 = vst [vmem:[#allocation110_spill] sm:$0xff] %v9003_v49  ;;  %3177 = vmatpush.msra.mxu2 %v9003_v49  ;;  %v9020_v25 = vsel %vm12604_vm4, %v1720_v52, %v1743_v42  ;;  %v9024_v38 = vsel %vm12615_vm15, %v1721_v12, %v1744_v40  ;;  %v1745_v21 = vsel %vm12723_vm9, %v5902_v9, %v5903_v63  ;;  %v12725_v59 = vld [vmem:[#allocation70_spill] sm:$0xff]  ;;  %vm12730_vm8 = vmmov %vm12729_vm5 }
 0x2d5   :  { %12720 = vst [vmem:[#allocation191_spill] sm:$0xff] %v9020_v25  ;;  %3193 = vmatpush.msra.mxu3 %v9020_v25  ;;  %v9040_v12 = vsel %vm12613_vm6, %v1722_v19, %v1745_v21  ;;  %v9044_v42 = vpop.permute.xlu2 %5945  ;;  %vm12731_vm11 = vmmov %vm12719_vm1 }
 0x2d6   :  { %12721 = vst [vmem:[#allocation192_spill] sm:$0xff] %v9024_v38  ;;  %3178 = vmatpush.msra.mxu2 %v12722_v0  ;;  %1389 = vrot.lane.b32.xlu1 %v6090_v16, %s6259_s13  ;;  %vm12732_vm14 = vmmov %vm12719_vm1  ;;  %v5947_v4 = vunpack.i.l.bf16 %v9044_v42 }
 0x2d7   :  { %1733 = vrot.lane.b32.xlu2 %v8228_v3, %s6261_s15  ;;  %1387 = vrot.lane.b32.xlu0 %v8873_v18, %s6259_s13  ;;  %12726 = vst [vmem:[#allocation194_spill] sm:$0xff] %v9040_v12  ;;  %v9042_v52 = vpop.permute.xlu1 %5910  ;;  %v9049_v40 = vpop.permute.xlu0 %5905  ;;  %vm12740_vm9 = vmmov %vm12729_vm5  ;;  %v12741_v18 = vld [vmem:[#allocation53_spill] sm:$0xff] }
 0x2d8   :  { %3243 = vmatpush.msrb.mxu2 %v12725_v59  ;;  %12727 = vst [vmem:[#allocation195_spill] sm:$0xff] %v9042_v52  ;;  %3194 = vmatpush.msra.mxu3 %v9040_v12  ;;  %v5913_v63 = vunpack.i.h.bf16 %v9042_v52  ;;  %v11675_v16 = vunpack.i.l.bf16 %v9042_v52  ;;  %v5908_v23 = vunpack.i.h.bf16 %v9049_v40  ;;  %v11676_v49 = vunpack.i.l.bf16 %v9049_v40  ;;  %v12745_v12 = vld [vmem:[#allocation35_spill] sm:$0xff] }
 0x2d9   :  { %12728 = vst [vmem:[#allocation196_spill] sm:$0xff] %v9049_v40  ;;  %3179 = vmatmul.f32.vlgmr.msra.gmra.mxu2 %v9033_v58  ;;  %v12753_v40 = vld [vmem:[#allocation91_spill] sm:$0xff] }
 0x2da   :  { %3244 = vmatpush.msrb.mxu2 %v12642_v41  ;;  %v1739_v19 = vsel %vm12729_vm5, %v11675_v16, %v5913_v63  ;;  %v1746_v21 = vsel %vm12730_vm8, %v5913_v63, %v5902_v9  ;;  %v1715_v59 = vsel %vm12731_vm11, %v5908_v23, %v5898_v60  ;;  %v1716_v3 = vsel %vm12732_vm14, %v11676_v49, %v5908_v23  ;;  %v12735_v23 = vld [vmem:[#allocation58_spill] sm:$0xff]  ;;  %vm12751_vm8 = vmmov %vm12719_vm1 }
 0x2db   :  { %v9070_v34 = vsel %vm12628_vm12, %v1716_v3, %v1739_v19  ;;  %v9074_v16 = vsel %vm12630_vm3, %v1715_v59, %v1746_v21  ;;  %v5917_v60 = vunpack.i.l.bf16 %v8890_v31  ;;  %v12736_v9 = vld [vmem:[#allocation78_spill] sm:$0xff]  ;;  %v5932_v21 = vunpack.i.l.bf16 %v8980_v62  ;;  %vm12763_vm11 = vmmov %vm12729_vm5 }
 0x2dc   :  { %3245 = vmatpush.msrb.mxu2 %v6412_v57  ;;  %12733 = vst [vmem:[#allocation197_spill] sm:$0xff] %v9070_v34  ;;  %3195 = vmatpush.msra.mxu3 %v9070_v34  ;;  %v12738_v34 = vld [vmem:[#allocation52_spill] sm:$0xff]  ;;  %vm12766_vm14 = vmmov %vm12719_vm1 }
 0x2dd   :  { %12734 = vst [vmem:[#allocation198_spill] sm:$0xff] %v9074_v16  ;;  %v9087_v63 = vpop.permute.xlu2 %5960 }
 0x2de   :  { %3246 = vmatpush.msrb.mxu2 %v6378_v46  ;;  %2283 = vrot.lane.b32.xlu1 %v8476_v1, %s6258_s12  ;;  %12737 = vst [vmem:[#allocation199_spill] sm:$0xff] %v9087_v63  ;;  %v12782_v16 = vunpack.i.l.bf16 %v9087_v63 }
 0x2df   :  { %2387 = vrot.lane.b32.xlu2 %v8476_v1, %s6260_s14  ;;  %2413 = vrot.lane.b32.xlu0 %v8432_v56, %s6261_s15  ;;  %v5926_v3 = vpop.permute.xlu1 %5925  ;;  %v9089_v19 = vpop.permute.xlu0 %5920 }
 0x2e0   :  { %3247 = vmatpush.msrb.mxu2 %v12735_v23  ;;  %3196 = vmatpush.msra.mxu3 %v12736_v9  ;;  %v5928_v59 = vunpack.i.h.bf16 %v5926_v3  ;;  %v5922_v49 = vunpack.i.l.bf16 %v9089_v19  ;;  %v12739_v23 = vld [vmem:[#allocation75_spill] sm:$0xff]  ;;  %v12742_v9 = vld [vmem:[#allocation86_spill] sm:$0xff] }
 0x2e2   :  { %3248 = vmatpush.msrb.mxu2 %v12738_v34  ;;  %v2402_v1 = vsel %vm12719_vm1, %v5928_v59, %v5917_v60  ;;  %3197 = vmatpush.msra.mxu3 %v12739_v23  ;;  %v2425_v58 = vsel %vm12740_vm9, %v5932_v21, %v5922_v49  ;;  %v5927_v23 = vunpack.i.l.bf16 %v5926_v3  ;;  %vm12770_vm9 = vmmov %vm12729_vm5 }
 0x2e3   :  { %v9103_v27 = vsel %vm12613_vm6, %v2402_v1, %v2425_v58  ;;  %v5933_v1 = vunpack.i.h.bf16 %v8980_v62  ;;  %v12747_v58 = vld [vmem:[#allocation127_spill] sm:$0xff]  ;;  %v12750_v62 = vld [vmem:[#allocation98_spill] sm:$0xff] }
 0x2e4   :  { %3249 = vmatpush.msrb.mxu2 %v12741_v18  ;;  %3198 = vmatpush.msra.mxu3 %v12742_v9  ;;  %12743 = vst [vmem:[#allocation200_spill] sm:$0xff] %v9103_v27  ;;  %v12746_v18 = vld [vmem:[#allocation17_spill] sm:$0xff] }
 0x2e5   :  { %3203 = vmatpush.msrb.mxu0 %v9103_v27 }
 0x2e6   :  { %3250 = vmatpush.msrb.mxu2 %v12744_v17  ;;  %3263 = vmatpush.msrb.mxu3 %v12745_v12  ;;  %v12748_v17 = vld [vmem:[#allocation39_spill] sm:$0xff] }
 0x2e7   :  { %2173 = vrot.lane.b32.xlu1 %v6402_v54, %s6261_s15  ;;  %2309 = vrot.lane.b32.xlu2 %v8432_v56, %s6259_s13  ;;  %v9114_v9 = vpop.permute.xlu1 %5940  ;;  %v9120_v27 = vpop.permute.xlu2 %5975 }
 0x2e8   :  { %2147 = vrot.lane.b32.xlu0 %v12746_v18, %s6260_s14  ;;  %3251 = vmatpush.msrb.mxu2 %v12747_v58  ;;  %v11696_v12 = vunpack.i.l.bf16 %v9114_v9  ;;  %v9122_v34 = vpop.permute.xlu0 %5935  ;;  %v12752_v58 = vld [vmem:[#allocation47_spill] sm:$0xff] }
 0x2e9   :  { %3264 = vmatpush.msrb.mxu3 %v12748_v17  ;;  %v11697_v56 = vunpack.i.l.bf16 %v9122_v34 }
 0x2ea   :  { %v2419_v25 = vsel %vm12729_vm5, %v11696_v12, %v5933_v1  ;;  %3252 = vmatpush.msrb.mxu2 %v12749_v61  ;;  %v12755_v12 = vld [vmem:[#allocation45_spill] sm:$0xff]  ;;  %v12756_v61 = vld [vmem:[#allocation92_spill] sm:$0xff]  ;;  %vm12773_vm5 = vcmp.lt.s32.totalorder %v6324_v13, 116 }
 0x2eb   :  { %3265 = vmatpush.msrb.mxu3 %v12750_v62  ;;  %v2396_v17 = vsel %vm12751_vm8, %v11697_v56, %v5927_v23  ;;  %v12760_v62 = vld [vmem:[#allocation121_spill] sm:$0xff]  ;;  %vm12775_vm8 = vmmov %vm12773_vm5 }
 0x2ec   :  { %3253 = vmatpush.msrb.mxu2 %v12752_v58  ;;  %v9139_v3 = vsel %vm12628_vm12, %v2396_v17, %v2419_v25  ;;  %v12758_v17 = vld [vmem:[#allocation143_spill] sm:$0xff] }
 0x2ed   :  { %3266 = vmatpush.msrb.mxu3 %v12753_v40  ;;  %12754 = vst [vmem:[#allocation201_spill] sm:$0xff] %v9139_v3  ;;  %3204 = vmatpush.msrb.mxu0 %v9139_v3  ;;  %v12757_v40 = vld [vmem:[#allocation49_spill] sm:$0xff] }
 0x2ee   :  { %3254 = vmatpush.msrb.mxu2 %v12755_v12  ;;  %v12761_v12 = vld [vmem:[#allocation144_spill] sm:$0xff] }
 0x2ef   :  { %3267 = vmatpush.msrb.mxu3 %v12756_v61  ;;  %2043 = vrot.lane.b32.xlu2 %v12746_v18, %s6258_s12  ;;  %v9149_v56 = vpop.permute.xlu1 %5955  ;;  %v9153_v25 = vpop.permute.xlu2 %5990  ;;  %v11705_v61 = vunpack.i.h.bf16 %v8890_v31  ;;  %v12768_v18 = vld [vmem:[#allocation81_spill] sm:$0xff] }
 0x2f0   :  { %2069 = vrot.lane.b32.xlu0 %v6402_v54, %s6259_s13  ;;  %3255 = vmatpush.msrb.mxu2 %v12757_v40  ;;  %12759 = vst [vmem:[#allocation202_spill] sm:$0xff] %v9153_v25  ;;  %v9155_v3 = vpop.permute.xlu0 %5950  ;;  %v12762_v54 = vunpack.i.h.bf16 %v9089_v19  ;;  %v12764_v40 = vld [vmem:[#allocation116_spill] sm:$0xff] }
 0x2f1   :  { %3268 = vmatpush.msrb.mxu3 %v12758_v17  ;;  %3205 = vmatpush.msrb.mxu0 %v8409_v15  ;;  %v12765_v17 = vld [vmem:[#allocation147_spill] sm:$0xff]  ;;  %v2401_v15 = vsel %vm12766_vm14, %v5917_v60, %v11705_v61 }
 0x2f2   :  { %3256 = vmatpush.msrb.mxu2 %v12760_v62  ;;  %v2424_v58 = vsel %vm12763_vm11, %v5922_v49, %v12762_v54  ;;  %v2395_v62 = vsel %vm12719_vm1, %v5927_v23, %v5928_v59  ;;  %v2426_v49 = vsel %vm12770_vm9, %v5933_v1, %v5932_v21  ;;  %v5953_v23 = vunpack.i.h.bf16 %v9155_v3  ;;  %v12771_v59 = vld [vmem:[#allocation82_spill] sm:$0xff]  ;;  %vm12783_vm9 = vmmov %vm12773_vm5 }
 0x2f3   :  { %3269 = vmatpush.msrb.mxu3 %v12761_v12  ;;  %3206 = vmatpush.msrb.mxu0 %v8413_v8  ;;  %v12767_v12 = vld [vmem:[#allocation119_spill] sm:$0xff]  ;;  %v9179_v54 = vsel %vm12615_vm15, %v2401_v15, %v2424_v58  ;;  %v9189_v61 = vsel %vm12630_vm3, %v2395_v62, %v2426_v49  ;;  %v5963_v21 = vunpack.i.h.bf16 %v9087_v63  ;;  %v5958_v1 = vunpack.i.h.bf16 %v9149_v56  ;;  %v12777_v8 = vld [vmem:[#allocation138_spill] sm:$0xff] }
 0x2f4   :  { %3257 = vmatpush.msrb.mxu2 %v12764_v40  ;;  %12769 = vst [vmem:[#allocation203_spill] sm:$0xff] %v9179_v54  ;;  %v5977_v49 = vunpack.i.l.bf16 %v9120_v27  ;;  %vm12776_vm11 = vcmp.lt.s32.totalorder %v6324_v13, 4  ;;  %v2318_v38 = vsel %vm12783_vm9, %v5953_v23, %v12782_v16  ;;  %vm12798_vm9 = vcmp.lt.s32.totalorder %v6324_v13, 12 }
 0x2f5   :  { %3270 = vmatpush.msrb.mxu3 %v12765_v17  ;;  %3207 = vmatpush.msrb.mxu0 %v8401_v37  ;;  %v5948_v17 = vunpack.i.h.bf16 %v9044_v42  ;;  %12772 = vst [vmem:[#allocation204_spill] sm:$0xff] %v9189_v61  ;;  %vm12780_vm14 = vmmov %vm12776_vm11  ;;  %v5938_v42 = vunpack.i.h.bf16 %v9122_v34 }
 0x2f6   :  { %3258 = vmatpush.msrb.mxu2 %v12767_v12  ;;  %vm12781_vm1 = vmmov %vm12776_vm11 }
 0x2f7   :  { %3271 = vmatpush.msrb.mxu3 %v12768_v18  ;;  %v5971_v60 = vpop.permute.xlu1 %5970  ;;  %v9191_v15 = vpop.permute.xlu2 %6005  ;;  %v2298_v52 = vsel %vm12781_vm1, %v5977_v49, %v5958_v1 }
 0x2f8   :  { %3323 = vmatpush.msra.mxu2 %v9179_v54  ;;  %v5973_v12 = vunpack.i.h.bf16 %v5971_v60  ;;  %v5972_v37 = vunpack.i.l.bf16 %v5971_v60  ;;  %v5966_v58 = vpop.permute.xlu0 %5965  ;;  %v12774_v54 = vld [vmem:[#allocation89_spill] sm:$0xff] }
 0x2f9   :  { %3272 = vmatpush.msrb.mxu3 %v12771_v59  ;;  %v5967_v18 = vunpack.i.l.bf16 %v5966_v58 }
 0x2fa   :  { %3324 = vmatpush.msra.mxu2 %v9189_v61  ;;  %v2319_v59 = vsel %vm12773_vm5, %v5972_v37, %v5953_v23  ;;  %v2321_v60 = vsel %vm12775_vm8, %v5973_v12, %v5963_v21  ;;  %vm12786_vm8 = vmmov %vm12781_vm1 }
 0x2fb   :  { %3273 = vmatpush.msrb.mxu3 %v12774_v54  ;;  %v2296_v40 = vsel %vm12776_vm11, %v5967_v18, %v5948_v17  ;;  %v12779_v54 = vunpack.i.l.bf16 %v9149_v56 }
 0x2fc   :  { %3325 = vmatpush.msra.mxu2 %v8451_v30  ;;  %v9210_v61 = vsel %vm7060_vm13, %v2296_v40, %v2319_v59  ;;  %v12784_v40 = vld [vmem:[#allocation135_spill] sm:$0xff]  ;;  %v9227_v59 = vsel %vm12582_vm7, %v2298_v52, %v2321_v60  ;;  %v12794_v60 = vld [vmem:[#allocation66_spill] sm:$0xff] }
 0x2fd   :  { %3274 = vmatpush.msrb.mxu3 %v12777_v8  ;;  %12778 = vst [vmem:[#allocation205_spill] sm:$0xff] %v9210_v61  ;;  %v2295_v62 = vsel %vm12780_vm14, %v5948_v17, %v12779_v54  ;;  %3208 = vmatpush.msrb.mxu0 %v9210_v61  ;;  %v5968_v8 = vunpack.i.h.bf16 %v5966_v58  ;;  %v2320_v17 = vsel %vm12773_vm5, %v5963_v21, %v5972_v37  ;;  %v12788_v58 = vld [vmem:[#allocation136_spill] sm:$0xff]  ;;  %v12789_v61 = vld [vmem:[#allocation54_spill] sm:$0xff]  ;;  %vm12793_vm14 = vmmov %vm12781_vm1 }
 0x2fe   :  { %3326 = vmatpush.msra.mxu2 %v8397_v50  ;;  %12785 = vst [vmem:[#allocation206_spill] sm:$0xff] %v9227_v59  ;;  %v2297_v54 = vsel %vm12786_vm8, %v5958_v1, %v5967_v18  ;;  %vm12790_vm11 = vnez %v12789_v61  ;;  %v5992_v1 = vunpack.i.l.bf16 %v9153_v25  ;;  %v12796_v18 = vunpack.i.h.bf16 %v9120_v27  ;;  %vm12800_vm8 = vmmov %vm12773_vm5  ;;  %v12979_v61 = vld [vmem:[#allocation139_spill] sm:$0xff] }
 0x2ff   :  { %3275 = vmatpush.msrb.mxu3 %v12784_v40  ;;  %3209 = vmatpush.msrb.mxu0 %v9227_v59  ;;  %v9235_v16 = vpop.permute.xlu1 %5985  ;;  %v9241_v52 = vsel %vm12790_vm11, %v2295_v62, %v2318_v38  ;;  %v2291_v38 = vsel %vm12793_vm14, %v5968_v8, %v5977_v49  ;;  %vm12805_vm14 = vcmp.lt.s32.totalorder %v6324_v13, 124  ;;  %v12846_v50 = vunpack.i.h.bf16 %v8447_v22 }
 0x300   :  { %3327 = vmatpush.msra.mxu2 %v8405_v24  ;;  %12787 = vst [vmem:[#allocation207_spill] sm:$0xff] %v9235_v16  ;;  %v5987_v37 = vunpack.i.l.bf16 %v9235_v16  ;;  %v9245_v21 = vpop.permute.xlu0 %5980  ;;  %v9254_v62 = vpop.permute.xlu2 %6020  ;;  %v2292_v59 = vsel %vm12781_vm1, %v12796_v18, %v5968_v8  ;;  %v12797_v23 = vunpack.i.h.bf16 %v9235_v16 }
 0x301   :  { %3276 = vmatpush.msrb.mxu3 %v12788_v58  ;;  %12791 = vst [vmem:[#allocation54_spill] sm:$0xff] %v9241_v52  ;;  %v5982_v24 = vunpack.i.l.bf16 %v9245_v21  ;;  %v9259_v58 = vsel %vm12584_vm10, %v2297_v54, %v2320_v17  ;;  %v12799_v49 = vunpack.i.h.bf16 %v9245_v21  ;;  %v12801_v17 = vld [vmem:[#allocation65_spill] sm:$0xff] }
 0x302   :  { %12792 = vst [vmem:[#allocation208_spill] sm:$0xff] %v9245_v21  ;;  %3328 = vmatpush.msra.mxu2 %v9241_v52  ;;  %v2159_v52 = vsel %vm12798_vm9, %v5987_v37, %v12797_v23  ;;  %v12804_v23 = vunpack.i.h.bf16 %v9153_v25  ;;  %v12818_v25 = vunpack.i.l.bf16 %v8676_v7 }
 0x303   :  { %3277 = vmatpush.msrb.mxu3 %v12794_v60  ;;  %12795 = vst [vmem:[#allocation209_spill] sm:$0xff] %v9259_v58  ;;  %v2315_v40 = vsel %vm12773_vm5, %v12799_v49, %v5982_v24  ;;  %v2322_v60 = vsel %vm12800_vm8, %v5982_v24, %v5973_v12  ;;  %v12806_v24 = vld [vmem:[#allocation63_spill] sm:$0xff]  ;;  %vm12811_vm5 = vcmp.lt.s32.totalorder %v6324_v13, 12 }
 0x304   :  { %3329 = vmatpush.msra.mxu2 %v9259_v58  ;;  %v9279_v8 = vsel %vm12580_vm0, %v2292_v59, %v2315_v40  ;;  %v9283_v54 = vsel %vm12593_vm2, %v2291_v38, %v2322_v60  ;;  %v2182_v18 = vsel %vm12805_vm14, %v5992_v1, %v12804_v23  ;;  %vm12807_vm1 = vnez %v12806_v24  ;;  %vm12809_vm0 = vmmov %vm12805_vm14  ;;  %v9648_v24 = vld [vmem:[#allocation3 + $0x38] sm:$0xff] }
 0x305   :  { %3278 = vmatpush.msrb.mxu3 %v12801_v17  ;;  %12802 = vst [vmem:[#allocation210_spill] sm:$0xff] %v9279_v8  ;;  %3210 = vmatpush.msrb.mxu0 %v9279_v8  ;;  %v9293_v12 = vsel %vm12807_vm1, %v2159_v52, %v2182_v18  ;;  %vm12810_vm9 = vmmov %vm12809_vm0  ;;  %v9304_v18 = vld [vmem:[#allocation6] sm:$0xff] }
 0x306   :  { %12803 = vst [vmem:[#allocation211_spill] sm:$0xff] %v9283_v54  ;;  %3330 = vmatpush.msra.mxu2 %v9283_v54  ;;  %vm12812_vm8 = vmmov %vm12811_vm5  ;;  %3139 = vmatmul.f32.vlgmr.msra.gmra.mxu0 %v9304_v18 }
 0x307   :  { %12808 = vst [vmem:[#allocation63_spill] sm:$0xff] %v9293_v12  ;;  %v6001_v29 = vpop.permute.xlu1 %6000  ;;  %3259 = vmatmul.f32.vlgmr.msrb.gmra.mxu2 %v9304_v18  ;;  %vm12817_vm14 = vmmov %vm12811_vm5 }
 0x308   :  { %3331 = vmatpush.msra.mxu2 %v9293_v12  ;;  %v6003_v40 = vunpack.i.h.bf16 %v6001_v29  ;;  %v6002_v59 = vunpack.i.l.bf16 %v6001_v29  ;;  %v5996_v60 = vpop.permute.xlu0 %5995  ;;  %v9306_v8 = vpop.permute.xlu2 %6035 }
 0x309   :  { %v5998_v38 = vunpack.i.h.bf16 %v5996_v60  ;;  %v5997_v49 = vunpack.i.l.bf16 %v5996_v60  ;;  %v6008_v60 = vunpack.i.h.bf16 %v9191_v15 }
 0x30a   :  { %v2183_v58 = vsel %vm12809_vm0, %v6003_v40, %v5992_v1  ;;  %v2184_v23 = vsel %vm12810_vm9, %v6002_v59, %v6003_v40  ;;  %v9322_v40 = vld [vmem:[#allocation6 + $0x18] sm:$0xff]  ;;  %vm12819_vm0 = vmmov %vm12811_vm5 }
 0x30b   :  { %v2160_v54 = vsel %vm12811_vm5, %v5998_v38, %v5987_v37  ;;  %v2161_v52 = vsel %vm12812_vm8, %v5997_v49, %v5998_v38  ;;  %v9320_v37 = vld [vmem:[#allocation6 + $0x8] sm:$0xff]  ;;  %12815 = vst [vmem:[#allocation214_spill] sm:$0xff] %v9322_v40  ;;  %3199 = vmatmul.f32.vlgmr.msra.gmra.mxu3 %v9322_v40  ;;  %v2162_v16 = vsel %vm12817_vm14, %v6008_v60, %v5997_v49  ;;  %vm12820_vm9 = vmmov %vm12819_vm0 }
 0x30c   :  { %v9310_v29 = vsel %vm12604_vm4, %v2160_v54, %v2183_v58  ;;  %v9314_v1 = vsel %vm12615_vm15, %v2161_v52, %v2184_v23  ;;  %v6007_v58 = vunpack.i.l.bf16 %v9191_v15  ;;  %3159 = vmatmul.f32.vlgmr.msra.gmra.mxu1 %v9320_v37  ;;  %vm12816_vm15 = vmmov %vm12811_vm5  ;;  %vm12822_vm5 = vcmp.lt.s32.totalorder %v6324_v13, 124 }
 0x30d   :  { %12813 = vst [vmem:[#allocation212_spill] sm:$0xff] %v9310_v29  ;;  %3211 = vmatpush.msrb.mxu0 %v9310_v29  ;;  %3332 = vmatpush.msra.mxu2 %v9314_v1  ;;  %vm12823_vm8 = vmmov %vm12822_vm5 }
 0x30e   :  { %12814 = vst [vmem:[#allocation213_spill] sm:$0xff] %v9314_v1  ;;  %v2155_v15 = vsel %vm12816_vm15, %v6007_v58, %v6008_v60  ;;  %vm12824_vm15 = vmmov %vm12822_vm5  ;;  %v12825_v60 = vunpack.i.l.bf16 %v8598_v11 }
 0x30f   :  { %v9328_v45 = vpop.permute.xlu1 %6015  ;;  %vm12827_vm14 = vmmov %vm12822_vm5 }
 0x310   :  { %v11740_v38 = vunpack.i.h.bf16 %v9328_v45  ;;  %v11741_v23 = vunpack.i.l.bf16 %v9328_v45  ;;  %v6011_v52 = vpop.permute.xlu0 %6010  ;;  %v12855_v10 = vunpack.i.h.bf16 %v9328_v45 }
 0x311   :  { %v6013_v29 = vunpack.i.h.bf16 %v6011_v52  ;;  %v6012_v12 = vunpack.i.l.bf16 %v6011_v52  ;;  %v12821_v52 = vunpack.i.l.bf16 %v9254_v62 }
 0x312   :  { %v1973_v54 = vsel %vm12819_vm0, %v11740_v38, %v12818_v25  ;;  %v2156_v1 = vsel %vm12820_vm9, %v11741_v23, %v6007_v58  ;;  %v12826_v25 = vunpack.i.h.bf16 %v9254_v62 }
 0x313   :  { %v2179_v63 = vsel %vm12822_vm5, %v12821_v52, %v6013_v29  ;;  %v2185_v49 = vsel %vm12823_vm8, %v6012_v12, %v6002_v59  ;;  %v2186_v7 = vsel %vm12824_vm15, %v6013_v29, %v6012_v12  ;;  %v12830_v12 = vld [vmem:[#allocation68_spill] sm:$0xff]  ;;  %v9376_v59 = vpop.permute.xlu2 %6050  ;;  %3279 = vmatmul.f32.vlgmr.msrb.gmra.mxu3 %v9320_v37 }
 0x314   :  { %v1996_v38 = vsel %vm12827_vm14, %v12826_v25, %v12825_v60  ;;  %v9364_v58 = vsel %vm12613_vm6, %v2162_v16, %v2185_v49  ;;  %v9368_v52 = vsel %vm12630_vm3, %v2155_v15, %v2186_v7  ;;  %vm12831_vm0 = vnez %v12830_v12  ;;  %v13135_v12 = vld [vmem:[#allocation48_spill] sm:$0xff] }
 0x315   :  { %12828 = vst [vmem:[#allocation215_spill] sm:$0xff] %v9364_v58  ;;  %3212 = vmatpush.msrb.mxu0 %v9364_v58  ;;  %3333 = vmatpush.msra.mxu2 %v9368_v52  ;;  %v9374_v11 = vsel %vm12831_vm0, %v1973_v54, %v1996_v38  ;;  %v9380_v29 = vsel %vm12628_vm12, %v2156_v1, %v2179_v63  ;;  %v6037_v1 = vunpack.i.l.bf16 %v9306_v8  ;;  %v5943_v49 = vunpack.i.h.bf16 %v9114_v9 }
 0x316   :  { %12829 = vst [vmem:[#allocation216_spill] sm:$0xff] %v9368_v52  ;;  %v5952_v7 = vunpack.i.l.bf16 %v9155_v3  ;;  %v6053_v63 = vunpack.i.h.bf16 %v9376_v59  ;;  %vm12836_vm6 = vcmp.lt.s32.totalorder %v6324_v13, 4  ;;  %v12837_v3 = vunpack.i.h.bf16 %v9306_v8 }
 0x317   :  { %12832 = vst [vmem:[#allocation68_spill] sm:$0xff] %v9374_v11  ;;  %3213 = vmatpush.msrb.mxu0 %v9380_v29  ;;  %3334 = vmatpush.msra.mxu2 %v12834_v36  ;;  %v9385_v20 = vpop.permute.xlu1 %6030  ;;  %vm12838_vm12 = vmmov %vm12836_vm6  ;;  %vm12839_vm3 = vcmp.lt.s32.totalorder %v6324_v13, 116 }
 0x318   :  { %12833 = vst [vmem:[#allocation217_spill] sm:$0xff] %v9380_v29  ;;  %v9387_v16 = vpop.permute.xlu0 %6025  ;;  %v6033_v54 = vunpack.i.h.bf16 %v9385_v20  ;;  %v2055_v11 = vsel %vm12838_vm12, %v6037_v1, %v12837_v3  ;;  %vm12840_vm9 = vmmov %vm12836_vm6  ;;  %vm12851_vm12 = vcmp.lt.s32.totalorder %v6324_v13, 124 }
 0x319   :  { %3214 = vmatpush.msrb.mxu0 %v12642_v41  ;;  %3335 = vmatpush.msra.mxu2 %v12612_v32  ;;  %v6028_v38 = vunpack.i.h.bf16 %v9387_v16  ;;  %vm12841_vm5 = vmmov %vm12836_vm6 }
 0x31a   :  { %v2081_v32 = vsel %vm12839_vm3, %v5952_v7, %v6033_v54  ;;  %vm12842_vm8 = vmmov %vm12841_vm5 }
 0x31b   :  { %3215 = vmatpush.msrb.mxu0 %v6412_v57  ;;  %3336 = vmatpush.msra.mxu2 %v6394_v51  ;;  %v9403_v60 = vpop.permute.xlu2 %1603  ;;  %v2058_v51 = vsel %vm12841_vm5, %v5947_v4, %v6028_v38  ;;  %vm12844_vm15 = vmmov %vm12839_vm3 }
 0x31c   :  { %vm12845_vm14 = vmmov %vm12839_vm3 }
 0x31d   :  { %3216 = vmatpush.msrb.mxu0 %v6378_v46  ;;  %v12835_v46 = vunpack.i.h.bf16 %v8508_v55 }
 0x31f   :  { %v9399_v15 = vpop.permute.xlu1 %6045  ;;  %v2051_v29 = vsel %vm12836_vm6, %v12835_v46, %v5947_v4  ;;  %vm12847_vm6 = vmmov %vm12839_vm3  ;;  %vm12853_vm3 = vcmp.lt.s32.totalorder %v6324_v13, 12 }
 0x320   :  { %v6048_v25 = vunpack.i.h.bf16 %v9399_v15  ;;  %v9406_v23 = vpop.permute.xlu0 %6040  ;;  %v2082_v21 = vsel %vm12847_vm6, %v12846_v50, %v5952_v7  ;;  %v3113_v7 = vld [vmem:[%s11222_s3] sm:$0xff] }
 0x321   :  { %v6042_v52 = vunpack.i.l.bf16 %v9406_v23  ;;  %v12843_v58 = vunpack.i.h.bf16 %v9406_v23 }
 0x322   :  { %v2056_v36 = vsel %vm12840_vm9, %v6048_v25, %v6037_v1  ;;  %v2057_v55 = vsel %vm12842_vm8, %v6028_v38, %v6048_v25  ;;  %v12850_v38 = vunpack.i.h.bf16 %v8608_v26  ;;  %vm12854_vm9 = vmmov %vm12847_vm6 }
 0x323   :  { %v2078_v46 = vsel %vm12844_vm15, %v6042_v52, %v12843_v58  ;;  %v2079_v3 = vsel %vm12845_vm14, %v6053_v63, %v6042_v52  ;;  %v12852_v52 = vunpack.i.h.bf16 %v8466_v14  ;;  %v2080_v50 = vsel %vm12854_vm9, %v6033_v54, %v6053_v63  ;;  %v9471_v63 = vld [vmem:[#allocation6 + $0x20] sm:$0xff]  ;;  %vm12871_vm15 = vmmov %vm12853_vm3 }
 0x324   :  { %v9440_v1 = vsel %vm7060_vm13, %v2056_v36, %v2079_v3  ;;  %v9444_v4 = vsel %vm12790_vm11, %v2055_v11, %v2078_v46  ;;  %v1998_v58 = vsel %vm12851_vm12, %v12850_v38, %v5943_v49  ;;  %vm12856_vm13 = vmmov %vm12853_vm3  ;;  %v11758_v11 = vunpack.i.l.bf16 %v9399_v15 }
 0x325   :  { %12848 = vst [vmem:[#allocation218_spill] sm:$0xff] %v9440_v1  ;;  %v1975_v25 = vsel %vm12853_vm3, %v12852_v52, %v5938_v42  ;;  %3217 = vmatpush.msrb.mxu0 %v9440_v1  ;;  %3337 = vmatpush.msra.mxu2 %v9444_v4  ;;  %v1974_v26 = vsel %vm12856_vm13, %v5938_v42, %v12855_v10  ;;  %v6264_v54 = vmov 0   ;;  %v11759_v42 = vunpack.i.l.bf16 %v9376_v59  ;;  %v9510_v10 = vpop.permute.xlu2 %6070  ;;  %vm12874_vm14 = vmmov %vm12847_vm6 }
 0x326   :  { %12849 = vst [vmem:[#allocation219_spill] sm:$0xff] %v9444_v4  ;;  %v9465_v14 = vsel %vm12582_vm7, %v2058_v51, %v2081_v32  ;;  %v9469_v36 = vsel %vm12584_vm10, %v2057_v55, %v2080_v50  ;;  %6074 = vset.pattern.permute.xlu1 %v6264_v54  ;;  %6075 = vset.pattern.permute.xlu2 %v6264_v54  ;;  %v12860_v55 = vunpack.i.h.bf16 %v9254_v62  ;;  %vm12861_vm7 = vmmov %vm12851_vm12  ;;  %vm3119_vm6 = vcmask 64512  }
 0x327   :  { %12857 = vst [vmem:[#allocation220_spill] sm:$0xff] %v9465_v14  ;;  %3218 = vmatpush.msrb.mxu0 %v9465_v14  ;;  %3338 = vmatpush.msra.mxu2 %v9469_v36  ;;  %v9478_v48 = vpop.permute.xlu1 %6060  ;;  %v9482_v51 = vsel %vm12593_vm2, %v2051_v29, %v2082_v21  ;;  %v9497_v5 = vsel %vm12807_vm1, %v1975_v25, %v1998_v58  ;;  %v12863_v21 = vld [vmem:[#allocation64_spill] sm:$0xff]  ;;  %vm12869_vm8 = vmmov %vm12861_vm7  ;;  %v12870_v25 = vunpack.i.h.bf16 %v8890_v31 }
 0x328   :  { %12858 = vst [vmem:[#allocation221_spill] sm:$0xff] %v9469_v36  ;;  %v1997_v32 = vsel %vm12861_vm7, %v5943_v49, %v12860_v55  ;;  %v6063_v46 = vunpack.i.h.bf16 %v9478_v48  ;;  %v9490_v3 = vpop.permute.xlu0 %6055  ;;  %vm12864_vm2 = vnez %v12863_v21  ;;  %3219 = vmatmul.f32.vlgmr.msrb.gmra.mxu0 %v9471_v63  ;;  %3116 = vperm.xlu1 %6074, %v3113_v7   ;;  %v12866_v49 = vld [vmem:[#allocation158_spill] sm:$0xff]  ;;  %v12868_v55 = vunpack.i.h.bf16 %v9089_v19  ;;  %v12872_v7 = vld [vmem:[#allocation157_spill] sm:$0xff]  ;;  %vm12887_vm12 = vmmov %vm12841_vm5 }
 0x329   :  { %12859 = vst [vmem:[#allocation222_spill] sm:$0xff] %v9482_v51  ;;  %3303 = vmatpush.msra.mxu0 %v9482_v51  ;;  %3423 = vmatpush.msrb.mxu2 %v9465_v14  ;;  %v6058_v38 = vunpack.i.h.bf16 %v9490_v3  ;;  %v9501_v29 = vsel %vm12864_vm2, %v1974_v26, %v1997_v32  ;;  %v12867_v52 = vunpack.i.h.bf16 %v12866_v49  ;;  %v12873_v32 = vunpack.i.h.bf16 %v12872_v7  ;;  %v12875_v49 = vld [vmem:[#allocation171_spill] sm:$0xff]  ;;  %vm12892_vm3 = vmmov %vm12861_vm7  ;;  %v13138_v21 = vld [vmem:[#allocation96_spill] sm:$0xff] }
 0x32a   :  { %12862 = vst [vmem:[#allocation223_spill] sm:$0xff] %v9497_v5  ;;  %v2423_v58 = vsel %vm12869_vm8, %v12868_v55, %v6063_v46  ;;  %3339 = vmatmul.f32.vlgmr.msra.gmra.mxu2 %v9471_v63  ;;  %6076 = vset.pattern.permute.xlu0 %v6264_v54  ;;  %v9535_v55 = vld [vmem:[#allocation6 + $0x28] sm:$0xff]  ;;  %v12885_v51 = vunpack.i.l.bf16 %v9387_v16  ;;  %v12886_v14 = vunpack.i.h.bf16 %v8643_v47  ;;  %vm12899_vm7 = vmmov %vm12856_vm13 }
 0x32b   :  { %12865 = vst [vmem:[#allocation64_spill] sm:$0xff] %v9501_v29  ;;  %v1615_v50 = vsel %vm12841_vm5, %v12867_v52, %v11758_v11  ;;  %3304 = vmatpush.msra.mxu0 %v9497_v5  ;;  %3424 = vmatpush.msrb.mxu2 %v9501_v29  ;;  %v2400_v26 = vsel %vm12871_vm15, %v12870_v25, %v6058_v38  ;;  %v12876_v52 = vld [vmem:[#allocation169_spill] sm:$0xff]  ;;  %v11766_v25 = vunpack.i.l.bf16 %v9385_v20  ;;  %vm12908_vm5 = vmmov %vm12892_vm3 }
 0x32c   :  { %v1638_v19 = vsel %vm12874_vm14, %v12873_v32, %v11759_v42  ;;  %v9533_v31 = vsel %vm12604_vm4, %v2400_v26, %v2423_v58  ;;  %12878 = vst [vmem:[#allocation157_spill] sm:$0xff] %v9535_v55  ;;  %v12880_v58 = vld [vmem:[#allocation170_spill] sm:$0xff]  ;;  %v12881_v32 = vld [vmem:[#allocation164_spill] sm:$0xff]  ;;  %vm12884_vm4 = vmmov %vm12854_vm9  ;;  %v1871_v11 = vsel %vm12887_vm12, %v12886_v14, %v12885_v51 }
 0x32d   :  { %3305 = vmatpush.msra.mxu0 %v12875_v49  ;;  %3425 = vmatpush.msrb.mxu2 %v12876_v52  ;;  %12877 = vst [vmem:[#allocation158_spill] sm:$0xff] %v9533_v31  ;;  %v9540_v54 = vsel %vm12790_vm11, %v1615_v50, %v1638_v19  ;;  %v12882_v50 = vld [vmem:[#allocation41_spill] sm:$0xff]  ;;  %v12888_v19 = vld [vmem:[#allocation168_spill] sm:$0xff]  ;;  %vm12894_vm9 = vmmov %vm12892_vm3  ;;  %v6057_v49 = vunpack.i.l.bf16 %v9490_v3 }
 0x32e   :  { %3238 = vmatpush.msrb.mxu1 %v9533_v31  ;;  %12879 = vst [vmem:[#allocation224_spill] sm:$0xff] %v9540_v54  ;;  %v12889_v42 = vld [vmem:[#allocation32_spill] sm:$0xff]  ;;  %v12906_v3 = vld [vmem:[#allocation175_spill] sm:$0xff]  ;;  %vm12910_vm8 = vmmov %vm12899_vm7 }
 0x32f   :  { %3306 = vmatpush.msra.mxu0 %v8718_v33  ;;  %3426 = vmatpush.msrb.mxu2 %v12880_v58  ;;  %v1894_v58 = vsel %vm12884_vm4, %v12883_v35, %v11766_v25  ;;  %v12890_v33 = vunpack.i.h.bf16 %v9510_v10  ;;  %v12893_v35 = vunpack.i.l.bf16 %v9510_v10  ;;  %vm12927_vm15 = vmmov %vm12899_vm7  ;;  %v12928_v52 = vld [vmem:[#allocation145_spill] sm:$0xff] }
 0x330   :  { %3283 = vmatpush.msra.mxu1 %v9540_v54  ;;  %v9550_v26 = vpop.permute.xlu1 %6065  ;;  %vm12933_vm14 = vmmov %vm12887_vm12 }
 0x331   :  { %5108 = vmatmul.msk.f32.vlgmr.msrb.gmra.mxu1 %vm3119_vm6, %v9535_v55  ;;  %3307 = vmatpush.msra.mxu0 %v12882_v50  ;;  %v9557_v7 = vpop.permute.xlu0 %1629  ;;  %v12891_v50 = vunpack.i.h.bf16 %v8510_v43  ;;  %v2422_v25 = vsel %vm12894_vm9, %v6063_v46, %v12893_v35  ;;  %v12895_v47 = vunpack.i.h.bf16 %v9550_v26  ;;  %v12901_v46 = vld [vmem:[#allocation28_spill] sm:$0xff]  ;;  %vm12935_vm4 = vmmov %vm12887_vm12  ;;  %vm12938_vm12 = vcmp.lt.s32.totalorder %v6324_v13, 116 }
 0x332   :  { %3284 = vmatpush.msra.mxu1 %v12881_v32  ;;  %3427 = vmatpush.msrb.mxu2 %v8305_v2  ;;  %v12896_v2 = vld [vmem:[#allocation124_spill] sm:$0xff] }
 0x333   :  { %3308 = vmatpush.msra.mxu0 %v12889_v42  ;;  %v1502_v39 = vsel %vm12892_vm3, %v12891_v50, %v12890_v33  ;;  %v12897_v14 = vunpack.i.h.bf16 %v12896_v2  ;;  %v12900_v42 = vld [vmem:[#allocation40_spill] sm:$0xff]  ;;  %v6062_v33 = vunpack.i.l.bf16 %v9478_v48  ;;  %v1860_v50 = vpop.permute.xlu2 %1859  ;;  %v9610_v48 = vsel %vm12790_vm11, %v1871_v11, %v1894_v58 }
 0x334   :  { %3285 = vmatpush.msra.mxu1 %v12888_v19  ;;  %v12898_v19 = vunpack.i.l.bf16 %v9550_v26  ;;  %3428 = vmatpush.msrb.mxu2 %v12900_v42  ;;  %12905 = vst [vmem:[#allocation226_spill] sm:$0xff] %v9610_v48  ;;  %v12911_v58 = vld [vmem:[#allocation188_spill] sm:$0xff] }
 0x335   :  { %v1479_v51 = vsel %vm12856_vm13, %v12897_v14, %v12895_v47  ;;  %3309 = vmatpush.msra.mxu0 %v12901_v46  ;;  %v12904_v47 = vld [vmem:[#allocation113_spill] sm:$0xff]  ;;  %v12918_v46 = vld [vmem:[#allocation192_spill] sm:$0xff] }
 0x336   :  { %v2399_v43 = vsel %vm12899_vm7, %v6058_v38, %v12898_v19  ;;  %v9600_v2 = vsel %vm12807_vm1, %v1479_v51, %v1502_v39  ;;  %3429 = vmatpush.msrb.mxu2 %v12904_v47  ;;  %v12907_v38 = vunpack.i.h.bf16 %v8982_v44  ;;  %v12909_v19 = vunpack.i.h.bf16 %v8791_v28  ;;  %v12912_v51 = vld [vmem:[#allocation29_spill] sm:$0xff]  ;;  %v12913_v44 = vld [vmem:[#allocation26_spill] sm:$0xff]  ;;  %v13151_v13 = vld [vmem:[#allocation88_spill] sm:$0xff] }
 0x337   :  { %12902 = vst [vmem:[#allocation124_spill] sm:$0xff] %v9600_v2  ;;  %v9604_v35 = vsel %vm12807_vm1, %v2399_v43, %v2422_v25  ;;  %3286 = vmatpush.msra.mxu1 %v9600_v2  ;;  %3310 = vmatpush.msra.mxu0 %v9610_v48  ;;  %v12914_v43 = vld [vmem:[#allocation97_spill] sm:$0xff] }
 0x338   :  { %12903 = vst [vmem:[#allocation225_spill] sm:$0xff] %v9604_v35  ;;  %3358 = vmatpush.msra.mxu3 %v9604_v35  ;;  %v1742_v25 = vsel %vm12908_vm5, %v12907_v38, %v6062_v33  ;;  %v1719_v39 = vsel %vm12910_vm8, %v12909_v19, %v6057_v49  ;;  %v9624_v11 = vpop.permute.xlu1 %1493  ;;  %v12916_v38 = vld [vmem:[#allocation183_spill] sm:$0xff]  ;;  %v12917_v19 = vld [vmem:[#allocation90_spill] sm:$0xff]  ;;  %vm12953_vm5 = vmmov %vm12935_vm4 }
 0x339   :  { %3287 = vmatpush.msra.mxu1 %v12906_v3  ;;  %3311 = vmatpush.msra.mxu0 %v12911_v58  ;;  %v9629_v14 = vpop.permute.xlu0 %1467  ;;  %v9637_v28 = vsel %vm12807_vm1, %v1719_v39, %v1742_v25  ;;  %v12920_v58 = vld [vmem:[#allocation198_spill] sm:$0xff]  ;;  %12921 = vst [vmem:[#allocation183_spill] sm:$0xff] %v9648_v24  ;;  %v12922_v25 = vld [vmem:[#allocation195_spill] sm:$0xff]  ;;  %vm12924_vm1 = vmmov %vm12892_vm3 }
 0x33a   :  { %3383 = vmatpush.msrb.mxu3 %v12722_v0  ;;  %12915 = vst [vmem:[#allocation227_spill] sm:$0xff] %v9637_v28  ;;  %v12923_v39 = vunpack.i.l.bf16 %v12922_v25  ;;  %vm12940_vm3 = vmmov %vm12938_vm12 }
 0x33b   :  { %5109 = vmatmul.msk.f32.vlgmr.msra.gmra.mxu3 %vm3119_vm6, %v9535_v55  ;;  %3288 = vmatpush.msra.mxu1 %v12913_v44  ;;  %v1734_v47 = vpop.permute.xlu2 %1733  ;;  %vm12943_vm9 = vmmov %vm12940_vm3 }
 0x33c   :  { %3384 = vmatpush.msrb.mxu3 %v12912_v51  ;;  %3312 = vmatpush.msra.mxu0 %v8946_v53  ;;  %v9643_v51 = vld [vmem:[#allocation3 + $0x8] sm:$0xff] }
 0x33d   :  { %3289 = vmatpush.msra.mxu1 %v12916_v38  ;;  %v12919_v53 = vld [vmem:[#allocation93_spill] sm:$0xff]  ;;  %v1740_v38 = vsel %vm12924_vm1, %v1734_v47, %v12923_v39  ;;  %v12934_v39 = vunpack.i.l.bf16 %v9387_v16 }
 0x33e   :  { %3385 = vmatpush.msrb.mxu3 %v12914_v43  ;;  %3313 = vmatpush.msra.mxu0 %v9637_v28  ;;  %v12925_v28 = vld [vmem:[#allocation196_spill] sm:$0xff] }
 0x33f   :  { %3290 = vmatpush.msra.mxu1 %v9643_v51 }
 0x340   :  { %3386 = vmatpush.msrb.mxu3 %v12917_v19  ;;  %3314 = vmatpush.msra.mxu0 %v12918_v46  ;;  %v1708_v44 = vpop.permute.xlu1 %1707  ;;  %v12926_v46 = vunpack.i.l.bf16 %v12925_v28  ;;  %v1870_v28 = vsel %vm12935_vm4, %v12934_v39, %v1860_v50  ;;  %v12947_v39 = vld [vmem:[#allocation55_spill] sm:$0xff]  ;;  %vm12968_vm4 = vmmov %vm12940_vm3 }
 0x341   :  { %3291 = vmatpush.msra.mxu1 %v9648_v24  ;;  %v1886_v42 = vpop.permute.xlu0 %1885  ;;  %v12931_v24 = vld [vmem:[#allocation177_spill] sm:$0xff]  ;;  %vm12948_vm7 = vnez %v12947_v39 }
 0x342   :  { %3387 = vmatpush.msrb.mxu3 %v12919_v53  ;;  %3315 = vmatpush.msra.mxu0 %v12920_v58  ;;  %v1717_v48 = vsel %vm12927_vm15, %v1708_v44, %v12926_v46  ;;  %v12930_v58 = vld [vmem:[#allocation79_spill] sm:$0xff]  ;;  %v12932_v5 = vunpack.i.l.bf16 %v12931_v24  ;;  %v12936_v46 = vld [vmem:[#allocation190_spill] sm:$0xff]  ;;  %v12944_v24 = vld [vmem:[#allocation56_spill] sm:$0xff] }
 0x343   :  { %v9662_v53 = vsel %vm12831_vm0, %v1717_v48, %v1740_v38  ;;  %v12937_v29 = vunpack.i.l.bf16 %v12936_v46  ;;  %v12939_v48 = vunpack.i.l.bf16 %v9385_v20  ;;  %vm12945_vm13 = vnez %v12944_v24  ;;  %v12950_v20 = vld [vmem:[#allocation60_spill] sm:$0xff]  ;;  %vm12961_vm15 = vmmov %vm12924_vm1  ;;  %v13152_v39 = vld [vmem:[#allocation221_spill] sm:$0xff] }
 0x344   :  { %3388 = vmatpush.msrb.mxu3 %v12928_v52  ;;  %12929 = vst [vmem:[#allocation195_spill] sm:$0xff] %v9662_v53  ;;  %3316 = vmatpush.msra.mxu0 %v12930_v58  ;;  %v1869_v25 = vsel %vm12933_vm14, %v1860_v50, %v12932_v5  ;;  %v12941_v58 = vld [vmem:[#allocation141_spill] sm:$0xff]  ;;  %v12942_v5 = vunpack.i.l.bf16 %v9376_v59  ;;  %v12952_v59 = vunpack.i.l.bf16 %v9399_v15  ;;  %v1741_v15 = vsel %vm12924_vm1, %v6062_v33, %v1734_v47  ;;  %vm12963_vm14 = vmmov %vm12910_vm8  ;;  %v12965_v47 = vld [vmem:[#allocation160_spill] sm:$0xff] }
 0x345   :  { %v1892_v36 = vsel %vm12938_vm12, %v1886_v42, %v12937_v29  ;;  %v1893_v38 = vsel %vm12940_vm3, %v12939_v48, %v1886_v42  ;;  %v12951_v42 = vld [vmem:[#allocation142_spill] sm:$0xff]  ;;  %v12954_v48 = vld [vmem:[#allocation87_spill] sm:$0xff]  ;;  %v12970_v53 = vld [vmem:[#allocation148_spill] sm:$0xff] }
 0x346   :  { %3389 = vmatpush.msrb.mxu3 %v12941_v58  ;;  %v1637_v16 = vsel %vm12943_vm9, %v12942_v5, %v9557_v7  ;;  %v9689_v50 = vsel %vm12945_vm13, %v1870_v28, %v1893_v38  ;;  %v9693_v29 = vsel %vm12948_vm7, %v1869_v25, %v1892_v36  ;;  %3317 = vmatpush.msra.mxu0 %v12950_v20  ;;  %v12956_v25 = vld [vmem:[#allocation182_spill] sm:$0xff]  ;;  %v12957_v38 = vld [vmem:[#allocation84_spill] sm:$0xff]  ;;  %vm12976_vm12 = vmmov %vm12953_vm5 }
 0x347   :  { %12946 = vst [vmem:[#allocation196_spill] sm:$0xff] %v9689_v50  ;;  %3430 = vmatpush.msrb.mxu2 %v9689_v50  ;;  %v1614_v46 = vsel %vm12953_vm5, %v12952_v59, %v9403_v60  ;;  %v1718_v36 = vsel %vm12910_vm8, %v6057_v49, %v1708_v44  ;;  %v12958_v5 = vld [vmem:[#allocation186_spill] sm:$0xff]  ;;  %v12962_v44 = vunpack.i.h.bf16 %v9550_v26  ;;  %vm12998_vm9 = vmmov %vm12924_vm1 }
 0x348   :  { %12949 = vst [vmem:[#allocation177_spill] sm:$0xff] %v9693_v29  ;;  %3390 = vmatpush.msrb.mxu3 %v12951_v42  ;;  %3318 = vmatpush.msra.mxu0 %v12954_v48  ;;  %v9706_v28 = vsel %vm12945_vm13, %v1614_v46, %v1637_v16  ;;  %v12959_v42 = vld [vmem:[#allocation80_spill] sm:$0xff]  ;;  %v12960_v16 = vunpack.i.h.bf16 %v9510_v10  ;;  %v9729_v33 = vsel %vm12864_vm2, %v1718_v36, %v1741_v15  ;;  %v12973_v36 = vld [vmem:[#allocation105_spill] sm:$0xff] }
 0x349   :  { %12955 = vst [vmem:[#allocation190_spill] sm:$0xff] %v9706_v28  ;;  %3431 = vmatpush.msrb.mxu2 %v12956_v25  ;;  %v1388_v59 = vpop.permute.xlu0 %1387  ;;  %v1478_v46 = vsel %vm12963_vm14, %v12962_v44, %v9629_v14  ;;  %v12966_v48 = vld [vmem:[#allocation180_spill] sm:$0xff]  ;;  %v12972_v25 = vld [vmem:[#allocation163_spill] sm:$0xff]  ;;  %v12974_v15 = vunpack.i.h.bf16 %v12973_v36  ;;  %vm13018_vm14 = vmmov %vm12910_vm8  ;;  %3319 = vmatmul.f32.vlgmr.msra.gmra.mxu0 %v9322_v40 }
 0x34a   :  { %3391 = vmatpush.msrb.mxu3 %v12957_v38  ;;  %3403 = vmatpush.msrb.mxu0 %v9706_v28  ;;  %v1501_v49 = vsel %vm12961_vm15, %v12960_v16, %v9624_v11  ;;  %12964 = vst [vmem:[#allocation56_spill] sm:$0xff] %v9729_v33  ;;  %v12967_v28 = vunpack.i.h.bf16 %v12966_v48  ;;  %v12969_v16 = vld [vmem:[#allocation83_spill] sm:$0xff]  ;;  %vm13015_vm15 = vmmov %vm12998_vm9 }
 0x34b   :  { %3432 = vmatpush.msrb.mxu2 %v12958_v5  ;;  %v2388_v5 = vpop.permute.xlu2 %2387 }
 0x34c   :  { %3392 = vmatpush.msrb.mxu3 %v12959_v42  ;;  %3404 = vmatpush.msrb.mxu0 %v12965_v47  ;;  %v1398_v20 = vsel %vm12968_vm4, %v12967_v28, %v1388_v59  ;;  %v12975_v47 = vunpack.i.l.bf16 %v12973_v36  ;;  %v9752_v28 = vsel %vm12864_vm2, %v1478_v46, %v1501_v49  ;;  %v12983_v36 = vld [vmem:[#allocation151_spill] sm:$0xff]  ;;  %v12984_v49 = vld [vmem:[#allocation118_spill] sm:$0xff]  ;;  %vm13032_vm4 = vmmov %vm12998_vm9 }
 0x34d   :  { %3433 = vmatpush.msrb.mxu2 %v9729_v33  ;;  %v9741_v44 = vsel %vm12790_vm11, %v12970_v53, %v1398_v20  ;;  %12977 = vst [vmem:[#allocation180_spill] sm:$0xff] %v9752_v28  ;;  %v12980_v53 = vld [vmem:[#allocation184_spill] sm:$0xff]  ;;  %v12985_v46 = vld [vmem:[#allocation102_spill] sm:$0xff]  ;;  %vm12990_vm11 = vmmov %vm12924_vm1 }
 0x34e   :  { %3393 = vmatpush.msrb.mxu3 %v12969_v16  ;;  %12971 = vst [vmem:[#allocation55_spill] sm:$0xff] %v9741_v44  ;;  %3405 = vmatpush.msrb.mxu0 %v12972_v25  ;;  %v1377_v48 = vsel %vm12976_vm12, %v12975_v47, %v12974_v15  ;;  %v12978_v16 = vld [vmem:[#allocation191_spill] sm:$0xff]  ;;  %v12982_v47 = vld [vmem:[#allocation194_spill] sm:$0xff]  ;;  %v12986_v15 = vld [vmem:[#allocation76_spill] sm:$0xff] }
 0x34f   :  { %3292 = vmatpush.msra.mxu1 %v9741_v44  ;;  %3434 = vmatpush.msrb.mxu2 %v12978_v16  ;;  %v9760_v20 = vsel %vm12584_vm10, %v1377_v48, %v12980_v53  ;;  %v12987_v16 = vunpack.i.l.bf16 %v9122_v34  ;;  %vm12988_vm10 = vmmov %vm12910_vm8  ;;  %v12989_v48 = vunpack.i.l.bf16 %v9114_v9  ;;  %v12995_v34 = vld [vmem:[#allocation109_spill] sm:$0xff]  ;;  %v12997_v9 = vunpack.i.l.bf16 %v9510_v10 }
 0x350   :  { %3394 = vmatpush.msrb.mxu3 %v12979_v61  ;;  %12981 = vst [vmem:[#allocation148_spill] sm:$0xff] %v9760_v20  ;;  %3406 = vmatpush.msrb.mxu0 %v9752_v28  ;;  %v12992_v28 = vld [vmem:[#allocation165_spill] sm:$0xff]  ;;  %vm13012_vm1 = vmmov %vm12940_vm3 }
 0x351   :  { %3293 = vmatpush.msra.mxu1 %v9760_v20  ;;  %3435 = vmatpush.msrb.mxu2 %v12982_v47  ;;  %v2414_v25 = vpop.permute.xlu0 %2413  ;;  %v2397_v6 = vsel %vm12988_vm10, %v2388_v5, %v12987_v16  ;;  %v12991_v47 = vld [vmem:[#allocation154_spill] sm:$0xff]  ;;  %v12993_v33 = vunpack.i.l.bf16 %v12992_v28  ;;  %v13000_v28 = vld [vmem:[#allocation67_spill] sm:$0xff]  ;;  %vm13039_vm12 = vmmov %vm12910_vm8 }
 0x352   :  { %3395 = vmatpush.msrb.mxu3 %v12983_v36  ;;  %3407 = vmatpush.msrb.mxu0 %v12984_v49  ;;  %v2420_v53 = vsel %vm12990_vm11, %v2414_v25, %v12989_v48  ;;  %v12996_v16 = vld [vmem:[#allocation174_spill] sm:$0xff]  ;;  %v2421_v48 = vsel %vm12998_vm9, %v12997_v9, %v2414_v25  ;;  %v13006_v25 = vunpack.i.l.bf16 %v9550_v26  ;;  %vm13041_vm10 = vmmov %vm12953_vm5 }
 0x353   :  { %3294 = vmatpush.msra.mxu1 %v12985_v46  ;;  %3436 = vmatpush.msrb.mxu2 %v12986_v15  ;;  %v1636_v46 = vsel %vm12940_vm3, %v9557_v7, %v12993_v33  ;;  %v9785_v49 = vsel %vm12831_vm0, %v2397_v6, %v2420_v53  ;;  %v13001_v15 = vld [vmem:[#allocation166_spill] sm:$0xff]  ;;  %v9800_v33 = vpop.permute.xlu2 %2309  ;;  %v13004_v53 = vld [vmem:[#allocation187_spill] sm:$0xff]  ;;  %vm13045_vm11 = vmmov %vm13012_vm1 }
 0x354   :  { %3396 = vmatpush.msrb.mxu3 %v12991_v47  ;;  %12994 = vst [vmem:[#allocation105_spill] sm:$0xff] %v9785_v49  ;;  %3408 = vmatpush.msrb.mxu0 %v12996_v16  ;;  %v12999_v47 = vld [vmem:[#allocation78_spill] sm:$0xff]  ;;  %v13002_v50 = vunpack.i.l.bf16 %v13001_v15  ;;  %v2398_v9 = vsel %vm12910_vm8, %v13006_v25, %v2388_v5  ;;  %v1390_v15 = vpop.permute.xlu1 %1389  ;;  %v13007_v16 = vld [vmem:[#allocation75_spill] sm:$0xff]  ;;  %vm13057_vm3 = vmmov %vm13012_vm1 }
 0x355   :  { %3295 = vmatpush.msra.mxu1 %v12995_v34  ;;  %3437 = vmatpush.msrb.mxu2 %v12999_v47  ;;  %v13003_v6 = vld [vmem:[#allocation106_spill] sm:$0xff]  ;;  %v1397_v26 = vsel %vm13012_vm1, %v1388_v59, %v1390_v15  ;;  %v13019_v59 = vld [vmem:[#allocation43_spill] sm:$0xff]  ;;  %v13085_v47 = vld [vmem:[#allocation37_spill] sm:$0xff] }
 0x356   :  { %3397 = vmatpush.msrb.mxu3 %v13000_v28  ;;  %v1613_v7 = vsel %vm12953_vm5, %v9403_v60, %v13002_v50  ;;  %3409 = vmatpush.msrb.mxu0 %v13004_v53  ;;  %v13008_v49 = vld [vmem:[#allocation62_spill] sm:$0xff]  ;;  %v9816_v60 = vsel %vm12864_vm2, %v2398_v9, %v2421_v48  ;;  %v13010_v50 = vld [vmem:[#allocation111_spill] sm:$0xff]  ;;  %v13013_v48 = vld [vmem:[#allocation176_spill] sm:$0xff] }
 0x357   :  { %3296 = vmatpush.msra.mxu1 %v13003_v6  ;;  %v9806_v10 = vsel %vm12948_vm7, %v1613_v7, %v1636_v46  ;;  %3438 = vmatpush.msrb.mxu2 %v13007_v16  ;;  %13009 = vst [vmem:[#allocation165_spill] sm:$0xff] %v9816_v60  ;;  %v9820_v46 = vld [vmem:[#allocation3 + $0x10] sm:$0xff]  ;;  %v13014_v7 = vunpack.i.l.bf16 %v13013_v48  ;;  %v13022_v48 = vld [vmem:[#allocation153_spill] sm:$0xff]  ;;  %vm13099_vm9 = vmmov %vm12953_vm5 }
 0x358   :  { %13005 = vst [vmem:[#allocation184_spill] sm:$0xff] %v9806_v10  ;;  %3398 = vmatpush.msrb.mxu3 %v13008_v49  ;;  %3410 = vmatpush.msrb.mxu0 %v9820_v46  ;;  %v13016_v25 = vld [vmem:[#allocation178_spill] sm:$0xff]  ;;  %vm13106_vm8 = vmmov %vm13012_vm1 }
 0x359   :  { %3523 = vmatpush.msra.mxu2 %v9806_v10  ;;  %3297 = vmatpush.msra.mxu1 %v13010_v50  ;;  %13011 = vst [vmem:[#allocation166_spill] sm:$0xff] %v9820_v46  ;;  %v1500_v53 = vsel %vm13015_vm15, %v9624_v11, %v13014_v7  ;;  %v13017_v9 = vunpack.i.l.bf16 %v13016_v25  ;;  %v9842_v50 = vld [vmem:[#allocation3] sm:$0xff]  ;;  %v13021_v46 = vld [vmem:[#allocation155_spill] sm:$0xff]  ;;  %v9849_v11 = vsel %vm12945_vm13, %v13022_v48, %v1397_v26  ;;  %v13024_v7 = vld [vmem:[#allocation17_spill] sm:$0xff] }
 0x35a   :  { %3478 = vmatpush.msra.mxu3 %v9816_v60  ;;  %v9828_v5 = vpop.permute.xlu0 %2147  ;;  %13020 = vst [vmem:[#allocation187_spill] sm:$0xff] %v9842_v50  ;;  %3411 = vmatpush.msrb.mxu0 %v9842_v50  ;;  %v13026_v25 = vld [vmem:[#allocation20_spill] sm:$0xff]  ;;  %v13027_v26 = vld [vmem:[#allocation181_spill] sm:$0xff]  ;;  %v13028_v48 = vld [vmem:[#allocation27_spill] sm:$0xff] }
 0x35b   :  { %3399 = vmatmul.f32.vlgmr.msrb.gmra.mxu3 %v9320_v37  ;;  %3524 = vmatpush.msra.mxu2 %v9540_v54  ;;  %v1477_v16 = vsel %vm13018_vm14, %v9629_v14, %v13017_v9  ;;  %13023 = vst [vmem:[#allocation176_spill] sm:$0xff] %v9849_v11  ;;  %v9861_v9 = vpop.permute.xlu2 %2043  ;;  %v13034_v50 = vld [vmem:[#allocation185_spill] sm:$0xff]  ;;  %v13037_v54 = vld [vmem:[#allocation100_spill] sm:$0xff]  ;;  %vm13116_vm15 = vmmov %vm13032_vm4 }
 0x35c   :  { %3483 = vmatpush.msrb.mxu3 %v12801_v17  ;;  %3298 = vmatpush.msra.mxu1 %v13019_v59  ;;  %v9855_v14 = vsel %vm12831_vm0, %v1477_v16, %v1500_v53  ;;  %v13029_v17 = vld [vmem:[#allocation104_spill] sm:$0xff]  ;;  %v13033_v53 = vld [vmem:[#allocation193_spill] sm:$0xff]  ;;  %v13038_v10 = vunpack.i.h.bf16 %v13037_v54  ;;  %vm13118_vm14 = vmmov %vm13039_vm12 }
 0x35d   :  { %3525 = vmatpush.msra.mxu2 %v12881_v32  ;;  %13025 = vst [vmem:[#allocation178_spill] sm:$0xff] %v9855_v14  ;;  %3412 = vmatpush.msrb.mxu0 %v9849_v11  ;;  %v13030_v32 = vunpack.i.h.bf16 %v13029_v17 }
 0x35e   :  { %3363 = vmatpush.msrb.mxu1 %v13021_v46  ;;  %3484 = vmatpush.msrb.mxu3 %v13024_v7  ;;  %v13031_v46 = vunpack.i.l.bf16 %v13029_v17 }
 0x35f   :  { %3526 = vmatpush.msra.mxu2 %v9855_v14  ;;  %3413 = vmatpush.msrb.mxu0 %v13027_v26  ;;  %v13035_v26 = vld [vmem:[#allocation95_spill] sm:$0xff] }
 0x360   :  { %3364 = vmatpush.msrb.mxu1 %v13026_v25  ;;  %3485 = vmatpush.msrb.mxu3 %v12642_v41  ;;  %v1317_v16 = vsel %vm13032_vm4, %v13031_v46, %v13030_v32  ;;  %v13036_v14 = vunpack.i.l.bf16 %v13035_v26  ;;  %v13040_v32 = vunpack.i.h.bf16 %v9306_v8 }
 0x361   :  { %3527 = vmatpush.msra.mxu2 %v9600_v2  ;;  %3299 = vmatmul.f32.vlgmr.msra.gmra.mxu1 %v13033_v53  ;;  %v13042_v2 = vld [vmem:[#allocation23_spill] sm:$0xff]  ;;  %v13043_v53 = vld [vmem:[#allocation57_spill] sm:$0xff] }
 0x362   :  { %3365 = vmatpush.msrb.mxu1 %v13028_v48  ;;  %3486 = vmatpush.msrb.mxu3 %v6412_v57  ;;  %v9875_v11 = vpop.permute.xlu0 %2069  ;;  %v1294_v17 = vsel %vm13039_vm12, %v13038_v10, %v13036_v14  ;;  %v2054_v46 = vsel %vm13041_vm10, %v13040_v32, %v9861_v9  ;;  %v13048_v10 = vld [vmem:[#allocation59_spill] sm:$0xff]  ;;  %v9908_v14 = vld [vmem:[#allocation3 + $0x28] sm:$0xff]  ;;  %v13052_v32 = vld [vmem:[#allocation72_spill] sm:$0xff] }
 0x363   :  { %3414 = vmatpush.msrb.mxu0 %v13034_v50  ;;  %v13044_v50 = vunpack.i.h.bf16 %v9406_v23  ;;  %3528 = vmatpush.msra.mxu2 %v12906_v3  ;;  %v9899_v8 = vsel %vm12864_vm2, %v1294_v17, %v1317_v16  ;;  %v13049_v23 = vld [vmem:[#allocation58_spill] sm:$0xff]  ;;  %13050 = vst [vmem:[#allocation193_spill] sm:$0xff] %v9908_v14  ;;  %v13053_v16 = vld [vmem:[#allocation52_spill] sm:$0xff]  ;;  %v9914_v17 = vld [vmem:[#allocation3 + $0x18] sm:$0xff] }
 0x364   :  { %3366 = vmatpush.msrb.mxu1 %v13042_v2  ;;  %3487 = vmatpush.msrb.mxu3 %v13043_v53  ;;  %13046 = vst [vmem:[#allocation153_spill] sm:$0xff] %v9899_v8  ;;  %v13059_v53 = vld [vmem:[#allocation73_spill] sm:$0xff]  ;;  %v13060_v2 = vld [vmem:[#allocation131_spill] sm:$0xff] }
 0x365   :  { %v2077_v26 = vsel %vm13045_vm11, %v13044_v50, %v9875_v11  ;;  %3415 = vmatpush.msrb.mxu0 %v9899_v8  ;;  %3529 = vmatpush.msra.mxu2 %v9908_v14  ;;  %v13051_v50 = vld [vmem:[#allocation103_spill] sm:$0xff]  ;;  %13054 = vst [vmem:[#allocation95_spill] sm:$0xff] %v9914_v17  ;;  %v13063_v8 = vld [vmem:[#allocation152_spill] sm:$0xff]  ;;  %v13083_v14 = vld [vmem:[#allocation121_spill] sm:$0xff] }
 0x366   :  { %v9903_v54 = vsel %vm12945_vm13, %v2054_v46, %v2077_v26  ;;  %3367 = vmatpush.msrb.mxu1 %v13048_v10  ;;  %3488 = vmatpush.msrb.mxu3 %v13049_v23  ;;  %v13055_v46 = vld [vmem:[#allocation189_spill] sm:$0xff] }
 0x367   :  { %13047 = vst [vmem:[#allocation104_spill] sm:$0xff] %v9903_v54  ;;  %3416 = vmatpush.msrb.mxu0 %v13051_v50  ;;  %3530 = vmatpush.msra.mxu2 %v9914_v17  ;;  %v13056_v26 = vunpack.i.l.bf16 %v13055_v46  ;;  %v13058_v23 = vld [vmem:[#allocation101_spill] sm:$0xff]  ;;  %v13061_v50 = vld [vmem:[#allocation36_spill] sm:$0xff]  ;;  %v13065_v46 = vld [vmem:[#allocation126_spill] sm:$0xff] }
 0x368   :  { %3368 = vmatpush.msrb.mxu1 %v13052_v32  ;;  %3489 = vmatpush.msrb.mxu3 %v13053_v16  ;;  %v13062_v16 = vld [vmem:[#allocation123_spill] sm:$0xff] }
 0x369   :  { %v1396_v3 = vsel %vm13057_vm3, %v1390_v15, %v13056_v26  ;;  %3417 = vmatpush.msrb.mxu0 %v13058_v23  ;;  %3531 = vmatpush.msra.mxu2 %v9643_v51  ;;  %v13066_v15 = vld [vmem:[#allocation125_spill] sm:$0xff]  ;;  %v13067_v26 = vld [vmem:[#allocation127_spill] sm:$0xff]  ;;  %v13069_v23 = vld [vmem:[#allocation128_spill] sm:$0xff] }
 0x36a   :  { %3369 = vmatpush.msrb.mxu1 %v13059_v53  ;;  %3490 = vmatpush.msrb.mxu3 %v13060_v2  ;;  %v9930_v17 = vsel %vm12948_vm7, %v13063_v8, %v1396_v3  ;;  %v13068_v51 = vld [vmem:[#allocation35_spill] sm:$0xff]  ;;  %v13072_v8 = vld [vmem:[#allocation50_spill] sm:$0xff] }
 0x36b   :  { %3418 = vmatpush.msrb.mxu0 %v13061_v50  ;;  %13064 = vst [vmem:[#allocation100_spill] sm:$0xff] %v9930_v17  ;;  %3532 = vmatpush.msra.mxu2 %v9930_v17  ;;  %v13070_v2 = vld [vmem:[#allocation51_spill] sm:$0xff]  ;;  %v13074_v53 = vld [vmem:[#allocation98_spill] sm:$0xff]  ;;  %v13075_v17 = vld [vmem:[#allocation112_spill] sm:$0xff] }
 0x36c   :  { %3370 = vmatpush.msrb.mxu1 %v13062_v16  ;;  %3491 = vmatpush.msrb.mxu3 %v13065_v46  ;;  %v13071_v3 = vld [vmem:[#allocation99_spill] sm:$0xff] }
 0x36d   :  { %3503 = vmatpush.msra.mxu0 %v13019_v59  ;;  %3533 = vmatpush.msra.mxu2 %v9741_v44  ;;  %v13073_v46 = vld [vmem:[#allocation47_spill] sm:$0xff] }
 0x36e   :  { %3371 = vmatpush.msrb.mxu1 %v13066_v15  ;;  %3492 = vmatpush.msrb.mxu3 %v13067_v26  ;;  %v13076_v26 = vld [vmem:[#allocation46_spill] sm:$0xff]  ;;  %v13078_v44 = vld [vmem:[#allocation91_spill] sm:$0xff] }
 0x36f   :  { %3504 = vmatpush.msra.mxu0 %v13068_v51  ;;  %3534 = vmatpush.msra.mxu2 %v9760_v20  ;;  %v13077_v51 = vld [vmem:[#allocation45_spill] sm:$0xff] }
 0x370   :  { %3372 = vmatpush.msrb.mxu1 %v13069_v23  ;;  %3493 = vmatpush.msrb.mxu3 %v13070_v2  ;;  %v13079_v2 = vld [vmem:[#allocation44_spill] sm:$0xff]  ;;  %v13081_v20 = vld [vmem:[#allocation149_spill] sm:$0xff] }
 0x371   :  { %3505 = vmatpush.msra.mxu0 %v13071_v3  ;;  %3535 = vmatpush.msra.mxu2 %v13075_v17  ;;  %v13080_v23 = vld [vmem:[#allocation120_spill] sm:$0xff]  ;;  %v13084_v17 = vld [vmem:[#allocation143_spill] sm:$0xff] }
 0x372   :  { %3373 = vmatpush.msrb.mxu1 %v13072_v8  ;;  %3494 = vmatpush.msrb.mxu3 %v13073_v46  ;;  %v13082_v46 = vld [vmem:[#allocation122_spill] sm:$0xff] }
 0x373   :  { %3506 = vmatpush.msra.mxu0 %v13074_v53  ;;  %3536 = vmatpush.msra.mxu2 %v12995_v34  ;;  %v13091_v34 = vld [vmem:[#allocation85_spill] sm:$0xff] }
 0x374   :  { %3374 = vmatpush.msrb.mxu1 %v13076_v26  ;;  %3495 = vmatpush.msrb.mxu3 %v13077_v51  ;;  %v13086_v51 = vld [vmem:[#allocation132_spill] sm:$0xff] }
 0x375   :  { %3507 = vmatpush.msra.mxu0 %v13078_v44  ;;  %3537 = vmatpush.msra.mxu2 %v13003_v6  ;;  %v13087_v44 = vld [vmem:[#allocation116_spill] sm:$0xff]  ;;  %v13089_v6 = vld [vmem:[#allocation133_spill] sm:$0xff] }
 0x376   :  { %3375 = vmatpush.msrb.mxu1 %v13079_v2  ;;  %3496 = vmatpush.msrb.mxu3 %v13080_v23  ;;  %v13088_v23 = vld [vmem:[#allocation144_spill] sm:$0xff]  ;;  %v13090_v2 = vld [vmem:[#allocation18_spill] sm:$0xff] }
 0x377   :  { %3508 = vmatpush.msra.mxu0 %v13081_v20  ;;  %3538 = vmatpush.msra.mxu2 %v13085_v47 }
 0x378   :  { %3376 = vmatpush.msrb.mxu1 %v13082_v46  ;;  %3497 = vmatpush.msrb.mxu3 %v13083_v14  ;;  %v2284_v14 = vpop.permute.xlu1 %2283 }
 0x379   :  { %3509 = vmatpush.msra.mxu0 %v13084_v17  ;;  %3439 = vmatmul.f32.vlgmr.msrb.gmra.mxu2 %v9322_v40  ;;  %v13092_v40 = vld [vmem:[#allocation203_spill] sm:$0xff] }
 0x37a   :  { %3377 = vmatpush.msrb.mxu1 %v13086_v51  ;;  %3498 = vmatpush.msrb.mxu3 %v13087_v44  ;;  %v13094_v44 = vld [vmem:[#allocation200_spill] sm:$0xff] }
 0x37b   :  { %3603 = vmatpush.msrb.mxu2 %v13008_v49  ;;  %3510 = vmatpush.msra.mxu0 %v13088_v23  ;;  %v13093_v49 = vld [vmem:[#allocation81_spill] sm:$0xff] }
 0x37c   :  { %5110 = vmatmul.msk.f32.vlgmr.msra.gmra.mxu3 %vm3119_vm6, %v9535_v55  ;;  %3378 = vmatpush.msrb.mxu1 %v13089_v6  ;;  %v13095_v23 = vld [vmem:[#allocation117_spill] sm:$0xff]  ;;  %v13097_v6 = vld [vmem:[#allocation159_spill] sm:$0xff]  ;;  %v13101_v55 = vld [vmem:[#allocation140_spill] sm:$0xff] }
 0x37d   :  { %3563 = vmatpush.msra.mxu3 %v9604_v35  ;;  %3604 = vmatpush.msrb.mxu2 %v13090_v2  ;;  %v13096_v35 = vld [vmem:[#allocation82_spill] sm:$0xff] }
 0x37e   :  { %3511 = vmatpush.msra.mxu0 %v13091_v34  ;;  %3443 = vmatpush.msra.mxu1 %v9533_v31  ;;  %v13100_v2 = vld [vmem:[#allocation74_spill] sm:$0xff]  ;;  %v13112_v34 = vld [vmem:[#allocation107_spill] sm:$0xff] }
 0x37f   :  { %3564 = vmatpush.msra.mxu3 %v13092_v40  ;;  %3605 = vmatpush.msrb.mxu2 %v13026_v25  ;;  %v13098_v40 = vunpack.i.h.bf16 %v9120_v27 }
 0x380   :  { %3512 = vmatpush.msra.mxu0 %v13093_v49  ;;  %3379 = vmatmul.f32.vlgmr.msrb.gmra.mxu1 %v9304_v18  ;;  %v2174_v49 = vpop.permute.xlu1 %2173 }
 0x381   :  { %3444 = vmatpush.msra.mxu1 %v13094_v44  ;;  %3565 = vmatpush.msra.mxu3 %v13095_v23  ;;  %v2293_v25 = vsel %vm13099_vm9, %v2284_v14, %v13098_v40  ;;  %v13102_v44 = vunpack.i.l.bf16 %v9149_v56  ;;  %v9991_v23 = vld [vmem:[#allocation6 + $0x10] sm:$0xff]  ;;  %v13108_v56 = vld [vmem:[#allocation199_spill] sm:$0xff] }
 0x382   :  { %3606 = vmatpush.msrb.mxu2 %v13028_v48  ;;  %3513 = vmatpush.msra.mxu0 %v13096_v35  ;;  %v13103_v35 = vld [vmem:[#allocation114_spill] sm:$0xff] }
 0x383   :  { %3445 = vmatpush.msra.mxu1 %v13097_v6  ;;  %3566 = vmatpush.msra.mxu3 %v8451_v30  ;;  %v2294_v48 = vsel %vm12953_vm5, %v13102_v44, %v2284_v14  ;;  %v13104_v30 = vld [vmem:[#allocation208_spill] sm:$0xff] }
 0x384   :  { %3607 = vmatpush.msrb.mxu2 %v13100_v2  ;;  %3514 = vmatpush.msra.mxu0 %v13101_v55  ;;  %v13105_v27 = vunpack.i.h.bf16 %v13104_v30  ;;  %v13107_v2 = vld [vmem:[#allocation34_spill] sm:$0xff]  ;;  %v13109_v55 = vunpack.i.l.bf16 %v13108_v56  ;;  %v13114_v56 = vld [vmem:[#allocation135_spill] sm:$0xff] }
 0x385   :  { %3419 = vmatmul.f32.vlgmr.msrb.gmra.mxu0 %v9991_v23  ;;  %3446 = vmatpush.msra.mxu1 %v13103_v35  ;;  %v13111_v30 = vld [vmem:[#allocation138_spill] sm:$0xff] }
 0x386   :  { %v2316_v40 = vsel %vm13106_vm8, %v9800_v33, %v13105_v27  ;;  %3567 = vmatpush.msra.mxu3 %v13107_v2  ;;  %3608 = vmatpush.msrb.mxu2 %v13048_v10  ;;  %v2317_v44 = vsel %vm13012_vm1, %v13109_v55, %v9800_v33  ;;  %v13115_v55 = vunpack.i.l.bf16 %v9254_v62  ;;  %v13124_v62 = vld [vmem:[#allocation207_spill] sm:$0xff] }
 0x387   :  { %v10009_v14 = vsel %vm12948_vm7, %v2293_v25, %v2316_v40  ;;  %3515 = vmatpush.msra.mxu0 %v13111_v30  ;;  %3447 = vmatpush.msra.mxu1 %v13112_v34  ;;  %v10015_v27 = vsel %vm12945_vm13, %v2294_v48, %v2317_v44  ;;  %v13117_v25 = vunpack.i.l.bf16 %v9328_v45  ;;  %v13119_v48 = vld [vmem:[#allocation54_spill] sm:$0xff]  ;;  %v13120_v40 = vld [vmem:[#allocation129_spill] sm:$0xff]  ;;  %vm13123_vm13 = vmmov %vm13032_vm4 }
 0x388   :  { %13110 = vst [vmem:[#allocation189_spill] sm:$0xff] %v10009_v14  ;;  %3568 = vmatpush.msra.mxu3 %v10009_v14  ;;  %3609 = vmatpush.msrb.mxu2 %v13052_v32  ;;  %v2180_v33 = vsel %vm13116_vm15, %v2174_v49, %v13115_v55  ;;  %v13121_v44 = vld [vmem:[#allocation202_spill] sm:$0xff]  ;;  %vm13126_vm4 = vmmov %vm13039_vm12  ;;  %v13127_v45 = vld [vmem:[#allocation71_spill] sm:$0xff] }
 0x389   :  { %13113 = vst [vmem:[#allocation152_spill] sm:$0xff] %v10015_v27  ;;  %3516 = vmatpush.msra.mxu0 %v13114_v56  ;;  %3448 = vmatpush.msra.mxu1 %v10015_v27  ;;  %v2157_v24 = vsel %vm13118_vm14, %v9828_v5, %v13117_v25  ;;  %v13122_v32 = vunpack.i.h.bf16 %v13121_v44  ;;  %v13125_v56 = vunpack.i.h.bf16 %v13124_v62  ;;  %v13128_v14 = vld [vmem:[#allocation205_spill] sm:$0xff]  ;;  %v13141_v62 = vunpack.i.l.bf16 %v8447_v22 }
 0x38a   :  { %3569 = vmatpush.msra.mxu3 %v13119_v48  ;;  %3610 = vmatpush.msrb.mxu2 %v13120_v40  ;;  %v13129_v25 = vld [vmem:[#allocation209_spill] sm:$0xff]  ;;  %v10047_v44 = vsel %vm12831_vm0, %v2157_v24, %v2180_v33  ;;  %v13131_v48 = vld [vmem:[#allocation66_spill] sm:$0xff]  ;;  %vm13142_vm0 = vmmov %vm13012_vm1 }
 0x38b   :  { %v2181_v2 = vsel %vm13123_vm13, %v13122_v32, %v2174_v49  ;;  %v2158_v55 = vsel %vm13126_vm4, %v13125_v56, %v9828_v5  ;;  %3517 = vmatpush.msra.mxu0 %v13127_v45  ;;  %3449 = vmatpush.msra.mxu1 %v13128_v14  ;;  %13130 = vst [vmem:[#allocation208_spill] sm:$0xff] %v10047_v44  ;;  %v13132_v49 = vld [vmem:[#allocation206_spill] sm:$0xff]  ;;  %v13134_v5 = vld [vmem:[#allocation63_spill] sm:$0xff]  ;;  %v13136_v56 = vld [vmem:[#allocation212_spill] sm:$0xff] }
 0x38c   :  { %3570 = vmatpush.msra.mxu3 %v13129_v25  ;;  %3611 = vmatpush.msrb.mxu2 %v13062_v16  ;;  %v10053_v32 = vsel %vm12864_vm2, %v2158_v55, %v2181_v2  ;;  %v13137_v33 = vld [vmem:[#allocation213_spill] sm:$0xff]  ;;  %v13139_v2 = vld [vmem:[#allocation215_spill] sm:$0xff]  ;;  %v2076_v55 = vsel %vm13142_vm0, %v9875_v11, %v13141_v62  ;;  %vm13147_vm2 = vmmov %vm12953_vm5 }
 0x38d   :  { %3518 = vmatpush.msra.mxu0 %v13131_v48  ;;  %3450 = vmatpush.msra.mxu1 %v13132_v49  ;;  %13133 = vst [vmem:[#allocation199_spill] sm:$0xff] %v10053_v32  ;;  %v13140_v24 = vld [vmem:[#allocation21_spill] sm:$0xff]  ;;  %v13150_v11 = vld [vmem:[#allocation146_spill] sm:$0xff] }
 0x38e   :  { %3571 = vmatpush.msra.mxu3 %v10047_v44  ;;  %3612 = vmatpush.msrb.mxu2 %v13066_v15  ;;  %v13143_v15 = vld [vmem:[#allocation25_spill] sm:$0xff]  ;;  %v13197_v44 = vld [vmem:[#allocation184_spill] sm:$0xff] }
 0x38f   :  { %3623 = vmatpush.msrb.mxu0 %v13061_v50  ;;  %3451 = vmatpush.msra.mxu1 %v10053_v32 }
 0x390   :  { %3572 = vmatpush.msra.mxu3 %v13134_v5  ;;  %3613 = vmatpush.msrb.mxu2 %v13135_v12  ;;  %v13164_v5 = vld [vmem:[#allocation38_spill] sm:$0xff] }
 0x391   :  { %3624 = vmatpush.msrb.mxu0 %v12722_v0  ;;  %3452 = vmatpush.msra.mxu1 %v13136_v56  ;;  %v13144_v0 = vld [vmem:[#allocation134_spill] sm:$0xff] }
 0x392   :  { %3573 = vmatpush.msra.mxu3 %v13137_v33  ;;  %3614 = vmatpush.msrb.mxu2 %v13072_v8  ;;  %v13145_v33 = vld [vmem:[#allocation161_spill] sm:$0xff] }
 0x393   :  { %3625 = vmatpush.msrb.mxu0 %v13138_v21  ;;  %3453 = vmatpush.msra.mxu1 %v13139_v2 }
 0x394   :  { %3574 = vmatpush.msra.mxu3 %v13140_v24  ;;  %3615 = vmatpush.msrb.mxu2 %v13076_v26  ;;  %v13146_v26 = vunpack.i.l.bf16 %v13145_v33  ;;  %v13148_v24 = vld [vmem:[#allocation24_spill] sm:$0xff]  ;;  %v13154_v33 = vld [vmem:[#allocation30_spill] sm:$0xff] }
 0x395   :  { %3626 = vmatpush.msrb.mxu0 %v12914_v43  ;;  %3454 = vmatpush.msra.mxu1 %v13024_v7 }
 0x396   :  { %3575 = vmatpush.msra.mxu3 %v13143_v15  ;;  %3616 = vmatpush.msrb.mxu2 %v13144_v0  ;;  %v2053_v25 = vsel %vm13147_vm2, %v9861_v9, %v13146_v26  ;;  %v13153_v9 = vld [vmem:[#allocation172_spill] sm:$0xff]  ;;  %v13163_v15 = vld [vmem:[#allocation33_spill] sm:$0xff] }
 0x397   :  { %3627 = vmatpush.msrb.mxu0 %v12917_v19  ;;  %3455 = vmatpush.msra.mxu1 %v12642_v41  ;;  %v10089_v22 = vsel %vm12948_vm7, %v2053_v25, %v2076_v55  ;;  %v3140_v25 = vpop.f32.mrf.mxu0  ;;  %v13155_v55 = vld [vmem:[#allocation68_spill] sm:$0xff] }
 0x398   :  { %3576 = vmatpush.msra.mxu3 %v13148_v24  ;;  %3617 = vmatpush.msrb.mxu2 %v13082_v46  ;;  %13149 = vst [vmem:[#allocation202_spill] sm:$0xff] %v10089_v22  ;;  %v13159_v24 = vld [vmem:[#allocation61_spill] sm:$0xff]  ;;  %v13161_v19 = vld [vmem:[#allocation108_spill] sm:$0xff] }
 0x399   :  { %3628 = vmatpush.msrb.mxu0 %v13150_v11  ;;  %3456 = vmatpush.msra.mxu1 %v6412_v57 }
 0x39a   :  { %3577 = vmatpush.msra.mxu3 %v10089_v22  ;;  %3618 = vmatpush.msrb.mxu2 %v13086_v51  ;;  %v10109_v26 = vpop.permute.xlu1 %3116  ;;  %v3160_v51 = vpop.f32.mrf.mxu1  ;;  %v13162_v22 = vld [vmem:[#allocation210_spill] sm:$0xff] }
 0x39b   :  { %3629 = vmatpush.msrb.mxu0 %v12928_v52  ;;  %3539 = vmatmul.f32.vlgmr.msra.gmra.mxu2 %v9991_v23  ;;  %v3141_v62 = vadd.f32 %v3140_v25, %v10109_v26  ;;  %v13160_v25 = vld [vmem:[#allocation171_spill] sm:$0xff] }
 0x39c   :  { %3683 = vmatpush.msra.mxu2 %v9816_v60  ;;  %3457 = vmatpush.msra.mxu1 %v9903_v54 }
 0x39d   :  { %3578 = vmatpush.msra.mxu3 %v9444_v4  ;;  %3630 = vmatpush.msrb.mxu0 %v12941_v58  ;;  %v3161_v58 = vadd.f32 %v3160_v51, %v3141_v62 }
 0x39e   :  { %3499 = vmatmul.f32.vlgmr.msrb.gmra.mxu3 %v9304_v18  ;;  %3684 = vmatpush.msra.mxu2 %v9533_v31  ;;  %v13157_v31 = vld [vmem:[#allocation223_spill] sm:$0xff] }
 0x39f   :  { %3663 = vmatpush.msrb.mxu3 %v9440_v1  ;;  %3458 = vmatpush.msra.mxu1 %v9440_v1  ;;  %v13156_v1 = vld [vmem:[#allocation64_spill] sm:$0xff] }
 0x3a0   :  { %3631 = vmatpush.msrb.mxu0 %v13151_v13  ;;  %3459 = vmatmul.f32.vlgmr.msra.gmra.mxu1 %v9471_v63 }
 0x3a1   :  { %3543 = vmatpush.msrb.mxu1 %v13152_v39  ;;  %3664 = vmatpush.msrb.mxu3 %v13153_v9  ;;  %v13158_v39 = vld [vmem:[#allocation169_spill] sm:$0xff]  ;;  %v3180_v9 = vpop.f32.mrf.mxu2 }
 0x3a2   :  { %3685 = vmatpush.msra.mxu2 %v13154_v33  ;;  %3632 = vmatpush.msrb.mxu0 %v12957_v38 }
 0x3a3   :  { %3544 = vmatpush.msrb.mxu1 %v13155_v55  ;;  %3665 = vmatpush.msrb.mxu3 %v13156_v1  ;;  %v3181_v1 = vadd.f32 %v3180_v9, %v3161_v58  ;;  %v13167_v9 = vld [vmem:[#allocation69_spill] sm:$0xff] }
 0x3a4   :  { %3686 = vmatpush.msra.mxu2 %v13097_v6  ;;  %3633 = vmatpush.msrb.mxu0 %v12959_v42  ;;  %v3200_v42 = vpop.f32.mrf.mxu3 }
 0x3a5   :  { %3545 = vmatpush.msrb.mxu1 %v13157_v31  ;;  %3666 = vmatpush.msrb.mxu3 %v13158_v39  ;;  %v3201_v51 = vadd.f32 %v3200_v42, %v3181_v1  ;;  %v3220_v62 = vpop.f32.mrf.mxu0  ;;  %v13166_v39 = vld [vmem:[#allocation40_spill] sm:$0xff]  ;;  %v13170_v1 = vld [vmem:[#allocation217_spill] sm:$0xff] }
 0x3a6   :  { %3687 = vmatpush.msra.mxu2 %v13103_v35  ;;  %3634 = vmatpush.msrb.mxu0 %v13159_v24  ;;  %v13165_v35 = vld [vmem:[#allocation41_spill] sm:$0xff] }
 0x3a7   :  { %3546 = vmatpush.msrb.mxu1 %v13160_v25  ;;  %3667 = vmatpush.msrb.mxu3 %v13161_v19  ;;  %v3221_v58 = vadd.f32 %v3220_v62, %v3201_v51  ;;  %v13168_v19 = vld [vmem:[#allocation32_spill] sm:$0xff]  ;;  %v13169_v25 = vld [vmem:[#allocation150_spill] sm:$0xff] }
 0x3a8   :  { %3688 = vmatpush.msra.mxu2 %v13162_v22  ;;  %3635 = vmatpush.msrb.mxu0 %v12979_v61  ;;  %v13172_v51 = vld [vmem:[#allocation226_spill] sm:$0xff] }
 0x3a9   :  { %3547 = vmatpush.msrb.mxu1 %v13163_v15  ;;  %3668 = vmatpush.msrb.mxu3 %v13164_v5  ;;  %v13173_v62 = vld [vmem:[#allocation182_spill] sm:$0xff] }
 0x3aa   :  { %3689 = vmatpush.msra.mxu2 %v10015_v27  ;;  %3636 = vmatpush.msrb.mxu0 %v12983_v36  ;;  %v13178_v36 = vld [vmem:[#allocation195_spill] sm:$0xff] }
 0x3ab   :  { %3548 = vmatpush.msrb.mxu1 %v13165_v35  ;;  %3669 = vmatpush.msrb.mxu3 %v13166_v39  ;;  %v13171_v39 = vld [vmem:[#allocation196_spill] sm:$0xff] }
 0x3ac   :  { %3690 = vmatpush.msra.mxu2 %v13128_v14  ;;  %3637 = vmatpush.msrb.mxu0 %v13167_v9  ;;  %v13177_v14 = vld [vmem:[#allocation92_spill] sm:$0xff] }
 0x3ad   :  { %3549 = vmatpush.msrb.mxu1 %v13168_v19  ;;  %3670 = vmatpush.msrb.mxu3 %v13169_v25  ;;  %v13187_v25 = vld [vmem:[#allocation76_spill] sm:$0xff]  ;;  %v13194_v19 = vld [vmem:[#allocation173_spill] sm:$0xff] }
 0x3ae   :  { %v3240_v5 = vpop.f32.mrf.mxu1  ;;  %3691 = vmatpush.msra.mxu2 %v13170_v1  ;;  %3638 = vmatpush.msrb.mxu0 %v13000_v28  ;;  %v13226_v1 = vld [vmem:[#allocation93_spill] sm:$0xff] }
 0x3af   :  { %v3241_v42 = vadd.f32 %v3240_v5, %v3221_v58  ;;  %3519 = vmatmul.f32.vlgmr.msra.gmra.mxu0 %v9320_v37  ;;  %3550 = vmatpush.msrb.mxu1 %v9693_v29  ;;  %v13174_v5 = vld [vmem:[#allocation188_spill] sm:$0xff]  ;;  %v13175_v37 = vld [vmem:[#allocation197_spill] sm:$0xff] }
 0x3b0   :  { %3671 = vmatpush.msrb.mxu3 %v13171_v39  ;;  %3692 = vmatpush.msra.mxu2 %v10053_v32  ;;  %v13176_v58 = vld [vmem:[#allocation16_spill] sm:$0xff]  ;;  %v13184_v39 = vld [vmem:[#allocation162_spill] sm:$0xff] }
 0x3b1   :  { %4083 = vst [vmem:[#allocation9] sm:$0xff] %v3241_v42  ;;  %3743 = vmatpush.msra.mxu0 %v13085_v47  ;;  %3551 = vmatpush.msrb.mxu1 %v13172_v51  ;;  %v13179_v42 = vld [vmem:[#allocation56_spill] sm:$0xff]  ;;  %v13207_v32 = vld [vmem:[#allocation178_spill] sm:$0xff] }
 0x3b2   :  { %3672 = vmatpush.msrb.mxu3 %v13173_v62  ;;  %3693 = vmatpush.msra.mxu2 %v13136_v56  ;;  %v13180_v56 = vld [vmem:[#allocation227_spill] sm:$0xff]  ;;  %v13182_v62 = vld [vmem:[#allocation192_spill] sm:$0xff] }
 0x3b3   :  { %3744 = vmatpush.msra.mxu0 %v13019_v59  ;;  %3552 = vmatpush.msrb.mxu1 %v13174_v5  ;;  %v13181_v59 = vld [vmem:[#allocation191_spill] sm:$0xff] }
 0x3b4   :  { %3673 = vmatpush.msrb.mxu3 %v13175_v37  ;;  %3694 = vmatpush.msra.mxu2 %v13176_v58  ;;  %v13183_v37 = vld [vmem:[#allocation86_spill] sm:$0xff]  ;;  %v13189_v5 = vld [vmem:[#allocation79_spill] sm:$0xff] }
 0x3b5   :  { %3745 = vmatpush.msra.mxu0 %v13177_v14  ;;  %3553 = vmatpush.msrb.mxu1 %v13178_v36 }
 0x3b6   :  { %3619 = vmatmul.f32.vlgmr.msrb.gmra.mxu2 %v9304_v18  ;;  %3674 = vmatpush.msrb.mxu3 %v13179_v42  ;;  %v13185_v18 = vld [vmem:[#allocation147_spill] sm:$0xff]  ;;  %v13186_v42 = vld [vmem:[#allocation77_spill] sm:$0xff] }
 0x3b7   :  { %3695 = vmatpush.msra.mxu2 %v13024_v7  ;;  %3746 = vmatpush.msra.mxu0 %v13071_v3 }
 0x3b8   :  { %3554 = vmatpush.msrb.mxu1 %v13180_v56  ;;  %3675 = vmatpush.msrb.mxu3 %v13181_v59  ;;  %v13188_v59 = vld [vmem:[#allocation201_spill] sm:$0xff] }
 0x3b9   :  { %3696 = vmatpush.msra.mxu2 %v12642_v41  ;;  %3747 = vmatpush.msra.mxu0 %v13074_v53  ;;  %v13190_v53 = vld [vmem:[#allocation78_spill] sm:$0xff] }
 0x3ba   :  { %3555 = vmatpush.msrb.mxu1 %v13182_v62  ;;  %3676 = vmatpush.msrb.mxu3 %v13183_v37  ;;  %v13191_v37 = vld [vmem:[#allocation168_spill] sm:$0xff]  ;;  %v13193_v62 = vld [vmem:[#allocation89_spill] sm:$0xff] }
 0x3bb   :  { %3697 = vmatpush.msra.mxu2 %v13184_v39  ;;  %3748 = vmatpush.msra.mxu0 %v13185_v18  ;;  %v13196_v39 = vld [vmem:[#allocation105_spill] sm:$0xff] }
 0x3bc   :  { %3556 = vmatpush.msrb.mxu1 %v13186_v42  ;;  %3677 = vmatpush.msrb.mxu3 %v13187_v25  ;;  %v13192_v25 = vld [vmem:[#allocation60_spill] sm:$0xff] }
 0x3bd   :  { %3698 = vmatpush.msra.mxu2 %v9903_v54  ;;  %3749 = vmatpush.msra.mxu0 %v13081_v20  ;;  %v13195_v54 = vld [vmem:[#allocation214_spill] sm:$0xff] }
 0x3be   :  { %3557 = vmatpush.msrb.mxu1 %v13189_v5  ;;  %3579 = vmatmul.f32.vlgmr.msra.gmra.mxu3 %v9471_v63 }
 0x3bf   :  { %3718 = vmatpush.msrb.mxu2 %v13188_v59  ;;  %3678 = vmatpush.msrb.mxu3 %v13190_v53  ;;  %v13199_v53 = vld [vmem:[#allocation85_spill] sm:$0xff] }
 0x3c0   :  { %3699 = vmatmul.f32.vlgmr.msra.gmra.mxu2 %v9471_v63  ;;  %3750 = vmatpush.msra.mxu0 %v13084_v17  ;;  %v13198_v63 = vld [vmem:[#allocation167_spill] sm:$0xff]  ;;  %v13201_v17 = vld [vmem:[#allocation190_spill] sm:$0xff] }
 0x3c1   :  { %3783 = vmatpush.msra.mxu2 %v9444_v4  ;;  %3763 = vmatpush.msra.mxu3 %v13191_v37  ;;  %v13200_v4 = vld [vmem:[#allocation224_spill] sm:$0xff]  ;;  %v13202_v37 = vld [vmem:[#allocation81_spill] sm:$0xff] }
 0x3c2   :  { %3558 = vmatpush.msrb.mxu1 %v13192_v25  ;;  %3751 = vmatpush.msra.mxu0 %v13193_v62  ;;  %v13203_v25 = vld [vmem:[#allocation26_spill] sm:$0xff]  ;;  %v13227_v62 = vld [vmem:[#allocation55_spill] sm:$0xff] }
 0x3c3   :  { %3784 = vmatpush.msra.mxu2 %v13194_v19  ;;  %3559 = vmatmul.f32.vlgmr.msrb.gmra.mxu1 %v13195_v54  ;;  %v13204_v54 = vld [vmem:[#allocation160_spill] sm:$0xff] }
 0x3c4   :  { %3598 = vmatpush.msra.mxu1 %v13196_v39  ;;  %3764 = vmatpush.msra.mxu3 %v13197_v44  ;;  %v13205_v19 = vld [vmem:[#allocation136_spill] sm:$0xff] }
 0x3c5   :  { %3752 = vmatpush.msra.mxu0 %v13199_v53  ;;  %3785 = vmatpush.msra.mxu2 %v13155_v55  ;;  %v13206_v44 = vld [vmem:[#allocation28_spill] sm:$0xff]  ;;  %v10194_v53 = vld [vmem:[#allocation6 + $0x8] sm:$0xff] }
 0x3c6   :  { %3643 = vmatpush.msrb.mxu1 %v13198_v63  ;;  %3765 = vmatpush.msra.mxu3 %v13200_v4  ;;  %v13208_v4 = vld [vmem:[#allocation179_spill] sm:$0xff]  ;;  %v13209_v55 = vld [vmem:[#allocation140_spill] sm:$0xff] }
 0x3c7   :  { %3753 = vmatpush.msra.mxu0 %v13202_v37  ;;  %3786 = vmatpush.msra.mxu2 %v13157_v31  ;;  %v13210_v31 = vld [vmem:[#allocation157_spill] sm:$0xff]  ;;  %v13211_v37 = vld [vmem:[#allocation124_spill] sm:$0xff] }
 0x3c8   :  { %3644 = vmatpush.msrb.mxu1 %v13201_v17  ;;  %3766 = vmatpush.msra.mxu3 %v13203_v25  ;;  %v13212_v25 = vld [vmem:[#allocation180_spill] sm:$0xff] }
 0x3c9   :  { %3754 = vmatpush.msra.mxu0 %v13205_v19  ;;  %3787 = vmatpush.msra.mxu2 %v13206_v44  ;;  %v13215_v44 = vld [vmem:[#allocation70_spill] sm:$0xff] }
 0x3ca   :  { %3645 = vmatpush.msrb.mxu1 %v13204_v54  ;;  %3767 = vmatpush.msra.mxu3 %v13207_v32  ;;  %v13213_v32 = vld [vmem:[#allocation183_spill] sm:$0xff]  ;;  %v13214_v54 = vld [vmem:[#allocation118_spill] sm:$0xff] }
 0x3cb   :  { %3639 = vmatmul.f32.vlgmr.msrb.gmra.mxu0 %v10194_v53  ;;  %3788 = vmatpush.msra.mxu2 %v13163_v15  ;;  %v13217_v15 = vld [vmem:[#allocation193_spill] sm:$0xff]  ;;  %v10211_v19 = vld [vmem:[#allocation3 + $0x30] sm:$0xff] }
 0x3cc   :  { %3646 = vmatpush.msrb.mxu1 %v13208_v4  ;;  %3755 = vmatpush.msra.mxu0 %v13209_v55  ;;  %v13216_v55 = vld [vmem:[#allocation137_spill] sm:$0xff] }
 0x3cd   :  { %5111 = vmatmul.msk.f32.vlgmr.msra.gmra.mxu1 %vm3119_vm6, %v13210_v31  ;;  %3768 = vmatpush.msra.mxu3 %v13211_v37  ;;  %v13220_v37 = vld [vmem:[#allocation31_spill] sm:$0xff] }
 0x3ce   :  { %3647 = vmatpush.msrb.mxu1 %v13212_v25  ;;  %3756 = vmatpush.msra.mxu0 %v13111_v30  ;;  %v13218_v30 = vld [vmem:[#allocation95_spill] sm:$0xff] }
 0x3cf   :  { %3789 = vmatpush.msra.mxu2 %v13165_v35  ;;  %3769 = vmatpush.msra.mxu3 %v13213_v32  ;;  %v13219_v35 = vld [vmem:[#allocation204_spill] sm:$0xff] }
 0x3d0   :  { %3648 = vmatpush.msrb.mxu1 %v13214_v54  ;;  %3757 = vmatpush.msra.mxu0 %v13215_v44  ;;  %v10218_v32 = vld [vmem:[#allocation3 + $0x20] sm:$0xff]  ;;  %v13221_v54 = vld [vmem:[#allocation102_spill] sm:$0xff] }
 0x3d1   :  { %3790 = vmatpush.msra.mxu2 %v13216_v55  ;;  %3770 = vmatpush.msra.mxu3 %v13217_v15  ;;  %v3260_v15 = vpop.f32.mrf.mxu2  ;;  %v13222_v55 = vld [vmem:[#allocation166_spill] sm:$0xff] }
 0x3d2   :  { %3649 = vmatpush.msrb.mxu1 %v10211_v19  ;;  %3758 = vmatpush.msra.mxu0 %v13127_v45  ;;  %v3261_v44 = vadd.f32 %v3260_v15, %v10109_v26  ;;  %v13231_v15 = vld [vmem:[#allocation87_spill] sm:$0xff] }
 0x3d3   :  { %3791 = vmatpush.msra.mxu2 %v9693_v29  ;;  %3771 = vmatpush.msra.mxu3 %v13218_v30  ;;  %v13223_v29 = vld [vmem:[#allocation198_spill] sm:$0xff]  ;;  %v13224_v30 = vld [vmem:[#allocation100_spill] sm:$0xff] }
 0x3d4   :  { %3838 = vmatpush.msrb.mxu0 %v13219_v35  ;;  %3650 = vmatpush.msrb.mxu1 %v10218_v32  ;;  %v13225_v35 = vld [vmem:[#allocation94_spill] sm:$0xff] }
 0x3d5   :  { %3759 = vmatmul.f32.vlgmr.msra.gmra.mxu0 %v10194_v53  ;;  %3792 = vmatpush.msra.mxu2 %v13172_v51  ;;  %v3280_v51 = vpop.f32.mrf.mxu3 }
 0x3d6   :  { %3863 = vmatpush.msra.mxu0 %v13220_v37  ;;  %3772 = vmatpush.msra.mxu3 %v13221_v54  ;;  %v13228_v54 = vld [vmem:[#allocation176_spill] sm:$0xff] }
 0x3d7   :  { %3651 = vmatpush.msrb.mxu1 %v13222_v55  ;;  %3793 = vmatpush.msra.mxu2 %v13223_v29  ;;  %v13229_v55 = vld [vmem:[#allocation111_spill] sm:$0xff]  ;;  %v13233_v29 = vld [vmem:[#allocation110_spill] sm:$0xff] }
 0x3d8   :  { %3864 = vmatpush.msra.mxu0 %v13061_v50  ;;  %3773 = vmatpush.msra.mxu3 %v13224_v30  ;;  %v3281_v50 = vadd.f32 %v3280_v51, %v3261_v44  ;;  %v13230_v30 = vld [vmem:[#allocation181_spill] sm:$0xff]  ;;  %v3320_v44 = vpop.f32.mrf.mxu0 }
 0x3d9   :  { %3652 = vmatpush.msrb.mxu1 %v13225_v35  ;;  %3794 = vmatpush.msra.mxu2 %v13178_v36  ;;  %v13232_v36 = vld [vmem:[#allocation112_spill] sm:$0xff]  ;;  %v3340_v51 = vpop.f32.mrf.mxu2 }
 0x3da   :  { %3865 = vmatpush.msra.mxu0 %v13226_v1  ;;  %3774 = vmatpush.msra.mxu3 %v13227_v62  ;;  %v13234_v1 = vld [vmem:[#allocation142_spill] sm:$0xff] }
 0x3db   :  { %3653 = vmatpush.msrb.mxu1 %v13228_v54  ;;  %3795 = vmatpush.msra.mxu2 %v13180_v56  ;;  %v13235_v56 = vld [vmem:[#allocation109_spill] sm:$0xff] }
 0x3dc   :  { %3866 = vmatpush.msra.mxu0 %v13138_v21  ;;  %3775 = vmatpush.msra.mxu3 %v13229_v55  ;;  %v13236_v55 = vld [vmem:[#allocation153_spill] sm:$0xff] }
 0x3dd   :  { %3654 = vmatpush.msrb.mxu1 %v13230_v30  ;;  %3796 = vmatpush.msra.mxu2 %v13231_v15  ;;  %v13238_v30 = vld [vmem:[#allocation163_spill] sm:$0xff] }
 0x3de   :  { %3867 = vmatpush.msra.mxu0 %v12914_v43  ;;  %3776 = vmatpush.msra.mxu3 %v13232_v36  ;;  %v3300_v62 = vpop.f32.mrf.mxu1  ;;  %v13237_v36 = vld [vmem:[#allocation39_spill] sm:$0xff] }
 0x3df   :  { %3655 = vmatpush.msrb.mxu1 %v13233_v29  ;;  %3797 = vmatpush.msra.mxu2 %v13186_v42  ;;  %v3301_v21 = vadd.f32 %v3300_v62, %v3281_v50  ;;  %v3360_v42 = vpop.f32.mrf.mxu3  ;;  %v13239_v15 = vld [vmem:[#allocation103_spill] sm:$0xff] }
 0x3e0   :  { %3868 = vmatpush.msra.mxu0 %v13234_v1  ;;  %3777 = vmatpush.msra.mxu3 %v13235_v56  ;;  %v10254_v50 = vld [vmem:[#allocation6 + $0x18] sm:$0xff]  ;;  %v13242_v56 = vld [vmem:[#allocation18_spill] sm:$0xff] }
 0x3e1   :  { %3656 = vmatpush.msrb.mxu1 %v13236_v55  ;;  %3798 = vmatpush.msra.mxu2 %v13189_v5  ;;  %v3321_v43 = vadd.f32 %v3320_v44, %v3301_v21  ;;  %v13240_v44 = vld [vmem:[#allocation23_spill] sm:$0xff] }
 0x3e2   :  { %3869 = vmatpush.msra.mxu0 %v13150_v11  ;;  %5112 = vmatmul.msk.f32.vlgmr.msrb.gmra.mxu2 %vm3119_vm6, %v13210_v31  ;;  %v13241_v5 = vld [vmem:[#allocation83_spill] sm:$0xff] }
 0x3e3   :  { %3778 = vmatpush.msra.mxu3 %v13237_v36  ;;  %3883 = vmatpush.msrb.mxu2 %v13238_v30  ;;  %v3341_v62 = vadd.f32 %v3340_v51, %v3321_v43  ;;  %v13243_v43 = vld [vmem:[#allocation174_spill] sm:$0xff]  ;;  %v13244_v51 = vld [vmem:[#allocation20_spill] sm:$0xff] }
 0x3e4   :  { %3657 = vmatpush.msrb.mxu1 %v13239_v15  ;;  %3679 = vmatmul.f32.vlgmr.msrb.gmra.mxu3 %v10254_v50 }
 0x3e5   :  { %3843 = vmatpush.msrb.mxu3 %v13000_v28  ;;  %3870 = vmatpush.msra.mxu0 %v12928_v52  ;;  %v3361_v21 = vadd.f32 %v3360_v42, %v3341_v62  ;;  %v13245_v42 = vld [vmem:[#allocation73_spill] sm:$0xff]  ;;  %v13246_v62 = vld [vmem:[#allocation154_spill] sm:$0xff]  ;;  %v13249_v28 = vld [vmem:[#allocation187_spill] sm:$0xff] }
 0x3e6   :  { %3884 = vmatpush.msrb.mxu2 %v13198_v63  ;;  %3658 = vmatpush.msrb.mxu1 %v13220_v37  ;;  %v13257_v52 = vld [vmem:[#allocation131_spill] sm:$0xff] }
 0x3e7   :  { %3844 = vmatpush.msrb.mxu3 %v13240_v44  ;;  %3871 = vmatpush.msra.mxu0 %v13241_v5  ;;  %4084 = vst [vmem:[#allocation9 + $0x8] sm:$0xff] %v3361_v21  ;;  %v13247_v21 = vld [vmem:[#allocation74_spill] sm:$0xff] }
 0x3e8   :  { %3723 = vmatpush.msra.mxu1 %v13131_v48  ;;  %3885 = vmatpush.msrb.mxu2 %v13201_v17  ;;  %v13248_v17 = vld [vmem:[#allocation53_spill] sm:$0xff]  ;;  %v13259_v48 = vld [vmem:[#allocation126_spill] sm:$0xff] }
 0x3e9   :  { %3845 = vmatpush.msrb.mxu3 %v13242_v56  ;;  %3872 = vmatpush.msra.mxu0 %v13151_v13 }
 0x3ea   :  { %3724 = vmatpush.msra.mxu1 %v13176_v58  ;;  %3886 = vmatpush.msrb.mxu2 %v13243_v43 }
 0x3eb   :  { %3846 = vmatpush.msrb.mxu3 %v13244_v51  ;;  %3873 = vmatpush.msra.mxu0 %v12957_v38  ;;  %v13250_v51 = vld [vmem:[#allocation57_spill] sm:$0xff]  ;;  %v13252_v38 = vld [vmem:[#allocation155_spill] sm:$0xff] }
 0x3ec   :  { %3725 = vmatpush.msra.mxu1 %v13024_v7  ;;  %3887 = vmatpush.msrb.mxu2 %v13208_v4 }
 0x3ed   :  { %3847 = vmatpush.msrb.mxu3 %v13245_v42  ;;  %3874 = vmatpush.msra.mxu0 %v13246_v62  ;;  %v13275_v42 = vld [vmem:[#allocation117_spill] sm:$0xff] }
 0x3ee   :  { %3726 = vmatpush.msra.mxu1 %v12642_v41  ;;  %3888 = vmatpush.msrb.mxu2 %v13212_v25  ;;  %v13251_v25 = vld [vmem:[#allocation128_spill] sm:$0xff] }
 0x3ef   :  { %5113 = vmatmul.msk.f32.vlgmr.msrb.gmra.mxu0 %vm3119_vm6, %v13210_v31  ;;  %3848 = vmatpush.msrb.mxu3 %v13247_v21  ;;  %v13253_v31 = vld [vmem:[#allocation58_spill] sm:$0xff] }
 0x3f0   :  { %3875 = vmatpush.msra.mxu0 %v13159_v24  ;;  %3727 = vmatpush.msra.mxu1 %v13248_v17 }
 0x3f1   :  { %3889 = vmatpush.msrb.mxu2 %v13249_v28  ;;  %3849 = vmatpush.msrb.mxu3 %v13048_v10  ;;  %v13254_v28 = vld [vmem:[#allocation130_spill] sm:$0xff]  ;;  %v13255_v10 = vld [vmem:[#allocation185_spill] sm:$0xff] }
 0x3f2   :  { %3876 = vmatpush.msra.mxu0 %v12979_v61  ;;  %3728 = vmatpush.msra.mxu1 %v13250_v51  ;;  %v13256_v61 = vld [vmem:[#allocation200_spill] sm:$0xff] }
 0x3f3   :  { %3890 = vmatpush.msrb.mxu2 %v10211_v19  ;;  %3850 = vmatpush.msrb.mxu3 %v13251_v25  ;;  %v13272_v25 = vld [vmem:[#allocation225_spill] sm:$0xff] }
 0x3f4   :  { %3877 = vmatpush.msra.mxu0 %v13252_v38  ;;  %3729 = vmatpush.msra.mxu1 %v13253_v31 }
 0x3f5   :  { %3891 = vmatpush.msrb.mxu2 %v10218_v32  ;;  %3851 = vmatpush.msrb.mxu3 %v13120_v40  ;;  %v13258_v32 = vld [vmem:[#allocation44_spill] sm:$0xff] }
 0x3f6   :  { %3878 = vmatpush.msra.mxu0 %v13167_v9  ;;  %3730 = vmatpush.msra.mxu1 %v13254_v28  ;;  %v13264_v40 = vld [vmem:[#allocation52_spill] sm:$0xff] }
 0x3f7   :  { %3892 = vmatpush.msrb.mxu2 %v13255_v10  ;;  %3852 = vmatpush.msrb.mxu3 %v13062_v16  ;;  %v13260_v16 = vld [vmem:[#allocation49_spill] sm:$0xff] }
 0x3f8   :  { %3958 = vmatpush.msrb.mxu0 %v13256_v61  ;;  %3731 = vmatpush.msra.mxu1 %v13257_v52  ;;  %v13261_v61 = vld [vmem:[#allocation101_spill] sm:$0xff] }
 0x3f9   :  { %3879 = vmatmul.f32.vlgmr.msra.gmra.mxu0 %v10194_v53  ;;  %3893 = vmatpush.msrb.mxu2 %v13225_v35 }
 0x3fa   :  { %3963 = vmatpush.msra.mxu0 %v13127_v45  ;;  %3853 = vmatpush.msrb.mxu3 %v13258_v32  ;;  %v13262_v45 = vld [vmem:[#allocation51_spill] sm:$0xff]  ;;  %v13263_v32 = vld [vmem:[#allocation133_spill] sm:$0xff] }
 0x3fb   :  { %3732 = vmatpush.msra.mxu1 %v13259_v48  ;;  %3894 = vmatpush.msrb.mxu2 %v13228_v54  ;;  %v13265_v54 = vld [vmem:[#allocation47_spill] sm:$0xff] }
 0x3fc   :  { %3964 = vmatpush.msra.mxu0 %v6412_v57  ;;  %3854 = vmatpush.msrb.mxu3 %v13135_v12  ;;  %v13267_v12 = vld [vmem:[#allocation29_spill] sm:$0xff] }
 0x3fd   :  { %3733 = vmatpush.msra.mxu1 %v13260_v16  ;;  %3895 = vmatpush.msrb.mxu2 %v13261_v61 }
 0x3fe   :  { %3965 = vmatpush.msra.mxu0 %v13176_v58  ;;  %3855 = vmatpush.msrb.mxu3 %v13072_v8  ;;  %v13266_v8 = vld [vmem:[#allocation119_spill] sm:$0xff] }
 0x3ff   :  { %3734 = vmatpush.msra.mxu1 %v13262_v45  ;;  %3896 = vmatpush.msrb.mxu2 %v13233_v29 }
 0x400   :  { %3966 = vmatpush.msra.mxu0 %v13024_v7  ;;  %3856 = vmatpush.msrb.mxu3 %v13263_v32  ;;  %v13268_v32 = vld [vmem:[#allocation120_spill] sm:$0xff] }
 0x401   :  { %3735 = vmatpush.msra.mxu1 %v13265_v54  ;;  %3897 = vmatpush.msrb.mxu2 %v13236_v55  ;;  %v13269_v55 = vld [vmem:[#allocation127_spill] sm:$0xff] }
 0x402   :  { %3967 = vmatpush.msra.mxu0 %v13264_v40  ;;  %3659 = vmatmul.f32.vlgmr.msrb.gmra.mxu1 %v9991_v23 }
 0x403   :  { %3857 = vmatpush.msrb.mxu3 %v13144_v0  ;;  %3736 = vmatpush.msra.mxu1 %v13266_v8  ;;  %v13270_v0 = vld [vmem:[#allocation121_spill] sm:$0xff] }
 0x404   :  { %3968 = vmatpush.msra.mxu0 %v13248_v17  ;;  %3898 = vmatpush.msrb.mxu2 %v13267_v12 }
 0x405   :  { %3799 = vmatmul.f32.vlgmr.msra.gmra.mxu2 %v10254_v50  ;;  %3858 = vmatpush.msrb.mxu3 %v13082_v46  ;;  %v10337_v46 = vld [vmem:[#allocation6] sm:$0xff] }
 0x406   :  { %3969 = vmatpush.msra.mxu0 %v13250_v51  ;;  %3983 = vmatpush.msra.mxu2 %v13237_v36  ;;  %v13271_v51 = vld [vmem:[#allocation91_spill] sm:$0xff] }
 0x407   :  { %3737 = vmatpush.msra.mxu1 %v13268_v32  ;;  %3779 = vmatmul.f32.vlgmr.msra.gmra.mxu3 %v9991_v23 }
 0x408   :  { %3923 = vmatpush.msra.mxu3 %v13188_v59  ;;  %3970 = vmatpush.msra.mxu0 %v13269_v55  ;;  %v3380_v59 = vpop.f32.mrf.mxu1 }
 0x409   :  { %3984 = vmatpush.msra.mxu2 %v13085_v47  ;;  %3738 = vmatpush.msra.mxu1 %v13270_v0  ;;  %v13273_v47 = vld [vmem:[#allocation115_spill] sm:$0xff]  ;;  %v3381_v21 = vadd.f32 %v3380_v59, %v10109_v26  ;;  %v3420_v59 = vpop.f32.mrf.mxu0 }
 0x40a   :  { %3924 = vmatpush.msra.mxu3 %v9816_v60  ;;  %3971 = vmatpush.msra.mxu0 %v13254_v28  ;;  %v13274_v60 = vld [vmem:[#allocation45_spill] sm:$0xff] }
 0x40b   :  { %3803 = vmatpush.msrb.mxu1 %v13196_v39  ;;  %3985 = vmatpush.msra.mxu2 %v13271_v51 }
 0x40c   :  { %3925 = vmatpush.msra.mxu3 %v13112_v34  ;;  %3739 = vmatmul.f32.vlgmr.msra.gmra.mxu1 %v10337_v46  ;;  %v3400_v34 = vpop.f32.mrf.mxu3 }
 0x40d   :  { %3804 = vmatpush.msrb.mxu1 %v13272_v25  ;;  %3972 = vmatpush.msra.mxu0 %v13257_v52  ;;  %v13276_v52 = vld [vmem:[#allocation144_spill] sm:$0xff]  ;;  %v3401_v25 = vadd.f32 %v3400_v34, %v3381_v21  ;;  %v3440_v34 = vpop.f32.mrf.mxu2  ;;  %v13282_v21 = vld [vmem:[#allocation54_spill] sm:$0xff] }
 0x40e   :  { %3986 = vmatpush.msra.mxu2 %v13177_v14  ;;  %3926 = vmatpush.msra.mxu3 %v13154_v33  ;;  %v13277_v33 = vld [vmem:[#allocation156_spill] sm:$0xff]  ;;  %v13291_v14 = vld [vmem:[#allocation63_spill] sm:$0xff] }
 0x40f   :  { %3805 = vmatpush.msrb.mxu1 %v13273_v47  ;;  %3973 = vmatpush.msra.mxu0 %v13274_v60 }
 0x410   :  { %3987 = vmatpush.msra.mxu2 %v13071_v3  ;;  %3927 = vmatpush.msra.mxu3 %v13097_v6  ;;  %v13278_v3 = vld [vmem:[#allocation211_spill] sm:$0xff]  ;;  %v13279_v6 = vld [vmem:[#allocation116_spill] sm:$0xff] }
 0x411   :  { %3806 = vmatpush.msrb.mxu1 %v13275_v42  ;;  %3974 = vmatpush.msra.mxu0 %v13260_v16 }
 0x412   :  { %3988 = vmatpush.msra.mxu2 %v13276_v52  ;;  %3928 = vmatpush.msra.mxu3 %v13132_v49  ;;  %v13280_v52 = vld [vmem:[#allocation189_spill] sm:$0xff]  ;;  %v3421_v49 = vadd.f32 %v3420_v59, %v3401_v25  ;;  %v13286_v59 = vld [vmem:[#allocation204_spill] sm:$0xff] }
 0x413   :  { %3807 = vmatpush.msrb.mxu1 %v13277_v33  ;;  %3975 = vmatpush.msra.mxu0 %v13262_v45  ;;  %v13281_v45 = vld [vmem:[#allocation82_spill] sm:$0xff] }
 0x414   :  { %3989 = vmatpush.msra.mxu2 %v13185_v18  ;;  %3929 = vmatpush.msra.mxu3 %v13162_v22  ;;  %v13283_v22 = vld [vmem:[#allocation89_spill] sm:$0xff]  ;;  %v3441_v25 = vadd.f32 %v3440_v34, %v3421_v49  ;;  %v13292_v49 = vld [vmem:[#allocation34_spill] sm:$0xff] }
 0x415   :  { %3808 = vmatpush.msrb.mxu1 %v13278_v3  ;;  %3976 = vmatpush.msra.mxu0 %v13279_v6  ;;  %v13284_v18 = vld [vmem:[#allocation217_spill] sm:$0xff] }
 0x416   :  { %3990 = vmatpush.msra.mxu2 %v13081_v20  ;;  %3930 = vmatpush.msra.mxu3 %v10015_v27  ;;  %v10369_v20 = vld [vmem:[#allocation6 + $0x28] sm:$0xff]  ;;  %v13285_v27 = vld [vmem:[#allocation216_spill] sm:$0xff] }
 0x417   :  { %3809 = vmatpush.msrb.mxu1 %v13280_v52  ;;  %3977 = vmatpush.msra.mxu0 %v13266_v8 }
 0x418   :  { %3991 = vmatpush.msra.mxu2 %v13281_v45  ;;  %3931 = vmatpush.msra.mxu3 %v13139_v2  ;;  %v13287_v2 = vld [vmem:[#allocation85_spill] sm:$0xff]  ;;  %v13288_v45 = vld [vmem:[#allocation199_spill] sm:$0xff] }
 0x419   :  { %3810 = vmatpush.msrb.mxu1 %v13282_v21  ;;  %3978 = vmatpush.msra.mxu0 %v13268_v32  ;;  %v13289_v21 = vld [vmem:[#allocation208_spill] sm:$0xff] }
 0x41a   :  { %3992 = vmatpush.msra.mxu2 %v13283_v22  ;;  %3932 = vmatpush.msra.mxu3 %v13284_v18  ;;  %v3480_v22 = vpop.f32.mrf.mxu3  ;;  %v13290_v18 = vld [vmem:[#allocation135_spill] sm:$0xff] }
 0x41b   :  { %5114 = vmatmul.msk.f32.vlgmr.msrb.gmra.mxu0 %vm3119_vm6, %v10369_v20  ;;  %3811 = vmatpush.msrb.mxu1 %v13285_v27 }
 0x41c   :  { %4043 = vmatpush.msrb.mxu0 %v13286_v59  ;;  %3993 = vmatpush.msra.mxu2 %v13287_v2  ;;  %v13293_v2 = vld [vmem:[#allocation136_spill] sm:$0xff] }
 0x41d   :  { %3933 = vmatpush.msra.mxu3 %v13288_v45  ;;  %3812 = vmatpush.msrb.mxu1 %v13289_v21  ;;  %v3460_v32 = vpop.f32.mrf.mxu1  ;;  %v13294_v45 = vld [vmem:[#allocation19_spill] sm:$0xff] }
 0x41e   :  { %4044 = vmatpush.msrb.mxu0 %v13196_v39  ;;  %3994 = vmatpush.msra.mxu2 %v13290_v18  ;;  %v3461_v56 = vadd.f32 %v3460_v32, %v3441_v25  ;;  %v13295_v39 = vld [vmem:[#allocation140_spill] sm:$0xff]  ;;  %v13296_v32 = vld [vmem:[#allocation21_spill] sm:$0xff]  ;;  %v13302_v18 = vld [vmem:[#allocation162_spill] sm:$0xff] }
 0x41f   :  { %3934 = vmatpush.msra.mxu3 %v6412_v57  ;;  %3813 = vmatpush.msrb.mxu1 %v13291_v14  ;;  %v13297_v25 = vld [vmem:[#allocation65_spill] sm:$0xff]  ;;  %v13310_v14 = vld [vmem:[#allocation90_spill] sm:$0xff] }
 0x420   :  { %4045 = vmatpush.msrb.mxu0 %v13292_v49  ;;  %3899 = vmatmul.f32.vlgmr.msrb.gmra.mxu2 %v9991_v23  ;;  %v3481_v34 = vadd.f32 %v3480_v22, %v3461_v56  ;;  %v13298_v23 = vld [vmem:[#allocation220_spill] sm:$0xff]  ;;  %v13299_v56 = vld [vmem:[#allocation209_spill] sm:$0xff] }
 0x421   :  { %3995 = vmatpush.msra.mxu2 %v13293_v2  ;;  %3935 = vmatpush.msra.mxu3 %v13176_v58  ;;  %v13300_v22 = vld [vmem:[#allocation25_spill] sm:$0xff]  ;;  %v13301_v2 = vld [vmem:[#allocation70_spill] sm:$0xff] }
 0x422   :  { %4046 = vmatpush.msrb.mxu0 %v13273_v47  ;;  %3814 = vmatpush.msrb.mxu1 %v13294_v45  ;;  %4085 = vst [vmem:[#allocation9 + $0x10] sm:$0xff] %v3481_v34  ;;  %v13303_v34 = vld [vmem:[#allocation203_spill] sm:$0xff] }
 0x423   :  { %3996 = vmatpush.msra.mxu2 %v13295_v39  ;;  %3936 = vmatpush.msra.mxu3 %v13024_v7  ;;  %v13304_v39 = vld [vmem:[#allocation222_spill] sm:$0xff]  ;;  %v13306_v7 = vld [vmem:[#allocation171_spill] sm:$0xff] }
 0x424   :  { %4047 = vmatpush.msrb.mxu0 %v13275_v42  ;;  %3815 = vmatpush.msrb.mxu1 %v13296_v32  ;;  %v13305_v42 = vld [vmem:[#allocation202_spill] sm:$0xff] }
 0x425   :  { %3997 = vmatpush.msra.mxu2 %v13297_v25  ;;  %3937 = vmatpush.msra.mxu3 %v13298_v23  ;;  %v10409_v23 = vld [vmem:[#allocation6 + $0x20] sm:$0xff] }
 0x426   :  { %4048 = vmatpush.msrb.mxu0 %v13299_v56  ;;  %3816 = vmatpush.msrb.mxu1 %v13300_v22  ;;  %v13307_v25 = vld [vmem:[#allocation104_spill] sm:$0xff]  ;;  %v13308_v22 = vld [vmem:[#allocation213_spill] sm:$0xff] }
 0x427   :  { %3998 = vmatpush.msra.mxu2 %v13301_v2  ;;  %3938 = vmatpush.msra.mxu3 %v13302_v18 }
 0x428   :  { %4049 = vmatpush.msrb.mxu0 %v13278_v3  ;;  %3817 = vmatpush.msrb.mxu1 %v13304_v39  ;;  %v13320_v3 = vld [vmem:[#allocation141_spill] sm:$0xff] }
 0x429   :  { %4078 = vmatpush.msrb.mxu2 %v13303_v34  ;;  %3859 = vmatmul.f32.vlgmr.msrb.gmra.mxu3 %v10337_v46 }
 0x42a   :  { %3999 = vmatmul.f32.vlgmr.msra.gmra.mxu2 %v10194_v53  ;;  %4023 = vmatpush.msrb.mxu3 %v13305_v42  ;;  %v13309_v53 = vld [vmem:[#allocation173_spill] sm:$0xff] }
 0x42b   :  { %4126 = vmatpush.msra.mxu2 %v13267_v12  ;;  %4050 = vmatpush.msrb.mxu0 %v13280_v52  ;;  %v13311_v12 = vld [vmem:[#allocation170_spill] sm:$0xff]  ;;  %v13313_v52 = vld [vmem:[#allocation93_spill] sm:$0xff] }
 0x42c   :  { %3818 = vmatpush.msrb.mxu1 %v13305_v42  ;;  %4024 = vmatpush.msrb.mxu3 %v13306_v7  ;;  %v13312_v42 = vld [vmem:[#allocation68_spill] sm:$0xff] }
 0x42d   :  { %4127 = vmatpush.msra.mxu2 %v13220_v37  ;;  %3819 = vmatmul.f32.vlgmr.msrb.gmra.mxu1 %v10409_v23  ;;  %v13314_v37 = vld [vmem:[#allocation172_spill] sm:$0xff] }
 0x42e   :  { %3903 = vmatpush.msra.mxu1 %v13307_v25  ;;  %4051 = vmatpush.msrb.mxu0 %v13308_v22  ;;  %v13315_v7 = vld [vmem:[#allocation32_spill] sm:$0xff] }
 0x42f   :  { %4025 = vmatpush.msrb.mxu3 %v13309_v53  ;;  %4128 = vmatpush.msra.mxu2 %v13310_v14  ;;  %v13316_v25 = vld [vmem:[#allocation96_spill] sm:$0xff] }
 0x430   :  { %3904 = vmatpush.msra.mxu1 %v13311_v12  ;;  %4052 = vmatpush.msrb.mxu0 %v13285_v27  ;;  %v13317_v22 = vld [vmem:[#allocation64_spill] sm:$0xff]  ;;  %v13321_v27 = vld [vmem:[#allocation113_spill] sm:$0xff] }
 0x431   :  { %4026 = vmatpush.msrb.mxu3 %v13312_v42  ;;  %4129 = vmatpush.msra.mxu2 %v13313_v52  ;;  %v13318_v53 = vld [vmem:[#allocation24_spill] sm:$0xff]  ;;  %v3500_v42 = vpop.f32.mrf.mxu3  ;;  %v13322_v52 = vld [vmem:[#allocation33_spill] sm:$0xff] }
 0x432   :  { %3905 = vmatpush.msra.mxu1 %v13314_v37  ;;  %4053 = vmatpush.msrb.mxu0 %v13289_v21  ;;  %v13319_v14 = vld [vmem:[#allocation28_spill] sm:$0xff] }
 0x433   :  { %4027 = vmatpush.msrb.mxu3 %v13315_v7  ;;  %4130 = vmatpush.msra.mxu2 %v13316_v25  ;;  %v13323_v21 = vld [vmem:[#allocation108_spill] sm:$0xff]  ;;  %v13325_v7 = vld [vmem:[#allocation38_spill] sm:$0xff] }
 0x434   :  { %3906 = vmatpush.msra.mxu1 %v13317_v22  ;;  %4054 = vmatpush.msrb.mxu0 %v13318_v53  ;;  %v13324_v25 = vld [vmem:[#allocation188_spill] sm:$0xff]  ;;  %v13326_v22 = vld [vmem:[#allocation221_spill] sm:$0xff] }
 0x435   :  { %4028 = vmatpush.msrb.mxu3 %v13319_v14  ;;  %4131 = vmatpush.msra.mxu2 %v13320_v3  ;;  %v3501_v14 = vadd.f32 %v3500_v42, %v10109_v26  ;;  %v3520_v3 = vpop.f32.mrf.mxu0  ;;  %v3540_v42 = vpop.f32.mrf.mxu2 }
 0x436   :  { %3907 = vmatpush.msra.mxu1 %v13321_v27  ;;  %4055 = vmatpush.msrb.mxu0 %v13294_v45  ;;  %v13327_v45 = vld [vmem:[#allocation137_spill] sm:$0xff] }
 0x437   :  { %4029 = vmatpush.msrb.mxu3 %v13322_v52  ;;  %4132 = vmatpush.msra.mxu2 %v13234_v1  ;;  %v13328_v52 = vld [vmem:[#allocation80_spill] sm:$0xff]  ;;  %v13329_v1 = vld [vmem:[#allocation186_spill] sm:$0xff] }
 0x438   :  { %3908 = vmatpush.msra.mxu1 %v13323_v21  ;;  %4056 = vmatpush.msrb.mxu0 %v13296_v32  ;;  %v13330_v32 = vld [vmem:[#allocation177_spill] sm:$0xff] }
 0x439   :  { %4030 = vmatpush.msrb.mxu3 %v13324_v25  ;;  %4133 = vmatpush.msra.mxu2 %v13150_v11  ;;  %v3521_v11 = vadd.f32 %v3520_v3, %v3501_v14  ;;  %v13331_v25 = vld [vmem:[#allocation150_spill] sm:$0xff]  ;;  %v13336_v3 = vld [vmem:[#allocation151_spill] sm:$0xff] }
 0x43a   :  { %3909 = vmatpush.msra.mxu1 %v13325_v7  ;;  %4057 = vmatpush.msrb.mxu0 %v13326_v22  ;;  %v13332_v7 = vld [vmem:[#allocation192_spill] sm:$0xff]  ;;  %v13337_v14 = vld [vmem:[#allocation194_spill] sm:$0xff] }
 0x43b   :  { %4031 = vmatpush.msrb.mxu3 %v13327_v45  ;;  %4134 = vmatpush.msra.mxu2 %v13328_v52  ;;  %v13333_v45 = vld [vmem:[#allocation169_spill] sm:$0xff] }
 0x43c   :  { %3910 = vmatpush.msra.mxu1 %v13329_v1  ;;  %4058 = vmatpush.msrb.mxu0 %v13304_v39  ;;  %v13334_v39 = vld [vmem:[#allocation196_spill] sm:$0xff] }
 0x43d   :  { %3979 = vmatmul.f32.vlgmr.msra.gmra.mxu0 %v10337_v46  ;;  %4032 = vmatpush.msrb.mxu3 %v13330_v32  ;;  %v13335_v46 = vld [vmem:[#allocation198_spill] sm:$0xff]  ;;  %v3541_v32 = vadd.f32 %v3540_v42, %v3521_v11  ;;  %v13341_v11 = vld [vmem:[#allocation40_spill] sm:$0xff] }
 0x43e   :  { %4135 = vmatpush.msra.mxu2 %v13241_v5  ;;  %4166 = vmatpush.msra.mxu0 %v13302_v18  ;;  %v13338_v18 = vld [vmem:[#allocation195_spill] sm:$0xff] }
 0x43f   :  { %3911 = vmatpush.msra.mxu1 %v13331_v25  ;;  %4033 = vmatpush.msrb.mxu3 %v13332_v7 }
 0x440   :  { %4136 = vmatpush.msra.mxu2 %v13151_v13  ;;  %4167 = vmatpush.msra.mxu0 %v13333_v45  ;;  %v3560_v52 = vpop.f32.mrf.mxu1  ;;  %v13339_v13 = vld [vmem:[#allocation197_spill] sm:$0xff] }
 0x441   :  { %3912 = vmatpush.msra.mxu1 %v13334_v39  ;;  %4034 = vmatpush.msrb.mxu3 %v13335_v46  ;;  %v3561_v7 = vadd.f32 %v3560_v52, %v3541_v32  ;;  %v13340_v46 = vld [vmem:[#allocation60_spill] sm:$0xff]  ;;  %v3580_v42 = vpop.f32.mrf.mxu3  ;;  %v13346_v32 = vld [vmem:[#allocation77_spill] sm:$0xff] }
 0x442   :  { %4137 = vmatpush.msra.mxu2 %v13336_v3  ;;  %4168 = vmatpush.msra.mxu0 %v13311_v12  ;;  %v13342_v39 = vld [vmem:[#allocation56_spill] sm:$0xff] }
 0x443   :  { %3913 = vmatpush.msra.mxu1 %v13337_v14  ;;  %4035 = vmatpush.msrb.mxu3 %v13338_v18  ;;  %v13343_v18 = vld [vmem:[#allocation87_spill] sm:$0xff] }
 0x444   :  { %5115 = vmatmul.msk.f32.vlgmr.msrb.gmra.mxu2 %vm3119_vm6, %v10369_v20  ;;  %4169 = vmatpush.msra.mxu0 %v13314_v37  ;;  %v13344_v20 = vld [vmem:[#allocation62_spill] sm:$0xff]  ;;  %v13345_v37 = vld [vmem:[#allocation75_spill] sm:$0xff] }
 0x445   :  { %4138 = vmatpush.msra.mxu2 %v13246_v62  ;;  %3914 = vmatpush.msra.mxu1 %v13339_v13  ;;  %v3581_v62 = vadd.f32 %v3580_v42, %v3561_v7  ;;  %v13351_v7 = vld [vmem:[#allocation76_spill] sm:$0xff]  ;;  %v13354_v42 = vld [vmem:[#allocation118_spill] sm:$0xff] }
 0x446   :  { %4036 = vmatpush.msrb.mxu3 %v13340_v46  ;;  %4170 = vmatpush.msra.mxu0 %v13341_v11 }
 0x447   :  { %4139 = vmatpush.msra.mxu2 %v13159_v24  ;;  %3915 = vmatpush.msra.mxu1 %v13342_v39  ;;  %v10474_v24 = vld [vmem:[#allocation8 + $0x8] sm:$0xff]  ;;  %v13348_v39 = vld [vmem:[#allocation160_spill] sm:$0xff] }
 0x448   :  { %4037 = vmatpush.msrb.mxu3 %v13343_v18  ;;  %4171 = vmatpush.msra.mxu0 %v13321_v27  ;;  %v13347_v18 = vld [vmem:[#allocation86_spill] sm:$0xff] }
 0x449   :  { %4140 = vmatpush.msra.mxu2 %v13344_v20  ;;  %3916 = vmatpush.msra.mxu1 %v13345_v37  ;;  %v13349_v20 = vld [vmem:[#allocation158_spill] sm:$0xff] }
 0x44a   :  { %3939 = vmatmul.f32.vlgmr.msra.gmra.mxu3 %v10409_v23  ;;  %4172 = vmatpush.msra.mxu0 %v13323_v21  ;;  %v3600_v52 = vpop.f32.mrf.mxu1  ;;  %v13350_v27 = vld [vmem:[#allocation182_spill] sm:$0xff]  ;;  %v13357_v21 = vld [vmem:[#allocation175_spill] sm:$0xff] }
 0x44b   :  { %4038 = vmatpush.msrb.mxu3 %v13346_v32  ;;  %4141 = vmatpush.msra.mxu2 %v13252_v38  ;;  %v3601_v46 = vadd.f32 %v3600_v52, %v3581_v62  ;;  %v13352_v62 = vld [vmem:[#allocation164_spill] sm:$0xff]  ;;  %v13355_v52 = vld [vmem:[#allocation191_spill] sm:$0xff]  ;;  %v13360_v32 = vld [vmem:[#allocation78_spill] sm:$0xff] }
 0x44c   :  { %3917 = vmatpush.msra.mxu1 %v13347_v18  ;;  %4173 = vmatpush.msra.mxu0 %v13350_v27 }
 0x44d   :  { %4146 = vmatpush.msra.mxu3 %v13348_v39  ;;  %4221 = vmatpush.msrb.mxu2 %v13349_v20  ;;  %4086 = vst [vmem:[#allocation9 + $0x18] sm:$0xff] %v3601_v46  ;;  %v13353_v46 = vld [vmem:[#allocation168_spill] sm:$0xff] }
 0x44e   :  { %4142 = vmatmul.f32.vlgmr.msra.gmra.mxu2 %v10474_v24  ;;  %3918 = vmatpush.msra.mxu1 %v13351_v7 }
 0x44f   :  { %4226 = vmatpush.msra.mxu2 %v13301_v2  ;;  %4147 = vmatpush.msra.mxu3 %v13238_v30  ;;  %v13356_v2 = vld [vmem:[#allocation184_spill] sm:$0xff]  ;;  %v6111_v30 = vld [vmem:[#allocation6 + $0x10] sm:$0xff] }
 0x450   :  { %3919 = vmatmul.f32.vlgmr.msra.gmra.mxu1 %v10254_v50  ;;  %4174 = vmatpush.msra.mxu0 %v13329_v1 }
 0x451   :  { %4003 = vmatpush.msrb.mxu1 %v13352_v62  ;;  %4227 = vmatpush.msra.mxu2 %v12642_v41 }
 0x452   :  { %4148 = vmatpush.msra.mxu3 %v13198_v63  ;;  %4175 = vmatpush.msra.mxu0 %v13331_v25  ;;  %v13358_v25 = vld [vmem:[#allocation26_spill] sm:$0xff] }
 0x453   :  { %4004 = vmatpush.msrb.mxu1 %v13353_v46  ;;  %4228 = vmatpush.msra.mxu2 %v6412_v57  ;;  %v10504_v63 = vld [vmem:[#allocation3 + $0x10] sm:$0xff] }
 0x454   :  { %4149 = vmatpush.msra.mxu3 %v13354_v42  ;;  %4176 = vmatpush.msra.mxu0 %v13355_v52  ;;  %13359 = vst [vmem:[#allocation207_spill] sm:$0xff] %v10504_v63  ;;  %v10510_v42 = vld [vmem:[#allocation3] sm:$0xff] }
 0x455   :  { %4005 = vmatpush.msrb.mxu1 %v13356_v2  ;;  %4229 = vmatpush.msra.mxu2 %v13176_v58  ;;  %13362 = vst [vmem:[#allocation161_spill] sm:$0xff] %v10510_v42 }
 0x456   :  { %4150 = vmatpush.msra.mxu3 %v13243_v43  ;;  %4177 = vmatpush.msra.mxu0 %v13337_v14  ;;  %v13361_v43 = vld [vmem:[#allocation178_spill] sm:$0xff] }
 0x457   :  { %4006 = vmatpush.msrb.mxu1 %v13357_v21  ;;  %4230 = vmatpush.msra.mxu2 %v13253_v31 }
 0x458   :  { %4151 = vmatpush.msra.mxu3 %v13208_v4  ;;  %4178 = vmatpush.msra.mxu0 %v13339_v13  ;;  %v10514_v13 = vld [vmem:[#allocation3 + $0x8] sm:$0xff]  ;;  %v10520_v4 = vld [vmem:[#allocation3 + $0x38] sm:$0xff] }
 0x459   :  { %4007 = vmatpush.msrb.mxu1 %v13358_v25  ;;  %4231 = vmatpush.msra.mxu2 %v13264_v40  ;;  %13363 = vst [vmem:[#allocation16_spill] sm:$0xff] %v10520_v4 }
 0x45a   :  { %4152 = vmatpush.msra.mxu3 %v10504_v63  ;;  %4179 = vmatpush.msra.mxu0 %v13360_v32  ;;  %v10527_v63 = vld [vmem:[#allocation3 + $0x28] sm:$0xff] }
 0x45b   :  { %4008 = vmatpush.msrb.mxu1 %v13361_v43  ;;  %4232 = vmatpush.msra.mxu2 %v13248_v17  ;;  %v13364_v17 = vld [vmem:[#allocation181_spill] sm:$0xff] }
 0x45c   :  { %4153 = vmatpush.msra.mxu3 %v10510_v42  ;;  %4180 = vmatpush.msra.mxu0 %v13345_v37  ;;  %v13365_v42 = vld [vmem:[#allocation224_spill] sm:$0xff] }
 0x45d   :  { %4009 = vmatpush.msrb.mxu1 %v10514_v13  ;;  %4233 = vmatpush.msra.mxu2 %v13259_v48 }
 0x45e   :  { %4154 = vmatpush.msra.mxu3 %v10211_v19  ;;  %4181 = vmatpush.msra.mxu0 %v13347_v18  ;;  %v13366_v19 = vld [vmem:[#allocation148_spill] sm:$0xff] }
 0x45f   :  { %4010 = vmatpush.msrb.mxu1 %v10520_v4  ;;  %4234 = vmatpush.msra.mxu2 %v13269_v55  ;;  %v13368_v18 = vld [vmem:[#allocation124_spill] sm:$0xff] }
 0x460   :  { %4059 = vmatmul.f32.vlgmr.msrb.gmra.mxu0 %v10409_v23  ;;  %4155 = vmatpush.msra.mxu3 %v13364_v17  ;;  %v13367_v23 = vld [vmem:[#allocation102_spill] sm:$0xff]  ;;  %v13377_v17 = vld [vmem:[#allocation55_spill] sm:$0xff] }
 0x461   :  { %4266 = vmatpush.msrb.mxu0 %v13365_v42  ;;  %4011 = vmatpush.msrb.mxu1 %v10527_v63 }
 0x462   :  { %4235 = vmatpush.msra.mxu2 %v13254_v28  ;;  %4156 = vmatpush.msra.mxu3 %v13255_v10  ;;  %v13369_v28 = vld [vmem:[#allocation100_spill] sm:$0xff]  ;;  %v13370_v10 = vld [vmem:[#allocation106_spill] sm:$0xff] }
 0x463   :  { %4267 = vmatpush.msrb.mxu0 %v13352_v62  ;;  %4012 = vmatpush.msrb.mxu1 %v13366_v19 }
 0x464   :  { %4236 = vmatpush.msra.mxu2 %v13265_v54  ;;  %4157 = vmatpush.msra.mxu3 %v13225_v35  ;;  %v13372_v35 = vld [vmem:[#allocation42_spill] sm:$0xff] }
 0x465   :  { %4268 = vmatpush.msrb.mxu0 %v13353_v46  ;;  %4013 = vmatpush.msrb.mxu1 %v13367_v23  ;;  %v13371_v46 = vld [vmem:[#allocation111_spill] sm:$0xff] }
 0x466   :  { %4237 = vmatpush.msra.mxu2 %v13274_v60  ;;  %4158 = vmatpush.msra.mxu3 %v13239_v15  ;;  %v10552_v15 = vld [vmem:[#allocation8 + $0x28] sm:$0xff] }
 0x467   :  { %4269 = vmatpush.msrb.mxu0 %v13368_v18  ;;  %4014 = vmatpush.msrb.mxu1 %v13369_v28 }
 0x468   :  { %4238 = vmatpush.msra.mxu2 %v13260_v16  ;;  %4159 = vmatpush.msra.mxu3 %v13261_v61  ;;  %v10554_v16 = vld [vmem:[#allocation3 + $0x18] sm:$0xff]  ;;  %v13373_v61 = vld [vmem:[#allocation112_spill] sm:$0xff] }
 0x469   :  { %4270 = vmatpush.msrb.mxu0 %v13357_v21  ;;  %4015 = vmatpush.msrb.mxu1 %v13370_v10 }
 0x46a   :  { %4239 = vmatpush.msra.mxu2 %v13270_v0  ;;  %4160 = vmatpush.msra.mxu3 %v13233_v29  ;;  %v13374_v29 = vld [vmem:[#allocation35_spill] sm:$0xff] }
 0x46b   :  { %4271 = vmatpush.msrb.mxu0 %v13358_v25  ;;  %4016 = vmatpush.msrb.mxu1 %v13371_v46  ;;  %v3620_v25 = vpop.f32.mrf.mxu2 }
 0x46c   :  { %4240 = vmatpush.msra.mxu2 %v13279_v6  ;;  %4161 = vmatpush.msra.mxu3 %v13372_v35 }
 0x46d   :  { %4272 = vmatpush.msrb.mxu0 %v10554_v16  ;;  %4017 = vmatpush.msrb.mxu1 %v13373_v61  ;;  %v13397_v61 = vld [vmem:[#allocation29_spill] sm:$0xff] }
 0x46e   :  { %4039 = vmatmul.f32.vlgmr.msrb.gmra.mxu3 %v10254_v50  ;;  %4241 = vmatpush.msra.mxu2 %v13266_v8  ;;  %v13375_v50 = vld [vmem:[#allocation98_spill] sm:$0xff]  ;;  %v13376_v8 = vld [vmem:[#allocation27_spill] sm:$0xff] }
 0x46f   :  { %4246 = vmatpush.msrb.mxu3 %v13374_v29  ;;  %5116 = vmatmul.msk.f32.vlgmr.msrb.gmra.mxu2 %vm3119_vm6, %v10552_v15 }
 0x470   :  { %4273 = vmatpush.msrb.mxu0 %v10514_v13  ;;  %4306 = vmatpush.msrb.mxu2 %v13303_v34 }
 0x471   :  { %4018 = vmatpush.msrb.mxu1 %v13374_v29  ;;  %4247 = vmatpush.msrb.mxu3 %v13237_v36  ;;  %v13378_v36 = vld [vmem:[#allocation92_spill] sm:$0xff]  ;;  %v13382_v29 = vld [vmem:[#allocation109_spill] sm:$0xff] }
 0x472   :  { %4274 = vmatpush.msrb.mxu0 %v10520_v4  ;;  %4307 = vmatpush.msrb.mxu2 %v13286_v59  ;;  %v13379_v59 = vld [vmem:[#allocation18_spill] sm:$0xff]  ;;  %v3621_v4 = vadd.f32 %v3620_v25, %v10109_v26  ;;  %v13386_v25 = vld [vmem:[#allocation147_spill] sm:$0xff] }
 0x473   :  { %4106 = vmatpush.msra.mxu1 %v13167_v9  ;;  %4248 = vmatpush.msrb.mxu3 %v13375_v50  ;;  %v3640_v50 = vpop.f32.mrf.mxu0  ;;  %v13383_v9 = vld [vmem:[#allocation54_spill] sm:$0xff]  ;;  %v3700_v39 = vpop.f32.mrf.mxu2 }
 0x474   :  { %4275 = vmatpush.msrb.mxu0 %v13377_v17  ;;  %4308 = vmatpush.msrb.mxu2 %v13277_v33  ;;  %v13390_v33 = vld [vmem:[#allocation125_spill] sm:$0xff] }
 0x475   :  { %4107 = vmatpush.msra.mxu1 %v13376_v8  ;;  %4249 = vmatpush.msrb.mxu3 %v13271_v51  ;;  %v13381_v51 = vld [vmem:[#allocation72_spill] sm:$0xff] }
 0x476   :  { %4019 = vmatmul.f32.vlgmr.msrb.gmra.mxu1 %v6111_v30  ;;  %4276 = vmatpush.msrb.mxu0 %v13366_v19  ;;  %v13380_v30 = vld [vmem:[#allocation143_spill] sm:$0xff] }
 0x477   :  { %4108 = vmatpush.msra.mxu1 %v13240_v44  ;;  %4309 = vmatpush.msrb.mxu2 %v13292_v49  ;;  %v13384_v49 = vld [vmem:[#allocation144_spill] sm:$0xff] }
 0x478   :  { %4250 = vmatpush.msrb.mxu3 %v13378_v36  ;;  %4277 = vmatpush.msrb.mxu0 %v13367_v23  ;;  %v13385_v36 = vld [vmem:[#allocation73_spill] sm:$0xff]  ;;  %v13388_v23 = vld [vmem:[#allocation211_spill] sm:$0xff] }
 0x479   :  { %4109 = vmatpush.msra.mxu1 %v13379_v59  ;;  %4310 = vmatpush.msrb.mxu2 %v13273_v47  ;;  %v3641_v59 = vadd.f32 %v3640_v50, %v3621_v4  ;;  %v13387_v47 = vld [vmem:[#allocation74_spill] sm:$0xff]  ;;  %v13391_v50 = vld [vmem:[#allocation43_spill] sm:$0xff] }
 0x47a   :  { %4251 = vmatpush.msrb.mxu3 %v13380_v30  ;;  %4278 = vmatpush.msrb.mxu0 %v13382_v29  ;;  %v10595_v30 = vld [vmem:[#allocation8 + $0x18] sm:$0xff]  ;;  %v3680_v29 = vpop.f32.mrf.mxu3 }
 0x47b   :  { %4110 = vmatpush.msra.mxu1 %v13381_v51  ;;  %4311 = vmatpush.msrb.mxu2 %v13383_v9 }
 0x47c   :  { %4252 = vmatpush.msrb.mxu3 %v13384_v49  ;;  %4279 = vmatpush.msrb.mxu0 %v13370_v10  ;;  %v13389_v49 = vld [vmem:[#allocation81_spill] sm:$0xff] }
 0x47d   :  { %4111 = vmatpush.msra.mxu1 %v13385_v36  ;;  %4312 = vmatpush.msrb.mxu2 %v13299_v56  ;;  %v13392_v56 = vld [vmem:[#allocation63_spill] sm:$0xff]  ;;  %v13396_v10 = vld [vmem:[#allocation89_spill] sm:$0xff] }
 0x47e   :  { %4253 = vmatpush.msrb.mxu3 %v13386_v25  ;;  %4280 = vmatpush.msrb.mxu0 %v13371_v46  ;;  %v13395_v25 = vld [vmem:[#allocation213_spill] sm:$0xff] }
 0x47f   :  { %4112 = vmatpush.msra.mxu1 %v13387_v47  ;;  %4313 = vmatpush.msrb.mxu2 %v13388_v23  ;;  %v3660_v9 = vpop.f32.mrf.mxu1  ;;  %v13393_v47 = vld [vmem:[#allocation82_spill] sm:$0xff]  ;;  %v13394_v23 = vld [vmem:[#allocation128_spill] sm:$0xff] }
 0x480   :  { %4254 = vmatpush.msrb.mxu3 %v13389_v49  ;;  %v3661_v4 = vadd.f32 %v3660_v9, %v3641_v59  ;;  %4281 = vmatpush.msrb.mxu0 %v13391_v50  ;;  %v13398_v9 = vld [vmem:[#allocation129_spill] sm:$0xff]  ;;  %v10609_v59 = vld [vmem:[#allocation8 + $0x10] sm:$0xff]  ;;  %v3720_v50 = vpop.f32.mrf.mxu2 }
 0x481   :  { %4113 = vmatpush.msra.mxu1 %v13390_v33  ;;  %4314 = vmatpush.msrb.mxu2 %v13392_v56  ;;  %13399 = vst [vmem:[#allocation214_spill] sm:$0xff] %v10609_v59  ;;  %v13400_v56 = vld [vmem:[#allocation216_spill] sm:$0xff] }
 0x482   :  { %4182 = vmatmul.f32.vlgmr.msra.gmra.mxu0 %v10595_v30  ;;  %4255 = vmatpush.msrb.mxu3 %v13393_v47  ;;  %v3681_v46 = vadd.f32 %v3680_v29, %v3661_v4  ;;  %v13401_v47 = vld [vmem:[#allocation138_spill] sm:$0xff]  ;;  %v13402_v4 = vld [vmem:[#allocation97_spill] sm:$0xff] }
 0x483   :  { %4366 = vmatpush.msra.mxu0 %v13372_v35  ;;  %4114 = vmatpush.msra.mxu1 %v13394_v23  ;;  %v13403_v35 = vld [vmem:[#allocation46_spill] sm:$0xff] }
 0x484   :  { %4315 = vmatpush.msrb.mxu2 %v13395_v25  ;;  %4256 = vmatpush.msrb.mxu3 %v13396_v10  ;;  %v3701_v49 = vadd.f32 %v3700_v39, %v3681_v46  ;;  %v13404_v25 = vld [vmem:[#allocation25_spill] sm:$0xff]  ;;  %v13405_v39 = vld [vmem:[#allocation135_spill] sm:$0xff]  ;;  %v13406_v46 = vld [vmem:[#allocation90_spill] sm:$0xff] }
 0x485   :  { %4367 = vmatpush.msra.mxu0 %v13397_v61  ;;  %4115 = vmatpush.msra.mxu1 %v13398_v9  ;;  %v13407_v61 = vld [vmem:[#allocation44_spill] sm:$0xff]  ;;  %v13411_v9 = vld [vmem:[#allocation19_spill] sm:$0xff]  ;;  %v13412_v10 = vld [vmem:[#allocation66_spill] sm:$0xff] }
 0x486   :  { %4316 = vmatpush.msrb.mxu2 %v13400_v56  ;;  %4257 = vmatpush.msrb.mxu3 %v13401_v47  ;;  %v3721_v29 = vadd.f32 %v3720_v50, %v3701_v49  ;;  %v13408_v56 = vld [vmem:[#allocation136_spill] sm:$0xff]  ;;  %v13409_v49 = vld [vmem:[#allocation93_spill] sm:$0xff] }
 0x487   :  { %4368 = vmatpush.msra.mxu0 %v13402_v4  ;;  %4116 = vmatpush.msra.mxu1 %v13403_v35  ;;  %v13410_v50 = vld [vmem:[#allocation48_spill] sm:$0xff]  ;;  %v13413_v47 = vld [vmem:[#allocation145_spill] sm:$0xff] }
 0x488   :  { %4317 = vmatpush.msrb.mxu2 %v13404_v25  ;;  %4162 = vmatmul.f32.vlgmr.msra.gmra.mxu3 %v10609_v59  ;;  %4087 = vst [vmem:[#allocation9 + $0x20] sm:$0xff] %v3721_v29  ;;  %v13414_v29 = vld [vmem:[#allocation132_spill] sm:$0xff]  ;;  %v10629_v25 = vld [vmem:[#allocation8] sm:$0xff] }
 0x489   :  { %4258 = vmatpush.msrb.mxu3 %v13405_v39  ;;  %4369 = vmatpush.msra.mxu0 %v13406_v46  ;;  %v13415_v39 = vld [vmem:[#allocation219_spill] sm:$0xff]  ;;  %13416 = vst [vmem:[#allocation157_spill] sm:$0xff] %v10629_v25  ;;  %v13417_v46 = vld [vmem:[#allocation65_spill] sm:$0xff]  ;;  %v13427_v4 = vld [vmem:[#allocation64_spill] sm:$0xff] }
 0x48a   :  { %4117 = vmatpush.msra.mxu1 %v13407_v61  ;;  %4318 = vmatpush.msrb.mxu2 %v13318_v53  ;;  %v13418_v53 = vld [vmem:[#allocation141_spill] sm:$0xff] }
 0x48b   :  { %4259 = vmatpush.msrb.mxu3 %v13408_v56  ;;  %4370 = vmatpush.msra.mxu0 %v13409_v49  ;;  %v13419_v56 = vld [vmem:[#allocation133_spill] sm:$0xff]  ;;  %v13422_v49 = vld [vmem:[#allocation220_spill] sm:$0xff] }
 0x48c   :  { %4118 = vmatpush.msra.mxu1 %v13410_v50  ;;  %4319 = vmatpush.msrb.mxu2 %v13411_v9  ;;  %v13420_v50 = vld [vmem:[#allocation225_spill] sm:$0xff]  ;;  %v13421_v9 = vld [vmem:[#allocation142_spill] sm:$0xff] }
 0x48d   :  { %4260 = vmatpush.msrb.mxu3 %v13412_v10  ;;  %4371 = vmatpush.msra.mxu0 %v13413_v47  ;;  %v13423_v10 = vld [vmem:[#allocation134_spill] sm:$0xff]  ;;  %v13426_v47 = vld [vmem:[#allocation200_spill] sm:$0xff] }
 0x48e   :  { %4119 = vmatpush.msra.mxu1 %v13414_v29  ;;  %4320 = vmatpush.msrb.mxu2 %v13415_v39  ;;  %v13424_v39 = vld [vmem:[#allocation84_spill] sm:$0xff] }
 0x48f   :  { %4261 = vmatpush.msrb.mxu3 %v13417_v46  ;;  %4372 = vmatpush.msra.mxu0 %v13418_v53  ;;  %v13425_v53 = vld [vmem:[#allocation20_spill] sm:$0xff] }
 0x490   :  { %4120 = vmatpush.msra.mxu1 %v13419_v56  ;;  %4321 = vmatpush.msrb.mxu2 %v13326_v22  ;;  %v13428_v22 = vld [vmem:[#allocation80_spill] sm:$0xff] }
 0x491   :  { %4341 = vmatpush.msra.mxu3 %v13420_v50  ;;  %4242 = vmatmul.f32.vlgmr.msra.gmra.mxu2 %v10629_v25 }
 0x492   :  { %4262 = vmatmul.f32.vlgmr.msrb.gmra.mxu3 %v10474_v24  ;;  %4373 = vmatpush.msra.mxu0 %v13421_v9  ;;  %v13429_v9 = vld [vmem:[#allocation201_spill] sm:$0xff] }
 0x493   :  { %4346 = vmatpush.msrb.mxu3 %v13252_v38  ;;  %4406 = vmatpush.msra.mxu2 %v13422_v49  ;;  %v3740_v38 = vpop.f32.mrf.mxu1 }
 0x494   :  { %4121 = vmatpush.msra.mxu1 %v13423_v10  ;;  %4374 = vmatpush.msra.mxu0 %v13424_v39  ;;  %v13430_v10 = vld [vmem:[#allocation114_spill] sm:$0xff] }
 0x495   :  { %4122 = vmatmul.f32.vlgmr.msra.gmra.mxu1 %v10629_v25  ;;  %4347 = vmatpush.msrb.mxu3 %v13425_v53  ;;  %v13431_v53 = vld [vmem:[#allocation59_spill] sm:$0xff] }
 0x496   :  { %4186 = vmatpush.msrb.mxu1 %v13426_v47  ;;  %4407 = vmatpush.msra.mxu2 %v13427_v4  ;;  %v13432_v4 = vld [vmem:[#allocation139_spill] sm:$0xff] }
 0x497   :  { %4348 = vmatpush.msrb.mxu3 %v13376_v8  ;;  %4375 = vmatpush.msra.mxu0 %v13428_v22  ;;  %v13433_v8 = vld [vmem:[#allocation107_spill] sm:$0xff]  ;;  %v13434_v22 = vld [vmem:[#allocation38_spill] sm:$0xff] }
 0x498   :  { %4187 = vmatpush.msrb.mxu1 %v13429_v9  ;;  %4408 = vmatpush.msra.mxu2 %v13333_v45  ;;  %v3741_v9 = vadd.f32 %v3740_v38, %v10109_v26  ;;  %v13438_v45 = vld [vmem:[#allocation113_spill] sm:$0xff]  ;;  %v13439_v38 = vld [vmem:[#allocation123_spill] sm:$0xff] }
 0x499   :  { %4349 = vmatpush.msrb.mxu3 %v13240_v44  ;;  %4376 = vmatpush.msra.mxu0 %v13241_v5  ;;  %v3760_v5 = vpop.f32.mrf.mxu0  ;;  %v13435_v44 = vld [vmem:[#allocation30_spill] sm:$0xff] }
 0x49a   :  { %4188 = vmatpush.msrb.mxu1 %v13430_v10  ;;  %4409 = vmatpush.msra.mxu2 %v13311_v12  ;;  %v13436_v12 = vld [vmem:[#allocation205_spill] sm:$0xff] }
 0x49b   :  { %4350 = vmatpush.msrb.mxu3 %v13431_v53  ;;  %4377 = vmatpush.msra.mxu0 %v13432_v4  ;;  %v13437_v53 = vld [vmem:[#allocation154_spill] sm:$0xff]  ;;  %v3780_v4 = vpop.f32.mrf.mxu3 }
 0x49c   :  { %4189 = vmatpush.msrb.mxu1 %v13433_v8  ;;  %4410 = vmatpush.msra.mxu2 %v13434_v22  ;;  %v3761_v22 = vadd.f32 %v3760_v5, %v3741_v9  ;;  %v13445_v5 = vld [vmem:[#allocation165_spill] sm:$0xff]  ;;  %v3800_v9 = vpop.f32.mrf.mxu2 }
 0x49d   :  { %4282 = vmatmul.f32.vlgmr.msrb.gmra.mxu0 %v10609_v59  ;;  %4351 = vmatpush.msrb.mxu3 %v13381_v51  ;;  %v13440_v51 = vld [vmem:[#allocation206_spill] sm:$0xff]  ;;  %v13441_v59 = vld [vmem:[#allocation67_spill] sm:$0xff] }
 0x49e   :  { %4190 = vmatpush.msrb.mxu1 %v13435_v44  ;;  %4378 = vmatpush.msra.mxu0 %v13336_v3  ;;  %v13442_v44 = vld [vmem:[#allocation196_spill] sm:$0xff]  ;;  %v3781_v3 = vadd.f32 %v3780_v4, %v3761_v22  ;;  %v13450_v4 = vld [vmem:[#allocation17_spill] sm:$0xff] }
 0x49f   :  { %4411 = vmatpush.msra.mxu2 %v13341_v11  ;;  %4352 = vmatpush.msrb.mxu3 %v13385_v36  ;;  %v13443_v11 = vld [vmem:[#allocation210_spill] sm:$0xff]  ;;  %v13449_v22 = vld [vmem:[#allocation56_spill] sm:$0xff] }
 0x4a0   :  { %4191 = vmatpush.msrb.mxu1 %v13436_v12  ;;  %4379 = vmatpush.msra.mxu0 %v13437_v53  ;;  %v13444_v36 = vld [vmem:[#allocation62_spill] sm:$0xff]  ;;  %v13447_v53 = vld [vmem:[#allocation215_spill] sm:$0xff] }
 0x4a1   :  { %4412 = vmatpush.msra.mxu2 %v13438_v45  ;;  %4353 = vmatpush.msrb.mxu3 %v13439_v38  ;;  %v13446_v45 = vld [vmem:[#allocation212_spill] sm:$0xff] }
 0x4a2   :  { %4192 = vmatpush.msrb.mxu1 %v13440_v51  ;;  %4380 = vmatpush.msra.mxu0 %v13441_v59 }
 0x4a3   :  { %4413 = vmatpush.msra.mxu2 %v13442_v44  ;;  %4354 = vmatpush.msrb.mxu3 %v13390_v33  ;;  %v13448_v33 = vld [vmem:[#allocation50_spill] sm:$0xff] }
 0x4a4   :  { %4193 = vmatpush.msrb.mxu1 %v13443_v11  ;;  %4381 = vmatpush.msra.mxu0 %v13444_v36  ;;  %v3801_v11 = vadd.f32 %v3800_v9, %v3781_v3  ;;  %v13452_v9 = vld [vmem:[#allocation122_spill] sm:$0xff] }
 0x4a5   :  { %4414 = vmatpush.msra.mxu2 %v13350_v27  ;;  %4355 = vmatpush.msrb.mxu3 %v13394_v23 }
 0x4a6   :  { %4461 = vmatpush.msrb.mxu0 %v13445_v5  ;;  %4194 = vmatpush.msrb.mxu1 %v13446_v45  ;;  %v13451_v5 = vld [vmem:[#allocation217_spill] sm:$0xff] }
 0x4a7   :  { %4382 = vmatmul.f32.vlgmr.msra.gmra.mxu0 %v10474_v24  ;;  %4415 = vmatpush.msra.mxu2 %v13329_v1 }
 0x4a8   :  { %4466 = vmatpush.msra.mxu0 %v13417_v46  ;;  %4195 = vmatpush.msrb.mxu1 %v13447_v53  ;;  %v3840_v46 = vpop.f32.mrf.mxu0 }
 0x4a9   :  { %4356 = vmatpush.msrb.mxu3 %v13448_v33  ;;  %4416 = vmatpush.msra.mxu2 %v13449_v22  ;;  %v13500_v33 = vld [vmem:[#allocation33_spill] sm:$0xff] }
 0x4aa   :  { %4467 = vmatpush.msra.mxu0 %v13450_v4  ;;  %4196 = vmatpush.msrb.mxu1 %v13451_v5  ;;  %v3820_v38 = vpop.f32.mrf.mxu1  ;;  %v13464_v5 = vld [vmem:[#allocation32_spill] sm:$0xff] }
 0x4ab   :  { %4357 = vmatpush.msrb.mxu3 %v13403_v35  ;;  %4417 = vmatpush.msra.mxu2 %v13355_v52  ;;  %v3821_v23 = vadd.f32 %v3820_v38, %v3801_v11  ;;  %v13453_v11 = vld [vmem:[#allocation57_spill] sm:$0xff]  ;;  %v10702_v38 = vld [vmem:[#allocation8 + $0x20] sm:$0xff]  ;;  %v13496_v35 = vld [vmem:[#allocation63_spill] sm:$0xff] }
 0x4ac   :  { %4468 = vmatpush.msra.mxu0 %v12642_v41  ;;  %4197 = vmatpush.msrb.mxu1 %v12642_v41 }
 0x4ad   :  { %4358 = vmatpush.msrb.mxu3 %v13407_v61  ;;  %4418 = vmatpush.msra.mxu2 %v13337_v14  ;;  %v3841_v3 = vadd.f32 %v3840_v46, %v3821_v23  ;;  %v13454_v23 = vld [vmem:[#allocation218_spill] sm:$0xff]  ;;  %v13455_v46 = vld [vmem:[#allocation131_spill] sm:$0xff]  ;;  %v13461_v61 = vld [vmem:[#allocation173_spill] sm:$0xff] }
 0x4ae   :  { %4469 = vmatpush.msra.mxu0 %v6412_v57  ;;  %4198 = vmatpush.msrb.mxu1 %v6412_v57  ;;  %v13460_v14 = vld [vmem:[#allocation51_spill] sm:$0xff] }
 0x4af   :  { %4359 = vmatpush.msrb.mxu3 %v13452_v9  ;;  %4419 = vmatpush.msra.mxu2 %v13351_v7  ;;  %4088 = vst [vmem:[#allocation9 + $0x28] sm:$0xff] %v3841_v3  ;;  %v13456_v3 = vld [vmem:[#allocation222_spill] sm:$0xff]  ;;  %v13483_v9 = vld [vmem:[#allocation60_spill] sm:$0xff] }
 0x4b0   :  { %4470 = vmatpush.msra.mxu0 %v13453_v11  ;;  %4199 = vmatpush.msrb.mxu1 %v13176_v58  ;;  %v3880_v1 = vpop.f32.mrf.mxu0 }
 0x4b1   :  { %4360 = vmatpush.msrb.mxu3 %v13414_v29  ;;  %4420 = vmatpush.msra.mxu2 %v13360_v32  ;;  %v13482_v29 = vld [vmem:[#allocation189_spill] sm:$0xff] }
 0x4b2   :  { %4471 = vmatpush.msra.mxu0 %v13253_v31  ;;  %4200 = vmatpush.msrb.mxu1 %v13454_v23 }
 0x4b3   :  { %4361 = vmatpush.msrb.mxu3 %v13419_v56  ;;  %4421 = vmatpush.msra.mxu2 %v13345_v37  ;;  %v13457_v37 = vld [vmem:[#allocation223_spill] sm:$0xff] }
 0x4b4   :  { %4472 = vmatpush.msra.mxu0 %v13264_v40  ;;  %4322 = vmatmul.f32.vlgmr.msrb.gmra.mxu2 %v10702_v38  ;;  %v4097_v40 = vld [vmem:[%s11223_s4] sm:$0xff]  ;;  %v13458_v56 = vld [vmem:[#allocation159_spill] sm:$0xff]  ;;  %s6265_s4 = smov [#allocation9]  }
 0x4b5   :  { %5117 = vmatmul.msk.f32.vlgmr.msra.gmra.mxu3 %vm3119_vm6, %v10552_v15  ;;  %4506 = vmatpush.msrb.mxu2 %v13356_v2  ;;  %s5079_s21 = sshll.u32 %s6265_s4, 4  ;;  %s5080_s21 = int_to_ptr.vmem [resolvable:$true] %s5079_s21 }
 0x4b6   :  { %4426 = vmatpush.msra.mxu3 %v13349_v20  ;;  %4201 = vmatpush.msrb.mxu1 %v13422_v49  ;;  %v13459_v49 = vld [vmem:[#allocation171_spill] sm:$0xff]  ;;  %v13481_v20 = vld [vmem:[#allocation106_spill] sm:$0xff] }
 0x4b7   :  { %4473 = vmatpush.msra.mxu0 %v13455_v46  ;;  %4202 = vmatmul.f32.vlgmr.msrb.gmra.mxu1 %v10702_v38 }
 0x4b8   :  { %4286 = vmatpush.msra.mxu1 %v13456_v3  ;;  %4427 = vmatpush.msra.mxu3 %v13426_v47  ;;  %v13466_v47 = vld [vmem:[#allocation28_spill] sm:$0xff] }
 0x4b9   :  { %4507 = vmatpush.msrb.mxu2 %v13365_v42  ;;  %4474 = vmatpush.msra.mxu0 %v13259_v48  ;;  %v13494_v3 = vld [vmem:[#allocation160_spill] sm:$0xff] }
 0x4ba   :  { %4287 = vmatpush.msra.mxu1 %v13457_v37  ;;  %4428 = vmatpush.msra.mxu3 %v13458_v56 }
 0x4bb   :  { %4508 = vmatpush.msrb.mxu2 %v13352_v62  ;;  %4475 = vmatpush.msra.mxu0 %v13269_v55  ;;  %v13462_v62 = vld [vmem:[#allocation41_spill] sm:$0xff]  ;;  %v3860_v55 = vpop.f32.mrf.mxu3 }
 0x4bc   :  { %4100 = vperm.xlu2 %6075, %v4097_v40   ;;  %4288 = vmatpush.msra.mxu1 %v13459_v49  ;;  %v13463_v40 = vld [vmem:[#allocation152_spill] sm:$0xff] }
 0x4bd   :  { %4429 = vmatpush.msra.mxu3 %v13430_v10  ;;  %4509 = vmatpush.msrb.mxu2 %v13361_v43  ;;  %v13477_v10 = vld [vmem:[#allocation109_spill] sm:$0xff] }
 0x4be   :  { %4476 = vmatpush.msra.mxu0 %v13460_v14  ;;  %4289 = vmatpush.msra.mxu1 %v13461_v61  ;;  %v3861_v61 = vadd.f32 %v3860_v55, %v10109_v26  ;;  %v13469_v55 = vld [vmem:[#allocation188_spill] sm:$0xff] }
 0x4bf   :  { %4430 = vmatpush.msra.mxu3 %v13433_v8  ;;  %4510 = vmatpush.msrb.mxu2 %v13368_v18  ;;  %v13465_v8 = vld [vmem:[#allocation120_spill] sm:$0xff] }
 0x4c0   :  { %4477 = vmatpush.msra.mxu0 %v13265_v54  ;;  %4290 = vmatpush.msra.mxu1 %v13462_v62 }
 0x4c1   :  { %4431 = vmatpush.msra.mxu3 %v13463_v40  ;;  %4511 = vmatpush.msrb.mxu2 %v13357_v21  ;;  %v13468_v21 = vld [vmem:[#allocation199_spill] sm:$0xff]  ;;  %v3900_v40 = vpop.f32.mrf.mxu2 }
 0x4c2   :  { %4478 = vmatpush.msra.mxu0 %v13274_v60  ;;  %4291 = vmatpush.msra.mxu1 %v13464_v5  ;;  %v13467_v60 = vld [vmem:[#allocation226_spill] sm:$0xff] }
 0x4c3   :  { %4432 = vmatpush.msra.mxu3 %v13436_v12  ;;  %4512 = vmatpush.msrb.mxu2 %v10527_v63  ;;  %v3881_v12 = vadd.f32 %v3880_v1, %v3861_v61  ;;  %v13471_v61 = vld [vmem:[#allocation227_spill] sm:$0xff] }
 0x4c4   :  { %4479 = vmatpush.msra.mxu0 %v13465_v8  ;;  %4292 = vmatpush.msra.mxu1 %v13466_v47  ;;  %v13470_v47 = vld [vmem:[#allocation137_spill] sm:$0xff] }
 0x4c5   :  { %4433 = vmatpush.msra.mxu3 %v13440_v51  ;;  %4513 = vmatpush.msrb.mxu2 %v10554_v16  ;;  %v13472_v51 = vld [vmem:[#allocation117_spill] sm:$0xff] }
 0x4c6   :  { %4480 = vmatpush.msra.mxu0 %v13270_v0  ;;  %4293 = vmatpush.msra.mxu1 %v13467_v60 }
 0x4c7   :  { %4434 = vmatpush.msra.mxu3 %v13468_v21  ;;  %4514 = vmatpush.msrb.mxu2 %v10514_v13  ;;  %v3901_v13 = vadd.f32 %v3900_v40, %v3881_v12  ;;  %v13473_v21 = vld [vmem:[#allocation192_spill] sm:$0xff]  ;;  %v3960_v12 = vpop.f32.mrf.mxu0 }
 0x4c8   :  { %4481 = vmatpush.msra.mxu0 %v13279_v6  ;;  %4294 = vmatpush.msra.mxu1 %v13469_v55  ;;  %v13474_v40 = vld [vmem:[#allocation112_spill] sm:$0xff] }
 0x4c9   :  { %4435 = vmatpush.msra.mxu3 %v13446_v45  ;;  %5118 = vmatmul.msk.f32.vlgmr.msrb.gmra.mxu0 %vm3119_vm6, %v10552_v15 }
 0x4ca   :  { %4515 = vmatpush.msrb.mxu2 %v13369_v28  ;;  %4546 = vmatpush.msrb.mxu0 %v13420_v50 }
 0x4cb   :  { %4295 = vmatpush.msra.mxu1 %v13470_v47  ;;  %4436 = vmatpush.msra.mxu3 %v13447_v53  ;;  %v13475_v47 = vld [vmem:[#allocation156_spill] sm:$0xff]  ;;  %v13476_v53 = vld [vmem:[#allocation198_spill] sm:$0xff] }
 0x4cc   :  { %4516 = vmatpush.msrb.mxu2 %v13377_v17  ;;  %4547 = vmatpush.msrb.mxu0 %v13303_v34 }
 0x4cd   :  { %4296 = vmatpush.msra.mxu1 %v13471_v61  ;;  %4437 = vmatpush.msra.mxu3 %v13450_v4  ;;  %v3920_v1 = vpop.f32.mrf.mxu1  ;;  %v3940_v6 = vpop.f32.mrf.mxu3 }
 0x4ce   :  { %4517 = vmatpush.msrb.mxu2 %v13366_v19  ;;  %4548 = vmatpush.msrb.mxu0 %v13472_v51  ;;  %v3921_v45 = vadd.f32 %v3920_v1, %v3901_v13  ;;  %v13478_v19 = vld [vmem:[#allocation34_spill] sm:$0xff]  ;;  %v13479_v13 = vld [vmem:[#allocation79_spill] sm:$0xff]  ;;  %v13480_v1 = vld [vmem:[#allocation104_spill] sm:$0xff] }
 0x4cf   :  { %4297 = vmatpush.msra.mxu1 %v13473_v21  ;;  %4438 = vmatpush.msra.mxu3 %v12642_v41 }
 0x4d0   :  { %4518 = vmatpush.msrb.mxu2 %v13474_v40  ;;  %4549 = vmatpush.msrb.mxu0 %v13475_v47  ;;  %v3941_v34 = vadd.f32 %v3940_v6, %v3921_v45  ;;  %v13484_v6 = vld [vmem:[#allocation37_spill] sm:$0xff]  ;;  %v13485_v45 = vld [vmem:[#allocation54_spill] sm:$0xff] }
 0x4d1   :  { %4298 = vmatpush.msra.mxu1 %v13476_v53  ;;  %4439 = vmatpush.msra.mxu3 %v6412_v57  ;;  %v13491_v53 = vld [vmem:[#allocation190_spill] sm:$0xff] }
 0x4d2   :  { %4519 = vmatpush.msrb.mxu2 %v13477_v10  ;;  %4550 = vmatpush.msrb.mxu0 %v13478_v19  ;;  %v3961_v56 = vadd.f32 %v3960_v12, %v3941_v34  ;;  %v13486_v34 = vld [vmem:[#allocation221_spill] sm:$0xff]  ;;  %v13487_v12 = vld [vmem:[#allocation36_spill] sm:$0xff]  ;;  %v13492_v57 = vld [vmem:[#allocation42_spill] sm:$0xff] }
 0x4d3   :  { %4299 = vmatpush.msra.mxu1 %v13479_v13  ;;  %4440 = vmatpush.msra.mxu3 %v13480_v1  ;;  %v13489_v19 = vld [vmem:[#allocation209_spill] sm:$0xff]  ;;  %v13493_v1 = vld [vmem:[#allocation208_spill] sm:$0xff]  ;;  %v13535_v10 = vld [vmem:[#allocation38_spill] sm:$0xff] }
 0x4d4   :  { %4520 = vmatpush.msrb.mxu2 %v13481_v20  ;;  %4551 = vmatpush.msrb.mxu0 %v13482_v29  ;;  %4089 = vst [vmem:[#allocation9 + $0x30] sm:$0xff] %v3961_v56  ;;  %v13488_v20 = vld [vmem:[#allocation87_spill] sm:$0xff]  ;;  %v13490_v56 = vld [vmem:[#allocation68_spill] sm:$0xff] }
 0x4d5   :  { %4300 = vmatpush.msra.mxu1 %v13483_v9  ;;  %4441 = vmatpush.msra.mxu3 %v13454_v23 }
 0x4d6   :  { %4521 = vmatpush.msrb.mxu2 %v13484_v6  ;;  %4552 = vmatpush.msrb.mxu0 %v13485_v45 }
 0x4d7   :  { %4362 = vmatmul.f32.vlgmr.msrb.gmra.mxu3 %v10629_v25  ;;  %4422 = vmatmul.f32.vlgmr.msra.gmra.mxu2 %v10595_v30 }
 0x4d8   :  { %4526 = vmatpush.msrb.mxu3 %v13486_v34  ;;  %4606 = vmatpush.msra.mxu2 %v13487_v12  ;;  %v13495_v34 = vld [vmem:[#allocation96_spill] sm:$0xff] }
 0x4d9   :  { %4301 = vmatpush.msra.mxu1 %v13488_v20  ;;  %4553 = vmatpush.msrb.mxu0 %v13489_v19  ;;  %v13497_v19 = vld [vmem:[#allocation163_spill] sm:$0xff]  ;;  %v13498_v20 = vld [vmem:[#allocation97_spill] sm:$0xff] }
 0x4da   :  { %4302 = vmatmul.f32.vlgmr.msra.gmra.mxu1 %v10595_v30  ;;  %4527 = vmatpush.msrb.mxu3 %v13490_v56  ;;  %v13499_v56 = vld [vmem:[#allocation213_spill] sm:$0xff] }
 0x4db   :  { %4386 = vmatpush.msrb.mxu1 %v13491_v53  ;;  %4607 = vmatpush.msra.mxu2 %v13492_v57  ;;  %v13501_v57 = vld [vmem:[#allocation180_spill] sm:$0xff] }
 0x4dc   :  { %4554 = vmatpush.msrb.mxu0 %v13493_v1  ;;  %4528 = vmatpush.msrb.mxu3 %v13457_v37  ;;  %v13502_v1 = vld [vmem:[#allocation90_spill] sm:$0xff]  ;;  %v13503_v37 = vld [vmem:[#allocation21_spill] sm:$0xff] }
 0x4dd   :  { %4387 = vmatpush.msrb.mxu1 %v13494_v3  ;;  %4608 = vmatpush.msra.mxu2 %v13495_v34  ;;  %v13504_v34 = vld [vmem:[#allocation118_spill] sm:$0xff] }
 0x4de   :  { %4555 = vmatpush.msrb.mxu0 %v13496_v35  ;;  %4529 = vmatpush.msrb.mxu3 %v13459_v49  ;;  %v13505_v35 = vld [vmem:[#allocation146_spill] sm:$0xff]  ;;  %v13506_v49 = vld [vmem:[#allocation25_spill] sm:$0xff] }
 0x4df   :  { %4388 = vmatpush.msrb.mxu1 %v13497_v19  ;;  %4609 = vmatpush.msra.mxu2 %v13498_v20  ;;  %v13507_v19 = vld [vmem:[#allocation174_spill] sm:$0xff]  ;;  %v13510_v20 = vld [vmem:[#allocation177_spill] sm:$0xff] }
 0x4e0   :  { %4556 = vmatpush.msrb.mxu0 %v13499_v56  ;;  %4530 = vmatpush.msrb.mxu3 %v13500_v33  ;;  %v13508_v56 = vld [vmem:[#allocation145_spill] sm:$0xff]  ;;  %v13509_v33 = vld [vmem:[#allocation24_spill] sm:$0xff] }
 0x4e1   :  { %4389 = vmatpush.msrb.mxu1 %v13501_v57  ;;  %4610 = vmatpush.msra.mxu2 %v13502_v1  ;;  %v10815_v1 = vld [vmem:[#allocation3 + $0x20] sm:$0xff] }
 0x4e2   :  { %4557 = vmatpush.msrb.mxu0 %v13503_v37  ;;  %4531 = vmatpush.msrb.mxu3 %v13462_v62  ;;  %13511 = vst [vmem:[#allocation183_spill] sm:$0xff] %v10815_v1  ;;  %v13512_v62 = vld [vmem:[#allocation141_spill] sm:$0xff]  ;;  %v13513_v37 = vld [vmem:[#allocation202_spill] sm:$0xff] }
 0x4e3   :  { %4390 = vmatpush.msrb.mxu1 %v13504_v34  ;;  %4611 = vmatpush.msra.mxu2 %v13505_v35  ;;  %v3980_v35 = vpop.f32.mrf.mxu0 }
 0x4e4   :  { %4558 = vmatpush.msrb.mxu0 %v13506_v49  ;;  %4532 = vmatpush.msrb.mxu3 %v13464_v5  ;;  %v13514_v5 = vld [vmem:[#allocation207_spill] sm:$0xff]  ;;  %v13529_v49 = vld [vmem:[#allocation153_spill] sm:$0xff] }
 0x4e5   :  { %4391 = vmatpush.msrb.mxu1 %v13507_v19  ;;  %4612 = vmatpush.msra.mxu2 %v13508_v56  ;;  %v13515_v19 = vld [vmem:[#allocation88_spill] sm:$0xff]  ;;  %v13516_v56 = vld [vmem:[#allocation219_spill] sm:$0xff] }
 0x4e6   :  { %4559 = vmatpush.msrb.mxu0 %v13509_v33  ;;  %4533 = vmatpush.msrb.mxu3 %v13510_v20  ;;  %v13517_v33 = vld [vmem:[#allocation161_spill] sm:$0xff]  ;;  %v3981_v20 = vadd.f32 %v3980_v35, %v10109_v26  ;;  %v13524_v35 = vld [vmem:[#allocation64_spill] sm:$0xff] }
 0x4e7   :  { %4392 = vmatpush.msrb.mxu1 %v10815_v1  ;;  %4613 = vmatpush.msra.mxu2 %v13512_v62  ;;  %v4000_v62 = vpop.f32.mrf.mxu2  ;;  %v13525_v26 = vld [vmem:[#allocation185_spill] sm:$0xff] }
 0x4e8   :  { %4560 = vmatpush.msrb.mxu0 %v13513_v37  ;;  %4534 = vmatpush.msrb.mxu3 %v13467_v60  ;;  %v13518_v60 = vld [vmem:[#allocation176_spill] sm:$0xff]  ;;  %v13519_v37 = vld [vmem:[#allocation195_spill] sm:$0xff] }
 0x4e9   :  { %4393 = vmatpush.msrb.mxu1 %v13514_v5  ;;  %4614 = vmatpush.msra.mxu2 %v13515_v19  ;;  %v13520_v19 = vld [vmem:[#allocation80_spill] sm:$0xff] }
 0x4ea   :  { %4561 = vmatpush.msrb.mxu0 %v13516_v56  ;;  %4535 = vmatpush.msrb.mxu3 %v13469_v55  ;;  %v13521_v56 = vld [vmem:[#allocation172_spill] sm:$0xff]  ;;  %v13522_v55 = vld [vmem:[#allocation181_spill] sm:$0xff] }
 0x4eb   :  { %4394 = vmatpush.msrb.mxu1 %v13517_v33  ;;  %4482 = vmatmul.f32.vlgmr.msra.gmra.mxu0 %v10629_v25  ;;  %v4001_v33 = vadd.f32 %v4000_v62, %v3981_v20  ;;  %v13523_v25 = vld [vmem:[#allocation61_spill] sm:$0xff]  ;;  %v13531_v62 = vld [vmem:[#allocation151_spill] sm:$0xff] }
 0x4ec   :  { %4615 = vmatpush.msra.mxu2 %v13424_v39  ;;  %4646 = vmatpush.msra.mxu0 %v13454_v23  ;;  %v13526_v23 = vld [vmem:[#allocation214_spill] sm:$0xff]  ;;  %v13530_v20 = vld [vmem:[#allocation77_spill] sm:$0xff] }
 0x4ed   :  { %4395 = vmatpush.msrb.mxu1 %v13518_v60  ;;  %4536 = vmatpush.msrb.mxu3 %v13519_v37  ;;  %v13527_v37 = vld [vmem:[#allocation139_spill] sm:$0xff] }
 0x4ee   :  { %4616 = vmatpush.msra.mxu2 %v13520_v19  ;;  %4647 = vmatpush.msra.mxu0 %v13521_v56  ;;  %v13528_v56 = vld [vmem:[#allocation169_spill] sm:$0xff] }
 0x4ef   :  { %4396 = vmatpush.msrb.mxu1 %v13522_v55  ;;  %4537 = vmatpush.msrb.mxu3 %v13471_v61 }
 0x4f0   :  { %4617 = vmatpush.msra.mxu2 %v13523_v25  ;;  %4648 = vmatpush.msra.mxu0 %v13524_v35  ;;  %v4060_v25 = vpop.f32.mrf.mxu0  ;;  %v13532_v35 = vld [vmem:[#allocation108_spill] sm:$0xff] }
 0x4f1   :  { %4397 = vmatpush.msrb.mxu1 %v13525_v26  ;;  %4522 = vmatmul.f32.vlgmr.msrb.gmra.mxu2 %v13526_v23  ;;  %v4040_v39 = vpop.f32.mrf.mxu3  ;;  %v13533_v26 = vld [vmem:[#allocation103_spill] sm:$0xff] }
 0x4f2   :  { %4538 = vmatpush.msrb.mxu3 %v13473_v21  ;;  %4618 = vmatpush.msra.mxu2 %v13527_v37  ;;  %v13534_v21 = vld [vmem:[#allocation69_spill] sm:$0xff]  ;;  %v4080_v37 = vpop.f32.mrf.mxu2 }
 0x4f3   :  { %v4020_v19 = vpop.f32.mrf.mxu1  ;;  %4649 = vmatpush.msra.mxu0 %v13528_v56  ;;  %4398 = vmatpush.msrb.mxu1 %v13529_v49  ;;  %v13536_v56 = vld [vmem:[#allocation101_spill] sm:$0xff] }
 0x4f4   :  { %v4021_v61 = vadd.f32 %v4020_v19, %v4001_v33  ;;  %4539 = vmatpush.msrb.mxu3 %v13530_v20  ;;  %4619 = vmatpush.msra.mxu2 %v13531_v62  ;;  %v13537_v19 = vld [vmem:[#allocation40_spill] sm:$0xff] }
 0x4f5   :  { %4650 = vmatpush.msra.mxu0 %v13532_v35  ;;  %4399 = vmatpush.msrb.mxu1 %v13533_v26 }
 0x4f6   :  { %v4041_v45 = vadd.f32 %v4040_v39, %v4021_v61  ;;  %4540 = vmatpush.msrb.mxu3 %v13479_v13  ;;  %4620 = vmatpush.msra.mxu2 %v13534_v21  ;;  %v13538_v39 = vld [vmem:[#allocation167_spill] sm:$0xff]  ;;  %v13539_v61 = vld [vmem:[#allocation201_spill] sm:$0xff]  ;;  %v13589_v13 = vld [vmem:[#allocation216_spill] sm:$0xff] }
 0x4f7   :  { %4651 = vmatpush.msra.mxu0 %v13535_v10  ;;  %4400 = vmatpush.msrb.mxu1 %v13536_v56  ;;  %v13540_v56 = vld [vmem:[#allocation150_spill] sm:$0xff] }
 0x4f8   :  { %v4061_v33 = vadd.f32 %v4060_v25, %v4041_v45  ;;  %4541 = vmatpush.msrb.mxu3 %v13483_v9  ;;  %4621 = vmatpush.msra.mxu2 %v13441_v59  ;;  %v13541_v25 = vld [vmem:[#allocation66_spill] sm:$0xff]  ;;  %v13542_v45 = vld [vmem:[#allocation43_spill] sm:$0xff] }
 0x4f9   :  { %4652 = vmatpush.msra.mxu0 %v13537_v19  ;;  %4442 = vmatmul.f32.vlgmr.msra.gmra.mxu3 %v10702_v38  ;;  %v13545_v19 = vld [vmem:[#allocation99_spill] sm:$0xff]  ;;  %v13547_v9 = vld [vmem:[#allocation98_spill] sm:$0xff] }
 0x4fa   :  { %v4081_v62 = vadd.f32 %v4080_v37, %v4061_v33  ;;  %4626 = vmatpush.msra.mxu3 %v13538_v39  ;;  %4701 = vmatpush.msrb.mxu2 %v13539_v61  ;;  %v13543_v37 = vld [vmem:[#allocation35_spill] sm:$0xff] }
 0x4fb   :  { %4401 = vmatpush.msrb.mxu1 %v13487_v12  ;;  %4622 = vmatmul.f32.vlgmr.msra.gmra.mxu2 %v10474_v24  ;;  %v13544_v33 = vld [vmem:[#allocation179_spill] sm:$0xff] }
 0x4fc   :  { %4090 = vst [vmem:[#allocation9 + $0x38] sm:$0xff] %v4081_v62  ;;  %4653 = vmatpush.msra.mxu0 %v13540_v56  ;;  %4706 = vmatpush.msra.mxu2 %v13541_v25  ;;  %v13546_v62 = vld [vmem:[#allocation197_spill] sm:$0xff]  ;;  %v13553_v39 = vld [vmem:[#allocation143_spill] sm:$0xff] }
 0x4fd   :  { %4402 = vmatmul.f32.vlgmr.msrb.gmra.mxu1 %v13526_v23  ;;  %4627 = vmatpush.msra.mxu3 %v13491_v53  ;;  %v13551_v53 = vld [vmem:[#allocation149_spill] sm:$0xff]  ;;  %5084 = dma.vmem_to_hbm [thread:$0]  %s5080_s21, 1024, %s5082_s24, [#allocation5]  }
 0x4fe   :  { %4486 = vmatpush.msra.mxu1 %v13542_v45  ;;  %4654 = vmatpush.msra.mxu0 %v13442_v44 }
 0x4ff   :  { %4707 = vmatpush.msra.mxu2 %v13176_v58  ;;  %4628 = vmatpush.msra.mxu3 %v13494_v3  ;;  %v13548_v3 = vld [vmem:[#allocation53_spill] sm:$0xff] }
 0x500   :  { %4487 = vmatpush.msra.mxu1 %v13543_v37  ;;  %4655 = vmatpush.msra.mxu0 %v13350_v27  ;;  %v13549_v27 = vld [vmem:[#allocation91_spill] sm:$0xff] }
 0x501   :  { %4708 = vmatpush.msra.mxu2 %v13450_v4  ;;  %4629 = vmatpush.msra.mxu3 %v13544_v33  ;;  %v10883_v33 = vld [vmem:[#allocation3 + $0x30] sm:$0xff] }
 0x502   :  { %4488 = vmatpush.msra.mxu1 %v13545_v19  ;;  %4656 = vmatpush.msra.mxu0 %v13546_v62  ;;  %13550 = vst [vmem:[#allocation193_spill] sm:$0xff] %v10883_v33 }
 0x503   :  { %4709 = vmatpush.msra.mxu2 %v12642_v41  ;;  %4630 = vmatpush.msra.mxu3 %v13501_v57  ;;  %v13552_v57 = vld [vmem:[#allocation86_spill] sm:$0xff] }
 0x504   :  { %4489 = vmatpush.msra.mxu1 %v13547_v9  ;;  %4657 = vmatpush.msra.mxu0 %v13449_v22 }
 0x505   :  { %4710 = vmatpush.msra.mxu2 %v13548_v3  ;;  %4631 = vmatpush.msra.mxu3 %v13504_v34  ;;  %v13554_v34 = vld [vmem:[#allocation130_spill] sm:$0xff] }
 0x506   :  { %4490 = vmatpush.msra.mxu1 %v13549_v27  ;;  %4658 = vmatpush.msra.mxu0 %v13355_v52  ;;  %v13555_v52 = vld [vmem:[#allocation144_spill] sm:$0xff]  ;;  %v13556_v27 = vld [vmem:[#allocation85_spill] sm:$0xff] }
 0x507   :  { %4711 = vmatpush.msra.mxu2 %v13453_v11  ;;  %4632 = vmatpush.msra.mxu3 %v10883_v33  ;;  %v13559_v33 = vld [vmem:[#allocation81_spill] sm:$0xff] }
 0x508   :  { %4491 = vmatpush.msra.mxu1 %v13551_v53  ;;  %4659 = vmatpush.msra.mxu0 %v13552_v57 }
 0x509   :  { %4712 = vmatpush.msra.mxu2 %v13253_v31  ;;  %4633 = vmatpush.msra.mxu3 %v10815_v1  ;;  %v13557_v31 = vld [vmem:[#allocation94_spill] sm:$0xff]  ;;  %v13558_v1 = vld [vmem:[#allocation168_spill] sm:$0xff] }
 0x50a   :  { %4492 = vmatpush.msra.mxu1 %v13553_v39  ;;  %4660 = vmatpush.msra.mxu0 %v13351_v7 }
 0x50b   :  { %4713 = vmatpush.msra.mxu2 %v13554_v34  ;;  %4634 = vmatpush.msra.mxu3 %v13514_v5  ;;  %v13560_v5 = vld [vmem:[#allocation49_spill] sm:$0xff] }
 0x50c   :  { %4493 = vmatpush.msra.mxu1 %v13555_v52  ;;  %4661 = vmatpush.msra.mxu0 %v13360_v32  ;;  %v13561_v32 = vld [vmem:[#allocation82_spill] sm:$0xff]  ;;  %v13562_v52 = vld [vmem:[#allocation140_spill] sm:$0xff] }
 0x50d   :  { %4714 = vmatpush.msra.mxu2 %v13455_v46  ;;  %4562 = vmatmul.f32.vlgmr.msrb.gmra.mxu0 %v10702_v38 }
 0x50e   :  { %4494 = vmatpush.msra.mxu1 %v13556_v27  ;;  %4635 = vmatpush.msra.mxu3 %v13557_v31  ;;  %v13563_v31 = vld [vmem:[#allocation110_spill] sm:$0xff] }
 0x50f   :  { %4746 = vmatpush.msrb.mxu0 %v13558_v1  ;;  %4715 = vmatpush.msra.mxu2 %v13259_v48  ;;  %v13564_v48 = vld [vmem:[#allocation26_spill] sm:$0xff] }
 0x510   :  { %4495 = vmatpush.msra.mxu1 %v13559_v33  ;;  %4636 = vmatpush.msra.mxu3 %v13518_v60  ;;  %v13565_v60 = vld [vmem:[#allocation138_spill] sm:$0xff] }
 0x511   :  { %4747 = vmatpush.msrb.mxu0 %v13356_v2  ;;  %4716 = vmatpush.msra.mxu2 %v13560_v5 }
 0x512   :  { %4496 = vmatpush.msra.mxu1 %v13561_v32  ;;  %4637 = vmatpush.msra.mxu3 %v13522_v55  ;;  %v13566_v32 = vld [vmem:[#allocation119_spill] sm:$0xff] }
 0x513   :  { %4748 = vmatpush.msrb.mxu0 %v13365_v42  ;;  %4717 = vmatpush.msra.mxu2 %v13460_v14  ;;  %v13567_v55 = vld [vmem:[#allocation135_spill] sm:$0xff] }
 0x514   :  { %4497 = vmatpush.msra.mxu1 %v13562_v52  ;;  %4638 = vmatpush.msra.mxu3 %v13563_v31  ;;  %v13568_v42 = vld [vmem:[#allocation71_spill] sm:$0xff] }
 0x515   :  { %4749 = vmatpush.msrb.mxu0 %v13564_v48  ;;  %4718 = vmatpush.msra.mxu2 %v13265_v54  ;;  %v13569_v31 = vld [vmem:[#allocation31_spill] sm:$0xff]  ;;  %v13570_v54 = vld [vmem:[#allocation16_spill] sm:$0xff] }
 0x516   :  { %4498 = vmatpush.msra.mxu1 %v13565_v60  ;;  %4639 = vmatpush.msra.mxu3 %v13529_v49 }
 0x517   :  { %4750 = vmatpush.msrb.mxu0 %v13361_v43  ;;  %4719 = vmatpush.msra.mxu2 %v13566_v32 }
 0x518   :  { %4499 = vmatpush.msra.mxu1 %v13567_v55  ;;  %4640 = vmatpush.msra.mxu3 %v13533_v26  ;;  %v13573_v26 = vld [vmem:[#allocation102_spill] sm:$0xff]  ;;  %v4123_v55 = vpop.f32.mrf.mxu1 }
 0x519   :  { %4751 = vmatpush.msrb.mxu0 %v13368_v18  ;;  %4720 = vmatpush.msra.mxu2 %v13465_v8  ;;  %v13571_v18 = vld [vmem:[#allocation105_spill] sm:$0xff] }
 0x51a   :  { %4500 = vmatpush.msra.mxu1 %v13568_v42  ;;  %4641 = vmatpush.msra.mxu3 %v13569_v31 }
 0x51b   :  { %4752 = vmatpush.msrb.mxu0 %v13570_v54  ;;  %4542 = vmatmul.f32.vlgmr.msrb.gmra.mxu3 %v10595_v30  ;;  %v10943_v54 = vpop.permute.xlu2 %4100 }
 0x51c   :  { %4721 = vmatpush.msra.mxu2 %v13270_v0  ;;  %4726 = vmatpush.msrb.mxu3 %v13484_v6  ;;  %v13572_v0 = vld [vmem:[#allocation92_spill] sm:$0xff]  ;;  %v13581_v6 = vld [vmem:[#allocation211_spill] sm:$0xff] }
 0x51d   :  { %4501 = vmatpush.msra.mxu1 %v13541_v25  ;;  %5120 = vmatmul.msk.f32.vlgmr.msrb.gmra.mxu2 %vm3119_vm6, %v10552_v15  ;;  %v13574_v25 = vld [vmem:[#allocation18_spill] sm:$0xff] }
 0x51e   :  { %4753 = vmatpush.msrb.mxu0 %v10527_v63  ;;  %4786 = vmatpush.msrb.mxu2 %v13571_v18  ;;  %v13575_v63 = vld [vmem:[#allocation115_spill] sm:$0xff] }
 0x51f   :  { %4581 = vmatpush.msrb.mxu1 %v13571_v18  ;;  %4727 = vmatpush.msrb.mxu3 %v13542_v45  ;;  %v13578_v45 = vld [vmem:[#allocation147_spill] sm:$0xff] }
 0x520   :  { %4502 = vmatmul.f32.vlgmr.msra.gmra.mxu1 %v10474_v24  ;;  %4754 = vmatpush.msrb.mxu0 %v10554_v16  ;;  %v13576_v16 = vld [vmem:[#allocation20_spill] sm:$0xff]  ;;  %v13577_v24 = vld [vmem:[#allocation27_spill] sm:$0xff] }
 0x521   :  { %4586 = vmatpush.msra.mxu1 %v13444_v36  ;;  %4787 = vmatpush.msrb.mxu2 %v13420_v50  ;;  %v4124_v36 = vadd.f32 %v4123_v55, %v10943_v54  ;;  %v4143_v50 = vpop.f32.mrf.mxu2  ;;  %v13583_v55 = vld [vmem:[#allocation72_spill] sm:$0xff] }
 0x522   :  { %4728 = vmatpush.msrb.mxu3 %v13572_v0  ;;  %4755 = vmatpush.msrb.mxu0 %v13573_v26  ;;  %v13580_v0 = vld [vmem:[#allocation111_spill] sm:$0xff] }
 0x523   :  { %4587 = vmatpush.msra.mxu1 %v13574_v25  ;;  %4788 = vmatpush.msrb.mxu2 %v13575_v63 }
 0x524   :  { %4729 = vmatpush.msrb.mxu3 %v13545_v19  ;;  %4756 = vmatpush.msrb.mxu0 %v13369_v28  ;;  %v13579_v19 = vld [vmem:[#allocation74_spill] sm:$0xff] }
 0x525   :  { %4588 = vmatpush.msra.mxu1 %v13576_v16  ;;  %4789 = vmatpush.msrb.mxu2 %v13472_v51 }
 0x526   :  { %4730 = vmatpush.msrb.mxu3 %v13547_v9  ;;  %4757 = vmatpush.msrb.mxu0 %v13377_v17  ;;  %v4144_v17 = vadd.f32 %v4143_v50, %v4124_v36  ;;  %v13582_v9 = vld [vmem:[#allocation59_spill] sm:$0xff]  ;;  %v4183_v50 = vpop.f32.mrf.mxu0 }
 0x527   :  { %4589 = vmatpush.msra.mxu1 %v13577_v24  ;;  %4790 = vmatpush.msrb.mxu2 %v13475_v47  ;;  %v4163_v47 = vpop.f32.mrf.mxu3  ;;  %v13585_v24 = vld [vmem:[#allocation54_spill] sm:$0xff]  ;;  %v13588_v36 = vld [vmem:[#allocation39_spill] sm:$0xff] }
 0x528   :  { %4731 = vmatpush.msrb.mxu3 %v13578_v45  ;;  %5119 = vmatmul.msk.f32.vlgmr.msrb.gmra.mxu1 %vm3119_vm6, %v10552_v15  ;;  %v13584_v15 = vld [vmem:[#allocation109_spill] sm:$0xff]  ;;  %v4164_v49 = vadd.f32 %v4163_v47, %v4144_v17  ;;  %v13593_v47 = vld [vmem:[#allocation63_spill] sm:$0xff] }
 0x529   :  { %4590 = vmatpush.msra.mxu1 %v13579_v19  ;;  %4758 = vmatpush.msrb.mxu0 %v13580_v0  ;;  %v13586_v45 = vld [vmem:[#allocation89_spill] sm:$0xff] }
 0x52a   :  { %4791 = vmatpush.msrb.mxu2 %v13581_v6  ;;  %4732 = vmatpush.msrb.mxu3 %v13551_v53  ;;  %v13587_v53 = vld [vmem:[#allocation129_spill] sm:$0xff] }
 0x52b   :  { %4591 = vmatpush.msra.mxu1 %v13582_v9  ;;  %4759 = vmatpush.msrb.mxu0 %v13474_v40  ;;  %v13592_v17 = vld [vmem:[#allocation125_spill] sm:$0xff] }
 0x52c   :  { %4792 = vmatpush.msrb.mxu2 %v13482_v29  ;;  %4733 = vmatpush.msrb.mxu3 %v13553_v39  ;;  %v13590_v39 = vld [vmem:[#allocation123_spill] sm:$0xff] }
 0x52d   :  { %4592 = vmatpush.msra.mxu1 %v13583_v55  ;;  %4760 = vmatpush.msrb.mxu0 %v13584_v15  ;;  %v13591_v55 = vld [vmem:[#allocation208_spill] sm:$0xff]  ;;  %v4184_v15 = vadd.f32 %v4183_v50, %v4164_v49  ;;  %v13600_v50 = vld [vmem:[#allocation21_spill] sm:$0xff] }
 0x52e   :  { %4793 = vmatpush.msrb.mxu2 %v13585_v24  ;;  %4734 = vmatpush.msrb.mxu3 %v13586_v45  ;;  %v13594_v45 = vld [vmem:[#allocation136_spill] sm:$0xff] }
 0x52f   :  { %4593 = vmatpush.msra.mxu1 %v13587_v53  ;;  %4761 = vmatpush.msrb.mxu0 %v13588_v36  ;;  %v13597_v36 = vld [vmem:[#allocation19_spill] sm:$0xff]  ;;  %v13598_v49 = vld [vmem:[#allocation96_spill] sm:$0xff] }
 0x530   :  { %4794 = vmatpush.msrb.mxu2 %v13589_v13  ;;  %4662 = vmatmul.f32.vlgmr.msra.gmra.mxu0 %v10595_v30  ;;  %v13595_v30 = vld [vmem:[#allocation93_spill] sm:$0xff] }
 0x531   :  { %4735 = vmatpush.msrb.mxu3 %v13556_v27  ;;  %4846 = vmatpush.msra.mxu0 %v13569_v31  ;;  %v13596_v31 = vld [vmem:[#allocation48_spill] sm:$0xff]  ;;  %v13626_v13 = vld [vmem:[#allocation73_spill] sm:$0xff] }
 0x532   :  { %4594 = vmatpush.msra.mxu1 %v13590_v39  ;;  %4795 = vmatpush.msrb.mxu2 %v13591_v55  ;;  %v4223_v55 = vpop.f32.mrf.mxu2 }
 0x533   :  { %4736 = vmatpush.msrb.mxu3 %v13559_v33  ;;  %4847 = vmatpush.msra.mxu0 %v13487_v12  ;;  %v13599_v33 = vld [vmem:[#allocation50_spill] sm:$0xff] }
 0x534   :  { %4595 = vmatpush.msra.mxu1 %v13592_v17  ;;  %4796 = vmatpush.msrb.mxu2 %v13593_v47  ;;  %v4203_v24 = vpop.f32.mrf.mxu1  ;;  %v13601_v17 = vld [vmem:[#allocation97_spill] sm:$0xff] }
 0x535   :  { %4737 = vmatpush.msrb.mxu3 %v13594_v45  ;;  %4848 = vmatpush.msra.mxu0 %v13595_v30  ;;  %v4204_v27 = vadd.f32 %v4203_v24, %v4184_v15  ;;  %v13602_v15 = vld [vmem:[#allocation46_spill] sm:$0xff]  ;;  %v13603_v47 = vld [vmem:[#allocation25_spill] sm:$0xff] }
 0x536   :  { %4596 = vmatpush.msra.mxu1 %v13596_v31  ;;  %4797 = vmatpush.msrb.mxu2 %v13597_v36  ;;  %v13604_v24 = vld [vmem:[#allocation142_spill] sm:$0xff]  ;;  %v13617_v45 = vld [vmem:[#allocation165_spill] sm:$0xff] }
 0x537   :  { %4642 = vmatmul.f32.vlgmr.msra.gmra.mxu3 %v13526_v23  ;;  %4849 = vmatpush.msra.mxu0 %v13598_v49  ;;  %v4224_v12 = vadd.f32 %v4223_v55, %v4204_v27  ;;  %v13605_v30 = vld [vmem:[#allocation70_spill] sm:$0xff] }
 0x538   :  { %4738 = vmatpush.msrb.mxu3 %v13562_v52  ;;  %4597 = vmatpush.msra.mxu1 %v13599_v33  ;;  %v13606_v27 = vld [vmem:[#allocation134_spill] sm:$0xff]  ;;  %v13616_v52 = vld [vmem:[#allocation23_spill] sm:$0xff] }
 0x539   :  { %4798 = vmatpush.msrb.mxu2 %v13600_v50  ;;  %4850 = vmatpush.msra.mxu0 %v13601_v17  ;;  %5066 = vst [vmem:[#allocation10] sm:$0xff] %v4224_v12  ;;  %v13607_v55 = vld [vmem:[#allocation222_spill] sm:$0xff] }
 0x53a   :  { %4739 = vmatpush.msrb.mxu3 %v13565_v60  ;;  %4598 = vmatpush.msra.mxu1 %v13602_v15  ;;  %v13608_v49 = vld [vmem:[#allocation146_spill] sm:$0xff]  ;;  %v13611_v60 = vld [vmem:[#allocation204_spill] sm:$0xff]  ;;  %v13612_v15 = vld [vmem:[#allocation157_spill] sm:$0xff] }
 0x53b   :  { %4799 = vmatpush.msrb.mxu2 %v13603_v47  ;;  %4851 = vmatpush.msra.mxu0 %v13604_v24  ;;  %v13609_v17 = vld [vmem:[#allocation122_spill] sm:$0xff]  ;;  %v11004_v47 = vld [vmem:[#allocation8 + $0x8] sm:$0xff]  ;;  %v13613_v24 = vld [vmem:[#allocation145_spill] sm:$0xff] }
 0x53c   :  { %4740 = vmatpush.msrb.mxu3 %v13605_v30  ;;  %4599 = vmatpush.msra.mxu1 %v13606_v27  ;;  %v13610_v12 = vld [vmem:[#allocation202_spill] sm:$0xff]  ;;  %v13614_v30 = vld [vmem:[#allocation104_spill] sm:$0xff] }
 0x53d   :  { %4800 = vmatpush.msrb.mxu2 %v13607_v55  ;;  %4852 = vmatpush.msra.mxu0 %v13608_v49  ;;  %v13615_v49 = vld [vmem:[#allocation132_spill] sm:$0xff]  ;;  %v13618_v55 = vld [vmem:[#allocation83_spill] sm:$0xff]  ;;  %v13619_v50 = vld [vmem:[#allocation170_spill] sm:$0xff] }
 0x53e   :  { %4741 = vmatpush.msrb.mxu3 %v13568_v42  ;;  %4600 = vmatpush.msra.mxu1 %v13609_v17  ;;  %v13620_v36 = vld [vmem:[#allocation158_spill] sm:$0xff] }
 0x53f   :  { %4801 = vmatpush.msrb.mxu2 %v13610_v12  ;;  %4742 = vmatmul.f32.vlgmr.msrb.gmra.mxu3 %v11004_v47 }
 0x540   :  { %4821 = vmatpush.msra.mxu3 %v13611_v60  ;;  %4722 = vmatmul.f32.vlgmr.msra.gmra.mxu2 %v13612_v15 }
 0x541   :  { %4853 = vmatpush.msra.mxu0 %v13613_v24  ;;  %4886 = vmatpush.msra.mxu2 %v13614_v30  ;;  %v13622_v24 = vld [vmem:[#allocation172_spill] sm:$0xff] }
 0x542   :  { %4826 = vmatpush.msrb.mxu3 %v13441_v59  ;;  %4601 = vmatpush.msra.mxu1 %v13615_v49  ;;  %v13621_v59 = vld [vmem:[#allocation88_spill] sm:$0xff]  ;;  %v13623_v49 = vld [vmem:[#allocation30_spill] sm:$0xff] }
 0x543   :  { %4602 = vmatmul.f32.vlgmr.msra.gmra.mxu1 %v13612_v15  ;;  %4854 = vmatpush.msra.mxu0 %v13618_v55  ;;  %v13624_v15 = vld [vmem:[#allocation84_spill] sm:$0xff]  ;;  %v13627_v55 = vld [vmem:[#allocation159_spill] sm:$0xff] }
 0x544   :  { %4827 = vmatpush.msrb.mxu3 %v13616_v52  ;;  %4666 = vmatpush.msrb.mxu1 %v13617_v45  ;;  %v13625_v52 = vld [vmem:[#allocation64_spill] sm:$0xff] }
 0x545   :  { %4887 = vmatpush.msra.mxu2 %v13619_v50  ;;  %4855 = vmatpush.msra.mxu0 %v13621_v59  ;;  %v13628_v50 = vld [vmem:[#allocation154_spill] sm:$0xff] }
 0x546   :  { %4828 = vmatpush.msrb.mxu3 %v13574_v25  ;;  %4667 = vmatpush.msrb.mxu1 %v13620_v36  ;;  %v4243_v25 = vpop.f32.mrf.mxu2  ;;  %v13629_v36 = vld [vmem:[#allocation113_spill] sm:$0xff]  ;;  %v13630_v59 = vld [vmem:[#allocation114_spill] sm:$0xff] }
 0x547   :  { %4888 = vmatpush.msra.mxu2 %v13622_v24  ;;  %4856 = vmatpush.msra.mxu0 %v13624_v15  ;;  %v4244_v24 = vadd.f32 %v4243_v25, %v10943_v54  ;;  %v4263_v15 = vpop.f32.mrf.mxu3  ;;  %v4283_v25 = vpop.f32.mrf.mxu0 }
 0x548   :  { %4829 = vmatpush.msrb.mxu3 %v13576_v16  ;;  %4668 = vmatpush.msrb.mxu1 %v13623_v49  ;;  %v13631_v16 = vld [vmem:[#allocation61_spill] sm:$0xff] }
 0x549   :  { %4889 = vmatpush.msra.mxu2 %v13625_v52  ;;  %4857 = vmatpush.msra.mxu0 %v13628_v50  ;;  %v13633_v52 = vld [vmem:[#allocation139_spill] sm:$0xff]  ;;  %v13635_v50 = vld [vmem:[#allocation128_spill] sm:$0xff] }
 0x54a   :  { %4830 = vmatpush.msrb.mxu3 %v13626_v13  ;;  %4669 = vmatpush.msrb.mxu1 %v13627_v55  ;;  %v13632_v13 = vld [vmem:[#allocation210_spill] sm:$0xff] }
 0x54b   :  { %4890 = vmatpush.msra.mxu2 %v13629_v36  ;;  %4762 = vmatmul.f32.vlgmr.msrb.gmra.mxu0 %v13526_v23  ;;  %v13634_v23 = vld [vmem:[#allocation152_spill] sm:$0xff]  ;;  %v13637_v36 = vld [vmem:[#allocation186_spill] sm:$0xff] }
 0x54c   :  { %4670 = vmatpush.msrb.mxu1 %v13630_v59  ;;  %4831 = vmatpush.msrb.mxu3 %v13579_v19  ;;  %v13636_v19 = vld [vmem:[#allocation155_spill] sm:$0xff]  ;;  %v13638_v59 = vld [vmem:[#allocation205_spill] sm:$0xff] }
 0x54d   :  { %4858 = vmatpush.msra.mxu0 %v13631_v16  ;;  %4891 = vmatpush.msra.mxu2 %v13532_v35  ;;  %v4264_v35 = vadd.f32 %v4263_v15, %v4244_v24  ;;  %v13641_v24 = vld [vmem:[#allocation199_spill] sm:$0xff] }
 0x54e   :  { %4671 = vmatpush.msrb.mxu1 %v13632_v13  ;;  %4832 = vmatpush.msrb.mxu3 %v13582_v9  ;;  %v13639_v9 = vld [vmem:[#allocation200_spill] sm:$0xff]  ;;  %v4323_v15 = vpop.f32.mrf.mxu2 }
 0x54f   :  { %4859 = vmatpush.msra.mxu0 %v13633_v52  ;;  %4892 = vmatpush.msra.mxu2 %v13535_v10  ;;  %v13640_v10 = vld [vmem:[#allocation217_spill] sm:$0xff]  ;;  %v4284_v16 = vadd.f32 %v4283_v25, %v4264_v35  ;;  %v13644_v52 = vld [vmem:[#allocation22_spill] sm:$0xff]  ;;  %v4383_v35 = vpop.f32.mrf.mxu0 }
 0x550   :  { %4672 = vmatpush.msrb.mxu1 %v13634_v23  ;;  %4833 = vmatpush.msrb.mxu3 %v13635_v50  ;;  %v13668_v25 = vld [vmem:[#allocation226_spill] sm:$0xff] }
 0x551   :  { %4860 = vmatpush.msra.mxu0 %v13636_v19  ;;  %4893 = vmatpush.msra.mxu2 %v13637_v36  ;;  %v13645_v19 = vld [vmem:[#allocation212_spill] sm:$0xff]  ;;  %v13646_v36 = vld [vmem:[#allocation133_spill] sm:$0xff] }
 0x552   :  { %4673 = vmatpush.msrb.mxu1 %v13638_v59  ;;  %4834 = vmatpush.msrb.mxu3 %v13587_v53  ;;  %v13642_v53 = vld [vmem:[#allocation44_spill] sm:$0xff] }
 0x553   :  { %4861 = vmatpush.msra.mxu0 %v13534_v21  ;;  %4894 = vmatpush.msra.mxu2 %v13540_v56  ;;  %v13643_v56 = vld [vmem:[#allocation194_spill] sm:$0xff]  ;;  %v13667_v59 = vld [vmem:[#allocation148_spill] sm:$0xff] }
 0x554   :  { %4674 = vmatpush.msrb.mxu1 %v13640_v10  ;;  %4835 = vmatpush.msrb.mxu3 %v13590_v39 }
 0x555   :  { %4941 = vmatpush.msrb.mxu0 %v13639_v9  ;;  %4895 = vmatpush.msra.mxu2 %v13442_v44 }
 0x556   :  { %4862 = vmatmul.f32.vlgmr.msra.gmra.mxu0 %v11004_v47  ;;  %4675 = vmatpush.msrb.mxu1 %v13641_v24 }
 0x557   :  { %4946 = vmatpush.msra.mxu0 %v13568_v42  ;;  %4836 = vmatpush.msrb.mxu3 %v13642_v53  ;;  %v4303_v21 = vpop.f32.mrf.mxu1  ;;  %v4343_v42 = vpop.f32.mrf.mxu3  ;;  %v13670_v53 = vld [vmem:[#allocation34_spill] sm:$0xff] }
 0x558   :  { %4896 = vmatpush.msra.mxu2 %v13643_v56  ;;  %v4304_v50 = vadd.f32 %v4303_v21, %v4284_v16  ;;  %4676 = vmatpush.msrb.mxu1 %v13645_v19  ;;  %v13671_v21 = vld [vmem:[#allocation195_spill] sm:$0xff]  ;;  %v13680_v19 = vld [vmem:[#allocation213_spill] sm:$0xff] }
 0x559   :  { %4947 = vmatpush.msra.mxu0 %v13644_v52  ;;  %4837 = vmatpush.msrb.mxu3 %v13596_v31  ;;  %v13647_v31 = vld [vmem:[#allocation75_spill] sm:$0xff] }
 0x55a   :  { %4897 = vmatpush.msra.mxu2 %v13546_v62  ;;  %v4324_v44 = vadd.f32 %v4323_v15, %v4304_v50  ;;  %4677 = vmatpush.msrb.mxu1 %v13176_v58  ;;  %v13648_v62 = vld [vmem:[#allocation52_spill] sm:$0xff]  ;;  %v4423_v9 = vpop.f32.mrf.mxu2  ;;  %v13673_v15 = vld [vmem:[#allocation227_spill] sm:$0xff]  ;;  %v13676_v50 = vld [vmem:[#allocation209_spill] sm:$0xff] }
 0x55b   :  { %4948 = vmatpush.msra.mxu0 %v13176_v58  ;;  %4838 = vmatpush.msrb.mxu3 %v13599_v33  ;;  %v11077_v33 = vld [vmem:[#allocation8 + $0x28] sm:$0xff] }
 0x55c   :  { %4898 = vmatpush.msra.mxu2 %v13449_v22  ;;  %v4344_v39 = vadd.f32 %v4343_v42, %v4324_v44  ;;  %4678 = vmatpush.msrb.mxu1 %v13450_v4  ;;  %v13649_v22 = vld [vmem:[#allocation162_spill] sm:$0xff]  ;;  %v13686_v42 = vld [vmem:[#allocation32_spill] sm:$0xff] }
 0x55d   :  { %4949 = vmatpush.msra.mxu0 %v13450_v4  ;;  %4839 = vmatpush.msrb.mxu3 %v13646_v36  ;;  %v13683_v44 = vld [vmem:[#allocation190_spill] sm:$0xff]  ;;  %v6121_v36 = vld [vmem:[#allocation8 + $0x10] sm:$0xff] }
 0x55e   :  { %4899 = vmatpush.msra.mxu2 %v13647_v31  ;;  %5067 = vst [vmem:[#allocation10 + $0x8] sm:$0xff] %v4344_v39  ;;  %4679 = vmatpush.msrb.mxu1 %v12642_v41  ;;  %v13650_v41 = vld [vmem:[#allocation164_spill] sm:$0xff]  ;;  %v13688_v31 = vld [vmem:[#allocation179_spill] sm:$0xff] }
 0x55f   :  { %4950 = vmatpush.msra.mxu0 %v13648_v62  ;;  %4840 = vmatpush.msrb.mxu3 %v13606_v27  ;;  %v6116_v27 = vld [vmem:[#allocation3 + $0x8] sm:$0xff]  ;;  %v13687_v39 = vld [vmem:[#allocation24_spill] sm:$0xff]  ;;  %v13689_v62 = vld [vmem:[#allocation19_spill] sm:$0xff] }
 0x560   :  { %4900 = vmatpush.msra.mxu2 %v13552_v57  ;;  %4680 = vmatpush.msrb.mxu1 %v13649_v22  ;;  %v13651_v57 = vld [vmem:[#allocation127_spill] sm:$0xff] }
 0x561   :  { %4951 = vmatpush.msra.mxu0 %v13548_v3  ;;  %4841 = vmatpush.msrb.mxu3 %v13609_v17  ;;  %v13654_v3 = vld [vmem:[#allocation173_spill] sm:$0xff]  ;;  %v4363_v17 = vpop.f32.mrf.mxu3 }
 0x562   :  { %4901 = vmatpush.msra.mxu2 %v13351_v7  ;;  %5121 = vmatmul.msk.f32.vlgmr.msra.gmra.mxu3 %vm3119_vm6, %v11077_v33  ;;  %v13652_v7 = vld [vmem:[#allocation219_spill] sm:$0xff] }
 0x563   :  { %4952 = vmatpush.msra.mxu0 %v13453_v11  ;;  %4802 = vmatmul.f32.vlgmr.msrb.gmra.mxu2 %v10702_v38  ;;  %v13653_v11 = vld [vmem:[#allocation107_spill] sm:$0xff] }
 0x564   :  { %4906 = vmatpush.msra.mxu3 %v13539_v61  ;;  %4986 = vmatpush.msrb.mxu2 %v13650_v41  ;;  %v13655_v61 = vld [vmem:[#allocation68_spill] sm:$0xff]  ;;  %v13691_v41 = vld [vmem:[#allocation21_spill] sm:$0xff] }
 0x565   :  { %4681 = vmatpush.msrb.mxu1 %v13614_v30  ;;  %4953 = vmatpush.msra.mxu0 %v13651_v57  ;;  %v13656_v30 = vld [vmem:[#allocation175_spill] sm:$0xff]  ;;  %v13692_v57 = vld [vmem:[#allocation188_spill] sm:$0xff] }
 0x566   :  { %4682 = vmatmul.f32.vlgmr.msrb.gmra.mxu1 %v10702_v38  ;;  %4907 = vmatpush.msra.mxu3 %v13617_v45  ;;  %v13657_v45 = vld [vmem:[#allocation45_spill] sm:$0xff] }
 0x567   :  { %4766 = vmatpush.msra.mxu1 %v13652_v7  ;;  %4987 = vmatpush.msrb.mxu2 %v13558_v1  ;;  %v13658_v1 = vld [vmem:[#allocation223_spill] sm:$0xff]  ;;  %v13693_v7 = vld [vmem:[#allocation221_spill] sm:$0xff] }
 0x568   :  { %4954 = vmatpush.msra.mxu0 %v13554_v34  ;;  %4908 = vmatpush.msra.mxu3 %v13653_v11  ;;  %v13659_v34 = vld [vmem:[#allocation206_spill] sm:$0xff]  ;;  %v13694_v11 = vld [vmem:[#allocation193_spill] sm:$0xff] }
 0x569   :  { %4767 = vmatpush.msra.mxu1 %v13654_v3  ;;  %4988 = vmatpush.msrb.mxu2 %v13356_v2  ;;  %v13660_v2 = vld [vmem:[#allocation28_spill] sm:$0xff] }
 0x56a   :  { %4955 = vmatpush.msra.mxu0 %v13455_v46  ;;  %4909 = vmatpush.msra.mxu3 %v13623_v49  ;;  %v13661_v46 = vld [vmem:[#allocation33_spill] sm:$0xff]  ;;  %v13662_v49 = vld [vmem:[#allocation116_spill] sm:$0xff] }
 0x56b   :  { %4768 = vmatpush.msra.mxu1 %v13655_v61  ;;  %4989 = vmatpush.msrb.mxu2 %v13656_v30  ;;  %v13696_v30 = vld [vmem:[#allocation183_spill] sm:$0xff] }
 0x56c   :  { %4956 = vmatpush.msra.mxu0 %v13657_v45  ;;  %4910 = vmatpush.msra.mxu3 %v13627_v55  ;;  %v13665_v55 = vld [vmem:[#allocation137_spill] sm:$0xff] }
 0x56d   :  { %4769 = vmatpush.msra.mxu1 %v13658_v1  ;;  %4990 = vmatpush.msrb.mxu2 %v13564_v48  ;;  %v6117_v48 = vld [vmem:[#allocation3 + $0x38] sm:$0xff]  ;;  %v13697_v45 = vld [vmem:[#allocation185_spill] sm:$0xff]  ;;  %v13698_v1 = vld [vmem:[#allocation192_spill] sm:$0xff] }
 0x56e   :  { %4957 = vmatpush.msra.mxu0 %v13560_v5  ;;  %4911 = vmatpush.msra.mxu3 %v13659_v34  ;;  %v13663_v5 = vld [vmem:[#allocation41_spill] sm:$0xff] }
 0x56f   :  { %4770 = vmatpush.msra.mxu1 %v13660_v2  ;;  %4991 = vmatpush.msrb.mxu2 %v13361_v43  ;;  %v13664_v43 = vld [vmem:[#allocation215_spill] sm:$0xff] }
 0x570   :  { %4958 = vmatpush.msra.mxu0 %v13460_v14  ;;  %4912 = vmatpush.msra.mxu3 %v13632_v13  ;;  %v4364_v14 = vadd.f32 %v4363_v17, %v10943_v54  ;;  %v6118_v13 = vld [vmem:[#allocation3 + $0x28] sm:$0xff]  ;;  %v13700_v17 = vld [vmem:[#allocation176_spill] sm:$0xff] }
 0x571   :  { %4771 = vmatpush.msra.mxu1 %v13661_v46  ;;  %4992 = vmatpush.msrb.mxu2 %v6116_v27 }
 0x572   :  { %4959 = vmatpush.msra.mxu0 %v13662_v49  ;;  %4913 = vmatpush.msra.mxu3 %v13634_v23  ;;  %v13666_v23 = vld [vmem:[#allocation177_spill] sm:$0xff] }
 0x573   :  { %4772 = vmatpush.msra.mxu1 %v13663_v5  ;;  %4993 = vmatpush.msrb.mxu2 %v6117_v48  ;;  %v13701_v48 = vld [vmem:[#allocation101_spill] sm:$0xff] }
 0x574   :  { %4960 = vmatpush.msra.mxu0 %v13566_v32  ;;  %4914 = vmatpush.msra.mxu3 %v13664_v43  ;;  %v4384_v32 = vadd.f32 %v4383_v35, %v4364_v14  ;;  %v4523_v27 = vpop.f32.mrf.mxu2  ;;  %v13702_v43 = vld [vmem:[#allocation60_spill] sm:$0xff]  ;;  %v13703_v35 = vld [vmem:[#allocation110_spill] sm:$0xff] }
 0x575   :  { %4773 = vmatpush.msra.mxu1 %v13665_v55  ;;  %4994 = vmatpush.msrb.mxu2 %v6118_v13  ;;  %v6123_v13 = vld [vmem:[#allocation8 + $0x20] sm:$0xff] }
 0x576   :  { %4961 = vmatpush.msra.mxu0 %v13465_v8  ;;  %4915 = vmatpush.msra.mxu3 %v13640_v10  ;;  %v13669_v10 = vld [vmem:[#allocation198_spill] sm:$0xff] }
 0x577   :  { %4774 = vmatpush.msra.mxu1 %v13666_v23  ;;  %5122 = vmatmul.msk.f32.vlgmr.msrb.gmra.mxu0 %vm3119_vm6, %v11077_v33 }
 0x578   :  { %4995 = vmatpush.msrb.mxu2 %v13667_v59  ;;  %5026 = vmatpush.msrb.mxu0 %v13611_v60  ;;  %v13704_v59 = vld [vmem:[#allocation153_spill] sm:$0xff] }
 0x579   :  { %4775 = vmatpush.msra.mxu1 %v13668_v25  ;;  %4916 = vmatpush.msra.mxu3 %v13641_v24 }
 0x57a   :  { %4996 = vmatpush.msrb.mxu2 %v13573_v26  ;;  %5027 = vmatpush.msrb.mxu0 %v13571_v18  ;;  %v4403_v8 = vpop.f32.mrf.mxu1  ;;  %v13672_v26 = vld [vmem:[#allocation106_spill] sm:$0xff]  ;;  %v4463_v18 = vpop.f32.mrf.mxu0 }
 0x57b   :  { %4776 = vmatpush.msra.mxu1 %v13669_v10  ;;  %4917 = vmatpush.msra.mxu3 %v13644_v52  ;;  %v4404_v16 = vadd.f32 %v4403_v8, %v4384_v32  ;;  %v13675_v52 = vld [vmem:[#allocation220_spill] sm:$0xff]  ;;  %v13705_v8 = vld [vmem:[#allocation29_spill] sm:$0xff] }
 0x57c   :  { %4997 = vmatpush.msrb.mxu2 %v13369_v28  ;;  %5028 = vmatpush.msrb.mxu0 %v13670_v53  ;;  %v4443_v60 = vpop.f32.mrf.mxu3  ;;  %v13674_v28 = vld [vmem:[#allocation87_spill] sm:$0xff] }
 0x57d   :  { %4777 = vmatpush.msra.mxu1 %v13671_v21  ;;  %4918 = vmatpush.msra.mxu3 %v13176_v58  ;;  %v4424_v24 = vadd.f32 %v4423_v9, %v4404_v16  ;;  %v13707_v16 = vld [vmem:[#allocation37_spill] sm:$0xff]  ;;  %v13708_v53 = vld [vmem:[#allocation91_spill] sm:$0xff] }
 0x57e   :  { %4998 = vmatpush.msrb.mxu2 %v13672_v26  ;;  %5029 = vmatpush.msrb.mxu0 %v13575_v63  ;;  %v13679_v63 = vld [vmem:[#allocation171_spill] sm:$0xff]  ;;  %v13713_v26 = vld [vmem:[#allocation149_spill] sm:$0xff] }
 0x57f   :  { %4778 = vmatpush.msra.mxu1 %v13673_v15  ;;  %4919 = vmatpush.msra.mxu3 %v13450_v4  ;;  %v4444_v56 = vadd.f32 %v4443_v60, %v4424_v24  ;;  %v6119_v4 = vld [vmem:[#allocation8] sm:$0xff]  ;;  %v13709_v60 = vld [vmem:[#allocation92_spill] sm:$0xff]  ;;  %v13715_v15 = vld [vmem:[#allocation89_spill] sm:$0xff] }
 0x580   :  { %4999 = vmatpush.msrb.mxu2 %v13580_v0  ;;  %5030 = vmatpush.msrb.mxu0 %v13472_v51  ;;  %v13677_v51 = vld [vmem:[#allocation79_spill] sm:$0xff]  ;;  %v13711_v24 = vld [vmem:[#allocation144_spill] sm:$0xff] }
 0x581   :  { %4779 = vmatpush.msra.mxu1 %v13674_v28  ;;  %4920 = vmatpush.msra.mxu3 %v13675_v52  ;;  %v4464_v58 = vadd.f32 %v4463_v18, %v4444_v56  ;;  %v13678_v0 = vld [vmem:[#allocation163_spill] sm:$0xff]  ;;  %v13714_v18 = vld [vmem:[#allocation82_spill] sm:$0xff]  ;;  %v13716_v56 = vld [vmem:[#allocation85_spill] sm:$0xff] }
 0x582   :  { %5000 = vmatpush.msrb.mxu2 %v13474_v40  ;;  %5031 = vmatpush.msrb.mxu0 %v13676_v50  ;;  %v6120_v40 = vld [vmem:[#allocation8 + $0x18] sm:$0xff]  ;;  %v13718_v52 = vld [vmem:[#allocation136_spill] sm:$0xff] }
 0x583   :  { %4780 = vmatpush.msra.mxu1 %v13530_v20  ;;  %4921 = vmatpush.msra.mxu3 %v13649_v22  ;;  %5068 = vst [vmem:[#allocation10 + $0x10] sm:$0xff] %v4464_v58  ;;  %v13690_v22 = vld [vmem:[#allocation180_spill] sm:$0xff]  ;;  %v13720_v50 = vld [vmem:[#allocation65_spill] sm:$0xff] }
 0x584   :  { %5001 = vmatpush.msrb.mxu2 %v13543_v37  ;;  %5032 = vmatpush.msrb.mxu0 %v13581_v6  ;;  %v13681_v37 = vld [vmem:[#allocation167_spill] sm:$0xff]  ;;  %v13682_v6 = vld [vmem:[#allocation216_spill] sm:$0xff] }
 0x585   :  { %4842 = vmatmul.f32.vlgmr.msrb.gmra.mxu3 %v6119_v4  ;;  %4781 = vmatpush.msra.mxu1 %v13677_v51  ;;  %v13719_v58 = vld [vmem:[#allocation140_spill] sm:$0xff]  ;;  %v13722_v51 = vld [vmem:[#allocation203_spill] sm:$0xff] }
 0x586   :  { %5006 = vmatpush.msrb.mxu3 %v13610_v12  ;;  %5033 = vmatpush.msrb.mxu0 %v13482_v29  ;;  %v13684_v29 = vld [vmem:[#allocation208_spill] sm:$0xff]  ;;  %v13685_v12 = vld [vmem:[#allocation174_spill] sm:$0xff] }
 0x587   :  { %4782 = vmatmul.f32.vlgmr.msra.gmra.mxu1 %v6120_v40  ;;  %4902 = vmatmul.f32.vlgmr.msra.gmra.mxu2 %v6120_v40 }
 0x588   :  { %4866 = vmatpush.msrb.mxu1 %v13678_v0  ;;  %5007 = vmatpush.msrb.mxu3 %v13679_v63  ;;  %v4623_v63 = vpop.f32.mrf.mxu2 }
 0x589   :  { %5034 = vmatpush.msrb.mxu0 %v13680_v19 }
 0x58a   :  { %4867 = vmatpush.msrb.mxu1 %v13681_v37  ;;  %5008 = vmatpush.msrb.mxu3 %v13654_v3  ;;  %v13695_v3 = vld [vmem:[#allocation222_spill] sm:$0xff] }
 0x58b   :  { %5035 = vmatpush.msrb.mxu0 %v13682_v6 }
 0x58c   :  { %4868 = vmatpush.msrb.mxu1 %v13683_v44  ;;  %5009 = vmatpush.msrb.mxu3 %v13655_v61  ;;  %v4483_v61 = vpop.f32.mrf.mxu0 }
 0x58d   :  { %5036 = vmatpush.msrb.mxu0 %v13684_v29  ;;  %4922 = vmatmul.f32.vlgmr.msra.gmra.mxu3 %v10702_v38  ;;  %v6122_v38 = vld [vmem:[#allocation3] sm:$0xff]  ;;  %v4484_v34 = vadd.f32 %v4483_v61, %v10943_v54 }
 0x58e   :  { %4869 = vmatpush.msrb.mxu1 %v13685_v12  ;;  %5010 = vmatpush.msrb.mxu3 %v13686_v42 }
 0x58f   :  { %5037 = vmatpush.msrb.mxu0 %v13687_v39  ;;  %5002 = vmatmul.f32.vlgmr.msrb.gmra.mxu2 %v6121_v36 }
 0x590   :  { %4870 = vmatpush.msrb.mxu1 %v13688_v31  ;;  %5011 = vmatpush.msrb.mxu3 %v13660_v2  ;;  %v13699_v2 = vld [vmem:[#allocation94_spill] sm:$0xff] }
 0x591   :  { %5038 = vmatpush.msrb.mxu0 %v13689_v62 }
 0x592   :  { %4871 = vmatpush.msrb.mxu1 %v13690_v22  ;;  %5012 = vmatpush.msrb.mxu3 %v13661_v46 }
 0x593   :  { %5039 = vmatpush.msrb.mxu0 %v13691_v41 }
 0x594   :  { %4872 = vmatpush.msrb.mxu1 %v6122_v38  ;;  %5013 = vmatpush.msrb.mxu3 %v13692_v57 }
 0x595   :  { %5040 = vmatpush.msrb.mxu0 %v13693_v7 }
 0x596   :  { %4873 = vmatpush.msrb.mxu1 %v13694_v11  ;;  %5014 = vmatpush.msrb.mxu3 %v13665_v55  ;;  %v4563_v55 = vpop.f32.mrf.mxu0 }
 0x597   :  { %5041 = vmatpush.msrb.mxu0 %v13695_v3 }
 0x598   :  { %4874 = vmatpush.msrb.mxu1 %v13696_v30  ;;  %5015 = vmatpush.msrb.mxu3 %v13666_v23 }
 0x599   :  { %4962 = vmatmul.f32.vlgmr.msra.gmra.mxu0 %v6119_v4  ;;  %v13721_v4 = vld [vmem:[#allocation70_spill] sm:$0xff] }
 0x59a   :  { %4875 = vmatpush.msrb.mxu1 %v13697_v45  ;;  %5016 = vmatpush.msrb.mxu3 %v13698_v1 }
 0x59c   :  { %4876 = vmatpush.msrb.mxu1 %v13699_v2  ;;  %5017 = vmatpush.msrb.mxu3 %v13669_v10  ;;  %v13706_v10 = vld [vmem:[#allocation39_spill] sm:$0xff] }
 0x59d   :  { %v4503_v46 = vpop.f32.mrf.mxu1 }
 0x59e   :  { %4877 = vmatpush.msrb.mxu1 %v13700_v17  ;;  %5018 = vmatpush.msrb.mxu3 %v13671_v21  ;;  %v4504_v49 = vadd.f32 %v4503_v46, %v4484_v34  ;;  %v4543_v5 = vpop.f32.mrf.mxu3  ;;  %v13710_v21 = vld [vmem:[#allocation99_spill] sm:$0xff] }
 0x5a0   :  { %4878 = vmatpush.msrb.mxu1 %v13701_v48  ;;  %5019 = vmatpush.msrb.mxu3 %v13702_v43  ;;  %v4524_v14 = vadd.f32 %v4523_v27, %v4504_v49  ;;  %v4703_v12 = vpop.f32.mrf.mxu2 }
 0x5a1   :  { %5042 = vmatmul.f32.vlgmr.msrb.gmra.mxu0 %v6123_v13 }
 0x5a2   :  { %4879 = vmatpush.msrb.mxu1 %v13703_v35  ;;  %5020 = vmatpush.msrb.mxu3 %v13674_v28  ;;  %v4544_v23 = vadd.f32 %v4543_v5, %v4524_v14  ;;  %v13717_v28 = vld [vmem:[#allocation135_spill] sm:$0xff] }
 0x5a4   :  { %4880 = vmatpush.msrb.mxu1 %v13704_v59  ;;  %5021 = vmatpush.msrb.mxu3 %v13530_v20  ;;  %v4564_v32 = vadd.f32 %v4563_v55, %v4544_v23  ;;  %v13712_v20 = vld [vmem:[#allocation147_spill] sm:$0xff] }
 0x5a5   :  { %v4583_v25 = vpop.f32.mrf.mxu1  ;;  %5022 = vmatmul.f32.vlgmr.msrb.gmra.mxu3 %v6120_v40 }
 0x5a6   :  { %4881 = vmatpush.msrb.mxu1 %v13705_v8  ;;  %v4584_v9 = vadd.f32 %v4583_v25, %v4564_v32 }
 0x5a7   :  { %4882 = vmatmul.f32.vlgmr.msrb.gmra.mxu1 %v6121_v36 }
 0x5a8   :  { %4966 = vmatpush.msra.mxu1 %v13706_v10  ;;  %5069 = vst [vmem:[#allocation10 + $0x18] sm:$0xff] %v4584_v9 }
 0x5aa   :  { %4967 = vmatpush.msra.mxu1 %v13707_v16 }
 0x5ac   :  { %4968 = vmatpush.msra.mxu1 %v13708_v53 }
 0x5ad   :  { %v4663_v6 = vpop.f32.mrf.mxu0 }
 0x5ae   :  { %4969 = vmatpush.msra.mxu1 %v13709_v60 }
 0x5b0   :  { %4970 = vmatpush.msra.mxu1 %v13710_v21 }
 0x5b2   :  { %4971 = vmatpush.msra.mxu1 %v13711_v24 }
 0x5b4   :  { %4972 = vmatpush.msra.mxu1 %v13712_v20 }
 0x5b6   :  { %4973 = vmatpush.msra.mxu1 %v13713_v26 }
 0x5b8   :  { %4974 = vmatpush.msra.mxu1 %v13714_v18 }
 0x5ba   :  { %4975 = vmatpush.msra.mxu1 %v13715_v15 }
 0x5bc   :  { %4976 = vmatpush.msra.mxu1 %v13716_v56 }
 0x5be   :  { %4977 = vmatpush.msra.mxu1 %v13717_v28 }
 0x5c0   :  { %4978 = vmatpush.msra.mxu1 %v13718_v52  ;;  %v4603_v40 = vpop.f32.mrf.mxu1 }
 0x5c1   :  { %v4604_v0 = vadd.f32 %v4603_v40, %v10943_v54 }
 0x5c2   :  { %4979 = vmatpush.msra.mxu1 %v13719_v58 }
 0x5c3   :  { %v4624_v19 = vadd.f32 %v4623_v63, %v4604_v0  ;;  %v4723_v39 = vpop.f32.mrf.mxu2 }
 0x5c4   :  { %4980 = vmatpush.msra.mxu1 %v13720_v50  ;;  %v4724_v36 = vadd.f32 %v4723_v39, %v10943_v54 }
 0x5c6   :  { %4981 = vmatpush.msra.mxu1 %v13721_v4 }
 0x5c7   :  { %4982 = vmatmul.f32.vlgmr.msra.gmra.mxu1 %v11004_v47  ;;  %v4643_v47 = vpop.f32.mrf.mxu3 }
 0x5c8   :  { %5061 = vmatpush.msrb.mxu1 %v13722_v51  ;;  %v4644_v37 = vadd.f32 %v4643_v47, %v4624_v19  ;;  %v4763_v22 = vpop.f32.mrf.mxu0 }
 0x5ca   :  { %v4664_v44 = vadd.f32 %v4663_v6, %v4644_v37 }
 0x5cf   :  { %5123 = vmatmul.msk.f32.vlgmr.msrb.gmra.mxu1 %vm3119_vm6, %v11077_v33  ;;  %v4743_v31 = vpop.f32.mrf.mxu3 }
 0x5d0   :  { %v4744_v62 = vadd.f32 %v4743_v31, %v4724_v36 }
 0x5d2   :  { %v4764_v41 = vadd.f32 %v4763_v22, %v4744_v62 }
 0x5d3   :  { %v4863_v1 = vpop.f32.mrf.mxu0 }
 0x5e3   :  { %v4683_v29 = vpop.f32.mrf.mxu1 }
 0x5e4   :  { %v4684_v33 = vadd.f32 %v4683_v29, %v4664_v44 }
 0x5e5   :  { %v4823_v3 = vpop.f32.mrf.mxu3 }
 0x5e6   :  { %v4704_v42 = vadd.f32 %v4703_v12, %v4684_v33  ;;  %v4803_v57 = vpop.f32.mrf.mxu2 }
 0x5e8   :  { %5070 = vst [vmem:[#allocation10 + $0x20] sm:$0xff] %v4704_v42 }
 0x5f4   :  { %v4943_v5 = vpop.f32.mrf.mxu0 }
 0x604   :  { %v4783_v38 = vpop.f32.mrf.mxu1 }
 0x605   :  { %v4784_v7 = vadd.f32 %v4783_v38, %v4764_v41 }
 0x607   :  { %v4804_v11 = vadd.f32 %v4803_v57, %v4784_v7 }
 0x608   :  { %v4843_v30 = vpop.f32.mrf.mxu3 }
 0x609   :  { %v4824_v61 = vadd.f32 %v4823_v3, %v4804_v11  ;;  %v4844_v45 = vadd.f32 %v4843_v30, %v10943_v54 }
 0x60a   :  { %v4903_v46 = vpop.f32.mrf.mxu2 }
 0x60b   :  { %5071 = vst [vmem:[#allocation10 + $0x28] sm:$0xff] %v4824_v61  ;;  %v4864_v34 = vadd.f32 %v4863_v1, %v4844_v45 }
 0x610   :  { %v4923_v17 = vpop.f32.mrf.mxu3 }
 0x612   :  { %v5003_v35 = vpop.f32.mrf.mxu2 }
 0x616   :  { %v4963_v14 = vpop.f32.mrf.mxu0 }
 0x617   :  { %v4964_v55 = vadd.f32 %v4963_v14, %v10943_v54 }
 0x61e   :  { %v5043_v25 = vpop.f32.mrf.mxu0 }
 0x624   :  { %v4883_v2 = vpop.f32.mrf.mxu1 }
 0x625   :  { %v4884_v27 = vadd.f32 %v4883_v2, %v4864_v34 }
 0x627   :  { %v4904_v49 = vadd.f32 %v4903_v46, %v4884_v27 }
 0x628   :  { %v5023_v59 = vpop.f32.mrf.mxu3 }
 0x629   :  { %v4924_v48 = vadd.f32 %v4923_v17, %v4904_v49 }
 0x62b   :  { %v4944_v43 = vadd.f32 %v4943_v5, %v4924_v48 }
 0x62d   :  { %5072 = vst [vmem:[#allocation10 + $0x30] sm:$0xff] %v4944_v43 }
 0x644   :  { %v4983_v13 = vpop.f32.mrf.mxu1 }
 0x645   :  { %v4984_v23 = vadd.f32 %v4983_v13, %v4964_v55 }
 0x647   :  { %v5004_v32 = vadd.f32 %v5003_v35, %v4984_v23 }
 0x649   :  { %v5024_v8 = vadd.f32 %v5023_v59, %v5004_v32 }
 0x64b   :  { %v5044_v9 = vadd.f32 %v5043_v25, %v5024_v8 }
 0x64c   :  { %v5063_v10 = vpop.f32.mrf.mxu1 }
 0x64d   :  { %v5064_v16 = vadd.f32 %v5063_v10, %v5044_v9 }
 0x64f   :  { %5073 = vst [vmem:[#allocation10 + $0x38] sm:$0xff] %v5064_v16 }
 0x650   :  { %5095 = dma.vmem_to_hbm [thread:$0]  %s5091_s25, 1024, %s5093_s28, [#allocation11]  }
 0x651   :  { %6248 = dma.done.wait [#allocation5], 1024  }
 0x652   :  { %6249 = vsyncadd [#allocation5], 4294966272 }
 0x653   :  { %6250 = dma.done.wait [#allocation11], 1024  }
 0x654   :  { %6251 = vsyncadd [#allocation11], 4294966272 }
 0x655   :  { %5104 = vsyncpa [#allocation4], 1 }
 0x656   :  { %5105 = vsyncpa [#allocation7], 1 }
 0x657   :  { %5106 = vsyncpa [#allocation5], 1 }
 0x658   :  { %5107 = vsyncpa [#allocation11], 1 }

</bundles_post_ra>
